<compile_context>
chip_gen: v7x
topology: tpu7x:2x2x1
jax: 0.10.0
libtpu: 0.0.40
codegen_flags: <defaults>
</compile_context>

<pallas_src>
import jax
import jax.numpy as jnp
from jax import lax
from jax.experimental import pallas as pl
from jax.experimental.pallas import tpu as pltpu

H_IN, W_IN = 65, 65            # input spatial size == output of the 3x3 conv
H_PAD, W_PAD = 67, 67          # logical size after padding=1 of the 1x1 conv
C_IN, C_MID, C_OUT = 3, 8, 8

# VMEM scratch frames: sublane-pad 67 -> 72, lane-pad 67 -> 128 so every
# full-plane load/store is an aligned, lane-dense (72,128) tile.
SUB_PAD = 72
LANE_PAD = 128

CO_GROUP = 4                   # stage-2 output channels per accumulator group


def fused_conv_hs_kernel(w1_ref, b1_ref, w2_ref, b2_ref, x_ref, o_ref,
                         xpad_ref, mid_ref):
    # One batch element per grid step.
    #   w1_ref : SMEM (C_MID*C_IN,)     1x1 weights, pre-scaled by 1/6   (O,I)
    #   b1_ref : SMEM (C_MID,)          b1/6 + 0.5
    #   w2_ref : SMEM (C_OUT*C_MID*9,)  3x3 weights, pre-scaled by 1/6   (O,I,Kh,Kw)
    #   b2_ref : SMEM (C_OUT,)          b2/6 + 0.5
    #   x_ref  : VMEM (1, C_IN, H_IN, W_IN)     raw input (no pre-padding)
    #   o_ref  : VMEM (1, C_OUT, H_IN, W_IN)
    #   xpad_ref: VMEM scratch (C_IN, 72, 128)  zero-padded input planes
    #   mid_ref : VMEM scratch (C_MID, 72, 128) conv1+hardsig result (on-chip)
    #
    # With 1/6-prescaled params: hardsigmoid(conv(x)) == clip(conv_s(x)+b_s, 0, 1)

    # ---- in-kernel padding=1 (replaces the wrapper jnp.pad) -----------------
    xpad_ref[...] = jnp.zeros((C_IN, SUB_PAD, LANE_PAD), jnp.float32)
    for ci in range(C_IN):
        xpad_ref[ci, 1:1 + H_IN, 1:1 + W_IN] = x_ref[0, ci]

    # ---- stage 1: 1x1 conv + hardsigmoid, full padded frame -----------------
    # Zero border of xpad => border of mid == clip(b1/6+0.5, 0, 1) == hsig(b1),
    # exactly matching the reference's padded conv1 output.
    xs = [xpad_ref[ci] for ci in range(C_IN)]          # hoisted: 3 aligned loads
    for co in range(C_MID):
        acc = w1_ref[co * C_IN + 0] * xs[0]
        for ci in range(1, C_IN):
            acc = acc + w1_ref[co * C_IN + ci] * xs[ci]
        mid_ref[co] = jnp.clip(acc + b1_ref[co], 0.0, 1.0)   # aligned (72,128) store

    # ---- stage 2: 3x3 VALID conv over the VMEM intermediate + hardsigmoid ---
    # Taps are co-invariant: build each (ci,dy,dx) window once and feed a group
    # of CO_GROUP accumulators.  ci loop is rolled (fori_loop) to bound unroll.
    for cog in range(0, C_OUT, CO_GROUP):

        def body(ci, accs, _cog=cog):
            accs = list(accs)
            for dy in range(3):
                for dx in range(3):
                    tap = mid_ref[ci, dy:dy + H_IN, dx:dx + W_IN]   # (65,65)
                    for g in range(CO_GROUP):
                        w = w2_ref[(((_cog + g) * C_MID + ci) * 3 + dy) * 3 + dx]
                        accs[g] = accs[g] + w * tap
            return tuple(accs)

        init = tuple(jnp.zeros((H_IN, W_IN), jnp.float32)
                     for _ in range(CO_GROUP))
        accs = lax.fori_loop(0, C_MID, body, init)

        for g in range(CO_GROUP):
            o_ref[0, cog + g] = jnp.clip(accs[g] + b2_ref[cog + g], 0.0, 1.0)


@jax.jit
def model_forward(x, w1, b1, w2, b2):
    n = x.shape[0]

    # Fold the "+3 ... /6" of both hardsigmoids into the (tiny) conv params.
    s = jnp.float32(1.0 / 6.0)
    w1s = (w1 * s).reshape(C_MID * C_IN).astype(jnp.float32)
    b1s = (b1 * s + 0.5).astype(jnp.float32)
    w2s = (w2 * s).reshape(C_OUT * C_MID * 9).astype(jnp.float32)
    b2s = (b2 * s + 0.5).astype(jnp.float32)

    return pl.pallas_call(
        fused_conv_hs_kernel,
        out_shape=jax.ShapeDtypeStruct((n, C_OUT, H_IN, W_IN), jnp.float32),
        grid=(n,),
        in_specs=[
            pl.BlockSpec(memory_space=pltpu.MemorySpace.SMEM),
            pl.BlockSpec(memory_space=pltpu.MemorySpace.SMEM),
            pl.BlockSpec(memory_space=pltpu.MemorySpace.SMEM),
            pl.BlockSpec(memory_space=pltpu.MemorySpace.SMEM),
            pl.BlockSpec((1, C_IN, H_IN, W_IN), lambda i: (i, 0, 0, 0)),
        ],
        out_specs=pl.BlockSpec((1, C_OUT, H_IN, W_IN), lambda i: (i, 0, 0, 0)),
        scratch_shapes=[
            pltpu.VMEM((C_IN, SUB_PAD, LANE_PAD), jnp.float32),
            pltpu.VMEM((C_MID, SUB_PAD, LANE_PAD), jnp.float32),
        ],
        compiler_params=pltpu.CompilerParams(
            dimension_semantics=("parallel",)),
    )(w1s, b1s, w2s, b2s, x)


def ref_forward(x, w1, b1, w2, b2):
    dn = ("NCHW", "OIHW", "NCHW")
    v1 = lax.conv_general_dilated(x, w1, (1, 1), ((1, 1), (1, 1)),
                                  dimension_numbers=dn)
    v1 = v1 + b1[None, :, None, None]
    v4 = jnp.clip(v1 + 3.0, 0.0, 6.0) / 6.0
    v5 = lax.conv_general_dilated(v4, w2, (1, 1), "VALID",
                                  dimension_numbers=dn)
    v5 = v5 + b2[None, :, None, None]
    return jnp.clip(v5 + 3.0, 0.0, 6.0) / 6.0


if __name__ == "__main__":
    key = jax.random.PRNGKey(0)
    kx, k1, k2, k3, k4 = jax.random.split(key, 5)

    # Deterministic synthetic parameters (shapes from the PyTorch __init__).
    x = jax.random.normal(kx, (2, C_IN, H_IN, W_IN), dtype=jnp.float32)
    w1 = 0.3 * jax.random.normal(k1, (C_MID, C_IN, 1, 1), dtype=jnp.float32)
    b1 = 0.1 * jax.random.normal(k2, (C_MID,), dtype=jnp.float32)
    w2 = 0.2 * jax.random.normal(k3, (C_OUT, C_MID, 3, 3), dtype=jnp.float32)
    b2 = 0.1 * jax.random.normal(k4, (C_OUT,), dtype=jnp.float32)

    out = jax.block_until_ready(model_forward(x, w1, b1, w2, b2))
    ref = jax.block_until_ready(ref_forward(x, w1, b1, w2, b2))

    assert out.shape == (2, C_OUT, H_IN, W_IN), out.shape
    assert jnp.allclose(out, ref, atol=1e-5, rtol=1e-5), "mismatch vs reference"
    print("KERNEL_OK")
</pallas_src>

<mosaic_0001>
module attributes {stable_mosaic.version = 11 : i64} {
  func.func @fused_conv_hs_kernel(%arg0: i32, %arg1: memref<24xf32, #tpu.memory_space<smem>>, %arg2: memref<8xf32, #tpu.memory_space<smem>>, %arg3: memref<576xf32, #tpu.memory_space<smem>>, %arg4: memref<8xf32, #tpu.memory_space<smem>>, %arg5: memref<1x3x65x65xf32, #tpu.memory_space<vmem>>, %arg6: memref<1x8x65x65xf32, #tpu.memory_space<vmem>>, %arg7: memref<3x72x128xf32, #tpu.memory_space<vmem>>, %arg8: memref<8x72x128xf32, #tpu.memory_space<vmem>>) attributes {dimension_semantics = [#tpu.dimension_semantics<parallel>], iteration_bounds = array<i64: 2>, scalar_prefetch = 0 : i64, scratch_operands = 2 : i64, tpu.core_type = #tpu.core_type<tc>, window_params = [{transform_indices = @transform_0, window_bounds = array<i64: 24>}, {transform_indices = @transform_1, window_bounds = array<i64: 8>}, {transform_indices = @transform_2, window_bounds = array<i64: 576>}, {transform_indices = @transform_3, window_bounds = array<i64: 8>}, {transform_indices = @transform_4, window_bounds = array<i64: 1, 3, 65, 65>}, {transform_indices = @transform_5, window_bounds = array<i64: 1, 8, 65, 65>}]} {
    %cst = arith.constant 0.000000e+00 : f32
    %0 = vector.broadcast %cst : f32 to vector<3x72x128xf32>
    %c0 = arith.constant 0 : index
    %c0_0 = arith.constant 0 : index
    %c0_1 = arith.constant 0 : index
    %1 = vector.load %arg7[%c0, %c0_0, %c0_1] : memref<3x72x128xf32, #tpu.memory_space<vmem>>, vector<3x72x128xf32>
    tpu.vector_store %arg7[%c0, %c0_0, %c0_1], %0 {strides = array<i32>} : memref<3x72x128xf32, #tpu.memory_space<vmem>>, vector<3x72x128xf32>,
    %c0_2 = arith.constant 0 : index
    %c0_3 = arith.constant 0 : index
    %c0_4 = arith.constant 0 : index
    %c0_5 = arith.constant 0 : index
    %2 = vector.load %arg5[%c0_2, %c0_3, %c0_4, %c0_5] : memref<1x3x65x65xf32, #tpu.memory_space<vmem>>, vector<1x1x65x65xf32>
    %3 = vector.shape_cast %2 : vector<1x1x65x65xf32> to vector<65x65xf32>
    %c0_6 = arith.constant 0 : index
    %c1 = arith.constant 1 : index
    %c1_7 = arith.constant 1 : index
    %4 = vector.load %arg7[%c0_6, %c1, %c1_7] : memref<3x72x128xf32, #tpu.memory_space<vmem>>, vector<1x65x65xf32>
    %5 = vector.shape_cast %4 : vector<1x65x65xf32> to vector<65x65xf32>
    %6 = vector.shape_cast %3 : vector<65x65xf32> to vector<1x65x65xf32>
    tpu.vector_store %arg7[%c0_6, %c1, %c1_7], %6 {strides = array<i32>} : memref<3x72x128xf32, #tpu.memory_space<vmem>>, vector<1x65x65xf32>,
    %c0_8 = arith.constant 0 : index
    %c1_9 = arith.constant 1 : index
    %c0_10 = arith.constant 0 : index
    %c0_11 = arith.constant 0 : index
    %7 = vector.load %arg5[%c0_8, %c1_9, %c0_10, %c0_11] : memref<1x3x65x65xf32, #tpu.memory_space<vmem>>, vector<1x1x65x65xf32>
    %8 = vector.shape_cast %7 : vector<1x1x65x65xf32> to vector<65x65xf32>
    %c1_12 = arith.constant 1 : index
    %c1_13 = arith.constant 1 : index
    %c1_14 = arith.constant 1 : index
    %9 = vector.load %arg7[%c1_12, %c1_13, %c1_14] : memref<3x72x128xf32, #tpu.memory_space<vmem>>, vector<1x65x65xf32>
    %10 = vector.shape_cast %9 : vector<1x65x65xf32> to vector<65x65xf32>
    %11 = vector.shape_cast %8 : vector<65x65xf32> to vector<1x65x65xf32>
    tpu.vector_store %arg7[%c1_12, %c1_13, %c1_14], %11 {strides = array<i32>} : memref<3x72x128xf32, #tpu.memory_space<vmem>>, vector<1x65x65xf32>,
    %c0_15 = arith.constant 0 : index
    %c2 = arith.constant 2 : index
    %c0_16 = arith.constant 0 : index
    %c0_17 = arith.constant 0 : index
    %12 = vector.load %arg5[%c0_15, %c2, %c0_16, %c0_17] : memref<1x3x65x65xf32, #tpu.memory_space<vmem>>, vector<1x1x65x65xf32>
    %13 = vector.shape_cast %12 : vector<1x1x65x65xf32> to vector<65x65xf32>
    %c2_18 = arith.constant 2 : index
    %c1_19 = arith.constant 1 : index
    %c1_20 = arith.constant 1 : index
    %14 = vector.load %arg7[%c2_18, %c1_19, %c1_20] : memref<3x72x128xf32, #tpu.memory_space<vmem>>, vector<1x65x65xf32>
    %15 = vector.shape_cast %14 : vector<1x65x65xf32> to vector<65x65xf32>
    %16 = vector.shape_cast %13 : vector<65x65xf32> to vector<1x65x65xf32>
    tpu.vector_store %arg7[%c2_18, %c1_19, %c1_20], %16 {strides = array<i32>} : memref<3x72x128xf32, #tpu.memory_space<vmem>>, vector<1x65x65xf32>,
    %c0_21 = arith.constant 0 : index
    %c0_22 = arith.constant 0 : index
    %c0_23 = arith.constant 0 : index
    %17 = vector.load %arg7[%c0_21, %c0_22, %c0_23] : memref<3x72x128xf32, #tpu.memory_space<vmem>>, vector<1x72x128xf32>
    %18 = vector.shape_cast %17 : vector<1x72x128xf32> to vector<72x128xf32>
    %c1_24 = arith.constant 1 : index
    %c0_25 = arith.constant 0 : index
    %c0_26 = arith.constant 0 : index
    %19 = vector.load %arg7[%c1_24, %c0_25, %c0_26] : memref<3x72x128xf32, #tpu.memory_space<vmem>>, vector<1x72x128xf32>
    %20 = vector.shape_cast %19 : vector<1x72x128xf32> to vector<72x128xf32>
    %c2_27 = arith.constant 2 : index
    %c0_28 = arith.constant 0 : index
    %c0_29 = arith.constant 0 : index
    %21 = vector.load %arg7[%c2_27, %c0_28, %c0_29] : memref<3x72x128xf32, #tpu.memory_space<vmem>>, vector<1x72x128xf32>
    %22 = vector.shape_cast %21 : vector<1x72x128xf32> to vector<72x128xf32>
    %c0_30 = arith.constant 0 : index
    %23 = memref.load %arg1[%c0_30] : memref<24xf32, #tpu.memory_space<smem>>
    %24 = vector.broadcast %23 : f32 to vector<72x128xf32>
    %25 = arith.mulf %24, %18 : vector<72x128xf32>
    %c1_31 = arith.constant 1 : index
    %26 = memref.load %arg1[%c1_31] : memref<24xf32, #tpu.memory_space<smem>>
    %27 = vector.broadcast %26 : f32 to vector<72x128xf32>
    %28 = arith.mulf %27, %20 : vector<72x128xf32>
    %29 = arith.addf %25, %28 : vector<72x128xf32>
    %c2_32 = arith.constant 2 : index
    %30 = memref.load %arg1[%c2_32] : memref<24xf32, #tpu.memory_space<smem>>
    %31 = vector.broadcast %30 : f32 to vector<72x128xf32>
    %32 = arith.mulf %31, %22 : vector<72x128xf32>
    %33 = arith.addf %29, %32 : vector<72x128xf32>
    %c0_33 = arith.constant 0 : index
    %34 = memref.load %arg2[%c0_33] : memref<8xf32, #tpu.memory_space<smem>>
    %35 = vector.broadcast %34 : f32 to vector<72x128xf32>
    %36 = arith.addf %33, %35 : vector<72x128xf32>
    %cst_34 = arith.constant 0.000000e+00 : f32
    %cst_35 = arith.constant 1.000000e+00 : f32
    %37 = vector.broadcast %cst_34 : f32 to vector<72x128xf32>
    %38 = arith.maximumf %37, %36 : vector<72x128xf32>
    %39 = vector.broadcast %cst_35 : f32 to vector<72x128xf32>
    %40 = arith.minimumf %39, %38 : vector<72x128xf32>
    %c0_36 = arith.constant 0 : index
    %c0_37 = arith.constant 0 : index
    %c0_38 = arith.constant 0 : index
    %41 = vector.load %arg8[%c0_36, %c0_37, %c0_38] : memref<8x72x128xf32, #tpu.memory_space<vmem>>, vector<1x72x128xf32>
    %42 = vector.shape_cast %41 : vector<1x72x128xf32> to vector<72x128xf32>
    %43 = vector.shape_cast %40 : vector<72x128xf32> to vector<1x72x128xf32>
    tpu.vector_store %arg8[%c0_36, %c0_37, %c0_38], %43 {strides = array<i32>} : memref<8x72x128xf32, #tpu.memory_space<vmem>>, vector<1x72x128xf32>,
    %c3 = arith.constant 3 : index
    %44 = memref.load %arg1[%c3] : memref<24xf32, #tpu.memory_space<smem>>
    %45 = vector.broadcast %44 : f32 to vector<72x128xf32>
    %46 = arith.mulf %45, %18 : vector<72x128xf32>
    %c4 = arith.constant 4 : index
    %47 = memref.load %arg1[%c4] : memref<24xf32, #tpu.memory_space<smem>>
    %48 = vector.broadcast %47 : f32 to vector<72x128xf32>
    %49 = arith.mulf %48, %20 : vector<72x128xf32>
    %50 = arith.addf %46, %49 : vector<72x128xf32>
    %c5 = arith.constant 5 : index
    %51 = memref.load %arg1[%c5] : memref<24xf32, #tpu.memory_space<smem>>
    %52 = vector.broadcast %51 : f32 to vector<72x128xf32>
    %53 = arith.mulf %52, %22 : vector<72x128xf32>
    %54 = arith.addf %50, %53 : vector<72x128xf32>
    %c1_39 = arith.constant 1 : index
    %55 = memref.load %arg2[%c1_39] : memref<8xf32, #tpu.memory_space<smem>>
    %56 = vector.broadcast %55 : f32 to vector<72x128xf32>
    %57 = arith.addf %54, %56 : vector<72x128xf32>
    %cst_40 = arith.constant 0.000000e+00 : f32
    %cst_41 = arith.constant 1.000000e+00 : f32
    %58 = vector.broadcast %cst_40 : f32 to vector<72x128xf32>
    %59 = arith.maximumf %58, %57 : vector<72x128xf32>
    %60 = vector.broadcast %cst_41 : f32 to vector<72x128xf32>
    %61 = arith.minimumf %60, %59 : vector<72x128xf32>
    %c1_42 = arith.constant 1 : index
    %c0_43 = arith.constant 0 : index
    %c0_44 = arith.constant 0 : index
    %62 = vector.load %arg8[%c1_42, %c0_43, %c0_44] : memref<8x72x128xf32, #tpu.memory_space<vmem>>, vector<1x72x128xf32>
    %63 = vector.shape_cast %62 : vector<1x72x128xf32> to vector<72x128xf32>
    %64 = vector.shape_cast %61 : vector<72x128xf32> to vector<1x72x128xf32>
    tpu.vector_store %arg8[%c1_42, %c0_43, %c0_44], %64 {strides = array<i32>} : memref<8x72x128xf32, #tpu.memory_space<vmem>>, vector<1x72x128xf32>,
    %c6 = arith.constant 6 : index
    %65 = memref.load %arg1[%c6] : memref<24xf32, #tpu.memory_space<smem>>
    %66 = vector.broadcast %65 : f32 to vector<72x128xf32>
    %67 = arith.mulf %66, %18 : vector<72x128xf32>
    %c7 = arith.constant 7 : index
    %68 = memref.load %arg1[%c7] : memref<24xf32, #tpu.memory_space<smem>>
    %69 = vector.broadcast %68 : f32 to vector<72x128xf32>
    %70 = arith.mulf %69, %20 : vector<72x128xf32>
    %71 = arith.addf %67, %70 : vector<72x128xf32>
    %c8 = arith.constant 8 : index
    %72 = memref.load %arg1[%c8] : memref<24xf32, #tpu.memory_space<smem>>
    %73 = vector.broadcast %72 : f32 to vector<72x128xf32>
    %74 = arith.mulf %73, %22 : vector<72x128xf32>
    %75 = arith.addf %71, %74 : vector<72x128xf32>
    %c2_45 = arith.constant 2 : index
    %76 = memref.load %arg2[%c2_45] : memref<8xf32, #tpu.memory_space<smem>>
    %77 = vector.broadcast %76 : f32 to vector<72x128xf32>
    %78 = arith.addf %75, %77 : vector<72x128xf32>
    %cst_46 = arith.constant 0.000000e+00 : f32
    %cst_47 = arith.constant 1.000000e+00 : f32
    %79 = vector.broadcast %cst_46 : f32 to vector<72x128xf32>
    %80 = arith.maximumf %79, %78 : vector<72x128xf32>
    %81 = vector.broadcast %cst_47 : f32 to vector<72x128xf32>
    %82 = arith.minimumf %81, %80 : vector<72x128xf32>
    %c2_48 = arith.constant 2 : index
    %c0_49 = arith.constant 0 : index
    %c0_50 = arith.constant 0 : index
    %83 = vector.load %arg8[%c2_48, %c0_49, %c0_50] : memref<8x72x128xf32, #tpu.memory_space<vmem>>, vector<1x72x128xf32>
    %84 = vector.shape_cast %83 : vector<1x72x128xf32> to vector<72x128xf32>
    %85 = vector.shape_cast %82 : vector<72x128xf32> to vector<1x72x128xf32>
    tpu.vector_store %arg8[%c2_48, %c0_49, %c0_50], %85 {strides = array<i32>} : memref<8x72x128xf32, #tpu.memory_space<vmem>>, vector<1x72x128xf32>,
    %c9 = arith.constant 9 : index
    %86 = memref.load %arg1[%c9] : memref<24xf32, #tpu.memory_space<smem>>
    %87 = vector.broadcast %86 : f32 to vector<72x128xf32>
    %88 = arith.mulf %87, %18 : vector<72x128xf32>
    %c10 = arith.constant 10 : index
    %89 = memref.load %arg1[%c10] : memref<24xf32, #tpu.memory_space<smem>>
    %90 = vector.broadcast %89 : f32 to vector<72x128xf32>
    %91 = arith.mulf %90, %20 : vector<72x128xf32>
    %92 = arith.addf %88, %91 : vector<72x128xf32>
    %c11 = arith.constant 11 : index
    %93 = memref.load %arg1[%c11] : memref<24xf32, #tpu.memory_space<smem>>
    %94 = vector.broadcast %93 : f32 to vector<72x128xf32>
    %95 = arith.mulf %94, %22 : vector<72x128xf32>
    %96 = arith.addf %92, %95 : vector<72x128xf32>
    %c3_51 = arith.constant 3 : index
    %97 = memref.load %arg2[%c3_51] : memref<8xf32, #tpu.memory_space<smem>>
    %98 = vector.broadcast %97 : f32 to vector<72x128xf32>
    %99 = arith.addf %96, %98 : vector<72x128xf32>
    %cst_52 = arith.constant 0.000000e+00 : f32
    %cst_53 = arith.constant 1.000000e+00 : f32
    %100 = vector.broadcast %cst_52 : f32 to vector<72x128xf32>
    %101 = arith.maximumf %100, %99 : vector<72x128xf32>
    %102 = vector.broadcast %cst_53 : f32 to vector<72x128xf32>
    %103 = arith.minimumf %102, %101 : vector<72x128xf32>
    %c3_54 = arith.constant 3 : index
    %c0_55 = arith.constant 0 : index
    %c0_56 = arith.constant 0 : index
    %104 = vector.load %arg8[%c3_54, %c0_55, %c0_56] : memref<8x72x128xf32, #tpu.memory_space<vmem>>, vector<1x72x128xf32>
    %105 = vector.shape_cast %104 : vector<1x72x128xf32> to vector<72x128xf32>
    %106 = vector.shape_cast %103 : vector<72x128xf32> to vector<1x72x128xf32>
    tpu.vector_store %arg8[%c3_54, %c0_55, %c0_56], %106 {strides = array<i32>} : memref<8x72x128xf32, #tpu.memory_space<vmem>>, vector<1x72x128xf32>,
    %c12 = arith.constant 12 : index
    %107 = memref.load %arg1[%c12] : memref<24xf32, #tpu.memory_space<smem>>
    %108 = vector.broadcast %107 : f32 to vector<72x128xf32>
    %109 = arith.mulf %108, %18 : vector<72x128xf32>
    %c13 = arith.constant 13 : index
    %110 = memref.load %arg1[%c13] : memref<24xf32, #tpu.memory_space<smem>>
    %111 = vector.broadcast %110 : f32 to vector<72x128xf32>
    %112 = arith.mulf %111, %20 : vector<72x128xf32>
    %113 = arith.addf %109, %112 : vector<72x128xf32>
    %c14 = arith.constant 14 : index
    %114 = memref.load %arg1[%c14] : memref<24xf32, #tpu.memory_space<smem>>
    %115 = vector.broadcast %114 : f32 to vector<72x128xf32>
    %116 = arith.mulf %115, %22 : vector<72x128xf32>
    %117 = arith.addf %113, %116 : vector<72x128xf32>
    %c4_57 = arith.constant 4 : index
    %118 = memref.load %arg2[%c4_57] : memref<8xf32, #tpu.memory_space<smem>>
    %119 = vector.broadcast %118 : f32 to vector<72x128xf32>
    %120 = arith.addf %117, %119 : vector<72x128xf32>
    %cst_58 = arith.constant 0.000000e+00 : f32
    %cst_59 = arith.constant 1.000000e+00 : f32
    %121 = vector.broadcast %cst_58 : f32 to vector<72x128xf32>
    %122 = arith.maximumf %121, %120 : vector<72x128xf32>
    %123 = vector.broadcast %cst_59 : f32 to vector<72x128xf32>
    %124 = arith.minimumf %123, %122 : vector<72x128xf32>
    %c4_60 = arith.constant 4 : index
    %c0_61 = arith.constant 0 : index
    %c0_62 = arith.constant 0 : index
    %125 = vector.load %arg8[%c4_60, %c0_61, %c0_62] : memref<8x72x128xf32, #tpu.memory_space<vmem>>, vector<1x72x128xf32>
    %126 = vector.shape_cast %125 : vector<1x72x128xf32> to vector<72x128xf32>
    %127 = vector.shape_cast %124 : vector<72x128xf32> to vector<1x72x128xf32>
    tpu.vector_store %arg8[%c4_60, %c0_61, %c0_62], %127 {strides = array<i32>} : memref<8x72x128xf32, #tpu.memory_space<vmem>>, vector<1x72x128xf32>,
    %c15 = arith.constant 15 : index
    %128 = memref.load %arg1[%c15] : memref<24xf32, #tpu.memory_space<smem>>
    %129 = vector.broadcast %128 : f32 to vector<72x128xf32>
    %130 = arith.mulf %129, %18 : vector<72x128xf32>
    %c16 = arith.constant 16 : index
    %131 = memref.load %arg1[%c16] : memref<24xf32, #tpu.memory_space<smem>>
    %132 = vector.broadcast %131 : f32 to vector<72x128xf32>
    %133 = arith.mulf %132, %20 : vector<72x128xf32>
    %134 = arith.addf %130, %133 : vector<72x128xf32>
    %c17 = arith.constant 17 : index
    %135 = memref.load %arg1[%c17] : memref<24xf32, #tpu.memory_space<smem>>
    %136 = vector.broadcast %135 : f32 to vector<72x128xf32>
    %137 = arith.mulf %136, %22 : vector<72x128xf32>
    %138 = arith.addf %134, %137 : vector<72x128xf32>
    %c5_63 = arith.constant 5 : index
    %139 = memref.load %arg2[%c5_63] : memref<8xf32, #tpu.memory_space<smem>>
    %140 = vector.broadcast %139 : f32 to vector<72x128xf32>
    %141 = arith.addf %138, %140 : vector<72x128xf32>
    %cst_64 = arith.constant 0.000000e+00 : f32
    %cst_65 = arith.constant 1.000000e+00 : f32
    %142 = vector.broadcast %cst_64 : f32 to vector<72x128xf32>
    %143 = arith.maximumf %142, %141 : vector<72x128xf32>
    %144 = vector.broadcast %cst_65 : f32 to vector<72x128xf32>
    %145 = arith.minimumf %144, %143 : vector<72x128xf32>
    %c5_66 = arith.constant 5 : index
    %c0_67 = arith.constant 0 : index
    %c0_68 = arith.constant 0 : index
    %146 = vector.load %arg8[%c5_66, %c0_67, %c0_68] : memref<8x72x128xf32, #tpu.memory_space<vmem>>, vector<1x72x128xf32>
    %147 = vector.shape_cast %146 : vector<1x72x128xf32> to vector<72x128xf32>
    %148 = vector.shape_cast %145 : vector<72x128xf32> to vector<1x72x128xf32>
    tpu.vector_store %arg8[%c5_66, %c0_67, %c0_68], %148 {strides = array<i32>} : memref<8x72x128xf32, #tpu.memory_space<vmem>>, vector<1x72x128xf32>,
    %c18 = arith.constant 18 : index
    %149 = memref.load %arg1[%c18] : memref<24xf32, #tpu.memory_space<smem>>
    %150 = vector.broadcast %149 : f32 to vector<72x128xf32>
    %151 = arith.mulf %150, %18 : vector<72x128xf32>
    %c19 = arith.constant 19 : index
    %152 = memref.load %arg1[%c19] : memref<24xf32, #tpu.memory_space<smem>>
    %153 = vector.broadcast %152 : f32 to vector<72x128xf32>
    %154 = arith.mulf %153, %20 : vector<72x128xf32>
    %155 = arith.addf %151, %154 : vector<72x128xf32>
    %c20 = arith.constant 20 : index
    %156 = memref.load %arg1[%c20] : memref<24xf32, #tpu.memory_space<smem>>
    %157 = vector.broadcast %156 : f32 to vector<72x128xf32>
    %158 = arith.mulf %157, %22 : vector<72x128xf32>
    %159 = arith.addf %155, %158 : vector<72x128xf32>
    %c6_69 = arith.constant 6 : index
    %160 = memref.load %arg2[%c6_69] : memref<8xf32, #tpu.memory_space<smem>>
    %161 = vector.broadcast %160 : f32 to vector<72x128xf32>
    %162 = arith.addf %159, %161 : vector<72x128xf32>
    %cst_70 = arith.constant 0.000000e+00 : f32
    %cst_71 = arith.constant 1.000000e+00 : f32
    %163 = vector.broadcast %cst_70 : f32 to vector<72x128xf32>
    %164 = arith.maximumf %163, %162 : vector<72x128xf32>
    %165 = vector.broadcast %cst_71 : f32 to vector<72x128xf32>
    %166 = arith.minimumf %165, %164 : vector<72x128xf32>
    %c6_72 = arith.constant 6 : index
    %c0_73 = arith.constant 0 : index
    %c0_74 = arith.constant 0 : index
    %167 = vector.load %arg8[%c6_72, %c0_73, %c0_74] : memref<8x72x128xf32, #tpu.memory_space<vmem>>, vector<1x72x128xf32>
    %168 = vector.shape_cast %167 : vector<1x72x128xf32> to vector<72x128xf32>
    %169 = vector.shape_cast %166 : vector<72x128xf32> to vector<1x72x128xf32>
    tpu.vector_store %arg8[%c6_72, %c0_73, %c0_74], %169 {strides = array<i32>} : memref<8x72x128xf32, #tpu.memory_space<vmem>>, vector<1x72x128xf32>,
    %c21 = arith.constant 21 : index
    %170 = memref.load %arg1[%c21] : memref<24xf32, #tpu.memory_space<smem>>
    %171 = vector.broadcast %170 : f32 to vector<72x128xf32>
    %172 = arith.mulf %171, %18 : vector<72x128xf32>
    %c22 = arith.constant 22 : index
    %173 = memref.load %arg1[%c22] : memref<24xf32, #tpu.memory_space<smem>>
    %174 = vector.broadcast %173 : f32 to vector<72x128xf32>
    %175 = arith.mulf %174, %20 : vector<72x128xf32>
    %176 = arith.addf %172, %175 : vector<72x128xf32>
    %c23 = arith.constant 23 : index
    %177 = memref.load %arg1[%c23] : memref<24xf32, #tpu.memory_space<smem>>
    %178 = vector.broadcast %177 : f32 to vector<72x128xf32>
    %179 = arith.mulf %178, %22 : vector<72x128xf32>
    %180 = arith.addf %176, %179 : vector<72x128xf32>
    %c7_75 = arith.constant 7 : index
    %181 = memref.load %arg2[%c7_75] : memref<8xf32, #tpu.memory_space<smem>>
    %182 = vector.broadcast %181 : f32 to vector<72x128xf32>
    %183 = arith.addf %180, %182 : vector<72x128xf32>
    %cst_76 = arith.constant 0.000000e+00 : f32
    %cst_77 = arith.constant 1.000000e+00 : f32
    %184 = vector.broadcast %cst_76 : f32 to vector<72x128xf32>
    %185 = arith.maximumf %184, %183 : vector<72x128xf32>
    %186 = vector.broadcast %cst_77 : f32 to vector<72x128xf32>
    %187 = arith.minimumf %186, %185 : vector<72x128xf32>
    %c7_78 = arith.constant 7 : index
    %c0_79 = arith.constant 0 : index
    %c0_80 = arith.constant 0 : index
    %188 = vector.load %arg8[%c7_78, %c0_79, %c0_80] : memref<8x72x128xf32, #tpu.memory_space<vmem>>, vector<1x72x128xf32>
    %189 = vector.shape_cast %188 : vector<1x72x128xf32> to vector<72x128xf32>
    %190 = vector.shape_cast %187 : vector<72x128xf32> to vector<1x72x128xf32>
    tpu.vector_store %arg8[%c7_78, %c0_79, %c0_80], %190 {strides = array<i32>} : memref<8x72x128xf32, #tpu.memory_space<vmem>>, vector<1x72x128xf32>,
    %cst_81 = arith.constant 0.000000e+00 : f32
    %191 = vector.broadcast %cst_81 : f32 to vector<65x65xf32>
    %cst_82 = arith.constant 0.000000e+00 : f32
    %192 = vector.broadcast %cst_82 : f32 to vector<65x65xf32>
    %cst_83 = arith.constant 0.000000e+00 : f32
    %193 = vector.broadcast %cst_83 : f32 to vector<65x65xf32>
    %cst_84 = arith.constant 0.000000e+00 : f32
    %194 = vector.broadcast %cst_84 : f32 to vector<65x65xf32>
    %c0_i32 = arith.constant 0 : i32
    %c8_i32 = arith.constant 8 : i32
    %195 = arith.addi %c0_i32, %c8_i32 : i32
    %c1_i32 = arith.constant 1 : i32
    %196:4 = scf.for %arg9 = %c0_i32 to %195 step %c1_i32 iter_args(%arg10 = %191, %arg11 = %192, %arg12 = %193, %arg13 = %194) -> (vector<65x65xf32>, vector<65x65xf32>, vector<65x65xf32>, vector<65x65xf32>)  : i32 {
      %283 = arith.index_cast %arg9 : i32 to index
      %c0_150 = arith.constant 0 : index
      %c0_151 = arith.constant 0 : index
      %284 = vector.load %arg8[%283, %c0_150, %c0_151] : memref<8x72x128xf32, #tpu.memory_space<vmem>>, vector<1x65x65xf32>
      %285 = vector.shape_cast %284 : vector<1x65x65xf32> to vector<65x65xf32>
      %c0_i32_152 = arith.constant 0 : i32
      %286 = arith.addi %c0_i32_152, %arg9 : i32
      %c3_i32 = arith.constant 3 : i32
      %287 = arith.muli %286, %c3_i32 : i32
      %c0_i32_153 = arith.constant 0 : i32
      %288 = arith.addi %287, %c0_i32_153 : i32
      %c3_i32_154 = arith.constant 3 : i32
      %289 = arith.muli %288, %c3_i32_154 : i32
      %c0_i32_155 = arith.constant 0 : i32
      %290 = arith.addi %289, %c0_i32_155 : i32
      %291 = arith.index_cast %290 : i32 to index
      %292 = memref.load %arg3[%291] : memref<576xf32, #tpu.memory_space<smem>>
      %293 = vector.broadcast %292 : f32 to vector<65x65xf32>
      %294 = arith.mulf %293, %285 : vector<65x65xf32>
      %295 = arith.addf %arg10, %294 : vector<65x65xf32>
      %c8_i32_156 = arith.constant 8 : i32
      %296 = arith.addi %c8_i32_156, %arg9 : i32
      %c3_i32_157 = arith.constant 3 : i32
      %297 = arith.muli %296, %c3_i32_157 : i32
      %c0_i32_158 = arith.constant 0 : i32
      %298 = arith.addi %297, %c0_i32_158 : i32
      %c3_i32_159 = arith.constant 3 : i32
      %299 = arith.muli %298, %c3_i32_159 : i32
      %c0_i32_160 = arith.constant 0 : i32
      %300 = arith.addi %299, %c0_i32_160 : i32
      %301 = arith.index_cast %300 : i32 to index
      %302 = memref.load %arg3[%301] : memref<576xf32, #tpu.memory_space<smem>>
      %303 = vector.broadcast %302 : f32 to vector<65x65xf32>
      %304 = arith.mulf %303, %285 : vector<65x65xf32>
      %305 = arith.addf %arg11, %304 : vector<65x65xf32>
      %c16_i32 = arith.constant 16 : i32
      %306 = arith.addi %c16_i32, %arg9 : i32
      %c3_i32_161 = arith.constant 3 : i32
      %307 = arith.muli %306, %c3_i32_161 : i32
      %c0_i32_162 = arith.constant 0 : i32
      %308 = arith.addi %307, %c0_i32_162 : i32
      %c3_i32_163 = arith.constant 3 : i32
      %309 = arith.muli %308, %c3_i32_163 : i32
      %c0_i32_164 = arith.constant 0 : i32
      %310 = arith.addi %309, %c0_i32_164 : i32
      %311 = arith.index_cast %310 : i32 to index
      %312 = memref.load %arg3[%311] : memref<576xf32, #tpu.memory_space<smem>>
      %313 = vector.broadcast %312 : f32 to vector<65x65xf32>
      %314 = arith.mulf %313, %285 : vector<65x65xf32>
      %315 = arith.addf %arg12, %314 : vector<65x65xf32>
      %c24_i32 = arith.constant 24 : i32
      %316 = arith.addi %c24_i32, %arg9 : i32
      %c3_i32_165 = arith.constant 3 : i32
      %317 = arith.muli %316, %c3_i32_165 : i32
      %c0_i32_166 = arith.constant 0 : i32
      %318 = arith.addi %317, %c0_i32_166 : i32
      %c3_i32_167 = arith.constant 3 : i32
      %319 = arith.muli %318, %c3_i32_167 : i32
      %c0_i32_168 = arith.constant 0 : i32
      %320 = arith.addi %319, %c0_i32_168 : i32
      %321 = arith.index_cast %320 : i32 to index
      %322 = memref.load %arg3[%321] : memref<576xf32, #tpu.memory_space<smem>>
      %323 = vector.broadcast %322 : f32 to vector<65x65xf32>
      %324 = arith.mulf %323, %285 : vector<65x65xf32>
      %325 = arith.addf %arg13, %324 : vector<65x65xf32>
      %326 = arith.index_cast %arg9 : i32 to index
      %c0_169 = arith.constant 0 : index
      %c1_170 = arith.constant 1 : index
      %327 = vector.load %arg8[%326, %c0_169, %c1_170] : memref<8x72x128xf32, #tpu.memory_space<vmem>>, vector<1x65x65xf32>
      %328 = vector.shape_cast %327 : vector<1x65x65xf32> to vector<65x65xf32>
      %c0_i32_171 = arith.constant 0 : i32
      %329 = arith.addi %c0_i32_171, %arg9 : i32
      %c3_i32_172 = arith.constant 3 : i32
      %330 = arith.muli %329, %c3_i32_172 : i32
      %c0_i32_173 = arith.constant 0 : i32
      %331 = arith.addi %330, %c0_i32_173 : i32
      %c3_i32_174 = arith.constant 3 : i32
      %332 = arith.muli %331, %c3_i32_174 : i32
      %c1_i32_175 = arith.constant 1 : i32
      %333 = arith.addi %332, %c1_i32_175 : i32
      %334 = arith.index_cast %333 : i32 to index
      %335 = memref.load %arg3[%334] : memref<576xf32, #tpu.memory_space<smem>>
      %336 = vector.broadcast %335 : f32 to vector<65x65xf32>
      %337 = arith.mulf %336, %328 : vector<65x65xf32>
      %338 = arith.addf %295, %337 : vector<65x65xf32>
      %c8_i32_176 = arith.constant 8 : i32
      %339 = arith.addi %c8_i32_176, %arg9 : i32
      %c3_i32_177 = arith.constant 3 : i32
      %340 = arith.muli %339, %c3_i32_177 : i32
      %c0_i32_178 = arith.constant 0 : i32
      %341 = arith.addi %340, %c0_i32_178 : i32
      %c3_i32_179 = arith.constant 3 : i32
      %342 = arith.muli %341, %c3_i32_179 : i32
      %c1_i32_180 = arith.constant 1 : i32
      %343 = arith.addi %342, %c1_i32_180 : i32
      %344 = arith.index_cast %343 : i32 to index
      %345 = memref.load %arg3[%344] : memref<576xf32, #tpu.memory_space<smem>>
      %346 = vector.broadcast %345 : f32 to vector<65x65xf32>
      %347 = arith.mulf %346, %328 : vector<65x65xf32>
      %348 = arith.addf %305, %347 : vector<65x65xf32>
      %c16_i32_181 = arith.constant 16 : i32
      %349 = arith.addi %c16_i32_181, %arg9 : i32
      %c3_i32_182 = arith.constant 3 : i32
      %350 = arith.muli %349, %c3_i32_182 : i32
      %c0_i32_183 = arith.constant 0 : i32
      %351 = arith.addi %350, %c0_i32_183 : i32
      %c3_i32_184 = arith.constant 3 : i32
      %352 = arith.muli %351, %c3_i32_184 : i32
      %c1_i32_185 = arith.constant 1 : i32
      %353 = arith.addi %352, %c1_i32_185 : i32
      %354 = arith.index_cast %353 : i32 to index
      %355 = memref.load %arg3[%354] : memref<576xf32, #tpu.memory_space<smem>>
      %356 = vector.broadcast %355 : f32 to vector<65x65xf32>
      %357 = arith.mulf %356, %328 : vector<65x65xf32>
      %358 = arith.addf %315, %357 : vector<65x65xf32>
      %c24_i32_186 = arith.constant 24 : i32
      %359 = arith.addi %c24_i32_186, %arg9 : i32
      %c3_i32_187 = arith.constant 3 : i32
      %360 = arith.muli %359, %c3_i32_187 : i32
      %c0_i32_188 = arith.constant 0 : i32
      %361 = arith.addi %360, %c0_i32_188 : i32
      %c3_i32_189 = arith.constant 3 : i32
      %362 = arith.muli %361, %c3_i32_189 : i32
      %c1_i32_190 = arith.constant 1 : i32
      %363 = arith.addi %362, %c1_i32_190 : i32
      %364 = arith.index_cast %363 : i32 to index
      %365 = memref.load %arg3[%364] : memref<576xf32, #tpu.memory_space<smem>>
      %366 = vector.broadcast %365 : f32 to vector<65x65xf32>
      %367 = arith.mulf %366, %328 : vector<65x65xf32>
      %368 = arith.addf %325, %367 : vector<65x65xf32>
      %369 = arith.index_cast %arg9 : i32 to index
      %c0_191 = arith.constant 0 : index
      %c2_192 = arith.constant 2 : index
      %370 = vector.load %arg8[%369, %c0_191, %c2_192] : memref<8x72x128xf32, #tpu.memory_space<vmem>>, vector<1x65x65xf32>
      %371 = vector.shape_cast %370 : vector<1x65x65xf32> to vector<65x65xf32>
      %c0_i32_193 = arith.constant 0 : i32
      %372 = arith.addi %c0_i32_193, %arg9 : i32
      %c3_i32_194 = arith.constant 3 : i32
      %373 = arith.muli %372, %c3_i32_194 : i32
      %c0_i32_195 = arith.constant 0 : i32
      %374 = arith.addi %373, %c0_i32_195 : i32
      %c3_i32_196 = arith.constant 3 : i32
      %375 = arith.muli %374, %c3_i32_196 : i32
      %c2_i32 = arith.constant 2 : i32
      %376 = arith.addi %375, %c2_i32 : i32
      %377 = arith.index_cast %376 : i32 to index
      %378 = memref.load %arg3[%377] : memref<576xf32, #tpu.memory_space<smem>>
      %379 = vector.broadcast %378 : f32 to vector<65x65xf32>
      %380 = arith.mulf %379, %371 : vector<65x65xf32>
      %381 = arith.addf %338, %380 : vector<65x65xf32>
      %c8_i32_197 = arith.constant 8 : i32
      %382 = arith.addi %c8_i32_197, %arg9 : i32
      %c3_i32_198 = arith.constant 3 : i32
      %383 = arith.muli %382, %c3_i32_198 : i32
      %c0_i32_199 = arith.constant 0 : i32
      %384 = arith.addi %383, %c0_i32_199 : i32
      %c3_i32_200 = arith.constant 3 : i32
      %385 = arith.muli %384, %c3_i32_200 : i32
      %c2_i32_201 = arith.constant 2 : i32
      %386 = arith.addi %385, %c2_i32_201 : i32
      %387 = arith.index_cast %386 : i32 to index
      %388 = memref.load %arg3[%387] : memref<576xf32, #tpu.memory_space<smem>>
      %389 = vector.broadcast %388 : f32 to vector<65x65xf32>
      %390 = arith.mulf %389, %371 : vector<65x65xf32>
      %391 = arith.addf %348, %390 : vector<65x65xf32>
      %c16_i32_202 = arith.constant 16 : i32
      %392 = arith.addi %c16_i32_202, %arg9 : i32
      %c3_i32_203 = arith.constant 3 : i32
      %393 = arith.muli %392, %c3_i32_203 : i32
      %c0_i32_204 = arith.constant 0 : i32
      %394 = arith.addi %393, %c0_i32_204 : i32
      %c3_i32_205 = arith.constant 3 : i32
      %395 = arith.muli %394, %c3_i32_205 : i32
      %c2_i32_206 = arith.constant 2 : i32
      %396 = arith.addi %395, %c2_i32_206 : i32
      %397 = arith.index_cast %396 : i32 to index
      %398 = memref.load %arg3[%397] : memref<576xf32, #tpu.memory_space<smem>>
      %399 = vector.broadcast %398 : f32 to vector<65x65xf32>
      %400 = arith.mulf %399, %371 : vector<65x65xf32>
      %401 = arith.addf %358, %400 : vector<65x65xf32>
      %c24_i32_207 = arith.constant 24 : i32
      %402 = arith.addi %c24_i32_207, %arg9 : i32
      %c3_i32_208 = arith.constant 3 : i32
      %403 = arith.muli %402, %c3_i32_208 : i32
      %c0_i32_209 = arith.constant 0 : i32
      %404 = arith.addi %403, %c0_i32_209 : i32
      %c3_i32_210 = arith.constant 3 : i32
      %405 = arith.muli %404, %c3_i32_210 : i32
      %c2_i32_211 = arith.constant 2 : i32
      %406 = arith.addi %405, %c2_i32_211 : i32
      %407 = arith.index_cast %406 : i32 to index
      %408 = memref.load %arg3[%407] : memref<576xf32, #tpu.memory_space<smem>>
      %409 = vector.broadcast %408 : f32 to vector<65x65xf32>
      %410 = arith.mulf %409, %371 : vector<65x65xf32>
      %411 = arith.addf %368, %410 : vector<65x65xf32>
      %412 = arith.index_cast %arg9 : i32 to index
      %c1_212 = arith.constant 1 : index
      %c0_213 = arith.constant 0 : index
      %413 = vector.load %arg8[%412, %c1_212, %c0_213] : memref<8x72x128xf32, #tpu.memory_space<vmem>>, vector<1x65x65xf32>
      %414 = vector.shape_cast %413 : vector<1x65x65xf32> to vector<65x65xf32>
      %c0_i32_214 = arith.constant 0 : i32
      %415 = arith.addi %c0_i32_214, %arg9 : i32
      %c3_i32_215 = arith.constant 3 : i32
      %416 = arith.muli %415, %c3_i32_215 : i32
      %c1_i32_216 = arith.constant 1 : i32
      %417 = arith.addi %416, %c1_i32_216 : i32
      %c3_i32_217 = arith.constant 3 : i32
      %418 = arith.muli %417, %c3_i32_217 : i32
      %c0_i32_218 = arith.constant 0 : i32
      %419 = arith.addi %418, %c0_i32_218 : i32
      %420 = arith.index_cast %419 : i32 to index
      %421 = memref.load %arg3[%420] : memref<576xf32, #tpu.memory_space<smem>>
      %422 = vector.broadcast %421 : f32 to vector<65x65xf32>
      %423 = arith.mulf %422, %414 : vector<65x65xf32>
      %424 = arith.addf %381, %423 : vector<65x65xf32>
      %c8_i32_219 = arith.constant 8 : i32
      %425 = arith.addi %c8_i32_219, %arg9 : i32
      %c3_i32_220 = arith.constant 3 : i32
      %426 = arith.muli %425, %c3_i32_220 : i32
      %c1_i32_221 = arith.constant 1 : i32
      %427 = arith.addi %426, %c1_i32_221 : i32
      %c3_i32_222 = arith.constant 3 : i32
      %428 = arith.muli %427, %c3_i32_222 : i32
      %c0_i32_223 = arith.constant 0 : i32
      %429 = arith.addi %428, %c0_i32_223 : i32
      %430 = arith.index_cast %429 : i32 to index
      %431 = memref.load %arg3[%430] : memref<576xf32, #tpu.memory_space<smem>>
      %432 = vector.broadcast %431 : f32 to vector<65x65xf32>
      %433 = arith.mulf %432, %414 : vector<65x65xf32>
      %434 = arith.addf %391, %433 : vector<65x65xf32>
      %c16_i32_224 = arith.constant 16 : i32
      %435 = arith.addi %c16_i32_224, %arg9 : i32
      %c3_i32_225 = arith.constant 3 : i32
      %436 = arith.muli %435, %c3_i32_225 : i32
      %c1_i32_226 = arith.constant 1 : i32
      %437 = arith.addi %436, %c1_i32_226 : i32
      %c3_i32_227 = arith.constant 3 : i32
      %438 = arith.muli %437, %c3_i32_227 : i32
      %c0_i32_228 = arith.constant 0 : i32
      %439 = arith.addi %438, %c0_i32_228 : i32
      %440 = arith.index_cast %439 : i32 to index
      %441 = memref.load %arg3[%440] : memref<576xf32, #tpu.memory_space<smem>>
      %442 = vector.broadcast %441 : f32 to vector<65x65xf32>
      %443 = arith.mulf %442, %414 : vector<65x65xf32>
      %444 = arith.addf %401, %443 : vector<65x65xf32>
      %c24_i32_229 = arith.constant 24 : i32
      %445 = arith.addi %c24_i32_229, %arg9 : i32
      %c3_i32_230 = arith.constant 3 : i32
      %446 = arith.muli %445, %c3_i32_230 : i32
      %c1_i32_231 = arith.constant 1 : i32
      %447 = arith.addi %446, %c1_i32_231 : i32
      %c3_i32_232 = arith.constant 3 : i32
      %448 = arith.muli %447, %c3_i32_232 : i32
      %c0_i32_233 = arith.constant 0 : i32
      %449 = arith.addi %448, %c0_i32_233 : i32
      %450 = arith.index_cast %449 : i32 to index
      %451 = memref.load %arg3[%450] : memref<576xf32, #tpu.memory_space<smem>>
      %452 = vector.broadcast %451 : f32 to vector<65x65xf32>
      %453 = arith.mulf %452, %414 : vector<65x65xf32>
      %454 = arith.addf %411, %453 : vector<65x65xf32>
      %455 = arith.index_cast %arg9 : i32 to index
      %c1_234 = arith.constant 1 : index
      %c1_235 = arith.constant 1 : index
      %456 = vector.load %arg8[%455, %c1_234, %c1_235] : memref<8x72x128xf32, #tpu.memory_space<vmem>>, vector<1x65x65xf32>
      %457 = vector.shape_cast %456 : vector<1x65x65xf32> to vector<65x65xf32>
      %c0_i32_236 = arith.constant 0 : i32
      %458 = arith.addi %c0_i32_236, %arg9 : i32
      %c3_i32_237 = arith.constant 3 : i32
      %459 = arith.muli %458, %c3_i32_237 : i32
      %c1_i32_238 = arith.constant 1 : i32
      %460 = arith.addi %459, %c1_i32_238 : i32
      %c3_i32_239 = arith.constant 3 : i32
      %461 = arith.muli %460, %c3_i32_239 : i32
      %c1_i32_240 = arith.constant 1 : i32
      %462 = arith.addi %461, %c1_i32_240 : i32
      %463 = arith.index_cast %462 : i32 to index
      %464 = memref.load %arg3[%463] : memref<576xf32, #tpu.memory_space<smem>>
      %465 = vector.broadcast %464 : f32 to vector<65x65xf32>
      %466 = arith.mulf %465, %457 : vector<65x65xf32>
      %467 = arith.addf %424, %466 : vector<65x65xf32>
      %c8_i32_241 = arith.constant 8 : i32
      %468 = arith.addi %c8_i32_241, %arg9 : i32
      %c3_i32_242 = arith.constant 3 : i32
      %469 = arith.muli %468, %c3_i32_242 : i32
      %c1_i32_243 = arith.constant 1 : i32
      %470 = arith.addi %469, %c1_i32_243 : i32
      %c3_i32_244 = arith.constant 3 : i32
      %471 = arith.muli %470, %c3_i32_244 : i32
      %c1_i32_245 = arith.constant 1 : i32
      %472 = arith.addi %471, %c1_i32_245 : i32
      %473 = arith.index_cast %472 : i32 to index
      %474 = memref.load %arg3[%473] : memref<576xf32, #tpu.memory_space<smem>>
      %475 = vector.broadcast %474 : f32 to vector<65x65xf32>
      %476 = arith.mulf %475, %457 : vector<65x65xf32>
      %477 = arith.addf %434, %476 : vector<65x65xf32>
      %c16_i32_246 = arith.constant 16 : i32
      %478 = arith.addi %c16_i32_246, %arg9 : i32
      %c3_i32_247 = arith.constant 3 : i32
      %479 = arith.muli %478, %c3_i32_247 : i32
      %c1_i32_248 = arith.constant 1 : i32
      %480 = arith.addi %479, %c1_i32_248 : i32
      %c3_i32_249 = arith.constant 3 : i32
      %481 = arith.muli %480, %c3_i32_249 : i32
      %c1_i32_250 = arith.constant 1 : i32
      %482 = arith.addi %481, %c1_i32_250 : i32
      %483 = arith.index_cast %482 : i32 to index
      %484 = memref.load %arg3[%483] : memref<576xf32, #tpu.memory_space<smem>>
      %485 = vector.broadcast %484 : f32 to vector<65x65xf32>
      %486 = arith.mulf %485, %457 : vector<65x65xf32>
      %487 = arith.addf %444, %486 : vector<65x65xf32>
      %c24_i32_251 = arith.constant 24 : i32
      %488 = arith.addi %c24_i32_251, %arg9 : i32
      %c3_i32_252 = arith.constant 3 : i32
      %489 = arith.muli %488, %c3_i32_252 : i32
      %c1_i32_253 = arith.constant 1 : i32
      %490 = arith.addi %489, %c1_i32_253 : i32
      %c3_i32_254 = arith.constant 3 : i32
      %491 = arith.muli %490, %c3_i32_254 : i32
      %c1_i32_255 = arith.constant 1 : i32
      %492 = arith.addi %491, %c1_i32_255 : i32
      %493 = arith.index_cast %492 : i32 to index
      %494 = memref.load %arg3[%493] : memref<576xf32, #tpu.memory_space<smem>>
      %495 = vector.broadcast %494 : f32 to vector<65x65xf32>
      %496 = arith.mulf %495, %457 : vector<65x65xf32>
      %497 = arith.addf %454, %496 : vector<65x65xf32>
      %498 = arith.index_cast %arg9 : i32 to index
      %c1_256 = arith.constant 1 : index
      %c2_257 = arith.constant 2 : index
      %499 = vector.load %arg8[%498, %c1_256, %c2_257] : memref<8x72x128xf32, #tpu.memory_space<vmem>>, vector<1x65x65xf32>
      %500 = vector.shape_cast %499 : vector<1x65x65xf32> to vector<65x65xf32>
      %c0_i32_258 = arith.constant 0 : i32
      %501 = arith.addi %c0_i32_258, %arg9 : i32
      %c3_i32_259 = arith.constant 3 : i32
      %502 = arith.muli %501, %c3_i32_259 : i32
      %c1_i32_260 = arith.constant 1 : i32
      %503 = arith.addi %502, %c1_i32_260 : i32
      %c3_i32_261 = arith.constant 3 : i32
      %504 = arith.muli %503, %c3_i32_261 : i32
      %c2_i32_262 = arith.constant 2 : i32
      %505 = arith.addi %504, %c2_i32_262 : i32
      %506 = arith.index_cast %505 : i32 to index
      %507 = memref.load %arg3[%506] : memref<576xf32, #tpu.memory_space<smem>>
      %508 = vector.broadcast %507 : f32 to vector<65x65xf32>
      %509 = arith.mulf %508, %500 : vector<65x65xf32>
      %510 = arith.addf %467, %509 : vector<65x65xf32>
      %c8_i32_263 = arith.constant 8 : i32
      %511 = arith.addi %c8_i32_263, %arg9 : i32
      %c3_i32_264 = arith.constant 3 : i32
      %512 = arith.muli %511, %c3_i32_264 : i32
      %c1_i32_265 = arith.constant 1 : i32
      %513 = arith.addi %512, %c1_i32_265 : i32
      %c3_i32_266 = arith.constant 3 : i32
      %514 = arith.muli %513, %c3_i32_266 : i32
      %c2_i32_267 = arith.constant 2 : i32
      %515 = arith.addi %514, %c2_i32_267 : i32
      %516 = arith.index_cast %515 : i32 to index
      %517 = memref.load %arg3[%516] : memref<576xf32, #tpu.memory_space<smem>>
      %518 = vector.broadcast %517 : f32 to vector<65x65xf32>
      %519 = arith.mulf %518, %500 : vector<65x65xf32>
      %520 = arith.addf %477, %519 : vector<65x65xf32>
      %c16_i32_268 = arith.constant 16 : i32
      %521 = arith.addi %c16_i32_268, %arg9 : i32
      %c3_i32_269 = arith.constant 3 : i32
      %522 = arith.muli %521, %c3_i32_269 : i32
      %c1_i32_270 = arith.constant 1 : i32
      %523 = arith.addi %522, %c1_i32_270 : i32
      %c3_i32_271 = arith.constant 3 : i32
      %524 = arith.muli %523, %c3_i32_271 : i32
      %c2_i32_272 = arith.constant 2 : i32
      %525 = arith.addi %524, %c2_i32_272 : i32
      %526 = arith.index_cast %525 : i32 to index
      %527 = memref.load %arg3[%526] : memref<576xf32, #tpu.memory_space<smem>>
      %528 = vector.broadcast %527 : f32 to vector<65x65xf32>
      %529 = arith.mulf %528, %500 : vector<65x65xf32>
      %530 = arith.addf %487, %529 : vector<65x65xf32>
      %c24_i32_273 = arith.constant 24 : i32
      %531 = arith.addi %c24_i32_273, %arg9 : i32
      %c3_i32_274 = arith.constant 3 : i32
      %532 = arith.muli %531, %c3_i32_274 : i32
      %c1_i32_275 = arith.constant 1 : i32
      %533 = arith.addi %532, %c1_i32_275 : i32
      %c3_i32_276 = arith.constant 3 : i32
      %534 = arith.muli %533, %c3_i32_276 : i32
      %c2_i32_277 = arith.constant 2 : i32
      %535 = arith.addi %534, %c2_i32_277 : i32
      %536 = arith.index_cast %535 : i32 to index
      %537 = memref.load %arg3[%536] : memref<576xf32, #tpu.memory_space<smem>>
      %538 = vector.broadcast %537 : f32 to vector<65x65xf32>
      %539 = arith.mulf %538, %500 : vector<65x65xf32>
      %540 = arith.addf %497, %539 : vector<65x65xf32>
      %541 = arith.index_cast %arg9 : i32 to index
      %c2_278 = arith.constant 2 : index
      %c0_279 = arith.constant 0 : index
      %542 = vector.load %arg8[%541, %c2_278, %c0_279] : memref<8x72x128xf32, #tpu.memory_space<vmem>>, vector<1x65x65xf32>
      %543 = vector.shape_cast %542 : vector<1x65x65xf32> to vector<65x65xf32>
      %c0_i32_280 = arith.constant 0 : i32
      %544 = arith.addi %c0_i32_280, %arg9 : i32
      %c3_i32_281 = arith.constant 3 : i32
      %545 = arith.muli %544, %c3_i32_281 : i32
      %c2_i32_282 = arith.constant 2 : i32
      %546 = arith.addi %545, %c2_i32_282 : i32
      %c3_i32_283 = arith.constant 3 : i32
      %547 = arith.muli %546, %c3_i32_283 : i32
      %c0_i32_284 = arith.constant 0 : i32
      %548 = arith.addi %547, %c0_i32_284 : i32
      %549 = arith.index_cast %548 : i32 to index
      %550 = memref.load %arg3[%549] : memref<576xf32, #tpu.memory_space<smem>>
      %551 = vector.broadcast %550 : f32 to vector<65x65xf32>
      %552 = arith.mulf %551, %543 : vector<65x65xf32>
      %553 = arith.addf %510, %552 : vector<65x65xf32>
      %c8_i32_285 = arith.constant 8 : i32
      %554 = arith.addi %c8_i32_285, %arg9 : i32
      %c3_i32_286 = arith.constant 3 : i32
      %555 = arith.muli %554, %c3_i32_286 : i32
      %c2_i32_287 = arith.constant 2 : i32
      %556 = arith.addi %555, %c2_i32_287 : i32
      %c3_i32_288 = arith.constant 3 : i32
      %557 = arith.muli %556, %c3_i32_288 : i32
      %c0_i32_289 = arith.constant 0 : i32
      %558 = arith.addi %557, %c0_i32_289 : i32
      %559 = arith.index_cast %558 : i32 to index
      %560 = memref.load %arg3[%559] : memref<576xf32, #tpu.memory_space<smem>>
      %561 = vector.broadcast %560 : f32 to vector<65x65xf32>
      %562 = arith.mulf %561, %543 : vector<65x65xf32>
      %563 = arith.addf %520, %562 : vector<65x65xf32>
      %c16_i32_290 = arith.constant 16 : i32
      %564 = arith.addi %c16_i32_290, %arg9 : i32
      %c3_i32_291 = arith.constant 3 : i32
      %565 = arith.muli %564, %c3_i32_291 : i32
      %c2_i32_292 = arith.constant 2 : i32
      %566 = arith.addi %565, %c2_i32_292 : i32
      %c3_i32_293 = arith.constant 3 : i32
      %567 = arith.muli %566, %c3_i32_293 : i32
      %c0_i32_294 = arith.constant 0 : i32
      %568 = arith.addi %567, %c0_i32_294 : i32
      %569 = arith.index_cast %568 : i32 to index
      %570 = memref.load %arg3[%569] : memref<576xf32, #tpu.memory_space<smem>>
      %571 = vector.broadcast %570 : f32 to vector<65x65xf32>
      %572 = arith.mulf %571, %543 : vector<65x65xf32>
      %573 = arith.addf %530, %572 : vector<65x65xf32>
      %c24_i32_295 = arith.constant 24 : i32
      %574 = arith.addi %c24_i32_295, %arg9 : i32
      %c3_i32_296 = arith.constant 3 : i32
      %575 = arith.muli %574, %c3_i32_296 : i32
      %c2_i32_297 = arith.constant 2 : i32
      %576 = arith.addi %575, %c2_i32_297 : i32
      %c3_i32_298 = arith.constant 3 : i32
      %577 = arith.muli %576, %c3_i32_298 : i32
      %c0_i32_299 = arith.constant 0 : i32
      %578 = arith.addi %577, %c0_i32_299 : i32
      %579 = arith.index_cast %578 : i32 to index
      %580 = memref.load %arg3[%579] : memref<576xf32, #tpu.memory_space<smem>>
      %581 = vector.broadcast %580 : f32 to vector<65x65xf32>
      %582 = arith.mulf %581, %543 : vector<65x65xf32>
      %583 = arith.addf %540, %582 : vector<65x65xf32>
      %584 = arith.index_cast %arg9 : i32 to index
      %c2_300 = arith.constant 2 : index
      %c1_301 = arith.constant 1 : index
      %585 = vector.load %arg8[%584, %c2_300, %c1_301] : memref<8x72x128xf32, #tpu.memory_space<vmem>>, vector<1x65x65xf32>
      %586 = vector.shape_cast %585 : vector<1x65x65xf32> to vector<65x65xf32>
      %c0_i32_302 = arith.constant 0 : i32
      %587 = arith.addi %c0_i32_302, %arg9 : i32
      %c3_i32_303 = arith.constant 3 : i32
      %588 = arith.muli %587, %c3_i32_303 : i32
      %c2_i32_304 = arith.constant 2 : i32
      %589 = arith.addi %588, %c2_i32_304 : i32
      %c3_i32_305 = arith.constant 3 : i32
      %590 = arith.muli %589, %c3_i32_305 : i32
      %c1_i32_306 = arith.constant 1 : i32
      %591 = arith.addi %590, %c1_i32_306 : i32
      %592 = arith.index_cast %591 : i32 to index
      %593 = memref.load %arg3[%592] : memref<576xf32, #tpu.memory_space<smem>>
      %594 = vector.broadcast %593 : f32 to vector<65x65xf32>
      %595 = arith.mulf %594, %586 : vector<65x65xf32>
      %596 = arith.addf %553, %595 : vector<65x65xf32>
      %c8_i32_307 = arith.constant 8 : i32
      %597 = arith.addi %c8_i32_307, %arg9 : i32
      %c3_i32_308 = arith.constant 3 : i32
      %598 = arith.muli %597, %c3_i32_308 : i32
      %c2_i32_309 = arith.constant 2 : i32
      %599 = arith.addi %598, %c2_i32_309 : i32
      %c3_i32_310 = arith.constant 3 : i32
      %600 = arith.muli %599, %c3_i32_310 : i32
      %c1_i32_311 = arith.constant 1 : i32
      %601 = arith.addi %600, %c1_i32_311 : i32
      %602 = arith.index_cast %601 : i32 to index
      %603 = memref.load %arg3[%602] : memref<576xf32, #tpu.memory_space<smem>>
      %604 = vector.broadcast %603 : f32 to vector<65x65xf32>
      %605 = arith.mulf %604, %586 : vector<65x65xf32>
      %606 = arith.addf %563, %605 : vector<65x65xf32>
      %c16_i32_312 = arith.constant 16 : i32
      %607 = arith.addi %c16_i32_312, %arg9 : i32
      %c3_i32_313 = arith.constant 3 : i32
      %608 = arith.muli %607, %c3_i32_313 : i32
      %c2_i32_314 = arith.constant 2 : i32
      %609 = arith.addi %608, %c2_i32_314 : i32
      %c3_i32_315 = arith.constant 3 : i32
      %610 = arith.muli %609, %c3_i32_315 : i32
      %c1_i32_316 = arith.constant 1 : i32
      %611 = arith.addi %610, %c1_i32_316 : i32
      %612 = arith.index_cast %611 : i32 to index
      %613 = memref.load %arg3[%612] : memref<576xf32, #tpu.memory_space<smem>>
      %614 = vector.broadcast %613 : f32 to vector<65x65xf32>
      %615 = arith.mulf %614, %586 : vector<65x65xf32>
      %616 = arith.addf %573, %615 : vector<65x65xf32>
      %c24_i32_317 = arith.constant 24 : i32
      %617 = arith.addi %c24_i32_317, %arg9 : i32
      %c3_i32_318 = arith.constant 3 : i32
      %618 = arith.muli %617, %c3_i32_318 : i32
      %c2_i32_319 = arith.constant 2 : i32
      %619 = arith.addi %618, %c2_i32_319 : i32
      %c3_i32_320 = arith.constant 3 : i32
      %620 = arith.muli %619, %c3_i32_320 : i32
      %c1_i32_321 = arith.constant 1 : i32
      %621 = arith.addi %620, %c1_i32_321 : i32
      %622 = arith.index_cast %621 : i32 to index
      %623 = memref.load %arg3[%622] : memref<576xf32, #tpu.memory_space<smem>>
      %624 = vector.broadcast %623 : f32 to vector<65x65xf32>
      %625 = arith.mulf %624, %586 : vector<65x65xf32>
      %626 = arith.addf %583, %625 : vector<65x65xf32>
      %627 = arith.index_cast %arg9 : i32 to index
      %c2_322 = arith.constant 2 : index
      %c2_323 = arith.constant 2 : index
      %628 = vector.load %arg8[%627, %c2_322, %c2_323] : memref<8x72x128xf32, #tpu.memory_space<vmem>>, vector<1x65x65xf32>
      %629 = vector.shape_cast %628 : vector<1x65x65xf32> to vector<65x65xf32>
      %c0_i32_324 = arith.constant 0 : i32
      %630 = arith.addi %c0_i32_324, %arg9 : i32
      %c3_i32_325 = arith.constant 3 : i32
      %631 = arith.muli %630, %c3_i32_325 : i32
      %c2_i32_326 = arith.constant 2 : i32
      %632 = arith.addi %631, %c2_i32_326 : i32
      %c3_i32_327 = arith.constant 3 : i32
      %633 = arith.muli %632, %c3_i32_327 : i32
      %c2_i32_328 = arith.constant 2 : i32
      %634 = arith.addi %633, %c2_i32_328 : i32
      %635 = arith.index_cast %634 : i32 to index
      %636 = memref.load %arg3[%635] : memref<576xf32, #tpu.memory_space<smem>>
      %637 = vector.broadcast %636 : f32 to vector<65x65xf32>
      %638 = arith.mulf %637, %629 : vector<65x65xf32>
      %639 = arith.addf %596, %638 : vector<65x65xf32>
      %c8_i32_329 = arith.constant 8 : i32
      %640 = arith.addi %c8_i32_329, %arg9 : i32
      %c3_i32_330 = arith.constant 3 : i32
      %641 = arith.muli %640, %c3_i32_330 : i32
      %c2_i32_331 = arith.constant 2 : i32
      %642 = arith.addi %641, %c2_i32_331 : i32
      %c3_i32_332 = arith.constant 3 : i32
      %643 = arith.muli %642, %c3_i32_332 : i32
      %c2_i32_333 = arith.constant 2 : i32
      %644 = arith.addi %643, %c2_i32_333 : i32
      %645 = arith.index_cast %644 : i32 to index
      %646 = memref.load %arg3[%645] : memref<576xf32, #tpu.memory_space<smem>>
      %647 = vector.broadcast %646 : f32 to vector<65x65xf32>
      %648 = arith.mulf %647, %629 : vector<65x65xf32>
      %649 = arith.addf %606, %648 : vector<65x65xf32>
      %c16_i32_334 = arith.constant 16 : i32
      %650 = arith.addi %c16_i32_334, %arg9 : i32
      %c3_i32_335 = arith.constant 3 : i32
      %651 = arith.muli %650, %c3_i32_335 : i32
      %c2_i32_336 = arith.constant 2 : i32
      %652 = arith.addi %651, %c2_i32_336 : i32
      %c3_i32_337 = arith.constant 3 : i32
      %653 = arith.muli %652, %c3_i32_337 : i32
      %c2_i32_338 = arith.constant 2 : i32
      %654 = arith.addi %653, %c2_i32_338 : i32
      %655 = arith.index_cast %654 : i32 to index
      %656 = memref.load %arg3[%655] : memref<576xf32, #tpu.memory_space<smem>>
      %657 = vector.broadcast %656 : f32 to vector<65x65xf32>
      %658 = arith.mulf %657, %629 : vector<65x65xf32>
      %659 = arith.addf %616, %658 : vector<65x65xf32>
      %c24_i32_339 = arith.constant 24 : i32
      %660 = arith.addi %c24_i32_339, %arg9 : i32
      %c3_i32_340 = arith.constant 3 : i32
      %661 = arith.muli %660, %c3_i32_340 : i32
      %c2_i32_341 = arith.constant 2 : i32
      %662 = arith.addi %661, %c2_i32_341 : i32
      %c3_i32_342 = arith.constant 3 : i32
      %663 = arith.muli %662, %c3_i32_342 : i32
      %c2_i32_343 = arith.constant 2 : i32
      %664 = arith.addi %663, %c2_i32_343 : i32
      %665 = arith.index_cast %664 : i32 to index
      %666 = memref.load %arg3[%665] : memref<576xf32, #tpu.memory_space<smem>>
      %667 = vector.broadcast %666 : f32 to vector<65x65xf32>
      %668 = arith.mulf %667, %629 : vector<65x65xf32>
      %669 = arith.addf %626, %668 : vector<65x65xf32>
      scf.yield %639, %649, %659, %669 : vector<65x65xf32>, vector<65x65xf32>, vector<65x65xf32>, vector<65x65xf32>
    }
    %c8_i32_85 = arith.constant 8 : i32
    %c0_86 = arith.constant 0 : index
    %197 = memref.load %arg4[%c0_86] : memref<8xf32, #tpu.memory_space<smem>>
    %198 = vector.broadcast %197 : f32 to vector<65x65xf32>
    %199 = arith.addf %196#0, %198 : vector<65x65xf32>
    %cst_87 = arith.constant 0.000000e+00 : f32
    %cst_88 = arith.constant 1.000000e+00 : f32
    %200 = vector.broadcast %cst_87 : f32 to vector<65x65xf32>
    %201 = arith.maximumf %200, %199 : vector<65x65xf32>
    %202 = vector.broadcast %cst_88 : f32 to vector<65x65xf32>
    %203 = arith.minimumf %202, %201 : vector<65x65xf32>
    %c0_89 = arith.constant 0 : index
    %c0_90 = arith.constant 0 : index
    %c0_91 = arith.constant 0 : index
    %c0_92 = arith.constant 0 : index
    %204 = vector.load %arg6[%c0_89, %c0_90, %c0_91, %c0_92] : memref<1x8x65x65xf32, #tpu.memory_space<vmem>>, vector<1x1x65x65xf32>
    %205 = vector.shape_cast %204 : vector<1x1x65x65xf32> to vector<65x65xf32>
    %206 = vector.shape_cast %203 : vector<65x65xf32> to vector<1x1x65x65xf32>
    tpu.vector_store %arg6[%c0_89, %c0_90, %c0_91, %c0_92], %206 {strides = array<i32>} : memref<1x8x65x65xf32, #tpu.memory_space<vmem>>, vector<1x1x65x65xf32>,
    %c1_93 = arith.constant 1 : index
    %207 = memref.load %arg4[%c1_93] : memref<8xf32, #tpu.memory_space<smem>>
    %208 = vector.broadcast %207 : f32 to vector<65x65xf32>
    %209 = arith.addf %196#1, %208 : vector<65x65xf32>
    %cst_94 = arith.constant 0.000000e+00 : f32
    %cst_95 = arith.constant 1.000000e+00 : f32
    %210 = vector.broadcast %cst_94 : f32 to vector<65x65xf32>
    %211 = arith.maximumf %210, %209 : vector<65x65xf32>
    %212 = vector.broadcast %cst_95 : f32 to vector<65x65xf32>
    %213 = arith.minimumf %212, %211 : vector<65x65xf32>
    %c0_96 = arith.constant 0 : index
    %c1_97 = arith.constant 1 : index
    %c0_98 = arith.constant 0 : index
    %c0_99 = arith.constant 0 : index
    %214 = vector.load %arg6[%c0_96, %c1_97, %c0_98, %c0_99] : memref<1x8x65x65xf32, #tpu.memory_space<vmem>>, vector<1x1x65x65xf32>
    %215 = vector.shape_cast %214 : vector<1x1x65x65xf32> to vector<65x65xf32>
    %216 = vector.shape_cast %213 : vector<65x65xf32> to vector<1x1x65x65xf32>
    tpu.vector_store %arg6[%c0_96, %c1_97, %c0_98, %c0_99], %216 {strides = array<i32>} : memref<1x8x65x65xf32, #tpu.memory_space<vmem>>, vector<1x1x65x65xf32>,
    %c2_100 = arith.constant 2 : index
    %217 = memref.load %arg4[%c2_100] : memref<8xf32, #tpu.memory_space<smem>>
    %218 = vector.broadcast %217 : f32 to vector<65x65xf32>
    %219 = arith.addf %196#2, %218 : vector<65x65xf32>
    %cst_101 = arith.constant 0.000000e+00 : f32
    %cst_102 = arith.constant 1.000000e+00 : f32
    %220 = vector.broadcast %cst_101 : f32 to vector<65x65xf32>
    %221 = arith.maximumf %220, %219 : vector<65x65xf32>
    %222 = vector.broadcast %cst_102 : f32 to vector<65x65xf32>
    %223 = arith.minimumf %222, %221 : vector<65x65xf32>
    %c0_103 = arith.constant 0 : index
    %c2_104 = arith.constant 2 : index
    %c0_105 = arith.constant 0 : index
    %c0_106 = arith.constant 0 : index
    %224 = vector.load %arg6[%c0_103, %c2_104, %c0_105, %c0_106] : memref<1x8x65x65xf32, #tpu.memory_space<vmem>>, vector<1x1x65x65xf32>
    %225 = vector.shape_cast %224 : vector<1x1x65x65xf32> to vector<65x65xf32>
    %226 = vector.shape_cast %223 : vector<65x65xf32> to vector<1x1x65x65xf32>
    tpu.vector_store %arg6[%c0_103, %c2_104, %c0_105, %c0_106], %226 {strides = array<i32>} : memref<1x8x65x65xf32, #tpu.memory_space<vmem>>, vector<1x1x65x65xf32>,
    %c3_107 = arith.constant 3 : index
    %227 = memref.load %arg4[%c3_107] : memref<8xf32, #tpu.memory_space<smem>>
    %228 = vector.broadcast %227 : f32 to vector<65x65xf32>
    %229 = arith.addf %196#3, %228 : vector<65x65xf32>
    %cst_108 = arith.constant 0.000000e+00 : f32
    %cst_109 = arith.constant 1.000000e+00 : f32
    %230 = vector.broadcast %cst_108 : f32 to vector<65x65xf32>
    %231 = arith.maximumf %230, %229 : vector<65x65xf32>
    %232 = vector.broadcast %cst_109 : f32 to vector<65x65xf32>
    %233 = arith.minimumf %232, %231 : vector<65x65xf32>
    %c0_110 = arith.constant 0 : index
    %c3_111 = arith.constant 3 : index
    %c0_112 = arith.constant 0 : index
    %c0_113 = arith.constant 0 : index
    %234 = vector.load %arg6[%c0_110, %c3_111, %c0_112, %c0_113] : memref<1x8x65x65xf32, #tpu.memory_space<vmem>>, vector<1x1x65x65xf32>
    %235 = vector.shape_cast %234 : vector<1x1x65x65xf32> to vector<65x65xf32>
    %236 = vector.shape_cast %233 : vector<65x65xf32> to vector<1x1x65x65xf32>
    tpu.vector_store %arg6[%c0_110, %c3_111, %c0_112, %c0_113], %236 {strides = array<i32>} : memref<1x8x65x65xf32, #tpu.memory_space<vmem>>, vector<1x1x65x65xf32>,
    %cst_114 = arith.constant 0.000000e+00 : f32
    %237 = vector.broadcast %cst_114 : f32 to vector<65x65xf32>
    %cst_115 = arith.constant 0.000000e+00 : f32
    %238 = vector.broadcast %cst_115 : f32 to vector<65x65xf32>
    %cst_116 = arith.constant 0.000000e+00 : f32
    %239 = vector.broadcast %cst_116 : f32 to vector<65x65xf32>
    %cst_117 = arith.constant 0.000000e+00 : f32
    %240 = vector.broadcast %cst_117 : f32 to vector<65x65xf32>
    %c0_i32_118 = arith.constant 0 : i32
    %c8_i32_119 = arith.constant 8 : i32
    %241 = arith.addi %c0_i32_118, %c8_i32_119 : i32
    %c1_i32_120 = arith.constant 1 : i32
    %242:4 = scf.for %arg9 = %c0_i32_118 to %241 step %c1_i32_120 iter_args(%arg10 = %237, %arg11 = %238, %arg12 = %239, %arg13 = %240) -> (vector<65x65xf32>, vector<65x65xf32>, vector<65x65xf32>, vector<65x65xf32>)  : i32 {
      %283 = arith.index_cast %arg9 : i32 to index
      %c0_150 = arith.constant 0 : index
      %c0_151 = arith.constant 0 : index
      %284 = vector.load %arg8[%283, %c0_150, %c0_151] : memref<8x72x128xf32, #tpu.memory_space<vmem>>, vector<1x65x65xf32>
      %285 = vector.shape_cast %284 : vector<1x65x65xf32> to vector<65x65xf32>
      %c32_i32 = arith.constant 32 : i32
      %286 = arith.addi %c32_i32, %arg9 : i32
      %c3_i32 = arith.constant 3 : i32
      %287 = arith.muli %286, %c3_i32 : i32
      %c0_i32_152 = arith.constant 0 : i32
      %288 = arith.addi %287, %c0_i32_152 : i32
      %c3_i32_153 = arith.constant 3 : i32
      %289 = arith.muli %288, %c3_i32_153 : i32
      %c0_i32_154 = arith.constant 0 : i32
      %290 = arith.addi %289, %c0_i32_154 : i32
      %291 = arith.index_cast %290 : i32 to index
      %292 = memref.load %arg3[%291] : memref<576xf32, #tpu.memory_space<smem>>
      %293 = vector.broadcast %292 : f32 to vector<65x65xf32>
      %294 = arith.mulf %293, %285 : vector<65x65xf32>
      %295 = arith.addf %arg10, %294 : vector<65x65xf32>
      %c40_i32 = arith.constant 40 : i32
      %296 = arith.addi %c40_i32, %arg9 : i32
      %c3_i32_155 = arith.constant 3 : i32
      %297 = arith.muli %296, %c3_i32_155 : i32
      %c0_i32_156 = arith.constant 0 : i32
      %298 = arith.addi %297, %c0_i32_156 : i32
      %c3_i32_157 = arith.constant 3 : i32
      %299 = arith.muli %298, %c3_i32_157 : i32
      %c0_i32_158 = arith.constant 0 : i32
      %300 = arith.addi %299, %c0_i32_158 : i32
      %301 = arith.index_cast %300 : i32 to index
      %302 = memref.load %arg3[%301] : memref<576xf32, #tpu.memory_space<smem>>
      %303 = vector.broadcast %302 : f32 to vector<65x65xf32>
      %304 = arith.mulf %303, %285 : vector<65x65xf32>
      %305 = arith.addf %arg11, %304 : vector<65x65xf32>
      %c48_i32 = arith.constant 48 : i32
      %306 = arith.addi %c48_i32, %arg9 : i32
      %c3_i32_159 = arith.constant 3 : i32
      %307 = arith.muli %306, %c3_i32_159 : i32
      %c0_i32_160 = arith.constant 0 : i32
      %308 = arith.addi %307, %c0_i32_160 : i32
      %c3_i32_161 = arith.constant 3 : i32
      %309 = arith.muli %308, %c3_i32_161 : i32
      %c0_i32_162 = arith.constant 0 : i32
      %310 = arith.addi %309, %c0_i32_162 : i32
      %311 = arith.index_cast %310 : i32 to index
      %312 = memref.load %arg3[%311] : memref<576xf32, #tpu.memory_space<smem>>
      %313 = vector.broadcast %312 : f32 to vector<65x65xf32>
      %314 = arith.mulf %313, %285 : vector<65x65xf32>
      %315 = arith.addf %arg12, %314 : vector<65x65xf32>
      %c56_i32 = arith.constant 56 : i32
      %316 = arith.addi %c56_i32, %arg9 : i32
      %c3_i32_163 = arith.constant 3 : i32
      %317 = arith.muli %316, %c3_i32_163 : i32
      %c0_i32_164 = arith.constant 0 : i32
      %318 = arith.addi %317, %c0_i32_164 : i32
      %c3_i32_165 = arith.constant 3 : i32
      %319 = arith.muli %318, %c3_i32_165 : i32
      %c0_i32_166 = arith.constant 0 : i32
      %320 = arith.addi %319, %c0_i32_166 : i32
      %321 = arith.index_cast %320 : i32 to index
      %322 = memref.load %arg3[%321] : memref<576xf32, #tpu.memory_space<smem>>
      %323 = vector.broadcast %322 : f32 to vector<65x65xf32>
      %324 = arith.mulf %323, %285 : vector<65x65xf32>
      %325 = arith.addf %arg13, %324 : vector<65x65xf32>
      %326 = arith.index_cast %arg9 : i32 to index
      %c0_167 = arith.constant 0 : index
      %c1_168 = arith.constant 1 : index
      %327 = vector.load %arg8[%326, %c0_167, %c1_168] : memref<8x72x128xf32, #tpu.memory_space<vmem>>, vector<1x65x65xf32>
      %328 = vector.shape_cast %327 : vector<1x65x65xf32> to vector<65x65xf32>
      %c32_i32_169 = arith.constant 32 : i32
      %329 = arith.addi %c32_i32_169, %arg9 : i32
      %c3_i32_170 = arith.constant 3 : i32
      %330 = arith.muli %329, %c3_i32_170 : i32
      %c0_i32_171 = arith.constant 0 : i32
      %331 = arith.addi %330, %c0_i32_171 : i32
      %c3_i32_172 = arith.constant 3 : i32
      %332 = arith.muli %331, %c3_i32_172 : i32
      %c1_i32_173 = arith.constant 1 : i32
      %333 = arith.addi %332, %c1_i32_173 : i32
      %334 = arith.index_cast %333 : i32 to index
      %335 = memref.load %arg3[%334] : memref<576xf32, #tpu.memory_space<smem>>
      %336 = vector.broadcast %335 : f32 to vector<65x65xf32>
      %337 = arith.mulf %336, %328 : vector<65x65xf32>
      %338 = arith.addf %295, %337 : vector<65x65xf32>
      %c40_i32_174 = arith.constant 40 : i32
      %339 = arith.addi %c40_i32_174, %arg9 : i32
      %c3_i32_175 = arith.constant 3 : i32
      %340 = arith.muli %339, %c3_i32_175 : i32
      %c0_i32_176 = arith.constant 0 : i32
      %341 = arith.addi %340, %c0_i32_176 : i32
      %c3_i32_177 = arith.constant 3 : i32
      %342 = arith.muli %341, %c3_i32_177 : i32
      %c1_i32_178 = arith.constant 1 : i32
      %343 = arith.addi %342, %c1_i32_178 : i32
      %344 = arith.index_cast %343 : i32 to index
      %345 = memref.load %arg3[%344] : memref<576xf32, #tpu.memory_space<smem>>
      %346 = vector.broadcast %345 : f32 to vector<65x65xf32>
      %347 = arith.mulf %346, %328 : vector<65x65xf32>
      %348 = arith.addf %305, %347 : vector<65x65xf32>
      %c48_i32_179 = arith.constant 48 : i32
      %349 = arith.addi %c48_i32_179, %arg9 : i32
      %c3_i32_180 = arith.constant 3 : i32
      %350 = arith.muli %349, %c3_i32_180 : i32
      %c0_i32_181 = arith.constant 0 : i32
      %351 = arith.addi %350, %c0_i32_181 : i32
      %c3_i32_182 = arith.constant 3 : i32
      %352 = arith.muli %351, %c3_i32_182 : i32
      %c1_i32_183 = arith.constant 1 : i32
      %353 = arith.addi %352, %c1_i32_183 : i32
      %354 = arith.index_cast %353 : i32 to index
      %355 = memref.load %arg3[%354] : memref<576xf32, #tpu.memory_space<smem>>
      %356 = vector.broadcast %355 : f32 to vector<65x65xf32>
      %357 = arith.mulf %356, %328 : vector<65x65xf32>
      %358 = arith.addf %315, %357 : vector<65x65xf32>
      %c56_i32_184 = arith.constant 56 : i32
      %359 = arith.addi %c56_i32_184, %arg9 : i32
      %c3_i32_185 = arith.constant 3 : i32
      %360 = arith.muli %359, %c3_i32_185 : i32
      %c0_i32_186 = arith.constant 0 : i32
      %361 = arith.addi %360, %c0_i32_186 : i32
      %c3_i32_187 = arith.constant 3 : i32
      %362 = arith.muli %361, %c3_i32_187 : i32
      %c1_i32_188 = arith.constant 1 : i32
      %363 = arith.addi %362, %c1_i32_188 : i32
      %364 = arith.index_cast %363 : i32 to index
      %365 = memref.load %arg3[%364] : memref<576xf32, #tpu.memory_space<smem>>
      %366 = vector.broadcast %365 : f32 to vector<65x65xf32>
      %367 = arith.mulf %366, %328 : vector<65x65xf32>
      %368 = arith.addf %325, %367 : vector<65x65xf32>
      %369 = arith.index_cast %arg9 : i32 to index
      %c0_189 = arith.constant 0 : index
      %c2_190 = arith.constant 2 : index
      %370 = vector.load %arg8[%369, %c0_189, %c2_190] : memref<8x72x128xf32, #tpu.memory_space<vmem>>, vector<1x65x65xf32>
      %371 = vector.shape_cast %370 : vector<1x65x65xf32> to vector<65x65xf32>
      %c32_i32_191 = arith.constant 32 : i32
      %372 = arith.addi %c32_i32_191, %arg9 : i32
      %c3_i32_192 = arith.constant 3 : i32
      %373 = arith.muli %372, %c3_i32_192 : i32
      %c0_i32_193 = arith.constant 0 : i32
      %374 = arith.addi %373, %c0_i32_193 : i32
      %c3_i32_194 = arith.constant 3 : i32
      %375 = arith.muli %374, %c3_i32_194 : i32
      %c2_i32 = arith.constant 2 : i32
      %376 = arith.addi %375, %c2_i32 : i32
      %377 = arith.index_cast %376 : i32 to index
      %378 = memref.load %arg3[%377] : memref<576xf32, #tpu.memory_space<smem>>
      %379 = vector.broadcast %378 : f32 to vector<65x65xf32>
      %380 = arith.mulf %379, %371 : vector<65x65xf32>
      %381 = arith.addf %338, %380 : vector<65x65xf32>
      %c40_i32_195 = arith.constant 40 : i32
      %382 = arith.addi %c40_i32_195, %arg9 : i32
      %c3_i32_196 = arith.constant 3 : i32
      %383 = arith.muli %382, %c3_i32_196 : i32
      %c0_i32_197 = arith.constant 0 : i32
      %384 = arith.addi %383, %c0_i32_197 : i32
      %c3_i32_198 = arith.constant 3 : i32
      %385 = arith.muli %384, %c3_i32_198 : i32
      %c2_i32_199 = arith.constant 2 : i32
      %386 = arith.addi %385, %c2_i32_199 : i32
      %387 = arith.index_cast %386 : i32 to index
      %388 = memref.load %arg3[%387] : memref<576xf32, #tpu.memory_space<smem>>
      %389 = vector.broadcast %388 : f32 to vector<65x65xf32>
      %390 = arith.mulf %389, %371 : vector<65x65xf32>
      %391 = arith.addf %348, %390 : vector<65x65xf32>
      %c48_i32_200 = arith.constant 48 : i32
      %392 = arith.addi %c48_i32_200, %arg9 : i32
      %c3_i32_201 = arith.constant 3 : i32
      %393 = arith.muli %392, %c3_i32_201 : i32
      %c0_i32_202 = arith.constant 0 : i32
      %394 = arith.addi %393, %c0_i32_202 : i32
      %c3_i32_203 = arith.constant 3 : i32
      %395 = arith.muli %394, %c3_i32_203 : i32
      %c2_i32_204 = arith.constant 2 : i32
      %396 = arith.addi %395, %c2_i32_204 : i32
      %397 = arith.index_cast %396 : i32 to index
      %398 = memref.load %arg3[%397] : memref<576xf32, #tpu.memory_space<smem>>
      %399 = vector.broadcast %398 : f32 to vector<65x65xf32>
      %400 = arith.mulf %399, %371 : vector<65x65xf32>
      %401 = arith.addf %358, %400 : vector<65x65xf32>
      %c56_i32_205 = arith.constant 56 : i32
      %402 = arith.addi %c56_i32_205, %arg9 : i32
      %c3_i32_206 = arith.constant 3 : i32
      %403 = arith.muli %402, %c3_i32_206 : i32
      %c0_i32_207 = arith.constant 0 : i32
      %404 = arith.addi %403, %c0_i32_207 : i32
      %c3_i32_208 = arith.constant 3 : i32
      %405 = arith.muli %404, %c3_i32_208 : i32
      %c2_i32_209 = arith.constant 2 : i32
      %406 = arith.addi %405, %c2_i32_209 : i32
      %407 = arith.index_cast %406 : i32 to index
      %408 = memref.load %arg3[%407] : memref<576xf32, #tpu.memory_space<smem>>
      %409 = vector.broadcast %408 : f32 to vector<65x65xf32>
      %410 = arith.mulf %409, %371 : vector<65x65xf32>
      %411 = arith.addf %368, %410 : vector<65x65xf32>
      %412 = arith.index_cast %arg9 : i32 to index
      %c1_210 = arith.constant 1 : index
      %c0_211 = arith.constant 0 : index
      %413 = vector.load %arg8[%412, %c1_210, %c0_211] : memref<8x72x128xf32, #tpu.memory_space<vmem>>, vector<1x65x65xf32>
      %414 = vector.shape_cast %413 : vector<1x65x65xf32> to vector<65x65xf32>
      %c32_i32_212 = arith.constant 32 : i32
      %415 = arith.addi %c32_i32_212, %arg9 : i32
      %c3_i32_213 = arith.constant 3 : i32
      %416 = arith.muli %415, %c3_i32_213 : i32
      %c1_i32_214 = arith.constant 1 : i32
      %417 = arith.addi %416, %c1_i32_214 : i32
      %c3_i32_215 = arith.constant 3 : i32
      %418 = arith.muli %417, %c3_i32_215 : i32
      %c0_i32_216 = arith.constant 0 : i32
      %419 = arith.addi %418, %c0_i32_216 : i32
      %420 = arith.index_cast %419 : i32 to index
      %421 = memref.load %arg3[%420] : memref<576xf32, #tpu.memory_space<smem>>
      %422 = vector.broadcast %421 : f32 to vector<65x65xf32>
      %423 = arith.mulf %422, %414 : vector<65x65xf32>
      %424 = arith.addf %381, %423 : vector<65x65xf32>
      %c40_i32_217 = arith.constant 40 : i32
      %425 = arith.addi %c40_i32_217, %arg9 : i32
      %c3_i32_218 = arith.constant 3 : i32
      %426 = arith.muli %425, %c3_i32_218 : i32
      %c1_i32_219 = arith.constant 1 : i32
      %427 = arith.addi %426, %c1_i32_219 : i32
      %c3_i32_220 = arith.constant 3 : i32
      %428 = arith.muli %427, %c3_i32_220 : i32
      %c0_i32_221 = arith.constant 0 : i32
      %429 = arith.addi %428, %c0_i32_221 : i32
      %430 = arith.index_cast %429 : i32 to index
      %431 = memref.load %arg3[%430] : memref<576xf32, #tpu.memory_space<smem>>
      %432 = vector.broadcast %431 : f32 to vector<65x65xf32>
      %433 = arith.mulf %432, %414 : vector<65x65xf32>
      %434 = arith.addf %391, %433 : vector<65x65xf32>
      %c48_i32_222 = arith.constant 48 : i32
      %435 = arith.addi %c48_i32_222, %arg9 : i32
      %c3_i32_223 = arith.constant 3 : i32
      %436 = arith.muli %435, %c3_i32_223 : i32
      %c1_i32_224 = arith.constant 1 : i32
      %437 = arith.addi %436, %c1_i32_224 : i32
      %c3_i32_225 = arith.constant 3 : i32
      %438 = arith.muli %437, %c3_i32_225 : i32
      %c0_i32_226 = arith.constant 0 : i32
      %439 = arith.addi %438, %c0_i32_226 : i32
      %440 = arith.index_cast %439 : i32 to index
      %441 = memref.load %arg3[%440] : memref<576xf32, #tpu.memory_space<smem>>
      %442 = vector.broadcast %441 : f32 to vector<65x65xf32>
      %443 = arith.mulf %442, %414 : vector<65x65xf32>
      %444 = arith.addf %401, %443 : vector<65x65xf32>
      %c56_i32_227 = arith.constant 56 : i32
      %445 = arith.addi %c56_i32_227, %arg9 : i32
      %c3_i32_228 = arith.constant 3 : i32
      %446 = arith.muli %445, %c3_i32_228 : i32
      %c1_i32_229 = arith.constant 1 : i32
      %447 = arith.addi %446, %c1_i32_229 : i32
      %c3_i32_230 = arith.constant 3 : i32
      %448 = arith.muli %447, %c3_i32_230 : i32
      %c0_i32_231 = arith.constant 0 : i32
      %449 = arith.addi %448, %c0_i32_231 : i32
      %450 = arith.index_cast %449 : i32 to index
      %451 = memref.load %arg3[%450] : memref<576xf32, #tpu.memory_space<smem>>
      %452 = vector.broadcast %451 : f32 to vector<65x65xf32>
      %453 = arith.mulf %452, %414 : vector<65x65xf32>
      %454 = arith.addf %411, %453 : vector<65x65xf32>
      %455 = arith.index_cast %arg9 : i32 to index
      %c1_232 = arith.constant 1 : index
      %c1_233 = arith.constant 1 : index
      %456 = vector.load %arg8[%455, %c1_232, %c1_233] : memref<8x72x128xf32, #tpu.memory_space<vmem>>, vector<1x65x65xf32>
      %457 = vector.shape_cast %456 : vector<1x65x65xf32> to vector<65x65xf32>
      %c32_i32_234 = arith.constant 32 : i32
      %458 = arith.addi %c32_i32_234, %arg9 : i32
      %c3_i32_235 = arith.constant 3 : i32
      %459 = arith.muli %458, %c3_i32_235 : i32
      %c1_i32_236 = arith.constant 1 : i32
      %460 = arith.addi %459, %c1_i32_236 : i32
      %c3_i32_237 = arith.constant 3 : i32
      %461 = arith.muli %460, %c3_i32_237 : i32
      %c1_i32_238 = arith.constant 1 : i32
      %462 = arith.addi %461, %c1_i32_238 : i32
      %463 = arith.index_cast %462 : i32 to index
      %464 = memref.load %arg3[%463] : memref<576xf32, #tpu.memory_space<smem>>
      %465 = vector.broadcast %464 : f32 to vector<65x65xf32>
      %466 = arith.mulf %465, %457 : vector<65x65xf32>
      %467 = arith.addf %424, %466 : vector<65x65xf32>
      %c40_i32_239 = arith.constant 40 : i32
      %468 = arith.addi %c40_i32_239, %arg9 : i32
      %c3_i32_240 = arith.constant 3 : i32
      %469 = arith.muli %468, %c3_i32_240 : i32
      %c1_i32_241 = arith.constant 1 : i32
      %470 = arith.addi %469, %c1_i32_241 : i32
      %c3_i32_242 = arith.constant 3 : i32
      %471 = arith.muli %470, %c3_i32_242 : i32
      %c1_i32_243 = arith.constant 1 : i32
      %472 = arith.addi %471, %c1_i32_243 : i32
      %473 = arith.index_cast %472 : i32 to index
      %474 = memref.load %arg3[%473] : memref<576xf32, #tpu.memory_space<smem>>
      %475 = vector.broadcast %474 : f32 to vector<65x65xf32>
      %476 = arith.mulf %475, %457 : vector<65x65xf32>
      %477 = arith.addf %434, %476 : vector<65x65xf32>
      %c48_i32_244 = arith.constant 48 : i32
      %478 = arith.addi %c48_i32_244, %arg9 : i32
      %c3_i32_245 = arith.constant 3 : i32
      %479 = arith.muli %478, %c3_i32_245 : i32
      %c1_i32_246 = arith.constant 1 : i32
      %480 = arith.addi %479, %c1_i32_246 : i32
      %c3_i32_247 = arith.constant 3 : i32
      %481 = arith.muli %480, %c3_i32_247 : i32
      %c1_i32_248 = arith.constant 1 : i32
      %482 = arith.addi %481, %c1_i32_248 : i32
      %483 = arith.index_cast %482 : i32 to index
      %484 = memref.load %arg3[%483] : memref<576xf32, #tpu.memory_space<smem>>
      %485 = vector.broadcast %484 : f32 to vector<65x65xf32>
      %486 = arith.mulf %485, %457 : vector<65x65xf32>
      %487 = arith.addf %444, %486 : vector<65x65xf32>
      %c56_i32_249 = arith.constant 56 : i32
      %488 = arith.addi %c56_i32_249, %arg9 : i32
      %c3_i32_250 = arith.constant 3 : i32
      %489 = arith.muli %488, %c3_i32_250 : i32
      %c1_i32_251 = arith.constant 1 : i32
      %490 = arith.addi %489, %c1_i32_251 : i32
      %c3_i32_252 = arith.constant 3 : i32
      %491 = arith.muli %490, %c3_i32_252 : i32
      %c1_i32_253 = arith.constant 1 : i32
      %492 = arith.addi %491, %c1_i32_253 : i32
      %493 = arith.index_cast %492 : i32 to index
      %494 = memref.load %arg3[%493] : memref<576xf32, #tpu.memory_space<smem>>
      %495 = vector.broadcast %494 : f32 to vector<65x65xf32>
      %496 = arith.mulf %495, %457 : vector<65x65xf32>
      %497 = arith.addf %454, %496 : vector<65x65xf32>
      %498 = arith.index_cast %arg9 : i32 to index
      %c1_254 = arith.constant 1 : index
      %c2_255 = arith.constant 2 : index
      %499 = vector.load %arg8[%498, %c1_254, %c2_255] : memref<8x72x128xf32, #tpu.memory_space<vmem>>, vector<1x65x65xf32>
      %500 = vector.shape_cast %499 : vector<1x65x65xf32> to vector<65x65xf32>
      %c32_i32_256 = arith.constant 32 : i32
      %501 = arith.addi %c32_i32_256, %arg9 : i32
      %c3_i32_257 = arith.constant 3 : i32
      %502 = arith.muli %501, %c3_i32_257 : i32
      %c1_i32_258 = arith.constant 1 : i32
      %503 = arith.addi %502, %c1_i32_258 : i32
      %c3_i32_259 = arith.constant 3 : i32
      %504 = arith.muli %503, %c3_i32_259 : i32
      %c2_i32_260 = arith.constant 2 : i32
      %505 = arith.addi %504, %c2_i32_260 : i32
      %506 = arith.index_cast %505 : i32 to index
      %507 = memref.load %arg3[%506] : memref<576xf32, #tpu.memory_space<smem>>
      %508 = vector.broadcast %507 : f32 to vector<65x65xf32>
      %509 = arith.mulf %508, %500 : vector<65x65xf32>
      %510 = arith.addf %467, %509 : vector<65x65xf32>
      %c40_i32_261 = arith.constant 40 : i32
      %511 = arith.addi %c40_i32_261, %arg9 : i32
      %c3_i32_262 = arith.constant 3 : i32
      %512 = arith.muli %511, %c3_i32_262 : i32
      %c1_i32_263 = arith.constant 1 : i32
      %513 = arith.addi %512, %c1_i32_263 : i32
      %c3_i32_264 = arith.constant 3 : i32
      %514 = arith.muli %513, %c3_i32_264 : i32
      %c2_i32_265 = arith.constant 2 : i32
      %515 = arith.addi %514, %c2_i32_265 : i32
      %516 = arith.index_cast %515 : i32 to index
      %517 = memref.load %arg3[%516] : memref<576xf32, #tpu.memory_space<smem>>
      %518 = vector.broadcast %517 : f32 to vector<65x65xf32>
      %519 = arith.mulf %518, %500 : vector<65x65xf32>
      %520 = arith.addf %477, %519 : vector<65x65xf32>
      %c48_i32_266 = arith.constant 48 : i32
      %521 = arith.addi %c48_i32_266, %arg9 : i32
      %c3_i32_267 = arith.constant 3 : i32
      %522 = arith.muli %521, %c3_i32_267 : i32
      %c1_i32_268 = arith.constant 1 : i32
      %523 = arith.addi %522, %c1_i32_268 : i32
      %c3_i32_269 = arith.constant 3 : i32
      %524 = arith.muli %523, %c3_i32_269 : i32
      %c2_i32_270 = arith.constant 2 : i32
      %525 = arith.addi %524, %c2_i32_270 : i32
      %526 = arith.index_cast %525 : i32 to index
      %527 = memref.load %arg3[%526] : memref<576xf32, #tpu.memory_space<smem>>
      %528 = vector.broadcast %527 : f32 to vector<65x65xf32>
      %529 = arith.mulf %528, %500 : vector<65x65xf32>
      %530 = arith.addf %487, %529 : vector<65x65xf32>
      %c56_i32_271 = arith.constant 56 : i32
      %531 = arith.addi %c56_i32_271, %arg9 : i32
      %c3_i32_272 = arith.constant 3 : i32
      %532 = arith.muli %531, %c3_i32_272 : i32
      %c1_i32_273 = arith.constant 1 : i32
      %533 = arith.addi %532, %c1_i32_273 : i32
      %c3_i32_274 = arith.constant 3 : i32
      %534 = arith.muli %533, %c3_i32_274 : i32
      %c2_i32_275 = arith.constant 2 : i32
      %535 = arith.addi %534, %c2_i32_275 : i32
      %536 = arith.index_cast %535 : i32 to index
      %537 = memref.load %arg3[%536] : memref<576xf32, #tpu.memory_space<smem>>
      %538 = vector.broadcast %537 : f32 to vector<65x65xf32>
      %539 = arith.mulf %538, %500 : vector<65x65xf32>
      %540 = arith.addf %497, %539 : vector<65x65xf32>
      %541 = arith.index_cast %arg9 : i32 to index
      %c2_276 = arith.constant 2 : index
      %c0_277 = arith.constant 0 : index
      %542 = vector.load %arg8[%541, %c2_276, %c0_277] : memref<8x72x128xf32, #tpu.memory_space<vmem>>, vector<1x65x65xf32>
      %543 = vector.shape_cast %542 : vector<1x65x65xf32> to vector<65x65xf32>
      %c32_i32_278 = arith.constant 32 : i32
      %544 = arith.addi %c32_i32_278, %arg9 : i32
      %c3_i32_279 = arith.constant 3 : i32
      %545 = arith.muli %544, %c3_i32_279 : i32
      %c2_i32_280 = arith.constant 2 : i32
      %546 = arith.addi %545, %c2_i32_280 : i32
      %c3_i32_281 = arith.constant 3 : i32
      %547 = arith.muli %546, %c3_i32_281 : i32
      %c0_i32_282 = arith.constant 0 : i32
      %548 = arith.addi %547, %c0_i32_282 : i32
      %549 = arith.index_cast %548 : i32 to index
      %550 = memref.load %arg3[%549] : memref<576xf32, #tpu.memory_space<smem>>
      %551 = vector.broadcast %550 : f32 to vector<65x65xf32>
      %552 = arith.mulf %551, %543 : vector<65x65xf32>
      %553 = arith.addf %510, %552 : vector<65x65xf32>
      %c40_i32_283 = arith.constant 40 : i32
      %554 = arith.addi %c40_i32_283, %arg9 : i32
      %c3_i32_284 = arith.constant 3 : i32
      %555 = arith.muli %554, %c3_i32_284 : i32
      %c2_i32_285 = arith.constant 2 : i32
      %556 = arith.addi %555, %c2_i32_285 : i32
      %c3_i32_286 = arith.constant 3 : i32
      %557 = arith.muli %556, %c3_i32_286 : i32
      %c0_i32_287 = arith.constant 0 : i32
      %558 = arith.addi %557, %c0_i32_287 : i32
      %559 = arith.index_cast %558 : i32 to index
      %560 = memref.load %arg3[%559] : memref<576xf32, #tpu.memory_space<smem>>
      %561 = vector.broadcast %560 : f32 to vector<65x65xf32>
      %562 = arith.mulf %561, %543 : vector<65x65xf32>
      %563 = arith.addf %520, %562 : vector<65x65xf32>
      %c48_i32_288 = arith.constant 48 : i32
      %564 = arith.addi %c48_i32_288, %arg9 : i32
      %c3_i32_289 = arith.constant 3 : i32
      %565 = arith.muli %564, %c3_i32_289 : i32
      %c2_i32_290 = arith.constant 2 : i32
      %566 = arith.addi %565, %c2_i32_290 : i32
      %c3_i32_291 = arith.constant 3 : i32
      %567 = arith.muli %566, %c3_i32_291 : i32
      %c0_i32_292 = arith.constant 0 : i32
      %568 = arith.addi %567, %c0_i32_292 : i32
      %569 = arith.index_cast %568 : i32 to index
      %570 = memref.load %arg3[%569] : memref<576xf32, #tpu.memory_space<smem>>
      %571 = vector.broadcast %570 : f32 to vector<65x65xf32>
      %572 = arith.mulf %571, %543 : vector<65x65xf32>
      %573 = arith.addf %530, %572 : vector<65x65xf32>
      %c56_i32_293 = arith.constant 56 : i32
      %574 = arith.addi %c56_i32_293, %arg9 : i32
      %c3_i32_294 = arith.constant 3 : i32
      %575 = arith.muli %574, %c3_i32_294 : i32
      %c2_i32_295 = arith.constant 2 : i32
      %576 = arith.addi %575, %c2_i32_295 : i32
      %c3_i32_296 = arith.constant 3 : i32
      %577 = arith.muli %576, %c3_i32_296 : i32
      %c0_i32_297 = arith.constant 0 : i32
      %578 = arith.addi %577, %c0_i32_297 : i32
      %579 = arith.index_cast %578 : i32 to index
      %580 = memref.load %arg3[%579] : memref<576xf32, #tpu.memory_space<smem>>
      %581 = vector.broadcast %580 : f32 to vector<65x65xf32>
      %582 = arith.mulf %581, %543 : vector<65x65xf32>
      %583 = arith.addf %540, %582 : vector<65x65xf32>
      %584 = arith.index_cast %arg9 : i32 to index
      %c2_298 = arith.constant 2 : index
      %c1_299 = arith.constant 1 : index
      %585 = vector.load %arg8[%584, %c2_298, %c1_299] : memref<8x72x128xf32, #tpu.memory_space<vmem>>, vector<1x65x65xf32>
      %586 = vector.shape_cast %585 : vector<1x65x65xf32> to vector<65x65xf32>
      %c32_i32_300 = arith.constant 32 : i32
      %587 = arith.addi %c32_i32_300, %arg9 : i32
      %c3_i32_301 = arith.constant 3 : i32
      %588 = arith.muli %587, %c3_i32_301 : i32
      %c2_i32_302 = arith.constant 2 : i32
      %589 = arith.addi %588, %c2_i32_302 : i32
      %c3_i32_303 = arith.constant 3 : i32
      %590 = arith.muli %589, %c3_i32_303 : i32
      %c1_i32_304 = arith.constant 1 : i32
      %591 = arith.addi %590, %c1_i32_304 : i32
      %592 = arith.index_cast %591 : i32 to index
      %593 = memref.load %arg3[%592] : memref<576xf32, #tpu.memory_space<smem>>
      %594 = vector.broadcast %593 : f32 to vector<65x65xf32>
      %595 = arith.mulf %594, %586 : vector<65x65xf32>
      %596 = arith.addf %553, %595 : vector<65x65xf32>
      %c40_i32_305 = arith.constant 40 : i32
      %597 = arith.addi %c40_i32_305, %arg9 : i32
      %c3_i32_306 = arith.constant 3 : i32
      %598 = arith.muli %597, %c3_i32_306 : i32
      %c2_i32_307 = arith.constant 2 : i32
      %599 = arith.addi %598, %c2_i32_307 : i32
      %c3_i32_308 = arith.constant 3 : i32
      %600 = arith.muli %599, %c3_i32_308 : i32
      %c1_i32_309 = arith.constant 1 : i32
      %601 = arith.addi %600, %c1_i32_309 : i32
      %602 = arith.index_cast %601 : i32 to index
      %603 = memref.load %arg3[%602] : memref<576xf32, #tpu.memory_space<smem>>
      %604 = vector.broadcast %603 : f32 to vector<65x65xf32>
      %605 = arith.mulf %604, %586 : vector<65x65xf32>
      %606 = arith.addf %563, %605 : vector<65x65xf32>
      %c48_i32_310 = arith.constant 48 : i32
      %607 = arith.addi %c48_i32_310, %arg9 : i32
      %c3_i32_311 = arith.constant 3 : i32
      %608 = arith.muli %607, %c3_i32_311 : i32
      %c2_i32_312 = arith.constant 2 : i32
      %609 = arith.addi %608, %c2_i32_312 : i32
      %c3_i32_313 = arith.constant 3 : i32
      %610 = arith.muli %609, %c3_i32_313 : i32
      %c1_i32_314 = arith.constant 1 : i32
      %611 = arith.addi %610, %c1_i32_314 : i32
      %612 = arith.index_cast %611 : i32 to index
      %613 = memref.load %arg3[%612] : memref<576xf32, #tpu.memory_space<smem>>
      %614 = vector.broadcast %613 : f32 to vector<65x65xf32>
      %615 = arith.mulf %614, %586 : vector<65x65xf32>
      %616 = arith.addf %573, %615 : vector<65x65xf32>
      %c56_i32_315 = arith.constant 56 : i32
      %617 = arith.addi %c56_i32_315, %arg9 : i32
      %c3_i32_316 = arith.constant 3 : i32
      %618 = arith.muli %617, %c3_i32_316 : i32
      %c2_i32_317 = arith.constant 2 : i32
      %619 = arith.addi %618, %c2_i32_317 : i32
      %c3_i32_318 = arith.constant 3 : i32
      %620 = arith.muli %619, %c3_i32_318 : i32
      %c1_i32_319 = arith.constant 1 : i32
      %621 = arith.addi %620, %c1_i32_319 : i32
      %622 = arith.index_cast %621 : i32 to index
      %623 = memref.load %arg3[%622] : memref<576xf32, #tpu.memory_space<smem>>
      %624 = vector.broadcast %623 : f32 to vector<65x65xf32>
      %625 = arith.mulf %624, %586 : vector<65x65xf32>
      %626 = arith.addf %583, %625 : vector<65x65xf32>
      %627 = arith.index_cast %arg9 : i32 to index
      %c2_320 = arith.constant 2 : index
      %c2_321 = arith.constant 2 : index
      %628 = vector.load %arg8[%627, %c2_320, %c2_321] : memref<8x72x128xf32, #tpu.memory_space<vmem>>, vector<1x65x65xf32>
      %629 = vector.shape_cast %628 : vector<1x65x65xf32> to vector<65x65xf32>
      %c32_i32_322 = arith.constant 32 : i32
      %630 = arith.addi %c32_i32_322, %arg9 : i32
      %c3_i32_323 = arith.constant 3 : i32
      %631 = arith.muli %630, %c3_i32_323 : i32
      %c2_i32_324 = arith.constant 2 : i32
      %632 = arith.addi %631, %c2_i32_324 : i32
      %c3_i32_325 = arith.constant 3 : i32
      %633 = arith.muli %632, %c3_i32_325 : i32
      %c2_i32_326 = arith.constant 2 : i32
      %634 = arith.addi %633, %c2_i32_326 : i32
      %635 = arith.index_cast %634 : i32 to index
      %636 = memref.load %arg3[%635] : memref<576xf32, #tpu.memory_space<smem>>
      %637 = vector.broadcast %636 : f32 to vector<65x65xf32>
      %638 = arith.mulf %637, %629 : vector<65x65xf32>
      %639 = arith.addf %596, %638 : vector<65x65xf32>
      %c40_i32_327 = arith.constant 40 : i32
      %640 = arith.addi %c40_i32_327, %arg9 : i32
      %c3_i32_328 = arith.constant 3 : i32
      %641 = arith.muli %640, %c3_i32_328 : i32
      %c2_i32_329 = arith.constant 2 : i32
      %642 = arith.addi %641, %c2_i32_329 : i32
      %c3_i32_330 = arith.constant 3 : i32
      %643 = arith.muli %642, %c3_i32_330 : i32
      %c2_i32_331 = arith.constant 2 : i32
      %644 = arith.addi %643, %c2_i32_331 : i32
      %645 = arith.index_cast %644 : i32 to index
      %646 = memref.load %arg3[%645] : memref<576xf32, #tpu.memory_space<smem>>
      %647 = vector.broadcast %646 : f32 to vector<65x65xf32>
      %648 = arith.mulf %647, %629 : vector<65x65xf32>
      %649 = arith.addf %606, %648 : vector<65x65xf32>
      %c48_i32_332 = arith.constant 48 : i32
      %650 = arith.addi %c48_i32_332, %arg9 : i32
      %c3_i32_333 = arith.constant 3 : i32
      %651 = arith.muli %650, %c3_i32_333 : i32
      %c2_i32_334 = arith.constant 2 : i32
      %652 = arith.addi %651, %c2_i32_334 : i32
      %c3_i32_335 = arith.constant 3 : i32
      %653 = arith.muli %652, %c3_i32_335 : i32
      %c2_i32_336 = arith.constant 2 : i32
      %654 = arith.addi %653, %c2_i32_336 : i32
      %655 = arith.index_cast %654 : i32 to index
      %656 = memref.load %arg3[%655] : memref<576xf32, #tpu.memory_space<smem>>
      %657 = vector.broadcast %656 : f32 to vector<65x65xf32>
      %658 = arith.mulf %657, %629 : vector<65x65xf32>
      %659 = arith.addf %616, %658 : vector<65x65xf32>
      %c56_i32_337 = arith.constant 56 : i32
      %660 = arith.addi %c56_i32_337, %arg9 : i32
      %c3_i32_338 = arith.constant 3 : i32
      %661 = arith.muli %660, %c3_i32_338 : i32
      %c2_i32_339 = arith.constant 2 : i32
      %662 = arith.addi %661, %c2_i32_339 : i32
      %c3_i32_340 = arith.constant 3 : i32
      %663 = arith.muli %662, %c3_i32_340 : i32
      %c2_i32_341 = arith.constant 2 : i32
      %664 = arith.addi %663, %c2_i32_341 : i32
      %665 = arith.index_cast %664 : i32 to index
      %666 = memref.load %arg3[%665] : memref<576xf32, #tpu.memory_space<smem>>
      %667 = vector.broadcast %666 : f32 to vector<65x65xf32>
      %668 = arith.mulf %667, %629 : vector<65x65xf32>
      %669 = arith.addf %626, %668 : vector<65x65xf32>
      scf.yield %639, %649, %659, %669 : vector<65x65xf32>, vector<65x65xf32>, vector<65x65xf32>, vector<65x65xf32>
    }
    %c8_i32_121 = arith.constant 8 : i32
    %c4_122 = arith.constant 4 : index
    %243 = memref.load %arg4[%c4_122] : memref<8xf32, #tpu.memory_space<smem>>
    %244 = vector.broadcast %243 : f32 to vector<65x65xf32>
    %245 = arith.addf %242#0, %244 : vector<65x65xf32>
    %cst_123 = arith.constant 0.000000e+00 : f32
    %cst_124 = arith.constant 1.000000e+00 : f32
    %246 = vector.broadcast %cst_123 : f32 to vector<65x65xf32>
    %247 = arith.maximumf %246, %245 : vector<65x65xf32>
    %248 = vector.broadcast %cst_124 : f32 to vector<65x65xf32>
    %249 = arith.minimumf %248, %247 : vector<65x65xf32>
    %c0_125 = arith.constant 0 : index
    %c4_126 = arith.constant 4 : index
    %c0_127 = arith.constant 0 : index
    %c0_128 = arith.constant 0 : index
    %250 = vector.load %arg6[%c0_125, %c4_126, %c0_127, %c0_128] : memref<1x8x65x65xf32, #tpu.memory_space<vmem>>, vector<1x1x65x65xf32>
    %251 = vector.shape_cast %250 : vector<1x1x65x65xf32> to vector<65x65xf32>
    %252 = vector.shape_cast %249 : vector<65x65xf32> to vector<1x1x65x65xf32>
    tpu.vector_store %arg6[%c0_125, %c4_126, %c0_127, %c0_128], %252 {strides = array<i32>} : memref<1x8x65x65xf32, #tpu.memory_space<vmem>>, vector<1x1x65x65xf32>,
    %c5_129 = arith.constant 5 : index
    %253 = memref.load %arg4[%c5_129] : memref<8xf32, #tpu.memory_space<smem>>
    %254 = vector.broadcast %253 : f32 to vector<65x65xf32>
    %255 = arith.addf %242#1, %254 : vector<65x65xf32>
    %cst_130 = arith.constant 0.000000e+00 : f32
    %cst_131 = arith.constant 1.000000e+00 : f32
    %256 = vector.broadcast %cst_130 : f32 to vector<65x65xf32>
    %257 = arith.maximumf %256, %255 : vector<65x65xf32>
    %258 = vector.broadcast %cst_131 : f32 to vector<65x65xf32>
    %259 = arith.minimumf %258, %257 : vector<65x65xf32>
    %c0_132 = arith.constant 0 : index
    %c5_133 = arith.constant 5 : index
    %c0_134 = arith.constant 0 : index
    %c0_135 = arith.constant 0 : index
    %260 = vector.load %arg6[%c0_132, %c5_133, %c0_134, %c0_135] : memref<1x8x65x65xf32, #tpu.memory_space<vmem>>, vector<1x1x65x65xf32>
    %261 = vector.shape_cast %260 : vector<1x1x65x65xf32> to vector<65x65xf32>
    %262 = vector.shape_cast %259 : vector<65x65xf32> to vector<1x1x65x65xf32>
    tpu.vector_store %arg6[%c0_132, %c5_133, %c0_134, %c0_135], %262 {strides = array<i32>} : memref<1x8x65x65xf32, #tpu.memory_space<vmem>>, vector<1x1x65x65xf32>,
    %c6_136 = arith.constant 6 : index
    %263 = memref.load %arg4[%c6_136] : memref<8xf32, #tpu.memory_space<smem>>
    %264 = vector.broadcast %263 : f32 to vector<65x65xf32>
    %265 = arith.addf %242#2, %264 : vector<65x65xf32>
    %cst_137 = arith.constant 0.000000e+00 : f32
    %cst_138 = arith.constant 1.000000e+00 : f32
    %266 = vector.broadcast %cst_137 : f32 to vector<65x65xf32>
    %267 = arith.maximumf %266, %265 : vector<65x65xf32>
    %268 = vector.broadcast %cst_138 : f32 to vector<65x65xf32>
    %269 = arith.minimumf %268, %267 : vector<65x65xf32>
    %c0_139 = arith.constant 0 : index
    %c6_140 = arith.constant 6 : index
    %c0_141 = arith.constant 0 : index
    %c0_142 = arith.constant 0 : index
    %270 = vector.load %arg6[%c0_139, %c6_140, %c0_141, %c0_142] : memref<1x8x65x65xf32, #tpu.memory_space<vmem>>, vector<1x1x65x65xf32>
    %271 = vector.shape_cast %270 : vector<1x1x65x65xf32> to vector<65x65xf32>
    %272 = vector.shape_cast %269 : vector<65x65xf32> to vector<1x1x65x65xf32>
    tpu.vector_store %arg6[%c0_139, %c6_140, %c0_141, %c0_142], %272 {strides = array<i32>} : memref<1x8x65x65xf32, #tpu.memory_space<vmem>>, vector<1x1x65x65xf32>,
    %c7_143 = arith.constant 7 : index
    %273 = memref.load %arg4[%c7_143] : memref<8xf32, #tpu.memory_space<smem>>
    %274 = vector.broadcast %273 : f32 to vector<65x65xf32>
    %275 = arith.addf %242#3, %274 : vector<65x65xf32>
    %cst_144 = arith.constant 0.000000e+00 : f32
    %cst_145 = arith.constant 1.000000e+00 : f32
    %276 = vector.broadcast %cst_144 : f32 to vector<65x65xf32>
    %277 = arith.maximumf %276, %275 : vector<65x65xf32>
    %278 = vector.broadcast %cst_145 : f32 to vector<65x65xf32>
    %279 = arith.minimumf %278, %277 : vector<65x65xf32>
    %c0_146 = arith.constant 0 : index
    %c7_147 = arith.constant 7 : index
    %c0_148 = arith.constant 0 : index
    %c0_149 = arith.constant 0 : index
    %280 = vector.load %arg6[%c0_146, %c7_147, %c0_148, %c0_149] : memref<1x8x65x65xf32, #tpu.memory_space<vmem>>, vector<1x1x65x65xf32>
    %281 = vector.shape_cast %280 : vector<1x1x65x65xf32> to vector<65x65xf32>
    %282 = vector.shape_cast %279 : vector<65x65xf32> to vector<1x1x65x65xf32>
    tpu.vector_store %arg6[%c0_146, %c7_147, %c0_148, %c0_149], %282 {strides = array<i32>} : memref<1x8x65x65xf32, #tpu.memory_space<vmem>>, vector<1x1x65x65xf32>,
    return
  }
  func.func @transform_0(%arg0: i32) -> i32 {
    %c0_i32 = arith.constant 0 : i32
    %c0_i32_0 = arith.constant 0 : i32
    return %c0_i32 : i32
  }
  func.func @transform_1(%arg0: i32) -> i32 {
    %c0_i32 = arith.constant 0 : i32
    %c0_i32_0 = arith.constant 0 : i32
    return %c0_i32 : i32
  }
  func.func @transform_2(%arg0: i32) -> i32 {
    %c0_i32 = arith.constant 0 : i32
    %c0_i32_0 = arith.constant 0 : i32
    return %c0_i32 : i32
  }
  func.func @transform_3(%arg0: i32) -> i32 {
    %c0_i32 = arith.constant 0 : i32
    %c0_i32_0 = arith.constant 0 : i32
    return %c0_i32 : i32
  }
  func.func @transform_4(%arg0: i32) -> (i32, i32, i32, i32) {
    %c0_i32 = arith.constant 0 : i32
    %c0_i32_0 = arith.constant 0 : i32
    %c0_i32_1 = arith.constant 0 : i32
    %c0_i32_2 = arith.constant 0 : i32
    return %arg0, %c0_i32, %c0_i32_0, %c0_i32_1 : i32, i32, i32, i32
  }
  func.func @transform_5(%arg0: i32) -> (i32, i32, i32, i32) {
    %c0_i32 = arith.constant 0 : i32
    %c0_i32_0 = arith.constant 0 : i32
    %c0_i32_1 = arith.constant 0 : i32
    %c0_i32_2 = arith.constant 0 : i32
    return %arg0, %c0_i32, %c0_i32_0, %c0_i32_1 : i32, i32, i32, i32
  }
}

</mosaic_0001>

<bundles_post_ra>
// kernel: model_forward.1
= control target key start
LH: loop header
LB: loop body
LE: loop exit
PB: predicated region body
PF: predicated region fallthrough
CT: control target
= control target key end

     0   :  { %s12821_s0 = inlined_call_operand.vmem [shape: f32[24], index: 0, kind: input, shape index: {}]   ;;  %s12822_s1 = inlined_call_operand.vmem [shape: f32[8], index: 1, kind: input, shape index: {}]   ;;  %s12823_s2 = inlined_call_operand.vmem [shape: f32[576], index: 2, kind: input, shape index: {}]   ;;  %s12824_s3 = inlined_call_operand.vmem [shape: f32[8], index: 3, kind: input, shape index: {}]   ;;  %s12825_s4 = inlined_call_operand.vmem [shape: f32[2,3,65,65], index: 4, kind: input, shape index: {}]   ;;  %s12826_s5 = inlined_call_operand.vmem [shape: f32[2,8,65,65], index: 5, kind: output, shape index: {}]  }
   0x1   :  { %12874 = sst [smem:[#allocation367_spill]] %s12821_s0 }
   0x2   :  { %12875 = sst [smem:[#allocation368_spill]] %s12822_s1 }
   0x3   :  { %12876 = sst [smem:[#allocation369_spill]] %s12823_s2 }
   0x4   :  { %12877 = sst [smem:[#allocation370_spill]] %s12824_s3 }
   0x5   :  { %12878 = sst [smem:[#allocation371_spill]] %s12825_s4 }
   0x6   :  { %12879 = sst [smem:[#allocation372_spill]] %s12826_s5 }
   0x7   :  { %10 = vsyncpa [#allocation5], 0 }
   0x8   :  { %11 = vsyncpa [#allocation7], 0 }
   0x9   :  { %12 = vsyncpa [#allocation10], 0  ;;  %s6802_s18 = smov 0  }
   0xa LB: > { %12880 = sst [smem:[#allocation14_spill]] %s6464_s18  ;;  %s12881_s1 = sld [smem:[#allocation368_spill]]  ;;  %s6464_s18 = sphi %s6802_s18, %s18_s18  }
   0xb   : > { %s6811_s22 = sadd.s32 4294967295, %s6464_s18   ;;  %p5272_p0 = scmp.ge.s32.totalorder %s6464_s18, 1 }
   0xc   : > { %p159_p1 = scmp.lt.s32.totalorder %s6464_s18, 3  ;;  %p5436_p2 = scmp.eq.s32.totalorder %s6811_s22, 0 }
   0xd   : > { %s12883_s0 = sld [smem:[#allocation367_spill]]  ;;  %s12884_s2 = sld [smem:[#allocation369_spill]] }
   0xe   : > { %p6816_p3 = pnand %p5272_p0, %p159_p1  ;;  %s12886_s3 = sld [smem:[#allocation370_spill]] }
  0x10   : > { %s183_s21 = sshll.u32 %s12881_s1, 4  ;;  %p5423_p4 = pneg %p6816_p3  ;;  %s184_s21 = int_to_ptr.vmem [resolvable:$true] %s183_s21 }
  0x11   : > { %s6090_s9 = scalar_lea.vmem %s184_s21, 16  ;;  %p6098_p10 = scmp.lt.s32.totalorder %s184_s21, %s184_s21 }
  0x12   : > { %p6834_p5 = pnand %p5436_p2, %p5423_p4  ;;  %p6091_p6 = scmp.ne.s32.totalorder %s184_s21, %s6090_s9 }
  0x13   : > { %s172_s26 = sshll.u32 %s12883_s0, 4  ;;  %s194_s29 = sshll.u32 %s12884_s2, 4  ;;  %s6823_s26 = int_to_ptr.vmem [resolvable:$true] %s172_s26  ;;  %s6830_s29 = int_to_ptr.vmem [resolvable:$true] %s194_s29 }
  0x14   : > { %s205_s8 = sshll.u32 %s12886_s3, 4  ;;  %p6092_p7 = pneg %p6834_p5  ;;  %s6841_s8 = int_to_ptr.vmem [resolvable:$true] %s205_s8 }
  0x15   : > { %p6099_p11 = scmp.lt.s32.totalorder %s6090_s9, %s6090_s9 }
  0x16   : > { %p6093_p8 = pnand %p6092_p7, %p6091_p6 }
  0x17   : > { %p6100_p12 = por %p6099_p11, %p6098_p10 }
  0x18   : > { %p6094_p9 = pneg %p6093_p8 }
  0x1a   : > { %p6101_p13 = pnand %p6100_p12, %p6094_p9 }
  0x1c   : > { %6104 = shalt.err (!%p6101_p13)
}
  0x1d   : > { %s6762_s10 = smov [#allocation6]   ;;  %s6105_s11 = scalar_lea.vmem %s6823_s26, 16 }
  0x1e   : > { %5429 = dma.vmem_to_smem (!%p6834_p5), %s184_s21, 16, %s6762_s10, [#allocation7]  }
  0x1f   : > { %p6106_p0 = scmp.ne.s32.totalorder %s6823_s26, %s6105_s11  ;;  %p6113_p6 = scmp.lt.s32.totalorder %s6823_s26, %s6823_s26 }
  0x20   : > { %p6114_p8 = scmp.lt.s32.totalorder %s6105_s11, %s6105_s11 }
  0x21   : > { %p6108_p1 = pnand %p6106_p0, %p6092_p7 }
  0x22   : > { %p6115_p10 = por %p6114_p8, %p6113_p6 }
  0x23   : > { %p6109_p4 = pneg %p6108_p1 }
  0x25   : > { %p6116_p9 = pnand %p6115_p10, %p6109_p4 }
  0x27   : > { %6119 = shalt.err (!%p6116_p9)
}
  0x28   : > { %s6763_s12 = smov [#allocation4]   ;;  %s6120_s13 = scalar_lea.vmem %s6830_s29, 80 }
  0x29   : > { %5426 = dma.vmem_to_smem (!%p6834_p5), %s6823_s26, 16, %s6763_s12, [#allocation5]  }
  0x2a   : > { %p6121_p11 = scmp.ne.s32.totalorder %s6830_s29, %s6120_s13  ;;  %s6127_s14 = scalar_lea.vmem %s6830_s29, 128 }
  0x2b   : > { %p6128_p0 = scmp.lt.s32.totalorder %s6830_s29, %s6830_s29  ;;  %p6129_p1 = scmp.lt.s32.totalorder %s6127_s14, %s6120_s13 }
  0x2c   : > { %p6123_p12 = pnand %p6121_p11, %p6092_p7 }
  0x2d   : > { %p6130_p4 = por %p6129_p1, %p6128_p0 }
  0x2e   : > { %p6124_p13 = pneg %p6123_p12 }
  0x30   : > { %p6131_p6 = pnand %p6130_p4, %p6124_p13 }
  0x32   : > { %6134 = shalt.err (!%p6131_p6)
}
  0x33   : > { %s6764_s15 = smov [#allocation8]   ;;  %s6135_s16 = scalar_lea.vmem %s6841_s8, 16 }
  0x34   : > { %5432 = dma.vmem_to_smem (!%p6834_p5), %s6830_s29, 80, %s6764_s15, [#allocation7]  }
  0x35   : > { %p6136_p8 = scmp.ne.s32.totalorder %s6841_s8, %s6135_s16  ;;  %p6143_p11 = scmp.lt.s32.totalorder %s6841_s8, %s6841_s8 }
  0x36   : > { %p6144_p12 = scmp.lt.s32.totalorder %s6135_s16, %s6135_s16 }
  0x37   : > { %p6138_p10 = pnand %p6136_p8, %p6092_p7 }
  0x38   : > { %p6145_p13 = por %p6144_p12, %p6143_p11 }
  0x39   : > { %p6139_p9 = pneg %p6138_p10 }
  0x3b   : > { %p6146_p0 = pnand %p6145_p13, %p6139_p9 }
  0x3d   : > { %6149 = shalt.err (!%p6146_p0)
}
  0x3e   : > { %s6765_s17 = smov [#allocation9]   ;;  %226 = sbr.rel (%p6816_p3) target bundleno = 1561 (0x619), region = 40 }
  0x3f   : > { %5435 = dma.vmem_to_smem (!%p6834_p5), %s6841_s8, 16, %s6765_s17, [#allocation10]  }
  0x45   : > { %6451 = dma.done.wait (%p5436_p2), [#allocation5], 16  }
  0x46   : > { %6453 = vsyncadd (%p5436_p2), [#allocation5], 4294967280 }
  0x47   : > { %6455 = dma.done.wait (%p5436_p2), [#allocation7], 96  }
  0x48   : > { %6457 = vsyncadd (%p5436_p2), [#allocation7], 4294967200 }
  0x49   : > { %6459 = dma.done.wait (%p5436_p2), [#allocation10], 16  }
  0x4a   : > { %6461 = vsyncadd (%p5436_p2), [#allocation10], 4294967280 }
  0x4b   : > { %244 = sfence }
  0x4c   : > { %p267_p3 = scmp.lt.s32.totalorder %s6811_s22, 1  ;;  %v6766_v0 = vmov 0.0   ;;  %s12887_s4 = sld [smem:[#allocation371_spill]]  ;;  %vm349_vm0 = vcmask 539656   ;;  %vm358_vm1 = vcmask 532488  }
  0x4d   : > { %279 = vst [vmem:[#allocation2 + $0x10] sm:$0xff] %v6766_v0  ;;  %280 = vst [vmem:[#allocation2 + $0x18] sm:$0xff] %v6766_v0  ;;  %s12888_s5 = sld [smem:[#allocation372_spill]]  ;;  %s6963_s28 = sld [smem:[#allocation4]] }
  0x4e   : > { %277 = vst [vmem:[#allocation2] sm:$0xff] %v6766_v0  ;;  %278 = vst [vmem:[#allocation2 + $0x8] sm:$0xff] %v6766_v0  ;;  %s14102_s22 = smov (!%p267_p3, %s6811_s22), 1  ;;  %s6965_s29 = sld [smem:[#allocation4 + $0x3]] }
  0x4f   : > { %281 = vst [vmem:[#allocation2 + $0x20] sm:$0xff] %v6766_v0  ;;  %282 = vst [vmem:[#allocation2 + $0x28] sm:$0xff] %v6766_v0  ;;  %s5405_s19 = smul.u32 216, %s14102_s22  ;;  %s6967_s30 = sld [smem:[#allocation4 + $0x6]] }
  0x50   : > { %283 = vst [vmem:[#allocation2 + $0x30] sm:$0xff] %v6766_v0  ;;  %284 = vst [vmem:[#allocation2 + $0x38] sm:$0xff] %v6766_v0  ;;  %s5406_s20 = smul.u32 576, %s14102_s22  ;;  %s6767_s22 = smov 1  }
  0x51   : > { %285 = vst [vmem:[#allocation2 + $0x40] sm:$0xff] %v6766_v0  ;;  %286 = vst [vmem:[#allocation2 + $0x48] sm:$0xff] %v6766_v0  ;;  %s6969_s6 = sld [smem:[#allocation4 + $0x9]]  ;;  %s6971_s7 = sld [smem:[#allocation4 + $0xc]] }
  0x52   : > { %287 = vst [vmem:[#allocation2 + $0x50] sm:$0xff] %v6766_v0  ;;  %288 = vst [vmem:[#allocation2 + $0x58] sm:$0xff] %v6766_v0  ;;  %s6902_s24 = scalar_lea.vmem %s12887_s4, %s5405_s19  ;;  %s6973_s8 = sld [smem:[#allocation4 + $0xf]] }
  0x53   : > { %289 = vst [vmem:[#allocation2 + $0x60] sm:$0xff] %v6766_v0  ;;  %290 = vst [vmem:[#allocation2 + $0x68] sm:$0xff] %v6766_v0  ;;  %s6907_s27 = scalar_lea.vmem %s12888_s5, %s5406_s20  ;;  %v306_v1 = vld [vmem:[%s6902_s24 + $0x10] sm:$0xff]  ;;  %v304_v2 = vld [vmem:[%s6902_s24] sm:$0xff]  ;;  %s6975_s9 = sld [smem:[#allocation4 + $0x12]]  ;;  %v7030_v30 = vstv %s6963_s28 }
  0x54   : > { %291 = vst [vmem:[#allocation2 + $0x70] sm:$0xff] %v6766_v0  ;;  %292 = vst [vmem:[#allocation2 + $0x78] sm:$0xff] %v6766_v0  ;;  %12889 = sst [smem:[#allocation15_spill]] %s6907_s27  ;;  %326 = vrot.lane.b32.xlu1 %v306_v1, %s6767_s22  ;;  %322 = vrot.lane.b32.xlu0 %v304_v2, %s6767_s22  ;;  %v307_v3 = vld [vmem:[%s6902_s24 + $0x18] sm:$0xff]  ;;  %v305_v4 = vld [vmem:[%s6902_s24 + $0x8] sm:$0xff]  ;;  %s6977_s10 = sld [smem:[#allocation4 + $0x15]] }
  0x55   : > { %293 = vst [vmem:[#allocation2 + $0x80] sm:$0xff] %v6766_v0  ;;  %294 = vst [vmem:[#allocation2 + $0x88] sm:$0xff] %v6766_v0  ;;  %v309_v5 = vld [vmem:[%s6902_s24 + $0x28] sm:$0xff]  ;;  %v308_v6 = vld [vmem:[%s6902_s24 + $0x20] sm:$0xff]  ;;  %s6979_s11 = sld [smem:[#allocation4 + $0x1]]  ;;  %s6981_s12 = sld [smem:[#allocation4 + $0x4]]  ;;  %v7033_v31 = vstv %s6965_s29  ;;  %v7036_v32 = vstv %s6967_s30 }
  0x56   : > { %295 = vst [vmem:[#allocation2 + $0x90] sm:$0xff] %v6766_v0  ;;  %296 = vst [vmem:[#allocation2 + $0x98] sm:$0xff] %v6766_v0  ;;  %v311_v7 = vld [vmem:[%s6902_s24 + $0x38] sm:$0xff]  ;;  %v310_v8 = vld [vmem:[%s6902_s24 + $0x30] sm:$0xff]  ;;  %s6983_s13 = sld [smem:[#allocation4 + $0x7]]  ;;  %s6985_s14 = sld [smem:[#allocation4 + $0xa]] }
  0x57   : > { %297 = vst [vmem:[#allocation2 + $0xa0] sm:$0xff] %v6766_v0  ;;  %298 = vst [vmem:[#allocation2 + $0xa8] sm:$0xff] %v6766_v0  ;;  %v5285_v9 = vld [vmem:[%s6902_s24 + $0x48] sm:$0xff]  ;;  %v312_v10 = vld [vmem:[%s6902_s24 + $0x40] sm:$0x1]  ;;  %s6987_s15 = sld [smem:[#allocation4 + $0xd]]  ;;  %v7039_v33 = vstv %s6969_s6  ;;  %v7042_v34 = vstv %s6971_s7 }
  0x58   : > { %299 = vst [vmem:[#allocation2 + $0xb0] sm:$0xff] %v6766_v0  ;;  %300 = vst [vmem:[#allocation2 + $0xb8] sm:$0xff] %v6766_v0  ;;  %328 = vrot.lane.b32.xlu1 %v307_v3, %s6767_s22  ;;  %324 = vrot.lane.b32.xlu0 %v305_v4, %s6767_s22  ;;  %v5287_v11 = vld [vmem:[%s6902_s24 + $0x58] sm:$0xff]  ;;  %v5286_v12 = vld [vmem:[%s6902_s24 + $0x50] sm:$0xff]  ;;  %s6989_s16 = sld [smem:[#allocation4 + $0x10]]  ;;  %s6991_s17 = sld [smem:[#allocation4 + $0x13]] }
  0x59   : > { %301 = vst [vmem:[#allocation2 + $0xc0] sm:$0xff] %v6766_v0  ;;  %302 = vst [vmem:[#allocation2 + $0xc8] sm:$0xff] %v6766_v0  ;;  %v5289_v13 = vld [vmem:[%s6902_s24 + $0x68] sm:$0xff]  ;;  %v5288_v14 = vld [vmem:[%s6902_s24 + $0x60] sm:$0xff]  ;;  %s6993_s19 = sld [smem:[#allocation4 + $0x16]]  ;;  %s6995_s20 = sld [smem:[#allocation4 + $0x2]]  ;;  %v7045_v35 = vstv %s6973_s8  ;;  %v7048_v36 = vstv %s6975_s9 }
  0x5a   : > { %303 = vst [vmem:[#allocation2 + $0xd0] sm:$0xff] %v6766_v0  ;;  %v5291_v15 = vld [vmem:[%s6902_s24 + $0x78] sm:$0xff]  ;;  %v5290_v16 = vld [vmem:[%s6902_s24 + $0x70] sm:$0xff]  ;;  %v5293_v17 = vld [vmem:[%s6902_s24 + $0x88] sm:$0x1]  ;;  %s6997_s21 = sld [smem:[#allocation4 + $0x5]]  ;;  %v7051_v37 = vstv %s6977_s10 }
  0x5b   : > { %v5292_v18 = vld [vmem:[%s6902_s24 + $0x80] sm:$0xff]  ;;  %v5295_v19 = vld [vmem:[%s6902_s24 + $0x98] sm:$0xff]  ;;  %v5294_v20 = vld [vmem:[%s6902_s24 + $0x90] sm:$0xff]  ;;  %s6999_s23 = sld [smem:[#allocation4 + $0x8]]  ;;  %s7003_s25 = sld [smem:[#allocation4 + $0xe]]  ;;  %v7056_v40 = vstv %s6979_s11 }
  0x5c   : > { %332 = vrot.lane.b32.xlu1 %v309_v5, %s6767_s22  ;;  %330 = vrot.lane.b32.xlu0 %v308_v6, %s6767_s22  ;;  %v5297_v21 = vld [vmem:[%s6902_s24 + $0xa8] sm:$0xff]  ;;  %v5296_v22 = vld [vmem:[%s6902_s24 + $0xa0] sm:$0xff]  ;;  %s7005_s26 = sld [smem:[#allocation4 + $0x11]]  ;;  %s7009_s0 = sld [smem:[#allocation4 + $0x17]] }
  0x5d   : > { %v5299_v23 = vld [vmem:[%s6902_s24 + $0xb8] sm:$0xff]  ;;  %v5298_v24 = vld [vmem:[%s6902_s24 + $0xb0] sm:$0xff]  ;;  %v5301_v25 = vld [vmem:[%s6902_s24 + $0xc8] sm:$0xff]  ;;  %s7011_s1 = sld [smem:[#allocation6]]  ;;  %s7013_s2 = sld [smem:[#allocation6 + $0x1]]  ;;  %v7059_v41 = vstv %s6981_s12 }
  0x5e   : > { %v5300_v26 = vld [vmem:[%s6902_s24 + $0xc0] sm:$0xff]  ;;  %v5302_v27 = vld [vmem:[%s6902_s24 + $0xd0] sm:$0x1]  ;;  %s7001_s24 = sld [smem:[#allocation4 + $0xb]]  ;;  %s7015_s3 = sld [smem:[#allocation6 + $0x2]]  ;;  %v7062_v42 = vstv %s6983_s13  ;;  %v7065_v43 = vstv %s6985_s14 }
  0x5f   : > { %s7017_s4 = sld [smem:[#allocation6 + $0x3]]  ;;  %s7021_s5 = sld [smem:[#allocation6 + $0x4]]  ;;  %v7068_v44 = vstv %s6987_s15  ;;  %v7071_v45 = vstv %s6989_s16  ;;  %v7074_v46 = vstv %s6991_s17  ;;  %v7077_v47 = vstv %s6993_s19 }
  0x60   : > { %336 = vrot.lane.b32.xlu1 %v311_v7, %s6767_s22  ;;  %334 = vrot.lane.b32.xlu0 %v310_v8, %s6767_s22  ;;  %s7023_s18 = sld [smem:[#allocation6 + $0x5]]  ;;  %s7025_s27 = sld [smem:[#allocation6 + $0x6]]  ;;  %v7080_v48 = vstv %s6995_s20  ;;  %v7083_v49 = vstv %s6997_s21 }
  0x61   : > { %12892 = vst [vmem:[#allocation17_spill] sm:$0xff] %v7080_v48  ;;  %12893 = vst [vmem:[#allocation18_spill] sm:$0xff] %v7083_v49  ;;  %v7086_v50 = vstv %s6999_s23  ;;  %v7092_v55 = vstv %s7003_s25 }
  0x62   : > { %12894 = vst [vmem:[#allocation19_spill] sm:$0xff] %v7086_v50  ;;  %12896 = vst [vmem:[#allocation21_spill] sm:$0xff] %v7092_v55  ;;  %v7095_v56 = vstv %s7005_s26  ;;  %v7101_v58 = vstv %s7009_s0  ;;  %s8022_s0 = smov 0  }
  0x63   : > { %12890 = sst [smem:[#allocation16_spill]] %s7013_s2  ;;  %s7027_s2 = sld [smem:[#allocation6 + $0x7]]  ;;  %12897 = vst [vmem:[#allocation22_spill] sm:$0xff] %v7095_v56  ;;  %12899 = vst [vmem:[#allocation24_spill] sm:$0xff] %v7101_v58  ;;  %v7106_v59 = vstv %s7011_s1 }
  0x64   : > { %379 = vrot.lane.b32.xlu1 %v5285_v9, %s6767_s22  ;;  %338 = vrot.lane.b32.xlu0 %v312_v10, %s6767_s22  ;;  %s12891_s28 = sld [smem:[#allocation16_spill]]  ;;  %v7089_v51 = vstv %s7001_s24  ;;  %12900 = vst [vmem:[#allocation25_spill] sm:$0xff] %v7106_v59  ;;  %v7112_v61 = vstv %s7015_s3 }
  0x65   : > { %12895 = vst [vmem:[#allocation20_spill] sm:$0xff] %v7089_v51  ;;  %12902 = vst [vmem:[#allocation27_spill] sm:$0xff] %v7112_v61  ;;  %v7115_v62 = vstv %s7017_s4  ;;  %v7118_v63 = vstv %s7021_s5 }
  0x66   : > { %12903 = vst [vmem:[#allocation28_spill] sm:$0xff] %v7115_v62  ;;  %12904 = vst [vmem:[#allocation29_spill] sm:$0xff] %v7118_v63  ;;  %v7121_v0 = vstv %s7023_s18  ;;  %v7124_v1 = vstv %s7025_s27 }
  0x67   : > { %12905 = vst [vmem:[#allocation30_spill] sm:$0xff] %v7121_v0  ;;  %12906 = vst [vmem:[#allocation31_spill] sm:$0xff] %v7124_v1 }
  0x68   : > { %383 = vrot.lane.b32.xlu1 %v5287_v11, %s6767_s22  ;;  %381 = vrot.lane.b32.xlu0 %v5286_v12, %s6767_s22 }
  0x69   : > { %v7127_v2 = vstv %s7027_s2 }
  0x6a   : > { %v7109_v60 = vstv %s12891_s28  ;;  %12907 = vst [vmem:[#allocation32_spill] sm:$0xff] %v7127_v2 }
  0x6b   : > { %12901 = vst [vmem:[#allocation26_spill] sm:$0xff] %v7109_v60 }
  0x6c   : > { %387 = vrot.lane.b32.xlu1 %v5289_v13, %s6767_s22  ;;  %385 = vrot.lane.b32.xlu0 %v5288_v14, %s6767_s22 }
  0x70   : > { %391 = vrot.lane.b32.xlu1 %v5291_v15, %s6767_s22  ;;  %389 = vrot.lane.b32.xlu0 %v5290_v16, %s6767_s22 }
  0x74   : > { %395 = vrot.lane.b32.xlu1 %v5293_v17, %s6767_s22  ;;  %393 = vrot.lane.b32.xlu0 %v5292_v18, %s6767_s22 }
  0x78   : > { %437 = vrot.lane.b32.xlu1 %v5295_v19, %s6767_s22  ;;  %435 = vrot.lane.b32.xlu0 %v5294_v20, %s6767_s22 }
  0x7c   : > { %441 = vrot.lane.b32.xlu1 %v5297_v21, %s6767_s22  ;;  %439 = vrot.lane.b32.xlu0 %v5296_v22, %s6767_s22 }
  0x80   : > { %445 = vrot.lane.b32.xlu1 %v5299_v23, %s6767_s22  ;;  %443 = vrot.lane.b32.xlu0 %v5298_v24, %s6767_s22 }
  0x84   : > { %449 = vrot.lane.b32.xlu1 %v5301_v25, %s6767_s22  ;;  %447 = vrot.lane.b32.xlu0 %v5300_v26, %s6767_s22 }
  0x88   : > { %451 = vrot.lane.b32.xlu0 %v5302_v27, %s6767_s22  ;;  %s7007_s22 = sld [smem:[#allocation4 + $0x14]] }
  0x8e   : > { %v7098_v57 = vstv %s7007_s22 }
  0x8f   : > { %12898 = vst [vmem:[#allocation23_spill] sm:$0xff] %v7098_v57 }
  0xc6   : > { %v327_v28 = vpop.permute.xlu1 %326  ;;  %v323_v29 = vpop.permute.xlu0 %322 }
  0xc7   : > { %352 = vst.msk [vmem:[#allocation2 + $0x11] sm:$0xff] %vm349_vm0, %v327_v28  ;;  %350 = vst.msk [vmem:[#allocation2 + $0x1] sm:$0xff] %vm349_vm0, %v323_v29 }
  0xca   : > { %v329_v38 = vpop.permute.xlu1 %328  ;;  %v325_v39 = vpop.permute.xlu0 %324 }
  0xcb   : > { %353 = vst.msk [vmem:[#allocation2 + $0x19] sm:$0xff] %vm349_vm0, %v329_v38  ;;  %351 = vst.msk [vmem:[#allocation2 + $0x9] sm:$0xff] %vm349_vm0, %v325_v39 }
  0xce   : > { %v472_v52 = vld [vmem:[#allocation2] sm:$0xff]  ;;  %v333_v53 = vpop.permute.xlu1 %332  ;;  %v331_v54 = vpop.permute.xlu0 %330 }
  0xcf   : > { %355 = vst.msk [vmem:[#allocation2 + $0x29] sm:$0xff] %vm349_vm0, %v333_v53  ;;  %354 = vst.msk [vmem:[#allocation2 + $0x21] sm:$0xff] %vm349_vm0, %v331_v54  ;;  %v7130_v3 = vmul.f32 %v7030_v30, %v472_v52  ;;  %v7133_v4 = vmul.f32 %v7033_v31, %v472_v52  ;;  %v7136_v5 = vmul.f32 %v7036_v32, %v472_v52 }
  0xd0   : > { %v7139_v6 = vmul.f32 %v7039_v33, %v472_v52  ;;  %v7142_v7 = vmul.f32 %v7042_v34, %v472_v52  ;;  %v7145_v8 = vmul.f32 %v7045_v35, %v472_v52  ;;  %v7148_v9 = vmul.f32 %v7048_v36, %v472_v52 }
  0xd1   : > { %v7151_v10 = vmul.f32 %v7051_v37, %v472_v52 }
  0xd2   : > { %v475_v11 = vld [vmem:[#allocation2 + $0x18] sm:$0xff]  ;;  %v473_v12 = vld [vmem:[#allocation2 + $0x8] sm:$0xff]  ;;  %v474_v13 = vld [vmem:[#allocation2 + $0x10] sm:$0xff]  ;;  %v337_v14 = vpop.permute.xlu1 %336  ;;  %v335_v15 = vpop.permute.xlu0 %334 }
  0xd3   : > { %v7154_v16 = vmul.f32 %v7030_v30, %v475_v11  ;;  %v7157_v17 = vmul.f32 %v7033_v31, %v475_v11  ;;  %v7160_v18 = vmul.f32 %v7036_v32, %v475_v11  ;;  %v7163_v19 = vmul.f32 %v7039_v33, %v475_v11  ;;  %357 = vst.msk [vmem:[#allocation2 + $0x39] sm:$0xff] %vm349_vm0, %v337_v14 }
  0xd4   : > { %356 = vst.msk [vmem:[#allocation2 + $0x31] sm:$0xff] %vm349_vm0, %v335_v15  ;;  %v7168_v20 = vmul.f32 %v7042_v34, %v475_v11  ;;  %v7171_v21 = vmul.f32 %v7045_v35, %v475_v11  ;;  %v7174_v22 = vmul.f32 %v7048_v36, %v475_v11  ;;  %v7177_v23 = vmul.f32 %v7051_v37, %v475_v11 }
  0xd5   : > { %v7180_v24 = vmul.f32 %v7030_v30, %v473_v12  ;;  %v7183_v25 = vmul.f32 %v7030_v30, %v474_v13  ;;  %v7186_v26 = vmul.f32 %v7033_v31, %v473_v12  ;;  %v7189_v27 = vmul.f32 %v7033_v31, %v474_v13 }
  0xd6   : > { %12908 = vst [vmem:[#allocation33_spill] sm:$0xff] %v7168_v20  ;;  %12909 = vst [vmem:[#allocation34_spill] sm:$0xff] %v7171_v21  ;;  %v7192_v28 = vmul.f32 %v7036_v32, %v473_v12  ;;  %v7195_v29 = vmul.f32 %v7036_v32, %v474_v13  ;;  %v7198_v38 = vmul.f32 %v7039_v33, %v473_v12  ;;  %v476_v52 = vld [vmem:[#allocation2 + $0x20] sm:$0xff]  ;;  %v477_v53 = vld [vmem:[#allocation2 + $0x28] sm:$0xff]  ;;  %v380_v54 = vpop.permute.xlu1 %379  ;;  %v339_v11 = vpop.permute.xlu0 %338 }
  0xd7   : > { %12910 = vst [vmem:[#allocation35_spill] sm:$0xff] %v7174_v22  ;;  %12911 = vst [vmem:[#allocation36_spill] sm:$0xff] %v7177_v23  ;;  %v7201_v39 = vmul.f32 %v7039_v33, %v474_v13  ;;  %v7204_v14 = vmul.f32 %v7042_v34, %v473_v12  ;;  %v7207_v15 = vmul.f32 %v7042_v34, %v474_v13 }
  0xd8   : > { %v7210_v2 = vmul.f32 %v7045_v35, %v473_v12  ;;  %v7213_v1 = vmul.f32 %v7045_v35, %v474_v13  ;;  %407 = vst.msk [vmem:[#allocation2 + $0x49] sm:$0xff] %vm349_vm0, %v380_v54  ;;  %v7218_v0 = vmul.f32 %v7048_v36, %v473_v12  ;;  %v7221_v63 = vmul.f32 %v7048_v36, %v474_v13 }
  0xd9   : > { %359 = vst.msk [vmem:[#allocation2 + $0x41] sm:$0x1] %vm358_vm1, %v339_v11  ;;  %v7224_v58 = vmul.f32 %v7051_v37, %v473_v12  ;;  %v7227_v57 = vmul.f32 %v7051_v37, %v474_v13  ;;  %v7230_v56 = vmul.f32 %v7030_v30, %v476_v52  ;;  %v7233_v55 = vmul.f32 %v7030_v30, %v477_v53 }
  0xda   : > { %v7236_v54 = vmul.f32 %v7033_v31, %v476_v52  ;;  %v7239_v11 = vmul.f32 %v7033_v31, %v477_v53  ;;  %v7242_v62 = vmul.f32 %v7036_v32, %v476_v52  ;;  %v7245_v12 = vmul.f32 %v7036_v32, %v477_v53  ;;  %v384_v51 = vpop.permute.xlu1 %383  ;;  %v382_v50 = vpop.permute.xlu0 %381 }
  0xdb   : > { %12912 = vst [vmem:[#allocation37_spill] sm:$0xff] %v7233_v55  ;;  %v7248_v13 = vmul.f32 %v7039_v33, %v476_v52  ;;  %v7251_v61 = vmul.f32 %v7039_v33, %v477_v53  ;;  %v478_v60 = vld [vmem:[#allocation2 + $0x30] sm:$0xff]  ;;  %v479_v59 = vld [vmem:[#allocation2 + $0x38] sm:$0xff]  ;;  %v7254_v49 = vmul.f32 %v7042_v34, %v476_v52  ;;  %v7257_v48 = vmul.f32 %v7042_v34, %v477_v53 }
  0xdc   : > { %12913 = vst [vmem:[#allocation38_spill] sm:$0xff] %v7239_v11  ;;  %12914 = vst [vmem:[#allocation39_spill] sm:$0xff] %v7245_v12  ;;  %v7260_v11 = vmul.f32 %v7045_v35, %v476_v52  ;;  %v7263_v12 = vmul.f32 %v7045_v35, %v477_v53  ;;  %v7271_v55 = vmul.f32 %v7048_v36, %v477_v53 }
  0xdd   : > { %12915 = vst [vmem:[#allocation40_spill] sm:$0xff] %v7248_v13  ;;  %12916 = vst [vmem:[#allocation41_spill] sm:$0xff] %v7251_v61  ;;  %v7268_v61 = vmul.f32 %v7048_v36, %v476_v52  ;;  %v7274_v23 = vmul.f32 %v7051_v37, %v476_v52  ;;  %v7280_v22 = vmul.f32 %v7030_v30, %v478_v60 }
  0xde   : > { %12917 = vst [vmem:[#allocation42_spill] sm:$0xff] %v7254_v49  ;;  %12918 = vst [vmem:[#allocation43_spill] sm:$0xff] %v7257_v48  ;;  %v7277_v48 = vmul.f32 %v7051_v37, %v477_v53  ;;  %v7295_v52 = vmul.f32 %v7036_v32, %v479_v59  ;;  %v7298_v53 = vmul.f32 %v7039_v33, %v478_v60 }
  0xdf   : > { %12919 = vst [vmem:[#allocation44_spill] sm:$0xff] %v7260_v11  ;;  %12920 = vst [vmem:[#allocation45_spill] sm:$0xff] %v7263_v12  ;;  %v7283_v12 = vmul.f32 %v7030_v30, %v479_v59 }
  0xe0   : > { %409 = vst.msk [vmem:[#allocation2 + $0x59] sm:$0xff] %vm349_vm0, %v384_v51  ;;  %408 = vst.msk [vmem:[#allocation2 + $0x51] sm:$0xff] %vm349_vm0, %v382_v50  ;;  %v7286_v50 = vmul.f32 %v7033_v31, %v478_v60  ;;  %v7289_v51 = vmul.f32 %v7033_v31, %v479_v59 }
  0xe1   : > { %12921 = vst [vmem:[#allocation46_spill] sm:$0xff] %v7268_v61  ;;  %12922 = vst [vmem:[#allocation47_spill] sm:$0xff] %v7271_v55  ;;  %v7292_v55 = vmul.f32 %v7036_v32, %v478_v60 }
  0xe2   : > { %12923 = vst [vmem:[#allocation48_spill] sm:$0xff] %v7274_v23  ;;  %12924 = vst [vmem:[#allocation49_spill] sm:$0xff] %v7277_v48  ;;  %v7301_v48 = vmul.f32 %v7039_v33, %v479_v59  ;;  %v386_v23 = vpop.permute.xlu0 %385 }
  0xe3   : > { %12925 = vst [vmem:[#allocation50_spill] sm:$0xff] %v7280_v22  ;;  %12926 = vst [vmem:[#allocation51_spill] sm:$0xff] %v7283_v12  ;;  %v481_v22 = vld [vmem:[#allocation2 + $0x48] sm:$0xff]  ;;  %v388_v12 = vpop.permute.xlu1 %387 }
  0xe4   : > { %12927 = vst [vmem:[#allocation52_spill] sm:$0xff] %v7286_v50  ;;  %12928 = vst [vmem:[#allocation53_spill] sm:$0xff] %v7289_v51  ;;  %v7304_v50 = vmul.f32 %v7042_v34, %v478_v60  ;;  %v7307_v51 = vmul.f32 %v7042_v34, %v479_v59  ;;  %v871_v61 = vmul.f32 %v7068_v44, %v481_v22 }
  0xe5   : > { %12929 = vst [vmem:[#allocation54_spill] sm:$0xff] %v7292_v55  ;;  %12930 = vst [vmem:[#allocation55_spill] sm:$0xff] %v7295_v52  ;;  %v7310_v55 = vmul.f32 %v7045_v35, %v478_v60  ;;  %v7313_v52 = vmul.f32 %v7045_v35, %v479_v59 }
  0xe6   : > { %12931 = vst [vmem:[#allocation56_spill] sm:$0xff] %v7298_v53  ;;  %12932 = vst [vmem:[#allocation57_spill] sm:$0xff] %v7301_v48  ;;  %v7318_v48 = vmul.f32 %v7048_v36, %v478_v60  ;;  %v7321_v53 = vmul.f32 %v7048_v36, %v479_v59 }
  0xe7   : > { %12933 = vst [vmem:[#allocation58_spill] sm:$0xff] %v7304_v50  ;;  %12934 = vst [vmem:[#allocation59_spill] sm:$0xff] %v7307_v51  ;;  %v7324_v50 = vmul.f32 %v7051_v37, %v478_v60  ;;  %v7327_v51 = vmul.f32 %v7051_v37, %v479_v59  ;;  %v1141_v60 = vmul.f32 %v7077_v47, %v481_v22  ;;  %v392_v11 = vpop.permute.xlu1 %391  ;;  %v390_v59 = vpop.permute.xlu0 %389 }
  0xe8   : > { %12935 = vst [vmem:[#allocation60_spill] sm:$0xff] %v7310_v55  ;;  %12936 = vst [vmem:[#allocation61_spill] sm:$0xff] %v7313_v52  ;;  %v512_v55 = vmul.f32 %v7056_v40, %v481_v22  ;;  %v601_v52 = vmul.f32 %v7059_v41, %v481_v22 }
  0xe9   : > { %411 = vst.msk [vmem:[#allocation2 + $0x69] sm:$0xff] %vm349_vm0, %v388_v12  ;;  %410 = vst.msk [vmem:[#allocation2 + $0x61] sm:$0xff] %vm349_vm0, %v386_v23  ;;  %v691_v12 = vmul.f32 %v7062_v42, %v481_v22  ;;  %v781_v23 = vmul.f32 %v7065_v43, %v481_v22 }
  0xea   : > { %12937 = vst [vmem:[#allocation62_spill] sm:$0xff] %v7318_v48  ;;  %12938 = vst [vmem:[#allocation63_spill] sm:$0xff] %v7321_v53  ;;  %v961_v48 = vmul.f32 %v7071_v45, %v481_v22  ;;  %v1051_v53 = vmul.f32 %v7074_v46, %v481_v22  ;;  %v7341_v21 = vadd.f32 %v601_v52, %v7133_v4  ;;  %v482_v4 = vld [vmem:[#allocation2 + $0x50] sm:$0xff] }
  0xeb   : > { %12939 = vst [vmem:[#allocation64_spill] sm:$0xff] %v7324_v50  ;;  %12940 = vst [vmem:[#allocation65_spill] sm:$0xff] %v7327_v51  ;;  %v480_v50 = vld [vmem:[#allocation2 + $0x40] sm:$0xff]  ;;  %v7338_v51 = vadd.f32 %v512_v55, %v7130_v3  ;;  %v7344_v49 = vadd.f32 %v691_v12, %v7136_v5  ;;  %v7347_v20 = vadd.f32 %v781_v23, %v7139_v6  ;;  %v483_v5 = vld [vmem:[#allocation2 + $0x58] sm:$0xff] }
  0xec   : > { %413 = vst.msk [vmem:[#allocation2 + $0x79] sm:$0xff] %vm349_vm0, %v392_v11  ;;  %412 = vst.msk [vmem:[#allocation2 + $0x71] sm:$0xff] %vm349_vm0, %v390_v59  ;;  %v7352_v22 = vadd.f32 %v871_v61, %v7142_v7  ;;  %v7355_v13 = vadd.f32 %v961_v48, %v7145_v8  ;;  %v7358_v55 = vadd.f32 %v1051_v53, %v7148_v9 }
  0xed   : > { %v7361_v3 = vadd.f32 %v1141_v60, %v7151_v10  ;;  %v7364_v6 = vmul.f32 %v7030_v30, %v480_v50  ;;  %v7367_v11 = vmul.f32 %v7033_v31, %v480_v50  ;;  %v7370_v61 = vmul.f32 %v7036_v32, %v480_v50  ;;  %v396_v31 = vpop.permute.xlu1 %395  ;;  %v394_v10 = vpop.permute.xlu0 %393 }
  0xee   : > { %v7373_v48 = vmul.f32 %v7039_v33, %v480_v50  ;;  %v7376_v7 = vmul.f32 %v7042_v34, %v480_v50  ;;  %v7379_v8 = vmul.f32 %v7045_v35, %v480_v50  ;;  %v7382_v9 = vmul.f32 %v7048_v36, %v480_v50  ;;  %415 = vst.msk [vmem:[#allocation2 + $0x89] sm:$0x1] %vm358_vm1, %v396_v31 }
  0xef   : > { %v7385_v30 = vmul.f32 %v7051_v37, %v480_v50  ;;  %v513_v32 = vmul.f32 %v7056_v40, %v482_v4  ;;  %v514_v52 = vmul.f32 %v7056_v40, %v483_v5  ;;  %v602_v33 = vmul.f32 %v7059_v41, %v482_v4  ;;  %414 = vst.msk [vmem:[#allocation2 + $0x81] sm:$0xff] %vm349_vm0, %v394_v10 }
  0xf0   : > { %v603_v34 = vmul.f32 %v7059_v41, %v483_v5  ;;  %v692_v35 = vmul.f32 %v7062_v42, %v482_v4  ;;  %v693_v36 = vmul.f32 %v7062_v42, %v483_v5  ;;  %v782_v37 = vmul.f32 %v7065_v43, %v482_v4 }
  0xf1   : > { %v783_v50 = vmul.f32 %v7065_v43, %v483_v5  ;;  %v7398_v53 = vadd.f32 %v513_v32, %v7180_v24  ;;  %v7401_v12 = vadd.f32 %v514_v52, %v7183_v25  ;;  %v7404_v23 = vadd.f32 %v602_v33, %v7186_v26  ;;  %v438_v25 = vpop.permute.xlu1 %437  ;;  %v436_v32 = vpop.permute.xlu0 %435 }
  0xf2   : > { %v7407_v60 = vadd.f32 %v603_v34, %v7189_v27  ;;  %v7410_v59 = vadd.f32 %v692_v35, %v7192_v28  ;;  %v7413_v31 = vadd.f32 %v693_v36, %v7195_v29  ;;  %v7416_v10 = vadd.f32 %v782_v37, %v7198_v38  ;;  %464 = vst.msk [vmem:[#allocation2 + $0x99] sm:$0xff] %vm349_vm0, %v438_v25  ;;  %v484_v34 = vld [vmem:[#allocation2 + $0x60] sm:$0xff]  ;;  %v485_v35 = vld [vmem:[#allocation2 + $0x68] sm:$0xff] }
  0xf3   : > { %v7419_v24 = vadd.f32 %v783_v50, %v7201_v39  ;;  %v872_v26 = vmul.f32 %v7068_v44, %v482_v4  ;;  %v873_v52 = vmul.f32 %v7068_v44, %v483_v5  ;;  %v962_v27 = vmul.f32 %v7071_v45, %v482_v4  ;;  %463 = vst.msk [vmem:[#allocation2 + $0x91] sm:$0xff] %vm349_vm0, %v436_v32 }
  0xf4   : > { %v963_v28 = vmul.f32 %v7071_v45, %v483_v5  ;;  %v1052_v29 = vmul.f32 %v7074_v46, %v482_v4  ;;  %v1053_v38 = vmul.f32 %v7074_v46, %v483_v5  ;;  %v1142_v39 = vmul.f32 %v7077_v47, %v482_v4 }
  0xf5   : > { %v1143_v33 = vmul.f32 %v7077_v47, %v483_v5  ;;  %v7432_v36 = vadd.f32 %v872_v26, %v7204_v14  ;;  %v7435_v37 = vadd.f32 %v873_v52, %v7207_v15  ;;  %v7438_v50 = vadd.f32 %v962_v27, %v7210_v2  ;;  %v442_v15 = vpop.permute.xlu1 %441  ;;  %v440_v26 = vpop.permute.xlu0 %439 }
  0xf6   : > { %v7441_v25 = vadd.f32 %v963_v28, %v7213_v1  ;;  %v7444_v32 = vadd.f32 %v1052_v29, %v7218_v0  ;;  %v7447_v4 = vadd.f32 %v1053_v38, %v7221_v63  ;;  %v7450_v5 = vadd.f32 %v1142_v39, %v7224_v58  ;;  %466 = vst.msk [vmem:[#allocation2 + $0xa9] sm:$0xff] %vm349_vm0, %v442_v15 }
  0xf7   : > { %12941 = vst [vmem:[#allocation66_spill] sm:$0xff] %v7435_v37  ;;  %v7453_v14 = vadd.f32 %v1143_v33, %v7227_v57  ;;  %v515_v2 = vmul.f32 %v7056_v40, %v484_v34  ;;  %v516_v52 = vmul.f32 %v7056_v40, %v485_v35  ;;  %v604_v1 = vmul.f32 %v7059_v41, %v484_v34 }
  0xf8   : > { %12942 = vst [vmem:[#allocation67_spill] sm:$0xff] %v7441_v25  ;;  %12943 = vst [vmem:[#allocation68_spill] sm:$0xff] %v7447_v4  ;;  %v605_v0 = vmul.f32 %v7059_v41, %v485_v35  ;;  %v694_v58 = vmul.f32 %v7062_v42, %v484_v34  ;;  %v695_v63 = vmul.f32 %v7062_v42, %v485_v35 }
  0xf9   : > { %12944 = vst [vmem:[#allocation69_spill] sm:$0xff] %v7453_v14  ;;  %465 = vst.msk [vmem:[#allocation2 + $0xa1] sm:$0xff] %vm349_vm0, %v440_v26  ;;  %v784_v57 = vmul.f32 %v7065_v43, %v484_v34  ;;  %v785_v27 = vmul.f32 %v7065_v43, %v485_v35  ;;  %v7466_v28 = vadd.f32 %v515_v2, %v7154_v16  ;;  %v12948_v16 = vld [vmem:[#allocation40_spill] sm:$0xff]  ;;  %v12958_v14 = vld [vmem:[#allocation35_spill] sm:$0xff] }
  0xfa   : > { %v7469_v29 = vadd.f32 %v516_v52, %v7230_v56  ;;  %v7472_v38 = vadd.f32 %v604_v1, %v7157_v17  ;;  %v7475_v39 = vadd.f32 %v605_v0, %v7236_v54  ;;  %v7478_v33 = vadd.f32 %v694_v58, %v7160_v18  ;;  %v446_v56 = vpop.permute.xlu1 %445  ;;  %v444_v52 = vpop.permute.xlu0 %443 }
  0xfb   : > { %v7481_v15 = vadd.f32 %v695_v63, %v7242_v62  ;;  %v7484_v26 = vadd.f32 %v784_v57, %v7163_v19  ;;  %v7487_v2 = vadd.f32 %v785_v27, %v12948_v16  ;;  %v874_v17 = vmul.f32 %v7068_v44, %v484_v34  ;;  %468 = vst.msk [vmem:[#allocation2 + $0xb9] sm:$0xff] %vm349_vm0, %v446_v56  ;;  %v486_v63 = vld [vmem:[#allocation2 + $0x70] sm:$0xff]  ;;  %v487_v57 = vld [vmem:[#allocation2 + $0x78] sm:$0xff] }
  0xfc   : > { %12945 = vst [vmem:[#allocation70_spill] sm:$0xff] %v7469_v29  ;;  %12946 = vst [vmem:[#allocation71_spill] sm:$0xff] %v7475_v39  ;;  %v875_v1 = vmul.f32 %v7068_v44, %v485_v35  ;;  %v964_v54 = vmul.f32 %v7071_v45, %v484_v34  ;;  %v965_v18 = vmul.f32 %v7071_v45, %v485_v35  ;;  %v12950_v27 = vld [vmem:[#allocation33_spill] sm:$0xff]  ;;  %v12954_v39 = vld [vmem:[#allocation34_spill] sm:$0xff] }
  0xfd   : > { %12947 = vst [vmem:[#allocation72_spill] sm:$0xff] %v7481_v15  ;;  %12949 = vst [vmem:[#allocation40_spill] sm:$0xff] %v7487_v2  ;;  %v1054_v62 = vmul.f32 %v7074_v46, %v484_v34  ;;  %v1055_v19 = vmul.f32 %v7074_v46, %v485_v35  ;;  %v1144_v0 = vmul.f32 %v7077_v47, %v484_v34  ;;  %v12952_v2 = vld [vmem:[#allocation42_spill] sm:$0xff] }
  0xfe   : > { %467 = vst.msk [vmem:[#allocation2 + $0xb1] sm:$0xff] %vm349_vm0, %v444_v52  ;;  %v1145_v58 = vmul.f32 %v7077_v47, %v485_v35  ;;  %v7500_v16 = vadd.f32 %v874_v17, %v12950_v27  ;;  %v7503_v15 = vadd.f32 %v875_v1, %v12952_v2  ;;  %v7506_v56 = vadd.f32 %v964_v54, %v12954_v39  ;;  %v12956_v52 = vld [vmem:[#allocation44_spill] sm:$0xff]  ;;  %v12960_v34 = vld [vmem:[#allocation46_spill] sm:$0xff]  ;;  %v450_v2 = vpop.permute.xlu1 %449  ;;  %v448_v1 = vpop.permute.xlu0 %447 }
  0xff   : > { %v7509_v29 = vadd.f32 %v965_v18, %v12956_v52  ;;  %v7512_v4 = vadd.f32 %v1054_v62, %v12958_v14  ;;  %v7515_v25 = vadd.f32 %v1055_v19, %v12960_v34  ;;  %v12962_v35 = vld [vmem:[#allocation36_spill] sm:$0xff]  ;;  %v517_v39 = vmul.f32 %v7056_v40, %v486_v63  ;;  %470 = vst.msk [vmem:[#allocation2 + $0xc9] sm:$0xff] %vm349_vm0, %v450_v2  ;;  %v12966_v52 = vld [vmem:[#allocation37_spill] sm:$0xff] }
 0x100   : > { %12951 = vst [vmem:[#allocation33_spill] sm:$0xff] %v7500_v16  ;;  %12953 = vst [vmem:[#allocation42_spill] sm:$0xff] %v7503_v15  ;;  %v7518_v37 = vadd.f32 %v1144_v0, %v12962_v35  ;;  %v12964_v17 = vld [vmem:[#allocation48_spill] sm:$0xff]  ;;  %v518_v54 = vmul.f32 %v7056_v40, %v487_v57  ;;  %v606_v18 = vmul.f32 %v7059_v41, %v486_v63  ;;  %v12968_v35 = vld [vmem:[#allocation50_spill] sm:$0xff] }
 0x101   : > { %12955 = vst [vmem:[#allocation34_spill] sm:$0xff] %v7506_v56  ;;  %12957 = vst [vmem:[#allocation44_spill] sm:$0xff] %v7509_v29  ;;  %v7521_v27 = vadd.f32 %v1145_v58, %v12964_v17  ;;  %v607_v14 = vmul.f32 %v7059_v41, %v487_v57  ;;  %v696_v62 = vmul.f32 %v7062_v42, %v486_v63  ;;  %v12972_v2 = vld [vmem:[#allocation52_spill] sm:$0xff]  ;;  %v12978_v56 = vld [vmem:[#allocation41_spill] sm:$0xff] }
 0x102   : > { %12959 = vst [vmem:[#allocation35_spill] sm:$0xff] %v7512_v4  ;;  %12961 = vst [vmem:[#allocation46_spill] sm:$0xff] %v7515_v25  ;;  %v697_v19 = vmul.f32 %v7062_v42, %v487_v57  ;;  %v786_v0 = vmul.f32 %v7065_v43, %v486_v63  ;;  %v787_v58 = vmul.f32 %v7065_v43, %v487_v57 }
 0x103   : > { %12963 = vst [vmem:[#allocation36_spill] sm:$0xff] %v7518_v37  ;;  %12965 = vst [vmem:[#allocation48_spill] sm:$0xff] %v7521_v27  ;;  %v7534_v34 = vadd.f32 %v517_v39, %v12966_v52  ;;  %v7537_v17 = vadd.f32 %v518_v54, %v12968_v35  ;;  %v12970_v27 = vld [vmem:[#allocation38_spill] sm:$0xff]  ;;  %v7543_v29 = vadd.f32 %v607_v14, %v12972_v2  ;;  %v12980_v39 = vld [vmem:[#allocation56_spill] sm:$0xff]  ;;  %v452_v54 = vpop.permute.xlu0 %451 }
 0x104   : > { %469 = vst.msk [vmem:[#allocation2 + $0xc1] sm:$0xff] %vm349_vm0, %v448_v1  ;;  %v7540_v25 = vadd.f32 %v606_v18, %v12970_v27  ;;  %v12974_v1 = vld [vmem:[#allocation39_spill] sm:$0xff]  ;;  %v12976_v37 = vld [vmem:[#allocation54_spill] sm:$0xff]  ;;  %v7552_v16 = vadd.f32 %v786_v0, %v12978_v56  ;;  %v7555_v52 = vadd.f32 %v787_v58, %v12980_v39  ;;  %v876_v35 = vmul.f32 %v7068_v44, %v486_v63 }
 0x105   : > { %12967 = vst [vmem:[#allocation37_spill] sm:$0xff] %v7534_v34  ;;  %12969 = vst [vmem:[#allocation50_spill] sm:$0xff] %v7537_v17  ;;  %v7546_v15 = vadd.f32 %v696_v62, %v12974_v1  ;;  %v7549_v4 = vadd.f32 %v697_v19, %v12976_v37  ;;  %v877_v27 = vmul.f32 %v7068_v44, %v487_v57  ;;  %v488_v0 = vld [vmem:[#allocation2 + $0x80] sm:$0xff]  ;;  %v489_v58 = vld [vmem:[#allocation2 + $0x88] sm:$0xff] }
 0x106   : > { %12971 = vst [vmem:[#allocation38_spill] sm:$0xff] %v7540_v25  ;;  %12973 = vst [vmem:[#allocation52_spill] sm:$0xff] %v7543_v29  ;;  %v966_v18 = vmul.f32 %v7071_v45, %v486_v63  ;;  %v967_v14 = vmul.f32 %v7071_v45, %v487_v57  ;;  %v1056_v37 = vmul.f32 %v7074_v46, %v486_v63  ;;  %v12982_v2 = vld [vmem:[#allocation43_spill] sm:$0xff]  ;;  %v12983_v39 = vld [vmem:[#allocation58_spill] sm:$0xff] }
 0x107   : > { %12975 = vst [vmem:[#allocation39_spill] sm:$0xff] %v7546_v15  ;;  %12977 = vst [vmem:[#allocation54_spill] sm:$0xff] %v7549_v4  ;;  %v1057_v62 = vmul.f32 %v7074_v46, %v487_v57  ;;  %v1146_v56 = vmul.f32 %v7077_v47, %v486_v63  ;;  %v1147_v19 = vmul.f32 %v7077_v47, %v487_v57  ;;  %v12984_v4 = vld [vmem:[#allocation45_spill] sm:$0xff]  ;;  %v12987_v63 = vld [vmem:[#allocation62_spill] sm:$0xff] }
 0x108   : > { %12979 = vst [vmem:[#allocation41_spill] sm:$0xff] %v7552_v16  ;;  %12981 = vst [vmem:[#allocation56_spill] sm:$0xff] %v7555_v52  ;;  %v7567_v1 = vadd.f32 %v876_v35, %v12982_v2  ;;  %v7570_v52 = vadd.f32 %v877_v27, %v12983_v39  ;;  %v7573_v29 = vadd.f32 %v966_v18, %v12984_v4  ;;  %v12986_v16 = vld [vmem:[#allocation47_spill] sm:$0xff]  ;;  %v12989_v57 = vld [vmem:[#allocation49_spill] sm:$0xff] }
 0x109   : > { %471 = vst.msk [vmem:[#allocation2 + $0xd1] sm:$0x1] %vm358_vm1, %v452_v54  ;;  %v12985_v54 = vld [vmem:[#allocation60_spill] sm:$0xff]  ;;  %v7579_v15 = vadd.f32 %v1056_v37, %v12986_v16  ;;  %v7582_v25 = vadd.f32 %v1057_v62, %v12987_v63  ;;  %v7585_v34 = vadd.f32 %v1146_v56, %v12989_v57  ;;  %v519_v27 = vmul.f32 %v7056_v40, %v488_v0  ;;  %v12992_v39 = vld [vmem:[#allocation51_spill] sm:$0xff]  ;;  %v12994_v63 = vld [vmem:[#allocation53_spill] sm:$0xff] }
 0x10a   : > { %v7576_v17 = vadd.f32 %v967_v14, %v12985_v54  ;;  %v12990_v35 = vld [vmem:[#allocation64_spill] sm:$0xff]  ;;  %v520_v4 = vmul.f32 %v7056_v40, %v489_v58  ;;  %v608_v18 = vmul.f32 %v7059_v41, %v488_v0  ;;  %v609_v14 = vmul.f32 %v7059_v41, %v489_v58  ;;  %v12996_v41 = vld [vmem:[#allocation55_spill] sm:$0xff] }
 0x10b   : > { %12988 = vst [vmem:[#allocation43_spill] sm:$0xff] %v7582_v25  ;;  %v7588_v2 = vadd.f32 %v1147_v19, %v12990_v35  ;;  %v698_v16 = vmul.f32 %v7062_v42, %v488_v0  ;;  %v699_v37 = vmul.f32 %v7062_v42, %v489_v58  ;;  %v788_v62 = vmul.f32 %v7065_v43, %v488_v0 }
 0x10c   : > { %v789_v56 = vmul.f32 %v7065_v43, %v489_v58  ;;  %v7599_v54 = vadd.f32 %v519_v27, %v12992_v39  ;;  %v7602_v19 = vadd.f32 %v520_v4, %v7364_v6  ;;  %v7605_v40 = vadd.f32 %v608_v18, %v12994_v63  ;;  %v13002_v39 = vld [vmem:[#allocation61_spill] sm:$0xff] }
 0x10d   : > { %12991 = vst [vmem:[#allocation58_spill] sm:$0xff] %v7588_v2  ;;  %v7608_v57 = vadd.f32 %v609_v14, %v7367_v11  ;;  %v7611_v35 = vadd.f32 %v698_v16, %v12996_v41  ;;  %v7614_v42 = vadd.f32 %v699_v37, %v7370_v61  ;;  %v12998_v2 = vld [vmem:[#allocation57_spill] sm:$0xff]  ;;  %v878_v6 = vmul.f32 %v7068_v44, %v488_v0  ;;  %v7630_v37 = vld [vmem:[#allocation2 + $0x90] sm:$0xff] }
 0x10e   : > { %12993 = vst [vmem:[#allocation45_spill] sm:$0xff] %v7602_v19  ;;  %v7617_v43 = vadd.f32 %v788_v62, %v12998_v2  ;;  %v7620_v27 = vadd.f32 %v789_v56, %v7373_v48  ;;  %v879_v4 = vmul.f32 %v7068_v44, %v489_v58  ;;  %v968_v18 = vmul.f32 %v7071_v45, %v488_v0  ;;  %v7632_v48 = vld [vmem:[#allocation2 + $0x98] sm:$0xff]  ;;  %v13000_v62 = vld [vmem:[#allocation59_spill] sm:$0xff] }
 0x10f   : > { %12995 = vst [vmem:[#allocation60_spill] sm:$0xff] %v7608_v57  ;;  %12997 = vst [vmem:[#allocation47_spill] sm:$0xff] %v7614_v42  ;;  %v969_v11 = vmul.f32 %v7071_v45, %v489_v58  ;;  %v1058_v14 = vmul.f32 %v7074_v46, %v488_v0  ;;  %v1059_v16 = vmul.f32 %v7074_v46, %v489_v58  ;;  %v13004_v46 = vld [vmem:[#allocation63_spill] sm:$0xff]  ;;  %v13014_v42 = vld [vmem:[#allocation25_spill] sm:$0xff] }
 0x110   : > { %12999 = vst [vmem:[#allocation62_spill] sm:$0xff] %v7620_v27  ;;  %v1148_v61 = vmul.f32 %v7077_v47, %v488_v0  ;;  %v1149_v2 = vmul.f32 %v7077_v47, %v489_v58  ;;  %v7635_v56 = vadd.f32 %v878_v6, %v13000_v62  ;;  %v7638_v44 = vadd.f32 %v879_v4, %v7376_v7  ;;  %v13007_v58 = vld [vmem:[#allocation65_spill] sm:$0xff] }
 0x111   : > { %v7641_v45 = vadd.f32 %v968_v18, %v13002_v39  ;;  %v7644_v63 = vadd.f32 %v969_v11, %v7379_v8  ;;  %v7647_v0 = vadd.f32 %v1058_v14, %v13004_v46  ;;  %v7650_v47 = vadd.f32 %v1059_v16, %v7382_v9  ;;  %v13010_v7 = vld [vmem:[#allocation17_spill] sm:$0xff]  ;;  %v13011_v8 = vld [vmem:[#allocation18_spill] sm:$0xff]  ;;  %v13012_v9 = vld [vmem:[#allocation19_spill] sm:$0xff] }
 0x112   : > { %13001 = vst [vmem:[#allocation49_spill] sm:$0xff] %v7638_v44  ;;  %v7653_v41 = vadd.f32 %v1148_v61, %v13007_v58  ;;  %v7656_v6 = vadd.f32 %v1149_v2, %v7385_v30  ;;  %v532_v4 = vmul.f32 %v13010_v7, %v7630_v37  ;;  %v533_v18 = vmul.f32 %v13010_v7, %v7632_v48  ;;  %v13013_v30 = vld [vmem:[#allocation20_spill] sm:$0xff] }
 0x113   : > { %13003 = vst [vmem:[#allocation64_spill] sm:$0xff] %v7644_v63  ;;  %13005 = vst [vmem:[#allocation51_spill] sm:$0xff] %v7647_v0  ;;  %v621_v11 = vmul.f32 %v13011_v8, %v7630_v37  ;;  %v622_v14 = vmul.f32 %v13011_v8, %v7632_v48  ;;  %v711_v16 = vmul.f32 %v13012_v9, %v7630_v37 }
 0x114   : > { %13006 = vst [vmem:[#allocation53_spill] sm:$0xff] %v7650_v47  ;;  %13008 = vst [vmem:[#allocation55_spill] sm:$0xff] %v7653_v41  ;;  %v712_v61 = vmul.f32 %v13012_v9, %v7632_v48  ;;  %v801_v2 = vmul.f32 %v13013_v30, %v7630_v37  ;;  %v802_v62 = vmul.f32 %v13013_v30, %v7632_v48  ;;  %v13015_v41 = vld [vmem:[#allocation26_spill] sm:$0xff] }
 0x115   : > { %13009 = vst [vmem:[#allocation57_spill] sm:$0xff] %v7656_v6  ;;  %v541_v39 = vadd.f32 %v532_v4, %v7338_v51  ;;  %v542_v46 = vadd.f32 %v533_v18, %v7398_v53  ;;  %v630_v58 = vadd.f32 %v621_v11, %v7341_v21  ;;  %v631_v6 = vadd.f32 %v622_v14, %v7404_v23  ;;  %v13016_v4 = vld [vmem:[#allocation27_spill] sm:$0xff]  ;;  %v13017_v18 = vld [vmem:[#allocation28_spill] sm:$0xff] }
 0x116   : > { %v720_v47 = vadd.f32 %v711_v16, %v7344_v49  ;;  %v721_v63 = vadd.f32 %v712_v61, %v7410_v59  ;;  %v810_v44 = vadd.f32 %v801_v2, %v7347_v20  ;;  %v811_v27 = vadd.f32 %v802_v62, %v7416_v10 }
 0x117   : > { %v552_v57 = vadd.f32 %v13014_v42, %v541_v39  ;;  %v553_v19 = vadd.f32 %v13014_v42, %v542_v46  ;;  %v641_v51 = vadd.f32 %v13015_v41, %v630_v58  ;;  %v642_v53 = vadd.f32 %v13015_v41, %v631_v6 }
 0x118   : > { %v731_v21 = vadd.f32 %v13016_v4, %v720_v47  ;;  %v732_v23 = vadd.f32 %v13016_v4, %v721_v63  ;;  %v821_v49 = vadd.f32 %v13017_v18, %v810_v44  ;;  %v822_v59 = vadd.f32 %v13017_v18, %v811_v27  ;;  %v13019_v44 = vld [vmem:[#allocation22_spill] sm:$0xff] }
 0x119   : > { %v561_v11 = vmax.f32 %v552_v57, 0.0  ;;  %v562_v20 = vmax.f32 %v553_v19, 0.0  ;;  %v650_v14 = vmax.f32 %v641_v51, 0.0  ;;  %v651_v10 = vmax.f32 %v642_v53, 0.0  ;;  %v13018_v19 = vld [vmem:[#allocation21_spill] sm:$0xff] }
 0x11a   : > { %v740_v16 = vmax.f32 %v731_v21, 0.0  ;;  %v741_v61 = vmax.f32 %v732_v23, 0.0  ;;  %v830_v2 = vmax.f32 %v821_v49, 0.0  ;;  %v831_v62 = vmax.f32 %v822_v59, 0.0  ;;  %v13020_v21 = vld [vmem:[#allocation23_spill] sm:$0xff]  ;;  %v13021_v59 = vld [vmem:[#allocation24_spill] sm:$0xff] }
 0x11b   : > { %v570_v39 = vmin.f32 %v561_v11, 1.0  ;;  %v571_v46 = vmin.f32 %v562_v20, 1.0  ;;  %v659_v58 = vmin.f32 %v650_v14, 1.0  ;;  %v660_v6 = vmin.f32 %v651_v10, 1.0 }
 0x11c   : > { %v749_v0 = vmin.f32 %v740_v16, 1.0  ;;  %v750_v47 = vmin.f32 %v741_v61, 1.0  ;;  %v839_v25 = vmin.f32 %v830_v2, 1.0  ;;  %v840_v63 = vmin.f32 %v831_v62, 1.0 }
 0x11d   : > { %579 = vst [vmem:[#allocation3] sm:$0xff] %v570_v39  ;;  %580 = vst [vmem:[#allocation3 + $0x8] sm:$0xff] %v571_v46  ;;  %v891_v57 = vmul.f32 %v13018_v19, %v7630_v37  ;;  %v892_v27 = vmul.f32 %v13018_v19, %v7632_v48  ;;  %v981_v51 = vmul.f32 %v13019_v44, %v7630_v37  ;;  %v13023_v46 = vld [vmem:[#allocation30_spill] sm:$0xff] }
 0x11e   : > { %669 = vst [vmem:[#allocation3 + $0x48] sm:$0xff] %v659_v58  ;;  %670 = vst [vmem:[#allocation3 + $0x50] sm:$0xff] %v660_v6  ;;  %v982_v53 = vmul.f32 %v13019_v44, %v7632_v48  ;;  %v1071_v23 = vmul.f32 %v13020_v21, %v7630_v37  ;;  %v1072_v49 = vmul.f32 %v13020_v21, %v7632_v48  ;;  %v13024_v58 = vld [vmem:[#allocation31_spill] sm:$0xff]  ;;  %v13025_v6 = vld [vmem:[#allocation32_spill] sm:$0xff] }
 0x11f   : > { %759 = vst [vmem:[#allocation3 + $0x90] sm:$0xff] %v749_v0  ;;  %760 = vst [vmem:[#allocation3 + $0x98] sm:$0xff] %v750_v47  ;;  %v1161_v11 = vmul.f32 %v13021_v59, %v7630_v37  ;;  %v1162_v20 = vmul.f32 %v13021_v59, %v7632_v48  ;;  %v900_v14 = vadd.f32 %v891_v57, %v7352_v22  ;;  %v13022_v37 = vld [vmem:[#allocation29_spill] sm:$0xff] }
 0x120   : > { %849 = vst [vmem:[#allocation3 + $0xd8] sm:$0xff] %v839_v25  ;;  %850 = vst [vmem:[#allocation3 + $0xe0] sm:$0xff] %v840_v63  ;;  %v901_v10 = vadd.f32 %v892_v27, %v7432_v36  ;;  %v990_v0 = vadd.f32 %v981_v51, %v7355_v13  ;;  %v991_v25 = vadd.f32 %v982_v53, %v7438_v50 }
 0x121   : > { %v1080_v16 = vadd.f32 %v1071_v23, %v7358_v55  ;;  %v1081_v61 = vadd.f32 %v1072_v49, %v7444_v32  ;;  %v1170_v2 = vadd.f32 %v1161_v11, %v7361_v3  ;;  %v1171_v62 = vadd.f32 %v1162_v20, %v7450_v5  ;;  %v7722_v23 = vld [vmem:[#allocation2 + $0xa0] sm:$0xff]  ;;  %v7724_v49 = vld [vmem:[#allocation2 + $0xa8] sm:$0xff] }
 0x122   : > { %v911_v39 = vadd.f32 %v13022_v37, %v900_v14  ;;  %v912_v48 = vadd.f32 %v13022_v37, %v901_v10  ;;  %v1001_v22 = vadd.f32 %v13023_v46, %v990_v0  ;;  %v1002_v36 = vadd.f32 %v13023_v46, %v991_v25 }
 0x123   : > { %v1091_v13 = vadd.f32 %v13024_v58, %v1080_v16  ;;  %v1092_v50 = vadd.f32 %v13024_v58, %v1081_v61  ;;  %v1181_v55 = vadd.f32 %v13025_v6, %v1170_v2  ;;  %v1182_v32 = vadd.f32 %v13025_v6, %v1171_v62 }
 0x124   : > { %v920_v47 = vmax.f32 %v911_v39, 0.0  ;;  %v921_v3 = vmax.f32 %v912_v48, 0.0  ;;  %v1010_v63 = vmax.f32 %v1001_v22, 0.0  ;;  %v1011_v5 = vmax.f32 %v1002_v36, 0.0 }
 0x125   : > { %v1100_v57 = vmax.f32 %v1091_v13, 0.0  ;;  %v1101_v27 = vmax.f32 %v1092_v50, 0.0  ;;  %v1190_v51 = vmax.f32 %v1181_v55, 0.0  ;;  %v1191_v53 = vmax.f32 %v1182_v32, 0.0 }
 0x126   : > { %v929_v11 = vmin.f32 %v920_v47, 1.0  ;;  %v930_v20 = vmin.f32 %v921_v3, 1.0  ;;  %v1019_v14 = vmin.f32 %v1010_v63, 1.0  ;;  %v1020_v10 = vmin.f32 %v1011_v5, 1.0 }
 0x127   : > { %v1109_v0 = vmin.f32 %v1100_v57, 1.0  ;;  %v1110_v25 = vmin.f32 %v1101_v27, 1.0  ;;  %v1199_v16 = vmin.f32 %v1190_v51, 1.0  ;;  %v1200_v61 = vmin.f32 %v1191_v53, 1.0 }
 0x128   : > { %939 = vst [vmem:[#allocation3 + $0x120] sm:$0xff] %v929_v11  ;;  %940 = vst [vmem:[#allocation3 + $0x128] sm:$0xff] %v930_v20  ;;  %v534_v2 = vmul.f32 %v13010_v7, %v7722_v23  ;;  %v535_v62 = vmul.f32 %v13010_v7, %v7724_v49  ;;  %v623_v39 = vmul.f32 %v13011_v8, %v7722_v23 }
 0x129   : > { %1029 = vst [vmem:[#allocation3 + $0x168] sm:$0xff] %v1019_v14  ;;  %1030 = vst [vmem:[#allocation3 + $0x170] sm:$0xff] %v1020_v10  ;;  %v624_v48 = vmul.f32 %v13011_v8, %v7724_v49  ;;  %v713_v22 = vmul.f32 %v13012_v9, %v7722_v23  ;;  %v714_v36 = vmul.f32 %v13012_v9, %v7724_v49 }
 0x12a   : > { %1119 = vst [vmem:[#allocation3 + $0x1b0] sm:$0xff] %v1109_v0  ;;  %1120 = vst [vmem:[#allocation3 + $0x1b8] sm:$0xff] %v1110_v25  ;;  %v803_v13 = vmul.f32 %v13013_v30, %v7722_v23  ;;  %v804_v50 = vmul.f32 %v13013_v30, %v7724_v49  ;;  %v543_v55 = vadd.f32 %v534_v2, %v7401_v12 }
 0x12b   : > { %1209 = vst [vmem:[#allocation3 + $0x1f8] sm:$0xff] %v1199_v16  ;;  %1210 = vst [vmem:[#allocation3 + $0x200] sm:$0xff] %v1200_v61  ;;  %v544_v32 = vadd.f32 %v535_v62, %v7466_v28  ;;  %v632_v47 = vadd.f32 %v623_v39, %v7407_v60  ;;  %v633_v3 = vadd.f32 %v624_v48, %v7472_v38 }
 0x12c   : > { %v722_v63 = vadd.f32 %v713_v22, %v7413_v31  ;;  %v723_v5 = vadd.f32 %v714_v36, %v7478_v33  ;;  %v812_v57 = vadd.f32 %v803_v13, %v7419_v24  ;;  %v813_v27 = vadd.f32 %v804_v50, %v7484_v26 }
 0x12d   : > { %v554_v51 = vadd.f32 %v13014_v42, %v543_v55  ;;  %v555_v53 = vadd.f32 %v13014_v42, %v544_v32  ;;  %v643_v12 = vadd.f32 %v13015_v41, %v632_v47  ;;  %v644_v28 = vadd.f32 %v13015_v41, %v633_v3 }
 0x12e   : > { %v733_v60 = vadd.f32 %v13016_v4, %v722_v63  ;;  %v734_v38 = vadd.f32 %v13016_v4, %v723_v5  ;;  %v823_v31 = vadd.f32 %v13017_v18, %v812_v57  ;;  %v824_v33 = vadd.f32 %v13017_v18, %v813_v27  ;;  %v13026_v57 = vld [vmem:[#allocation66_spill] sm:$0xff] }
 0x12f   : > { %v563_v11 = vmax.f32 %v554_v51, 0.0  ;;  %v564_v24 = vmax.f32 %v555_v53, 0.0  ;;  %v652_v20 = vmax.f32 %v643_v12, 0.0  ;;  %v653_v26 = vmax.f32 %v644_v28, 0.0  ;;  %v13027_v51 = vld [vmem:[#allocation33_spill] sm:$0xff]  ;;  %v13028_v12 = vld [vmem:[#allocation67_spill] sm:$0xff] }
 0x130   : > { %v742_v14 = vmax.f32 %v733_v60, 0.0  ;;  %v743_v10 = vmax.f32 %v734_v38, 0.0  ;;  %v832_v0 = vmax.f32 %v823_v31, 0.0  ;;  %v833_v25 = vmax.f32 %v824_v33, 0.0  ;;  %v13029_v60 = vld [vmem:[#allocation34_spill] sm:$0xff]  ;;  %v13030_v31 = vld [vmem:[#allocation68_spill] sm:$0xff] }
 0x131   : > { %v572_v16 = vmin.f32 %v563_v11, 1.0  ;;  %v573_v61 = vmin.f32 %v564_v24, 1.0  ;;  %v661_v2 = vmin.f32 %v652_v20, 1.0  ;;  %v662_v62 = vmin.f32 %v653_v26, 1.0  ;;  %v13031_v11 = vld [vmem:[#allocation35_spill] sm:$0xff]  ;;  %v13032_v20 = vld [vmem:[#allocation69_spill] sm:$0xff] }
 0x132   : > { %v751_v39 = vmin.f32 %v742_v14, 1.0  ;;  %v752_v48 = vmin.f32 %v743_v10, 1.0  ;;  %v841_v22 = vmin.f32 %v832_v0, 1.0  ;;  %v842_v36 = vmin.f32 %v833_v25, 1.0  ;;  %v13033_v14 = vld [vmem:[#allocation36_spill] sm:$0xff] }
 0x133   : > { %581 = vst [vmem:[#allocation3 + $0x10] sm:$0xff] %v572_v16  ;;  %582 = vst [vmem:[#allocation3 + $0x18] sm:$0xff] %v573_v61  ;;  %v893_v13 = vmul.f32 %v13018_v19, %v7722_v23  ;;  %v894_v50 = vmul.f32 %v13018_v19, %v7724_v49  ;;  %v983_v55 = vmul.f32 %v13019_v44, %v7722_v23 }
 0x134   : > { %671 = vst [vmem:[#allocation3 + $0x58] sm:$0xff] %v661_v2  ;;  %672 = vst [vmem:[#allocation3 + $0x60] sm:$0xff] %v662_v62  ;;  %v984_v32 = vmul.f32 %v13019_v44, %v7724_v49  ;;  %v1073_v47 = vmul.f32 %v13020_v21, %v7722_v23  ;;  %v1074_v3 = vmul.f32 %v13020_v21, %v7724_v49 }
 0x135   : > { %761 = vst [vmem:[#allocation3 + $0xa0] sm:$0xff] %v751_v39  ;;  %762 = vst [vmem:[#allocation3 + $0xa8] sm:$0xff] %v752_v48  ;;  %v1163_v63 = vmul.f32 %v13021_v59, %v7722_v23  ;;  %v1164_v5 = vmul.f32 %v13021_v59, %v7724_v49  ;;  %v902_v27 = vadd.f32 %v893_v13, %v13026_v57 }
 0x136   : > { %851 = vst [vmem:[#allocation3 + $0xe8] sm:$0xff] %v841_v22  ;;  %852 = vst [vmem:[#allocation3 + $0xf0] sm:$0xff] %v842_v36  ;;  %v903_v53 = vadd.f32 %v894_v50, %v13027_v51  ;;  %v992_v28 = vadd.f32 %v983_v55, %v13028_v12  ;;  %v993_v38 = vadd.f32 %v984_v32, %v13029_v60 }
 0x137   : > { %v1082_v33 = vadd.f32 %v1073_v47, %v13030_v31  ;;  %v1083_v24 = vadd.f32 %v1074_v3, %v13031_v11  ;;  %v1172_v26 = vadd.f32 %v1163_v63, %v13032_v20  ;;  %v1173_v10 = vadd.f32 %v1164_v5, %v13033_v14  ;;  %v7790_v47 = vld [vmem:[#allocation2 + $0xb0] sm:$0xff]  ;;  %v7792_v3 = vld [vmem:[#allocation2 + $0xb8] sm:$0xff]  ;;  %v13034_v14 = vld [vmem:[#allocation70_spill] sm:$0xff] }
 0x138   : > { %v913_v23 = vadd.f32 %v13022_v37, %v902_v27  ;;  %v914_v49 = vadd.f32 %v13022_v37, %v903_v53  ;;  %v1003_v0 = vadd.f32 %v13023_v46, %v992_v28  ;;  %v1004_v25 = vadd.f32 %v13023_v46, %v993_v38 }
 0x139   : > { %v1093_v16 = vadd.f32 %v13024_v58, %v1082_v33  ;;  %v1094_v61 = vadd.f32 %v13024_v58, %v1083_v24  ;;  %v1183_v2 = vadd.f32 %v13025_v6, %v1172_v26  ;;  %v1184_v62 = vadd.f32 %v13025_v6, %v1173_v10 }
 0x13a   : > { %v922_v39 = vmax.f32 %v913_v23, 0.0  ;;  %v923_v48 = vmax.f32 %v914_v49, 0.0  ;;  %v1012_v22 = vmax.f32 %v1003_v0, 0.0  ;;  %v1013_v36 = vmax.f32 %v1004_v25, 0.0  ;;  %v13035_v23 = vld [vmem:[#allocation37_spill] sm:$0xff]  ;;  %v13036_v0 = vld [vmem:[#allocation71_spill] sm:$0xff] }
 0x13b   : > { %v1102_v13 = vmax.f32 %v1093_v16, 0.0  ;;  %v1103_v50 = vmax.f32 %v1094_v61, 0.0  ;;  %v1192_v55 = vmax.f32 %v1183_v2, 0.0  ;;  %v1193_v32 = vmax.f32 %v1184_v62, 0.0  ;;  %v13037_v16 = vld [vmem:[#allocation38_spill] sm:$0xff]  ;;  %v13038_v2 = vld [vmem:[#allocation72_spill] sm:$0xff] }
 0x13c   : > { %v931_v63 = vmin.f32 %v922_v39, 1.0  ;;  %v932_v5 = vmin.f32 %v923_v48, 1.0  ;;  %v1021_v57 = vmin.f32 %v1012_v22, 1.0  ;;  %v1022_v27 = vmin.f32 %v1013_v36, 1.0  ;;  %v13039_v39 = vld [vmem:[#allocation39_spill] sm:$0xff]  ;;  %v13040_v22 = vld [vmem:[#allocation40_spill] sm:$0xff] }
 0x13d   : > { %v1111_v51 = vmin.f32 %v1102_v13, 1.0  ;;  %v1112_v53 = vmin.f32 %v1103_v50, 1.0  ;;  %v1201_v12 = vmin.f32 %v1192_v55, 1.0  ;;  %v1202_v28 = vmin.f32 %v1193_v32, 1.0  ;;  %v13041_v13 = vld [vmem:[#allocation41_spill] sm:$0xff] }
 0x13e   : > { %941 = vst [vmem:[#allocation3 + $0x130] sm:$0xff] %v931_v63  ;;  %942 = vst [vmem:[#allocation3 + $0x138] sm:$0xff] %v932_v5  ;;  %v536_v60 = vmul.f32 %v13010_v7, %v7790_v47  ;;  %v537_v38 = vmul.f32 %v13010_v7, %v7792_v3  ;;  %v625_v31 = vmul.f32 %v13011_v8, %v7790_v47 }
 0x13f   : > { %1031 = vst [vmem:[#allocation3 + $0x178] sm:$0xff] %v1021_v57  ;;  %1032 = vst [vmem:[#allocation3 + $0x180] sm:$0xff] %v1022_v27  ;;  %v626_v33 = vmul.f32 %v13011_v8, %v7792_v3  ;;  %v715_v11 = vmul.f32 %v13012_v9, %v7790_v47  ;;  %v716_v24 = vmul.f32 %v13012_v9, %v7792_v3 }
 0x140   : > { %1121 = vst [vmem:[#allocation3 + $0x1c0] sm:$0xff] %v1111_v51  ;;  %1122 = vst [vmem:[#allocation3 + $0x1c8] sm:$0xff] %v1112_v53  ;;  %v805_v20 = vmul.f32 %v13013_v30, %v7790_v47  ;;  %v806_v26 = vmul.f32 %v13013_v30, %v7792_v3  ;;  %v545_v10 = vadd.f32 %v536_v60, %v13034_v14 }
 0x141   : > { %1211 = vst [vmem:[#allocation3 + $0x208] sm:$0xff] %v1201_v12  ;;  %1212 = vst [vmem:[#allocation3 + $0x210] sm:$0xff] %v1202_v28  ;;  %v546_v49 = vadd.f32 %v537_v38, %v13035_v23  ;;  %v634_v25 = vadd.f32 %v625_v31, %v13036_v0  ;;  %v635_v61 = vadd.f32 %v626_v33, %v13037_v16 }
 0x142   : > { %v724_v62 = vadd.f32 %v715_v11, %v13038_v2  ;;  %v725_v48 = vadd.f32 %v716_v24, %v13039_v39  ;;  %v814_v36 = vadd.f32 %v805_v20, %v13040_v22  ;;  %v815_v50 = vadd.f32 %v806_v26, %v13041_v13  ;;  %v13042_v13 = vld [vmem:[#allocation42_spill] sm:$0xff] }
 0x143   : > { %v556_v55 = vadd.f32 %v13014_v42, %v545_v10  ;;  %v557_v32 = vadd.f32 %v13014_v42, %v546_v49  ;;  %v645_v63 = vadd.f32 %v13015_v41, %v634_v25  ;;  %v646_v5 = vadd.f32 %v13015_v41, %v635_v61 }
 0x144   : > { %v735_v57 = vadd.f32 %v13016_v4, %v724_v62  ;;  %v736_v27 = vadd.f32 %v13016_v4, %v725_v48  ;;  %v825_v51 = vadd.f32 %v13017_v18, %v814_v36  ;;  %v826_v53 = vadd.f32 %v13017_v18, %v815_v50 }
 0x145   : > { %v565_v12 = vmax.f32 %v556_v55, 0.0  ;;  %v566_v28 = vmax.f32 %v557_v32, 0.0  ;;  %v654_v60 = vmax.f32 %v645_v63, 0.0  ;;  %v655_v38 = vmax.f32 %v646_v5, 0.0  ;;  %v13043_v32 = vld [vmem:[#allocation44_spill] sm:$0xff] }
 0x146   : > { %v744_v31 = vmax.f32 %v735_v57, 0.0  ;;  %v745_v33 = vmax.f32 %v736_v27, 0.0  ;;  %v834_v11 = vmax.f32 %v825_v51, 0.0  ;;  %v835_v24 = vmax.f32 %v826_v53, 0.0  ;;  %v13044_v57 = vld [vmem:[#allocation46_spill] sm:$0xff]  ;;  %v13045_v53 = vld [vmem:[#allocation48_spill] sm:$0xff] }
 0x147   : > { %v574_v20 = vmin.f32 %v565_v12, 1.0  ;;  %v575_v26 = vmin.f32 %v566_v28, 1.0  ;;  %v663_v14 = vmin.f32 %v654_v60, 1.0  ;;  %v664_v10 = vmin.f32 %v655_v38, 1.0 }
 0x148   : > { %v753_v23 = vmin.f32 %v744_v31, 1.0  ;;  %v754_v49 = vmin.f32 %v745_v33, 1.0  ;;  %v843_v0 = vmin.f32 %v834_v11, 1.0  ;;  %v844_v25 = vmin.f32 %v835_v24, 1.0 }
 0x149   : > { %583 = vst [vmem:[#allocation3 + $0x20] sm:$0xff] %v574_v20  ;;  %584 = vst [vmem:[#allocation3 + $0x28] sm:$0xff] %v575_v26  ;;  %v895_v16 = vmul.f32 %v13018_v19, %v7790_v47  ;;  %v896_v61 = vmul.f32 %v13018_v19, %v7792_v3  ;;  %v985_v2 = vmul.f32 %v13019_v44, %v7790_v47 }
 0x14a   : > { %673 = vst [vmem:[#allocation3 + $0x68] sm:$0xff] %v663_v14  ;;  %674 = vst [vmem:[#allocation3 + $0x70] sm:$0xff] %v664_v10  ;;  %v986_v62 = vmul.f32 %v13019_v44, %v7792_v3  ;;  %v1075_v39 = vmul.f32 %v13020_v21, %v7790_v47  ;;  %v1076_v48 = vmul.f32 %v13020_v21, %v7792_v3 }
 0x14b   : > { %763 = vst [vmem:[#allocation3 + $0xb0] sm:$0xff] %v753_v23  ;;  %764 = vst [vmem:[#allocation3 + $0xb8] sm:$0xff] %v754_v49  ;;  %v1165_v22 = vmul.f32 %v13021_v59, %v7790_v47  ;;  %v1166_v36 = vmul.f32 %v13021_v59, %v7792_v3  ;;  %v904_v50 = vadd.f32 %v895_v16, %v13042_v13  ;;  %v7858_v23 = vld [vmem:[#allocation2 + $0xc0] sm:$0xff]  ;;  %v7860_v49 = vld [vmem:[#allocation2 + $0xc8] sm:$0xff] }
 0x14c   : > { %853 = vst [vmem:[#allocation3 + $0xf8] sm:$0xff] %v843_v0  ;;  %854 = vst [vmem:[#allocation3 + $0x100] sm:$0xff] %v844_v25  ;;  %v905_v55 = vadd.f32 %v896_v61, %v7567_v1  ;;  %v994_v63 = vadd.f32 %v985_v2, %v13043_v32  ;;  %v995_v5 = vadd.f32 %v986_v62, %v7573_v29 }
 0x14d   : > { %v1084_v27 = vadd.f32 %v1075_v39, %v13044_v57  ;;  %v1085_v51 = vadd.f32 %v1076_v48, %v7579_v15  ;;  %v1174_v12 = vadd.f32 %v1165_v22, %v13045_v53  ;;  %v1175_v28 = vadd.f32 %v1166_v36, %v7585_v34  ;;  %v13046_v57 = vld [vmem:[#allocation50_spill] sm:$0xff]  ;;  %v13047_v53 = vld [vmem:[#allocation52_spill] sm:$0xff] }
 0x14e   : > { %v915_v47 = vadd.f32 %v13022_v37, %v904_v50  ;;  %v916_v3 = vadd.f32 %v13022_v37, %v905_v55  ;;  %v1005_v60 = vadd.f32 %v13023_v46, %v994_v63  ;;  %v1006_v1 = vadd.f32 %v13023_v46, %v995_v5 }
 0x14f   : > { %v1095_v38 = vadd.f32 %v13024_v58, %v1084_v27  ;;  %v1096_v29 = vadd.f32 %v13024_v58, %v1085_v51  ;;  %v1185_v31 = vadd.f32 %v13025_v6, %v1174_v12  ;;  %v1186_v15 = vadd.f32 %v13025_v6, %v1175_v28 }
 0x150   : > { %v924_v33 = vmax.f32 %v915_v47, 0.0  ;;  %v925_v11 = vmax.f32 %v916_v3, 0.0  ;;  %v1014_v24 = vmax.f32 %v1005_v60, 0.0  ;;  %v1015_v34 = vmax.f32 %v1006_v1, 0.0  ;;  %v13048_v47 = vld [vmem:[#allocation54_spill] sm:$0xff]  ;;  %v13049_v1 = vld [vmem:[#allocation56_spill] sm:$0xff] }
 0x151   : > { %v1104_v20 = vmax.f32 %v1095_v38, 0.0  ;;  %v1105_v26 = vmax.f32 %v1096_v29, 0.0  ;;  %v1194_v14 = vmax.f32 %v1185_v31, 0.0  ;;  %v1195_v10 = vmax.f32 %v1186_v15, 0.0 }
 0x152   : > { %v933_v0 = vmin.f32 %v924_v33, 1.0  ;;  %v934_v25 = vmin.f32 %v925_v11, 1.0  ;;  %v1023_v16 = vmin.f32 %v1014_v24, 1.0  ;;  %v1024_v61 = vmin.f32 %v1015_v34, 1.0 }
 0x153   : > { %v1113_v2 = vmin.f32 %v1104_v20, 1.0  ;;  %v1114_v62 = vmin.f32 %v1105_v26, 1.0  ;;  %v1203_v39 = vmin.f32 %v1194_v14, 1.0  ;;  %v1204_v48 = vmin.f32 %v1195_v10, 1.0 }
 0x154   : > { %943 = vst [vmem:[#allocation3 + $0x140] sm:$0xff] %v933_v0  ;;  %944 = vst [vmem:[#allocation3 + $0x148] sm:$0xff] %v934_v25  ;;  %v538_v22 = vmul.f32 %v13010_v7, %v7858_v23  ;;  %v539_v36 = vmul.f32 %v13010_v7, %v7860_v49  ;;  %v627_v13 = vmul.f32 %v13011_v8, %v7858_v23 }
 0x155   : > { %1033 = vst [vmem:[#allocation3 + $0x188] sm:$0xff] %v1023_v16  ;;  %1034 = vst [vmem:[#allocation3 + $0x190] sm:$0xff] %v1024_v61  ;;  %v628_v50 = vmul.f32 %v13011_v8, %v7860_v49  ;;  %v717_v55 = vmul.f32 %v13012_v9, %v7858_v23  ;;  %v718_v32 = vmul.f32 %v13012_v9, %v7860_v49 }
 0x156   : > { %1123 = vst [vmem:[#allocation3 + $0x1d0] sm:$0xff] %v1113_v2  ;;  %1124 = vst [vmem:[#allocation3 + $0x1d8] sm:$0xff] %v1114_v62  ;;  %v807_v63 = vmul.f32 %v13013_v30, %v7858_v23  ;;  %v808_v5 = vmul.f32 %v13013_v30, %v7860_v49  ;;  %v547_v27 = vadd.f32 %v538_v22, %v13046_v57 }
 0x157   : > { %1213 = vst [vmem:[#allocation3 + $0x218] sm:$0xff] %v1203_v39  ;;  %1214 = vst [vmem:[#allocation3 + $0x220] sm:$0xff] %v1204_v48  ;;  %v548_v51 = vadd.f32 %v539_v36, %v7599_v54  ;;  %v636_v12 = vadd.f32 %v627_v13, %v13047_v53  ;;  %v637_v28 = vadd.f32 %v628_v50, %v7605_v40 }
 0x158   : > { %v726_v3 = vadd.f32 %v717_v55, %v13048_v47  ;;  %v727_v60 = vadd.f32 %v718_v32, %v7611_v35  ;;  %v816_v38 = vadd.f32 %v807_v63, %v13049_v1  ;;  %v817_v29 = vadd.f32 %v808_v5, %v7617_v43  ;;  %v13050_v47 = vld [vmem:[#allocation43_spill] sm:$0xff] }
 0x159   : > { %v558_v31 = vadd.f32 %v13014_v42, %v547_v27  ;;  %v559_v15 = vadd.f32 %v13014_v42, %v548_v51  ;;  %v647_v33 = vadd.f32 %v13015_v41, %v636_v12  ;;  %v648_v54 = vadd.f32 %v13015_v41, %v637_v28 }
 0x15a   : > { %v737_v11 = vadd.f32 %v13016_v4, %v726_v3  ;;  %v738_v40 = vadd.f32 %v13016_v4, %v727_v60  ;;  %v827_v24 = vadd.f32 %v13017_v18, %v816_v38  ;;  %v828_v35 = vadd.f32 %v13017_v18, %v817_v29  ;;  %v13051_v60 = vld [vmem:[#allocation51_spill] sm:$0xff]  ;;  %v13052_v38 = vld [vmem:[#allocation58_spill] sm:$0xff] }
 0x15b   : > { %v567_v34 = vmax.f32 %v558_v31, 0.0  ;;  %v568_v20 = vmax.f32 %v559_v15, 0.0  ;;  %v656_v26 = vmax.f32 %v647_v33, 0.0  ;;  %v657_v43 = vmax.f32 %v648_v54, 0.0  ;;  %v13053_v31 = vld [vmem:[#allocation55_spill] sm:$0xff] }
 0x15c   : > { %v746_v14 = vmax.f32 %v737_v11, 0.0  ;;  %v747_v10 = vmax.f32 %v738_v40, 0.0  ;;  %v836_v0 = vmax.f32 %v827_v24, 0.0  ;;  %v837_v25 = vmax.f32 %v828_v35, 0.0 }
 0x15d   : > { %v576_v16 = vmin.f32 %v567_v34, 1.0  ;;  %v577_v61 = vmin.f32 %v568_v20, 1.0  ;;  %v665_v2 = vmin.f32 %v656_v26, 1.0  ;;  %v666_v62 = vmin.f32 %v657_v43, 1.0 }
 0x15e   : > { %v755_v39 = vmin.f32 %v746_v14, 1.0  ;;  %v756_v48 = vmin.f32 %v747_v10, 1.0  ;;  %v845_v22 = vmin.f32 %v836_v0, 1.0  ;;  %v846_v36 = vmin.f32 %v837_v25, 1.0  ;;  %v498_v14 = vld [vmem:[#allocation2 + $0xd0] sm:$0xff] }
 0x15f   : > { %585 = vst [vmem:[#allocation3 + $0x30] sm:$0xff] %v576_v16  ;;  %586 = vst [vmem:[#allocation3 + $0x38] sm:$0xff] %v577_v61  ;;  %v897_v13 = vmul.f32 %v13018_v19, %v7858_v23  ;;  %v898_v50 = vmul.f32 %v13018_v19, %v7860_v49  ;;  %v987_v55 = vmul.f32 %v13019_v44, %v7858_v23 }
 0x160   : > { %675 = vst [vmem:[#allocation3 + $0x78] sm:$0xff] %v665_v2  ;;  %676 = vst [vmem:[#allocation3 + $0x80] sm:$0xff] %v666_v62  ;;  %v988_v32 = vmul.f32 %v13019_v44, %v7860_v49  ;;  %v1077_v63 = vmul.f32 %v13020_v21, %v7858_v23  ;;  %v1078_v5 = vmul.f32 %v13020_v21, %v7860_v49 }
 0x161   : > { %765 = vst [vmem:[#allocation3 + $0xc0] sm:$0xff] %v755_v39  ;;  %766 = vst [vmem:[#allocation3 + $0xc8] sm:$0xff] %v756_v48  ;;  %v1167_v57 = vmul.f32 %v13021_v59, %v7858_v23  ;;  %v1168_v27 = vmul.f32 %v13021_v59, %v7860_v49  ;;  %v906_v51 = vadd.f32 %v897_v13, %v7570_v52 }
 0x162   : > { %855 = vst [vmem:[#allocation3 + $0x108] sm:$0xff] %v845_v22  ;;  %856 = vst [vmem:[#allocation3 + $0x110] sm:$0xff] %v846_v36  ;;  %v907_v53 = vadd.f32 %v898_v50, %v7635_v56  ;;  %v996_v12 = vadd.f32 %v987_v55, %v7576_v17  ;;  %v997_v28 = vadd.f32 %v988_v32, %v7641_v45 }
 0x163   : > { %v1086_v3 = vadd.f32 %v1077_v63, %v13050_v47  ;;  %v1087_v1 = vadd.f32 %v1078_v5, %v13051_v60  ;;  %v1176_v29 = vadd.f32 %v1167_v57, %v13052_v38  ;;  %v1177_v15 = vadd.f32 %v1168_v27, %v13053_v31  ;;  %v13054_v5 = vld [vmem:[#allocation45_spill] sm:$0xff]  ;;  %v13055_v57 = vld [vmem:[#allocation60_spill] sm:$0xff]  ;;  %v13056_v27 = vld [vmem:[#allocation47_spill] sm:$0xff] }
 0x164   : > { %v917_v23 = vadd.f32 %v13022_v37, %v906_v51  ;;  %v918_v49 = vadd.f32 %v13022_v37, %v907_v53  ;;  %v1007_v52 = vadd.f32 %v13023_v46, %v996_v12  ;;  %v1008_v56 = vadd.f32 %v13023_v46, %v997_v28  ;;  %v13057_v51 = vld [vmem:[#allocation62_spill] sm:$0xff]  ;;  %v13058_v53 = vld [vmem:[#allocation49_spill] sm:$0xff]  ;;  %v13059_v28 = vld [vmem:[#allocation64_spill] sm:$0xff] }
 0x165   : > { %v1097_v17 = vadd.f32 %v13024_v58, %v1086_v3  ;;  %v1098_v45 = vadd.f32 %v13024_v58, %v1087_v1  ;;  %v1187_v33 = vadd.f32 %v13025_v6, %v1176_v29  ;;  %v1188_v54 = vadd.f32 %v13025_v6, %v1177_v15  ;;  %v13060_v3 = vld [vmem:[#allocation53_spill] sm:$0xff] }
 0x166   : > { %v926_v11 = vmax.f32 %v917_v23, 0.0  ;;  %v927_v40 = vmax.f32 %v918_v49, 0.0  ;;  %v1016_v24 = vmax.f32 %v1007_v52, 0.0  ;;  %v1017_v35 = vmax.f32 %v1008_v56, 0.0  ;;  %v13061_v60 = vld [vmem:[#allocation57_spill] sm:$0xff] }
 0x167   : > { %v1106_v34 = vmax.f32 %v1097_v17, 0.0  ;;  %v1107_v20 = vmax.f32 %v1098_v45, 0.0  ;;  %v1196_v26 = vmax.f32 %v1187_v33, 0.0  ;;  %v1197_v43 = vmax.f32 %v1188_v54, 0.0 }
 0x168   : > { %v935_v10 = vmin.f32 %v926_v11, 1.0  ;;  %v936_v0 = vmin.f32 %v927_v40, 1.0  ;;  %v1025_v25 = vmin.f32 %v1016_v24, 1.0  ;;  %v1026_v16 = vmin.f32 %v1017_v35, 1.0 }
 0x169   : > { %v1115_v61 = vmin.f32 %v1106_v34, 1.0  ;;  %v1116_v2 = vmin.f32 %v1107_v20, 1.0  ;;  %v1205_v62 = vmin.f32 %v1196_v26, 1.0  ;;  %v1206_v39 = vmin.f32 %v1197_v43, 1.0 }
 0x16a   : > { %945 = vst [vmem:[#allocation3 + $0x150] sm:$0xff] %v935_v10  ;;  %946 = vst [vmem:[#allocation3 + $0x158] sm:$0xff] %v936_v0  ;;  %v540_v48 = vmul.f32 %v13010_v7, %v498_v14  ;;  %v629_v22 = vmul.f32 %v13011_v8, %v498_v14  ;;  %v719_v36 = vmul.f32 %v13012_v9, %v498_v14  ;;  %v7954_v35 = vmov 0.0  }
 0x16b   : > { %1035 = vst [vmem:[#allocation3 + $0x198] sm:$0xff] %v1025_v25  ;;  %1036 = vst [vmem:[#allocation3 + $0x1a0] sm:$0xff] %v1026_v16  ;;  %v809_v13 = vmul.f32 %v13013_v30, %v498_v14  ;;  %v899_v50 = vmul.f32 %v13018_v19, %v498_v14  ;;  %v989_v55 = vmul.f32 %v13019_v44, %v498_v14  ;;  %v7956_v34 = vmov 0.0  }
 0x16c   : > { %1125 = vst [vmem:[#allocation3 + $0x1e0] sm:$0xff] %v1115_v61  ;;  %1126 = vst [vmem:[#allocation3 + $0x1e8] sm:$0xff] %v1116_v2  ;;  %v1079_v32 = vmul.f32 %v13020_v21, %v498_v14  ;;  %v1169_v63 = vmul.f32 %v13021_v59, %v498_v14  ;;  %v549_v7 = vadd.f32 %v540_v48, %v13054_v5  ;;  %v7958_v20 = vmov 0.0  }
 0x16d   : > { %1215 = vst [vmem:[#allocation3 + $0x228] sm:$0xff] %v1205_v62  ;;  %1216 = vst [vmem:[#allocation3 + $0x230] sm:$0xff] %v1206_v39  ;;  %v638_v8 = vadd.f32 %v629_v22, %v13055_v57  ;;  %v728_v9 = vadd.f32 %v719_v36, %v13056_v27  ;;  %v818_v30 = vadd.f32 %v809_v13, %v13057_v51  ;;  %v7960_v26 = vmov 0.0  }
 0x16e   : > { %v908_v12 = vadd.f32 %v899_v50, %v13058_v53  ;;  %v998_v47 = vadd.f32 %v989_v55, %v13059_v28  ;;  %v1088_v19 = vadd.f32 %v1079_v32, %v13060_v3  ;;  %v1178_v44 = vadd.f32 %v1169_v63, %v13061_v60 }
 0x16f   : > { %v560_v21 = vadd.f32 %v13014_v42, %v549_v7  ;;  %v649_v59 = vadd.f32 %v13015_v41, %v638_v8  ;;  %v739_v1 = vadd.f32 %v13016_v4, %v728_v9  ;;  %v829_v38 = vadd.f32 %v13017_v18, %v818_v30 }
 0x170   : > { %v919_v29 = vadd.f32 %v13022_v37, %v908_v12  ;;  %v1009_v31 = vadd.f32 %v13023_v46, %v998_v47  ;;  %v1099_v15 = vadd.f32 %v13024_v58, %v1088_v19  ;;  %v1189_v23 = vadd.f32 %v13025_v6, %v1178_v44 }
 0x171   : > { %v569_v49 = vmax.f32 %v560_v21, 0.0  ;;  %v658_v52 = vmax.f32 %v649_v59, 0.0  ;;  %v748_v56 = vmax.f32 %v739_v1, 0.0  ;;  %v838_v17 = vmax.f32 %v829_v38, 0.0 }
 0x172   : > { %v928_v45 = vmax.f32 %v919_v29, 0.0  ;;  %v1018_v42 = vmax.f32 %v1009_v31, 0.0  ;;  %v1108_v33 = vmax.f32 %v1099_v15, 0.0  ;;  %v1198_v41 = vmax.f32 %v1189_v23, 0.0 }
 0x173   : > { %v578_v54 = vmin.f32 %v569_v49, 1.0  ;;  %v667_v4 = vmin.f32 %v658_v52, 1.0  ;;  %v757_v11 = vmin.f32 %v748_v56, 1.0  ;;  %v847_v18 = vmin.f32 %v838_v17, 1.0 }
 0x174   : > { %v937_v40 = vmin.f32 %v928_v45, 1.0  ;;  %v1027_v37 = vmin.f32 %v1018_v42, 1.0  ;;  %v1117_v24 = vmin.f32 %v1108_v33, 1.0  ;;  %v1207_v46 = vmin.f32 %v1198_v41, 1.0 }
 0x175   : > { %587 = vst [vmem:[#allocation3 + $0x40] sm:$0xff] %v578_v54  ;;  %677 = vst [vmem:[#allocation3 + $0x88] sm:$0xff] %v667_v4  ;;  %v7950_v58 = vmov 0.0   ;;  %v7952_v6 = vmov 0.0   ;;  %v7962_v43 = vmov 0.0   ;;  %v7964_v14 = vmov 0.0  }
 0x176   : > { %767 = vst [vmem:[#allocation3 + $0xd0] sm:$0xff] %v757_v11  ;;  %857 = vst [vmem:[#allocation3 + $0x118] sm:$0xff] %v847_v18  ;;  %v7966_v10 = vmov 0.0   ;;  %v7968_v0 = vmov 0.0   ;;  %v7970_v25 = vmov 0.0   ;;  %v7972_v16 = vmov 0.0  }
 0x177   : > { %947 = vst [vmem:[#allocation3 + $0x160] sm:$0xff] %v937_v40  ;;  %1037 = vst [vmem:[#allocation3 + $0x1a8] sm:$0xff] %v1027_v37  ;;  %v7974_v61 = vmov 0.0   ;;  %v7976_v2 = vmov 0.0   ;;  %v7978_v62 = vmov 0.0   ;;  %v7980_v39 = vmov 0.0  }
 0x178   : > { %1127 = vst [vmem:[#allocation3 + $0x1f0] sm:$0xff] %v1117_v24  ;;  %1217 = vst [vmem:[#allocation3 + $0x238] sm:$0xff] %v1207_v46  ;;  %v7982_v48 = vmov 0.0   ;;  %v7984_v22 = vmov 0.0   ;;  %v7986_v36 = vmov 0.0   ;;  %v7988_v13 = vmov 0.0  }
 0x179   : > { %v7990_v50 = vmov 0.0   ;;  %v7992_v55 = vmov 0.0   ;;  %v7994_v32 = vmov 0.0   ;;  %v7996_v63 = vmov 0.0  }
 0x17a   : > { %v7998_v5 = vmov 0.0   ;;  %v8000_v7 = vmov 0.0   ;;  %v8002_v57 = vmov 0.0   ;;  %v8004_v8 = vmov 0.0  }
 0x17b   : > { %v8006_v27 = vmov 0.0   ;;  %v8008_v9 = vmov 0.0   ;;  %v8010_v51 = vmov 0.0   ;;  %v8012_v30 = vmov 0.0  }
 0x17c   : > { %v8014_v53 = vmov 0.0   ;;  %v8016_v12 = vmov 0.0   ;;  %v8018_v28 = vmov 0.0   ;;  %v8020_v47 = vmov 0.0  }
 0x17d LB: >> { %13062 = vst [vmem:[#allocation73_spill] sm:$0xff] %v6468_v58  ;;  %13063 = vst [vmem:[#allocation74_spill] sm:$0xff] %v6472_v6  ;;  %s1260_s1 = smul.u32 72, %s6612_s0  ;;  %s1292_s2 = sadd.s32 8, %s6612_s0  ;;  %s6612_s0 = sphi %s8022_s0, %s13557_s0   ;;  %v6608_v47 = vphi %v8020_v47, %v13556_v47   ;;  %v6604_v28 = vphi %v8018_v28, %v13555_v28   ;;  %v6600_v12 = vphi %v8016_v12, %v13554_v12   ;;  %v6596_v53 = vphi %v8014_v53, %v13553_v53   ;;  %v6592_v30 = vphi %v8012_v30, %v13552_v30   ;;  %v6588_v51 = vphi %v8010_v51, %v13551_v51   ;;  %v6584_v9 = vphi %v8008_v9, %v13550_v9   ;;  %v6580_v27 = vphi %v8006_v27, %v13549_v27   ;;  %v6576_v8 = vphi %v8004_v8, %v13548_v8   ;;  %v6572_v57 = vphi %v8002_v57, %v13547_v57   ;;  %v6568_v7 = vphi %v8000_v7, %v13546_v7   ;;  %v6564_v5 = vphi %v7998_v5, %v13545_v5   ;;  %v6560_v63 = vphi %v7996_v63, %v13544_v63   ;;  %v6556_v32 = vphi %v7994_v32, %v13543_v32   ;;  %v6552_v55 = vphi %v7992_v55, %v13542_v55   ;;  %v6548_v50 = vphi %v7990_v50, %v13541_v50   ;;  %v6544_v13 = vphi %v7988_v13, %v13540_v13   ;;  %v6540_v36 = vphi %v7986_v36, %v13539_v36   ;;  %v6536_v22 = vphi %v7984_v22, %v13538_v22   ;;  %v6532_v48 = vphi %v7982_v48, %v13537_v48   ;;  %v6528_v39 = vphi %v7980_v39, %v13536_v39   ;;  %v6524_v62 = vphi %v7978_v62, %v13535_v62   ;;  %v6520_v2 = vphi %v7976_v2, %v13534_v2   ;;  %v6516_v61 = vphi %v7974_v61, %v13533_v61   ;;  %v6512_v16 = vphi %v7972_v16, %v13532_v16   ;;  %v6508_v25 = vphi %v7970_v25, %v13530_v25   ;;  %v6504_v0 = vphi %v7968_v0, %v13528_v0   ;;  %v6500_v10 = vphi %v7966_v10, %v13526_v10   ;;  %v6496_v14 = vphi %v7964_v14, %v13524_v14   ;;  %v6492_v43 = vphi %v7962_v43, %v13522_v43   ;;  %v6488_v26 = vphi %v7960_v26, %v13521_v26   ;;  %v6484_v20 = vphi %v7958_v20, %v13520_v20   ;;  %v6480_v34 = vphi %v7956_v34, %v13519_v34   ;;  %v6476_v35 = vphi %v7954_v35, %v13517_v35   ;;  %v6472_v6 = vphi %v7952_v6, %v13516_v6   ;;  %v6468_v58 = vphi %v7950_v58, %v13514_v58  }
 0x17e   : >> { %13064 = vst [vmem:[#allocation75_spill] sm:$0xff] %v6476_v35  ;;  %13065 = vst [vmem:[#allocation76_spill] sm:$0xff] %v6480_v34  ;;  %s1271_s3 = smul.u32 9, %s6612_s0  ;;  %s1314_s7 = sadd.s32 16, %s6612_s0 }
 0x17f   : >> { %13066 = vst [vmem:[#allocation77_spill] sm:$0xff] %v6484_v20  ;;  %13067 = vst [vmem:[#allocation78_spill] sm:$0xff] %v6488_v26  ;;  %s8140_s4 = smul.u32 9, %s1292_s2  ;;  %s8143_s30 = scalar_lea.vmem [#allocation3], %s1260_s1 }
 0x180   : >> { %13068 = vst [vmem:[#allocation79_spill] sm:$0xff] %v6492_v43  ;;  %13069 = vst [vmem:[#allocation80_spill] sm:$0xff] %v6496_v14  ;;  %s1272_s5 = sld [smem:[#allocation8 + %s1271_s3]]  ;;  %s1358_s18 = sadd.s32 1, %s1271_s3  ;;  %v8146_v3 = vld [vmem:[%s8143_s30 + $0x10] sm:$0xff]  ;;  %v8149_v19 = vld [vmem:[%s8143_s30] sm:$0xff] }
 0x181   : >> { %13070 = vst [vmem:[#allocation81_spill] sm:$0xff] %v6500_v10  ;;  %13071 = vst [vmem:[#allocation82_spill] sm:$0xff] %v6504_v0  ;;  %s1359_s27 = sld [smem:[#allocation8 + %s1358_s18]]  ;;  %s1415_s29 = sadd.s32 1, %s8140_s4  ;;  %v8152_v60 = vld [vmem:[%s8143_s30 + $0x18] sm:$0xff]  ;;  %v8158_v59 = vld [vmem:[%s8143_s30 + $0x8] sm:$0xff] }
 0x182   : >> { %13072 = vst [vmem:[#allocation83_spill] sm:$0xff] %v6508_v25  ;;  %13073 = vst [vmem:[#allocation84_spill] sm:$0xff] %v6512_v16  ;;  %s1586_s6 = sadd.s32 2, %s1271_s3  ;;  %s1416_s8 = sld [smem:[#allocation8 + %s1415_s29]]  ;;  %v8185_v52 = vld [vmem:[%s8143_s30 + $0x28] sm:$0xff]  ;;  %v8188_v56 = vld [vmem:[%s8143_s30 + $0x20] sm:$0xff] }
 0x183   : >> { %13074 = vst [vmem:[#allocation85_spill] sm:$0xff] %v6516_v61  ;;  %13075 = vst [vmem:[#allocation86_spill] sm:$0xff] %v6520_v2  ;;  %s1587_s9 = sld [smem:[#allocation8 + %s1586_s6]]  ;;  %s1643_s10 = sadd.s32 2, %s8140_s4  ;;  %v8192_v17 = vld [vmem:[%s8143_s30 + $0x38] sm:$0xff]  ;;  %v8203_v33 = vld [vmem:[%s8143_s30 + $0x30] sm:$0xff] }
 0x184   : >> { %13076 = vst [vmem:[#allocation87_spill] sm:$0xff] %v6524_v62  ;;  %13077 = vst [vmem:[#allocation88_spill] sm:$0xff] %v6528_v39  ;;  %s8177_s11 = smul.u32 9, %s1314_s7  ;;  %s6768_s12 = smov 127   ;;  %v8206_v41 = vld [vmem:[%s8143_s30 + $0x40] sm:$0x1] }
 0x185   : >> { %13078 = vst [vmem:[#allocation89_spill] sm:$0xff] %v6532_v48  ;;  %13079 = vst [vmem:[#allocation90_spill] sm:$0xff] %v6536_v22  ;;  %s1336_s13 = sadd.s32 24, %s6612_s0  ;;  %s1644_s14 = sld [smem:[#allocation8 + %s1643_s10]] }
 0x186   : >> { %13080 = vst [vmem:[#allocation91_spill] sm:$0xff] %v6540_v36  ;;  %13081 = vst [vmem:[#allocation92_spill] sm:$0xff] %v6544_v13  ;;  %v8155_v44 = vstv %s1272_s5  ;;  %s1700_s15 = sadd.s32 2, %s8177_s11  ;;  %s8196_s16 = smul.u32 9, %s1336_s13 }
 0x187   : >> { %13082 = vst [vmem:[#allocation93_spill] sm:$0xff] %v6548_v50  ;;  %13083 = vst [vmem:[#allocation94_spill] sm:$0xff] %v6552_v55  ;;  %v1360_v21 = vstv %s1359_s27  ;;  %v8162_v1 = vmul.f32 %v8155_v44, %v8146_v3  ;;  %v8166_v38 = vmul.f32 %v8155_v44, %v8149_v19  ;;  %v8170_v29 = vmul.f32 %v8155_v44, %v8152_v60  ;;  %s8208_s17 = sld [smem:[#allocation8 + %s1700_s15]]  ;;  %s1472_s23 = sadd.s32 1, %s8177_s11 }
 0x188   : >> { %13084 = vst [vmem:[#allocation95_spill] sm:$0xff] %v6556_v32  ;;  %13085 = vst [vmem:[#allocation96_spill] sm:$0xff] %v6560_v63  ;;  %v1363_v31 = vmul.f32 %v1360_v21, %v8146_v3  ;;  %v1361_v15 = vmul.f32 %v1360_v21, %v8149_v19  ;;  %v1364_v23 = vmul.f32 %v1360_v21, %v8152_v60  ;;  %v8210_v54 = vstv %s1416_s8  ;;  %s1757_s19 = sadd.s32 2, %s8196_s16  ;;  %s8263_s21 = sld [smem:[#allocation8 + %s8140_s4]] }
 0x189   : >> { %13086 = vst [vmem:[#allocation97_spill] sm:$0xff] %v6564_v5  ;;  %13087 = vst [vmem:[#allocation98_spill] sm:$0xff] %v6568_v7  ;;  %v1362_v49 = vmul.f32 %v1360_v21, %v8158_v59  ;;  %v1366_v45 = vmul.f32 %v1360_v21, %v8185_v52  ;;  %v1365_v42 = vmul.f32 %v1360_v21, %v8188_v56  ;;  %v1588_v4 = vstv %s1587_s9  ;;  %s8224_s20 = sld [smem:[#allocation8 + %s1757_s19]]  ;;  %s1529_s26 = sadd.s32 1, %s8196_s16 }
 0x18a   : >> { %13088 = vst [vmem:[#allocation99_spill] sm:$0xff] %v6572_v57  ;;  %13089 = vst [vmem:[#allocation100_spill] sm:$0xff] %v6576_v8  ;;  %1383 = vrot.lane.b32.xlu1 %v1363_v31, %s6768_s12  ;;  %1379 = vrot.lane.b32.xlu0 %v1361_v15, %s6768_s12  ;;  %v1368_v11 = vmul.f32 %v1360_v21, %v8192_v17  ;;  %v1367_v18 = vmul.f32 %v1360_v21, %v8203_v33  ;;  %s1473_s24 = sld [smem:[#allocation8 + %s1472_s23]]  ;;  %s6769_s1 = smov 126  }
 0x18b   : >> { %13090 = vst [vmem:[#allocation101_spill] sm:$0xff] %v6580_v27  ;;  %13091 = vst [vmem:[#allocation102_spill] sm:$0xff] %v6584_v9  ;;  %v1369_v40 = vmul.f32 %v1360_v21, %v8206_v41  ;;  %v1418_v37 = vmul.f32 %v8210_v54, %v8149_v19  ;;  %v1420_v24 = vmul.f32 %v8210_v54, %v8146_v3  ;;  %v1645_v31 = vstv %s1644_s14  ;;  %s1316_s25 = sld [smem:[#allocation8 + %s8177_s11]]  ;;  %s1823_s3 = smul.u32 3, %s6612_s0 }
 0x18c   : >> { %13092 = vst [vmem:[#allocation103_spill] sm:$0xff] %v6588_v51  ;;  %13093 = vst [vmem:[#allocation104_spill] sm:$0xff] %v6592_v30  ;;  %v1419_v46 = vmul.f32 %v8210_v54, %v8158_v59  ;;  %v8227_v15 = vmul.f32 %v1588_v4, %v8158_v59  ;;  %v8230_v21 = vmul.f32 %v1588_v4, %v8149_v19  ;;  %s1338_s22 = sld [smem:[#allocation8 + %s8196_s16]]  ;;  %s8597_s29 = smul.u32 3, %s1292_s2 }
 0x18d   : >> { %13094 = vst [vmem:[#allocation105_spill] sm:$0xff] %v6604_v28  ;;  %v8245_v6 = vmul.f32 %v1588_v4, %v8192_v17  ;;  %v8248_v58 = vmul.f32 %v1588_v4, %v8203_v33  ;;  %v8251_v34 = vmul.f32 %v1645_v31, %v8149_v19  ;;  %v8254_v35 = vmul.f32 %v1588_v4, %v8206_v41  ;;  %s1530_s28 = sld [smem:[#allocation8 + %s1529_s26]]  ;;  %s1824_s4 = sadd.s32 1, %s1823_s3 }
 0x18e   : >> { %1385 = vrot.lane.b32.xlu1 %v1364_v23, %s6768_s12  ;;  %1381 = vrot.lane.b32.xlu0 %v1362_v49, %s6768_s12  ;;  %v8233_v23 = vmul.f32 %v1588_v4, %v8152_v60  ;;  %v8236_v49 = vmul.f32 %v1588_v4, %v8146_v3  ;;  %v8257_v26 = vmul.f32 %v1645_v31, %v8146_v3  ;;  %v1702_v0 = vstv %s8208_s17  ;;  %s8576_s5 = smul.u32 3, %s1824_s4  ;;  %s1847_s6 = sadd.s32 1, %s8597_s29 }
 0x18f   : >> { %v8260_v20 = vmul.f32 %v1645_v31, %v8158_v59  ;;  %v8268_v14 = vmul.f32 %v1645_v31, %v8188_v56  ;;  %v8271_v43 = vmul.f32 %v1645_v31, %v8152_v60  ;;  %v8278_v10 = vmul.f32 %v1645_v31, %v8185_v52  ;;  %s8622_s2 = smul.u32 3, %s1847_s6 }
 0x190   : >> { %v8281_v16 = vmul.f32 %v1645_v31, %v8206_v41  ;;  %v8290_v25 = vmul.f32 %v1702_v0, %v8149_v19  ;;  %v8293_v2 = vmul.f32 %v1702_v0, %v8152_v60  ;;  %v8296_v61 = vmul.f32 %v1702_v0, %v8146_v3  ;;  %s1915_s18 = sadd.s32 1, %s8576_s5  ;;  %s8671_s10 = smul.u32 3, %s1314_s7 }
 0x191   : >> { %v8299_v39 = vmul.f32 %v1702_v0, %v8185_v52  ;;  %v8302_v62 = vmul.f32 %v1702_v0, %v8188_v56  ;;  %v8309_v22 = vmul.f32 %v1702_v0, %v8192_v17  ;;  %v8312_v48 = vmul.f32 %v1702_v0, %v8203_v33  ;;  %s1916_s27 = sld [smem:[#allocation8 + %s1915_s18]]  ;;  %s1972_s8 = sadd.s32 1, %s8622_s2 }
 0x192   : >> { %1389 = vrot.lane.b32.xlu1 %v1366_v45, %s6768_s12  ;;  %1387 = vrot.lane.b32.xlu0 %v1365_v42, %s6768_s12  ;;  %v8239_v45 = vmul.f32 %v1588_v4, %v8185_v52  ;;  %v8242_v42 = vmul.f32 %v1588_v4, %v8188_v56  ;;  %v8274_v4 = vmul.f32 %v1645_v31, %v8203_v33  ;;  %v1759_v55 = vstv %s8224_s20  ;;  %s1973_s9 = sld [smem:[#allocation8 + %s1972_s8]]  ;;  %s1870_s11 = sadd.s32 1, %s8671_s10 }
 0x193   : >> { %v8318_v13 = vmul.f32 %v8155_v44, %v8185_v52  ;;  %v8322_v36 = vmul.f32 %v8155_v44, %v8188_v56  ;;  %v8326_v50 = vmul.f32 %v1702_v0, %v8206_v41  ;;  %v8329_v63 = vmul.f32 %v1759_v55, %v8149_v19  ;;  %s8693_s7 = smul.u32 3, %s1870_s11  ;;  %s2380_s18 = sadd.s32 2, %s1823_s3 }
 0x194   : >> { %v8341_v32 = vmul.f32 %v1759_v55, %v8146_v3  ;;  %v8344_v7 = vmul.f32 %v1759_v55, %v8158_v59  ;;  %v1295_v5 = vstv %s8263_s21  ;;  %v1421_v8 = vmul.f32 %v8210_v54, %v8152_v60  ;;  %s8714_s16 = smul.u32 3, %s1336_s13  ;;  %s2143_s21 = sadd.s32 2, %s8576_s5 }
 0x195   : >> { %13095 = vst [vmem:[#allocation106_spill] sm:$0xff] %v8318_v13  ;;  %13096 = vst [vmem:[#allocation107_spill] sm:$0xff] %v8322_v36  ;;  %v8354_v57 = vmul.f32 %v1295_v5, %v8149_v19  ;;  %v8358_v9 = vmul.f32 %v8155_v44, %v8206_v41  ;;  %v8364_v27 = vmul.f32 %v1759_v55, %v8152_v60  ;;  %v1474_v51 = vstv %s1473_s24  ;;  %s2029_s14 = sadd.s32 1, %s8693_s7  ;;  %s2144_s23 = sld [smem:[#allocation8 + %s2143_s21]] }
 0x196   : >> { %1393 = vrot.lane.b32.xlu1 %v1368_v11, %s6768_s12  ;;  %1391 = vrot.lane.b32.xlu0 %v1367_v18, %s6768_s12  ;;  %v8284_v11 = vmul.f32 %v1645_v31, %v8192_v17  ;;  %v8287_v18 = vmul.f32 %v1702_v0, %v8158_v59  ;;  %v8306_v31 = vmul.f32 %v8155_v44, %v8158_v59  ;;  %v1531_v28 = vstv %s1530_s28  ;;  %s2030_s15 = sld [smem:[#allocation8 + %s2029_s14]]  ;;  %s1893_s17 = sadd.s32 1, %s8714_s16 }
 0x197   : >> { %v1422_v0 = vmul.f32 %v8210_v54, %v8188_v56  ;;  %13099 = vst [vmem:[#allocation110_spill] sm:$0xff] %v8354_v57  ;;  %13100 = vst [vmem:[#allocation111_spill] sm:$0xff] %v8358_v9  ;;  %v8376_v57 = vmul.f32 %v1759_v55, %v8185_v52  ;;  %v1423_v9 = vmul.f32 %v8210_v54, %v8185_v52  ;;  %s8733_s13 = smul.u32 3, %s1893_s17  ;;  %s2200_s24 = sadd.s32 2, %s8622_s2 }
 0x198   : >> { %v8392_v30 = vmul.f32 %v1759_v55, %v8206_v41  ;;  %v8401_v36 = vmul.f32 %v1295_v5, %v8185_v52  ;;  %s2257_s26 = sadd.s32 2, %s8693_s7  ;;  %s2402_s8 = sadd.s32 2, %s8597_s29 }
 0x199   : >> { %s2086_s19 = sadd.s32 1, %s8733_s13  ;;  %s2314_s28 = sadd.s32 2, %s8733_s13 }
 0x19a   : >> { %1436 = vrot.lane.b32.xlu1 %v1418_v37, %s6768_s12  ;;  %1395 = vrot.lane.b32.xlu0 %v1369_v40, %s6768_s12  ;;  %v8333_v37 = vmul.f32 %v8155_v44, %v8192_v17  ;;  %v8337_v40 = vmul.f32 %v8155_v44, %v8203_v33  ;;  %v1424_v44 = vmul.f32 %v8210_v54, %v8203_v33  ;;  %s2087_s20 = sld [smem:[#allocation8 + %s2086_s19]]  ;;  %s8968_s29 = smul.u32 3, %s2402_s8 }
 0x19b   : >> { %13106 = vst [vmem:[#allocation117_spill] sm:$0xff] %v8401_v36  ;;  %v1317_v36 = vstv %s1316_s25  ;;  %s2201_s25 = sld [smem:[#allocation8 + %s2200_s24]]  ;;  %s2424_s14 = sadd.s32 2, %s8671_s10 }
 0x19c   : >> { %13097 = vst [vmem:[#allocation108_spill] sm:$0xff] %v8333_v37  ;;  %13098 = vst [vmem:[#allocation109_spill] sm:$0xff] %v8337_v40  ;;  %v8361_v40 = vmul.f32 %v1759_v55, %v8188_v56  ;;  %v8373_v37 = vmul.f32 %v1759_v55, %v8203_v33  ;;  %v8421_v13 = vmul.f32 %v1317_v36, %v8158_v59  ;;  %s2315_s4 = sld [smem:[#allocation8 + %s2314_s28]]  ;;  %s2446_s19 = sadd.s32 2, %s8714_s16 }
 0x19d   : >> { %s9125_s16 = smul.u32 3, %s2446_s19  ;;  %s1849_s24 = sld [smem:[#allocation8 + %s8622_s2]] }
 0x19e   : >> { %1440 = vrot.lane.b32.xlu1 %v1420_v24, %s6768_s12  ;;  %1438 = vrot.lane.b32.xlu0 %v1419_v46, %s6768_s12  ;;  %v8367_v24 = vmul.f32 %v1295_v5, %v8146_v3  ;;  %v8370_v46 = vmul.f32 %v1295_v5, %v8158_v59  ;;  %13109 = vst [vmem:[#allocation120_spill] sm:$0xff] %v8421_v13  ;;  %s9279_s2 = sld [smem:[#allocation8 + %s8733_s13]] }
 0x19f   : >> { %v8438_v13 = vmul.f32 %v1317_v36, %v8185_v52 }
 0x1a0   : >> { %13101 = vst [vmem:[#allocation112_spill] sm:$0xff] %v8367_v24  ;;  %13102 = vst [vmem:[#allocation113_spill] sm:$0xff] %v8370_v46  ;;  %v8385_v24 = vmul.f32 %v1295_v5, %v8188_v56  ;;  %v8389_v46 = vmul.f32 %v1295_v5, %v8152_v60 }
 0x1a1   : >> { %13113 = vst [vmem:[#allocation124_spill] sm:$0xff] %v8438_v13 }
 0x1a2   : >> { %1444 = vrot.lane.b32.xlu1 %v1422_v0, %s6768_s12  ;;  %1442 = vrot.lane.b32.xlu0 %v1421_v8, %s6768_s12  ;;  %13103 = vst [vmem:[#allocation114_spill] sm:$0xff] %v8385_v24  ;;  %13104 = vst [vmem:[#allocation115_spill] sm:$0xff] %v8389_v46  ;;  %v8395_v0 = vmul.f32 %v1759_v55, %v8192_v17  ;;  %v8398_v8 = vmul.f32 %v1295_v5, %v8203_v33 }
 0x1a3   : >> { %v1426_v46 = vmul.f32 %v8210_v54, %v8206_v41  ;;  %v1425_v24 = vmul.f32 %v8210_v54, %v8192_v17  ;;  %v8410_v55 = vmul.f32 %v1295_v5, %v8206_v41  ;;  %v8424_v54 = vmul.f32 %v1317_v36, %v8149_v19 }
 0x1a4   : >> { %13105 = vst [vmem:[#allocation116_spill] sm:$0xff] %v8398_v8  ;;  %v8413_v8 = vmul.f32 %v1295_v5, %v8192_v17  ;;  %v8431_v5 = vmul.f32 %v1317_v36, %v8146_v3 }
 0x1a5   : >> { %13107 = vst [vmem:[#allocation118_spill] sm:$0xff] %v8410_v55  ;;  %13110 = vst [vmem:[#allocation121_spill] sm:$0xff] %v8424_v54  ;;  %v8427_v55 = vmul.f32 %v1317_v36, %v8152_v60  ;;  %v8441_v54 = vmul.f32 %v1317_v36, %v8188_v56 }
 0x1a6   : >> { %1448 = vrot.lane.b32.xlu1 %v1424_v44, %s6768_s12  ;;  %1446 = vrot.lane.b32.xlu0 %v1423_v9, %s6768_s12  ;;  %13108 = vst [vmem:[#allocation119_spill] sm:$0xff] %v8413_v8  ;;  %v1476_v44 = vmul.f32 %v1474_v51, %v8158_v59  ;;  %v1475_v9 = vmul.f32 %v1474_v51, %v8149_v19  ;;  %13112 = vst [vmem:[#allocation123_spill] sm:$0xff] %v8431_v5  ;;  %v1339_v8 = vstv %s1338_s22  ;;  %s2258_s22 = sld [smem:[#allocation8 + %s2257_s26]] }
 0x1a7   : >> { %13111 = vst [vmem:[#allocation122_spill] sm:$0xff] %v8427_v55  ;;  %13114 = vst [vmem:[#allocation125_spill] sm:$0xff] %v8441_v54  ;;  %v1480_v5 = vmul.f32 %v1474_v51, %v8185_v52  ;;  %v8451_v55 = vmul.f32 %v1317_v36, %v8203_v33  ;;  %v8454_v13 = vmul.f32 %v1339_v8, %v8149_v19 }
 0x1a8   : >> { %v8457_v54 = vmul.f32 %v1317_v36, %v8206_v41 }
 0x1a9   : >> { %13116 = vst [vmem:[#allocation127_spill] sm:$0xff] %v8451_v55  ;;  %13117 = vst [vmem:[#allocation128_spill] sm:$0xff] %v8454_v13  ;;  %v8467_v55 = vmul.f32 %v1339_v8, %v8158_v59  ;;  %v1532_v13 = vmul.f32 %v1531_v28, %v8149_v19  ;;  %v1534_v19 = vmul.f32 %v1531_v28, %v8146_v3 }
 0x1aa   : >> { %1452 = vrot.lane.b32.xlu1 %v1426_v46, %s6768_s12  ;;  %1450 = vrot.lane.b32.xlu0 %v1425_v24, %s6768_s12  ;;  %v1478_v24 = vmul.f32 %v1474_v51, %v8152_v60  ;;  %v1477_v46 = vmul.f32 %v1474_v51, %v8146_v3  ;;  %13118 = vst [vmem:[#allocation129_spill] sm:$0xff] %v8457_v54 }
 0x1ab   : >> { %v8480_v54 = vmul.f32 %v1339_v8, %v8203_v33 }
 0x1ae   : >> { %1495 = vrot.lane.b32.xlu1 %v1476_v44, %s6768_s12  ;;  %1493 = vrot.lane.b32.xlu0 %v1475_v9, %s6768_s12  ;;  %v1479_v44 = vmul.f32 %v1474_v51, %v8188_v56  ;;  %v8448_v9 = vmul.f32 %v1317_v36, %v8192_v17  ;;  %v1483_v36 = vmul.f32 %v1474_v51, %v8206_v41 }
 0x1b0   : >> { %13115 = vst [vmem:[#allocation126_spill] sm:$0xff] %v8448_v9  ;;  %v8464_v9 = vmul.f32 %v1339_v8, %v8146_v3  ;;  %v1538_v3 = vmul.f32 %v1531_v28, %v8203_v33 }
 0x1b2   : >> { %1499 = vrot.lane.b32.xlu1 %v1478_v24, %s6768_s12  ;;  %1497 = vrot.lane.b32.xlu0 %v1477_v46, %s6768_s12  ;;  %v1482_v24 = vmul.f32 %v1474_v51, %v8192_v17  ;;  %v1481_v46 = vmul.f32 %v1474_v51, %v8203_v33  ;;  %13119 = vst [vmem:[#allocation130_spill] sm:$0xff] %v8464_v9 }
 0x1b3   : >> { %v8483_v9 = vmul.f32 %v1339_v8, %v8185_v52  ;;  %v1533_v51 = vmul.f32 %v1531_v28, %v8158_v59  ;;  %v1537_v59 = vmul.f32 %v1531_v28, %v8185_v52  ;;  %v8649_v52 = vld [vmem:[%s8143_s30 + $0x21] sm:$0xff] }
 0x1b5   : >> { %13120 = vst [vmem:[#allocation131_spill] sm:$0xff] %v8483_v9  ;;  %v1536_v9 = vmul.f32 %v1531_v28, %v8188_v56 }
 0x1b6   : >> { %1503 = vrot.lane.b32.xlu1 %v1480_v5, %s6768_s12  ;;  %1501 = vrot.lane.b32.xlu0 %v1479_v44, %s6768_s12  ;;  %v8474_v5 = vmul.f32 %v1339_v8, %v8188_v56  ;;  %v8477_v44 = vmul.f32 %v1339_v8, %v8152_v60 }
 0x1ba   : >> { %1507 = vrot.lane.b32.xlu1 %v1482_v24, %s6768_s12  ;;  %1505 = vrot.lane.b32.xlu0 %v1481_v46, %s6768_s12  ;;  %v8490_v24 = vmul.f32 %v1339_v8, %v8206_v41  ;;  %v8493_v46 = vmul.f32 %v1339_v8, %v8192_v17  ;;  %v1540_v8 = vmul.f32 %v1531_v28, %v8206_v41 }
 0x1be   : >> { %1550 = vrot.lane.b32.xlu1 %v1532_v13, %s6768_s12  ;;  %1509 = vrot.lane.b32.xlu0 %v1483_v36, %s6768_s12  ;;  %v1535_v13 = vmul.f32 %v1531_v28, %v8152_v60  ;;  %v1539_v36 = vmul.f32 %v1531_v28, %v8192_v17  ;;  %v8646_v60 = vld [vmem:[%s8143_s30 + $0x29] sm:$0xff] }
 0x1c2   : >> { %1554 = vrot.lane.b32.xlu1 %v1534_v19, %s6768_s12  ;;  %1552 = vrot.lane.b32.xlu0 %v1533_v51, %s6768_s12 }
 0x1c6   : >> { %1558 = vrot.lane.b32.xlu1 %v1536_v9, %s6768_s12  ;;  %1556 = vrot.lane.b32.xlu0 %v1535_v13, %s6768_s12 }
 0x1ca   : >> { %1562 = vrot.lane.b32.xlu1 %v1538_v3, %s6768_s12  ;;  %1560 = vrot.lane.b32.xlu0 %v1537_v59, %s6768_s12 }
 0x1ce   : >> { %1566 = vrot.lane.b32.xlu1 %v1540_v8, %s6768_s12  ;;  %1564 = vrot.lane.b32.xlu0 %v1539_v36, %s6768_s12 }
 0x1d2   : >> { %1609 = vrot.lane.b32.xlu1 %v8227_v15, %s6769_s1  ;;  %1607 = vrot.lane.b32.xlu0 %v8230_v21, %s6769_s1  ;;  %v8660_v15 = vld [vmem:[%s8143_s30 + $0x39] sm:$0xff]  ;;  %v8663_v21 = vld [vmem:[%s8143_s30 + $0x31] sm:$0xff] }
 0x1d6   : >> { %1613 = vrot.lane.b32.xlu1 %v8233_v23, %s6769_s1  ;;  %1611 = vrot.lane.b32.xlu0 %v8236_v49, %s6769_s1 }
 0x1da   : >> { %1617 = vrot.lane.b32.xlu1 %v8239_v45, %s6769_s1  ;;  %1615 = vrot.lane.b32.xlu0 %v8242_v42, %s6769_s1 }
 0x1de   : >> { %1621 = vrot.lane.b32.xlu1 %v8245_v6, %s6769_s1  ;;  %1619 = vrot.lane.b32.xlu0 %v8248_v58, %s6769_s1 }
 0x1e2   : >> { %1664 = vrot.lane.b32.xlu1 %v8251_v34, %s6769_s1  ;;  %1623 = vrot.lane.b32.xlu0 %v8254_v35, %s6769_s1 }
 0x1e6   : >> { %1668 = vrot.lane.b32.xlu1 %v8257_v26, %s6769_s1  ;;  %1666 = vrot.lane.b32.xlu0 %v8260_v20, %s6769_s1 }
 0x1ea   : >> { %1672 = vrot.lane.b32.xlu1 %v8268_v14, %s6769_s1  ;;  %1670 = vrot.lane.b32.xlu0 %v8271_v43, %s6769_s1 }
 0x1ee   : >> { %1676 = vrot.lane.b32.xlu1 %v8274_v4, %s6769_s1  ;;  %1674 = vrot.lane.b32.xlu0 %v8278_v10, %s6769_s1  ;;  %v1974_v4 = vstv %s1973_s9  ;;  %s2525_s9 = sadd.s32 1, %s8968_s29 }
 0x1ef   : >> { %v1979_v8 = vmul.f32 %v1974_v4, %v8649_v52  ;;  %s2526_s11 = sld [smem:[#allocation8 + %s2525_s9]] }
 0x1f2   : >> { %1680 = vrot.lane.b32.xlu1 %v8281_v16, %s6769_s1  ;;  %1678 = vrot.lane.b32.xlu0 %v8284_v11, %s6769_s1  ;;  %v8678_v11 = vld [vmem:[%s8143_s30 + $0x41] sm:$0x1] }
 0x1f6   : >> { %1723 = vrot.lane.b32.xlu1 %v8287_v18, %s6769_s1  ;;  %1721 = vrot.lane.b32.xlu0 %v8290_v25, %s6769_s1 }
 0x1fa   : >> { %1727 = vrot.lane.b32.xlu1 %v8293_v2, %s6769_s1  ;;  %1725 = vrot.lane.b32.xlu0 %v8296_v61, %s6769_s1  ;;  %v8613_v2 = vld [vmem:[%s8143_s30 + $0x9] sm:$0xff] }
 0x1fb   : >> { %v1976_v13 = vmul.f32 %v1974_v4, %v8613_v2 }
 0x1fc   : >> { %v8553_v58 = vpop.permute.xlu1 %1383  ;;  %v8555_v6 = vpop.permute.xlu0 %1379 }
 0x1fd   : >> { %13121 = vst [vmem:[#allocation132_spill] sm:$0xff] %v8553_v58  ;;  %13122 = vst [vmem:[#allocation133_spill] sm:$0xff] %v8555_v6  ;;  %v13255_v58 = vld [vmem:[#allocation121_spill] sm:$0xff] }
 0x1fe   : >> { %1731 = vrot.lane.b32.xlu1 %v8299_v39, %s6769_s1  ;;  %1729 = vrot.lane.b32.xlu0 %v8302_v62, %s6769_s1  ;;  %v1917_v62 = vstv %s1916_s27  ;;  %v8616_v39 = vld [vmem:[%s8143_s30 + $0x1] sm:$0xff]  ;;  %s8926_s27 = smul.u32 3, %s2380_s18 }
 0x1ff   : >> { %v1923_v33 = vmul.f32 %v1917_v62, %v8646_v60  ;;  %v1922_v41 = vmul.f32 %v1917_v62, %v8649_v52  ;;  %v1925_v45 = vmul.f32 %v1917_v62, %v8660_v15  ;;  %v1924_v42 = vmul.f32 %v1917_v62, %v8663_v21 }
 0x200   : >> { %v8562_v35 = vpop.permute.xlu1 %1385  ;;  %v8564_v34 = vpop.permute.xlu0 %1381  ;;  %s2468_s3 = sadd.s32 1, %s8926_s27  ;;  %s9656_s28 = sld [smem:[#allocation8 + %s8926_s27]] }
 0x201   : >> { %13123 = vst [vmem:[#allocation134_spill] sm:$0xff] %v8562_v35  ;;  %13124 = vst [vmem:[#allocation135_spill] sm:$0xff] %v8564_v34  ;;  %s2469_s6 = sld [smem:[#allocation8 + %s2468_s3]]  ;;  %s1223_s3 = sadd.s32 1, %s6612_s0  }
 0x202   : >> { %1735 = vrot.lane.b32.xlu1 %v8309_v22, %s6769_s1  ;;  %1733 = vrot.lane.b32.xlu0 %v8312_v48, %s6769_s1  ;;  %p10126_p2 = scmp.ge.s32.totalorder %s1223_s3, 8   ;;  %s13557_s0 = smov %s1223_s3 }
 0x203   : > { %s2924_s8 = sld [smem:[#allocation9]] (%p10126_p2)  ;;  %vm2953_vm2 = vcmask (%p10126_p2), 531456   ;;  %vm2962_vm3 = vcmask (%p10126_p2), 524288   ;;  %s13566_s0 = sld [smem:[#allocation15_spill]] (%p10126_p2) }
 0x204   : >> { %v8572_v20 = vpop.permute.xlu1 %1389  ;;  %v8574_v26 = vpop.permute.xlu0 %1387  ;;  %s10254_s9 = sld [smem:[#allocation9 + $0x2]] (%p10126_p2) }
 0x205   : >> { %13125 = vst [vmem:[#allocation136_spill] sm:$0xff] %v8572_v20  ;;  %13126 = vst [vmem:[#allocation137_spill] sm:$0xff] %v8574_v26 }
 0x206   : >> { %1778 = vrot.lane.b32.xlu1 %v8329_v63, %s6769_s1  ;;  %1737 = vrot.lane.b32.xlu0 %v8326_v50, %s6769_s1  ;;  %v1919_v50 = vmul.f32 %v1917_v62, %v8613_v2  ;;  %v8631_v63 = vld [vmem:[%s8143_s30 + $0x19] sm:$0xff] }
 0x207   : >> { %v1978_v36 = vmul.f32 %v1974_v4, %v8631_v63 }
 0x208   : >> { %v8582_v43 = vpop.permute.xlu1 %1393  ;;  %v8584_v14 = vpop.permute.xlu0 %1391 }
 0x209   : >> { %13127 = vst [vmem:[#allocation138_spill] sm:$0xff] %v8582_v43  ;;  %13128 = vst [vmem:[#allocation139_spill] sm:$0xff] %v8584_v14 }
 0x20a   : >> { %1782 = vrot.lane.b32.xlu1 %v8341_v32, %s6769_s1  ;;  %1780 = vrot.lane.b32.xlu0 %v8344_v7, %s6769_s1  ;;  %v1918_v32 = vmul.f32 %v1917_v62, %v8616_v39  ;;  %v8634_v7 = vld [vmem:[%s8143_s30 + $0x11] sm:$0xff] }
 0x20b   : >> { %v1920_v28 = vmul.f32 %v1917_v62, %v8634_v7  ;;  %v1977_v51 = vmul.f32 %v1974_v4, %v8634_v7 }
 0x20c   : >> { %v8591_v10 = vpop.permute.xlu1 %1436  ;;  %v8593_v25 = vpop.permute.xlu0 %1395 }
 0x20d   : >> { %13129 = vst [vmem:[#allocation140_spill] sm:$0xff] %v8591_v10  ;;  %13130 = vst [vmem:[#allocation141_spill] sm:$0xff] %v8593_v25 }
 0x20e   : >> { %1786 = vrot.lane.b32.xlu1 %v8361_v40, %s6769_s1  ;;  %1784 = vrot.lane.b32.xlu0 %v8364_v27, %s6769_s1  ;;  %v1975_v40 = vmul.f32 %v1974_v4, %v8616_v39 }
 0x210   : >> { %v8603_v16 = vpop.permute.xlu1 %1440  ;;  %v8605_v61 = vpop.permute.xlu0 %1438 }
 0x212   : >> { %1790 = vrot.lane.b32.xlu1 %v8373_v37, %s6769_s1  ;;  %1788 = vrot.lane.b32.xlu0 %v8376_v57, %s6769_s1 }
 0x214   : >> { %v8618_v48 = vpop.permute.xlu1 %1444  ;;  %v8620_v22 = vpop.permute.xlu0 %1442 }
 0x216   : >> { %1794 = vrot.lane.b32.xlu1 %v8392_v30, %s6769_s1  ;;  %1792 = vrot.lane.b32.xlu0 %v8395_v0, %s6769_s1  ;;  %v1921_v30 = vmul.f32 %v1917_v62, %v8631_v63  ;;  %v1926_v0 = vmul.f32 %v1917_v62, %v8678_v11 }
 0x218   : >> { %v8636_v57 = vpop.permute.xlu1 %1448  ;;  %v8638_v27 = vpop.permute.xlu0 %1446 }
 0x21a   : >> { %1938 = vrot.lane.b32.xlu1 %v1919_v50, %s6768_s12  ;;  %1936 = vrot.lane.b32.xlu0 %v1918_v32, %s6768_s12  ;;  %v1981_v32 = vmul.f32 %v1974_v4, %v8663_v21 }
 0x21c   : >> { %v8651_v56 = vpop.permute.xlu1 %1452  ;;  %v8653_v17 = vpop.permute.xlu0 %1450 }
 0x21d   : >> { %13131 = vst [vmem:[#allocation142_spill] sm:$0xff] %v8653_v17 }
 0x21e   : >> { %1942 = vrot.lane.b32.xlu1 %v1921_v30, %s6768_s12  ;;  %1940 = vrot.lane.b32.xlu0 %v1920_v28, %s6768_s12  ;;  %v1980_v30 = vmul.f32 %v1974_v4, %v8646_v60 }
 0x220   : >> { %v8665_v23 = vpop.permute.xlu1 %1495  ;;  %v8667_v49 = vpop.permute.xlu0 %1493 }
 0x221   : >> { %13132 = vst [vmem:[#allocation143_spill] sm:$0xff] %v8665_v23  ;;  %13133 = vst [vmem:[#allocation144_spill] sm:$0xff] %v8667_v49 }
 0x222   : >> { %1946 = vrot.lane.b32.xlu1 %v1923_v33, %s6768_s12  ;;  %1944 = vrot.lane.b32.xlu0 %v1922_v41, %s6768_s12  ;;  %v1983_v41 = vmul.f32 %v1974_v4, %v8678_v11 }
 0x224   : >> { %v8680_v18 = vpop.permute.xlu1 %1499  ;;  %v8682_v37 = vpop.permute.xlu0 %1497 }
 0x225   : >> { %13134 = vst [vmem:[#allocation145_spill] sm:$0xff] %v8680_v18  ;;  %13135 = vst [vmem:[#allocation146_spill] sm:$0xff] %v8682_v37  ;;  %v8993_v37 = vld [vmem:[%s8143_s30 + $0x22] sm:$0xff] }
 0x226   : >> { %1950 = vrot.lane.b32.xlu1 %v1925_v45, %s6768_s12  ;;  %1948 = vrot.lane.b32.xlu0 %v1924_v42, %s6768_s12  ;;  %v1982_v45 = vmul.f32 %v1974_v4, %v8660_v15  ;;  %v2031_v42 = vstv %s2030_s15  ;;  %s9033_s15 = smul.u32 3, %s2424_s14  ;;  %s10452_s14 = smov (%p10126_p2), 0  }
 0x227   : >> { %v2035_v4 = vmul.f32 %v2031_v42, %v8631_v63 }
 0x228   : >> { %v8689_v9 = vpop.permute.xlu1 %1503  ;;  %v8691_v19 = vpop.permute.xlu0 %1501  ;;  %s2582_s10 = sadd.s32 1, %s9033_s15  ;;  %s2810_s26 = sadd.s32 2, %s9033_s15 }
 0x229   : >> { %13136 = vst [vmem:[#allocation147_spill] sm:$0xff] %v8689_v9  ;;  %13137 = vst [vmem:[#allocation148_spill] sm:$0xff] %v8691_v19  ;;  %v8978_v19 = vld [vmem:[%s8143_s30 + $0x12] sm:$0xff]  ;;  %v8990_v9 = vld [vmem:[%s8143_s30 + $0x2a] sm:$0xff]  ;;  %s2583_s17 = sld [smem:[#allocation8 + %s2582_s10]] }
 0x22a   : >> { %1993 = vrot.lane.b32.xlu1 %v1975_v40, %s6768_s12  ;;  %1952 = vrot.lane.b32.xlu0 %v1926_v0, %s6768_s12 }
 0x22c   : >> { %v8699_v3 = vpop.permute.xlu1 %1507  ;;  %v8701_v59 = vpop.permute.xlu0 %1505 }
 0x22d   : >> { %13138 = vst [vmem:[#allocation149_spill] sm:$0xff] %v8699_v3  ;;  %13139 = vst [vmem:[#allocation150_spill] sm:$0xff] %v8701_v59 }
 0x22e   : >> { %1997 = vrot.lane.b32.xlu1 %v1977_v51, %s6768_s12  ;;  %1995 = vrot.lane.b32.xlu0 %v1976_v13, %s6768_s12  ;;  %v2033_v51 = vmul.f32 %v2031_v42, %v8613_v2  ;;  %v2032_v13 = vmul.f32 %v2031_v42, %v8616_v39 }
 0x230   : >> { %v8708_v62 = vpop.permute.xlu1 %1550  ;;  %v8710_v50 = vpop.permute.xlu0 %1509 }
 0x231   : >> { %13140 = vst [vmem:[#allocation151_spill] sm:$0xff] %v8708_v62  ;;  %13141 = vst [vmem:[#allocation152_spill] sm:$0xff] %v8710_v50 }
 0x232   : >> { %2001 = vrot.lane.b32.xlu1 %v1979_v8, %s6768_s12  ;;  %1999 = vrot.lane.b32.xlu0 %v1978_v36, %s6768_s12 }
 0x234   : >> { %v8720_v28 = vpop.permute.xlu1 %1554  ;;  %v8722_v33 = vpop.permute.xlu0 %1552 }
 0x235   : >> { %13142 = vst [vmem:[#allocation153_spill] sm:$0xff] %v8720_v28  ;;  %13143 = vst [vmem:[#allocation154_spill] sm:$0xff] %v8722_v33 }
 0x236   : >> { %2005 = vrot.lane.b32.xlu1 %v1981_v32, %s6768_s12  ;;  %2003 = vrot.lane.b32.xlu0 %v1980_v30, %s6768_s12  ;;  %v2034_v32 = vmul.f32 %v2031_v42, %v8634_v7 }
 0x238   : >> { %v8729_v40 = vpop.permute.xlu1 %1558  ;;  %v8731_v0 = vpop.permute.xlu0 %1556 }
 0x239   : >> { %13144 = vst [vmem:[#allocation155_spill] sm:$0xff] %v8729_v40  ;;  %13145 = vst [vmem:[#allocation156_spill] sm:$0xff] %v8731_v0 }
 0x23a   : >> { %2009 = vrot.lane.b32.xlu1 %v1983_v41, %s6768_s12  ;;  %2007 = vrot.lane.b32.xlu0 %v1982_v45, %s6768_s12  ;;  %v2037_v45 = vmul.f32 %v2031_v42, %v8646_v60 }
 0x23c   : >> { %v8739_v8 = vpop.permute.xlu1 %1562  ;;  %v8741_v36 = vpop.permute.xlu0 %1560 }
 0x23d   : >> { %13146 = vst [vmem:[#allocation157_spill] sm:$0xff] %v8739_v8  ;;  %13147 = vst [vmem:[#allocation158_spill] sm:$0xff] %v8741_v36  ;;  %v2036_v36 = vmul.f32 %v2031_v42, %v8649_v52 }
 0x23e   : >> { %2052 = vrot.lane.b32.xlu1 %v2033_v51, %s6768_s12  ;;  %2050 = vrot.lane.b32.xlu0 %v2032_v13, %s6768_s12 }
 0x240   : >> { %v8748_v30 = vpop.permute.xlu1 %1566  ;;  %v8750_v41 = vpop.permute.xlu0 %1564 }
 0x241   : >> { %13148 = vst [vmem:[#allocation159_spill] sm:$0xff] %v8748_v30  ;;  %13149 = vst [vmem:[#allocation160_spill] sm:$0xff] %v8750_v41  ;;  %v2039_v30 = vmul.f32 %v2031_v42, %v8660_v15  ;;  %v2038_v41 = vmul.f32 %v2031_v42, %v8663_v21 }
 0x242   : >> { %2056 = vrot.lane.b32.xlu1 %v2035_v4, %s6768_s12  ;;  %2054 = vrot.lane.b32.xlu0 %v2034_v32, %s6768_s12  ;;  %v2088_v4 = vstv %s2087_s20  ;;  %s2639_s20 = sadd.s32 1, %s9125_s16 }
 0x243   : >> { %s2640_s21 = sld [smem:[#allocation8 + %s2639_s20]] }
 0x244   : >> { %v8756_v51 = vpop.permute.xlu1 %1609  ;;  %v8758_v13 = vpop.permute.xlu0 %1607 }
 0x245   : >> { %13150 = vst [vmem:[#allocation161_spill] sm:$0xff] %v8756_v51  ;;  %13151 = vst [vmem:[#allocation162_spill] sm:$0xff] %v8758_v13  ;;  %v2089_v13 = vmul.f32 %v2088_v4, %v8616_v39 }
 0x246   : >> { %2060 = vrot.lane.b32.xlu1 %v2037_v45, %s6768_s12  ;;  %2058 = vrot.lane.b32.xlu0 %v2036_v36, %s6768_s12  ;;  %v2040_v45 = vmul.f32 %v2031_v42, %v8678_v11  ;;  %v2093_v42 = vmul.f32 %v2088_v4, %v8649_v52 }
 0x248   : >> { %v8764_v8 = vpop.permute.xlu1 %1613  ;;  %v8766_v32 = vpop.permute.xlu0 %1611 }
 0x249   : >> { %13152 = vst [vmem:[#allocation163_spill] sm:$0xff] %v8764_v8  ;;  %13153 = vst [vmem:[#allocation164_spill] sm:$0xff] %v8766_v32  ;;  %v2091_v8 = vmul.f32 %v2088_v4, %v8634_v7  ;;  %v2090_v32 = vmul.f32 %v2088_v4, %v8613_v2 }
 0x24a   : >> { %2064 = vrot.lane.b32.xlu1 %v2039_v30, %s6768_s12  ;;  %2062 = vrot.lane.b32.xlu0 %v2038_v41, %s6768_s12  ;;  %v2092_v41 = vmul.f32 %v2088_v4, %v8631_v63 }
 0x24c   : >> { %v8772_v51 = vpop.permute.xlu1 %1617  ;;  %v8774_v36 = vpop.permute.xlu0 %1615 }
 0x24d   : >> { %13154 = vst [vmem:[#allocation165_spill] sm:$0xff] %v8772_v51  ;;  %13155 = vst [vmem:[#allocation166_spill] sm:$0xff] %v8774_v36 }
 0x24e   : >> { %2107 = vrot.lane.b32.xlu1 %v2089_v13, %s6768_s12  ;;  %2066 = vrot.lane.b32.xlu0 %v2040_v45, %s6768_s12 }
 0x250   : >> { %v8780_v0 = vpop.permute.xlu1 %1621  ;;  %v8782_v30 = vpop.permute.xlu0 %1619 }
 0x251   : >> { %13156 = vst [vmem:[#allocation167_spill] sm:$0xff] %v8780_v0  ;;  %13157 = vst [vmem:[#allocation168_spill] sm:$0xff] %v8782_v30  ;;  %v2095_v30 = vmul.f32 %v2088_v4, %v8663_v21  ;;  %v2094_v0 = vmul.f32 %v2088_v4, %v8646_v60 }
 0x252   : >> { %2111 = vrot.lane.b32.xlu1 %v2091_v8, %s6768_s12  ;;  %2109 = vrot.lane.b32.xlu0 %v2090_v32, %s6768_s12 }
 0x254   : >> { %v8789_v13 = vpop.permute.xlu1 %1664  ;;  %v8791_v45 = vpop.permute.xlu0 %1623 }
 0x255   : >> { %13158 = vst [vmem:[#allocation169_spill] sm:$0xff] %v8789_v13  ;;  %13159 = vst [vmem:[#allocation170_spill] sm:$0xff] %v8791_v45  ;;  %v2097_v13 = vmul.f32 %v2088_v4, %v8678_v11  ;;  %v2096_v45 = vmul.f32 %v2088_v4, %v8660_v15 }
 0x256   : >> { %2115 = vrot.lane.b32.xlu1 %v2093_v42, %s6768_s12  ;;  %2113 = vrot.lane.b32.xlu0 %v2092_v41, %s6768_s12  ;;  %v2145_v42 = vstv %s2144_s23  ;;  %s1826_s23 = sld [smem:[#allocation8 + %s8576_s5]] }
 0x257   : >> { %v2147_v51 = vmul.f32 %v2145_v42, %v8613_v2  ;;  %v2146_v40 = vmul.f32 %v2145_v42, %v8616_v39  ;;  %v2149_v4 = vmul.f32 %v2145_v42, %v8631_v63  ;;  %v2148_v25 = vmul.f32 %v2145_v42, %v8634_v7  ;;  %s9203_s5 = sld [smem:[#allocation8 + %s8693_s7]]  ;;  %s2696_s7 = sadd.s32 2, %s8926_s27 }
 0x258   : >> { %v8797_v8 = vpop.permute.xlu1 %1668  ;;  %v8799_v32 = vpop.permute.xlu0 %1666  ;;  %v2151_v33 = vmul.f32 %v2145_v42, %v8646_v60  ;;  %v2150_v28 = vmul.f32 %v2145_v42, %v8649_v52  ;;  %v2153_v10 = vmul.f32 %v2145_v42, %v8660_v15  ;;  %v2152_v14 = vmul.f32 %v2145_v42, %v8663_v21  ;;  %s9356_s13 = sld [smem:[#allocation8 + %s2696_s7]] }
 0x259   : >> { %s9764_s27 = sld [smem:[#allocation8 + %s8968_s29]] }
 0x25a   : >> { %2119 = vrot.lane.b32.xlu1 %v2095_v30, %s6768_s12  ;;  %2117 = vrot.lane.b32.xlu0 %v2094_v0, %s6768_s12 }
 0x25c   : >> { %v8805_v36 = vpop.permute.xlu1 %1672  ;;  %v8807_v41 = vpop.permute.xlu0 %1670 }
 0x25e   : >> { %2123 = vrot.lane.b32.xlu1 %v2097_v13, %s6768_s12  ;;  %2121 = vrot.lane.b32.xlu0 %v2096_v45, %s6768_s12 }
 0x260   : >> { %v8813_v30 = vpop.permute.xlu1 %1676  ;;  %v8815_v0 = vpop.permute.xlu0 %1674 }
 0x262   : >> { %2166 = vrot.lane.b32.xlu1 %v2147_v51, %s6769_s1  ;;  %2164 = vrot.lane.b32.xlu0 %v2146_v40, %s6769_s1 }
 0x264   : >> { %v8822_v13 = vpop.permute.xlu1 %1680  ;;  %v8824_v45 = vpop.permute.xlu0 %1678 }
 0x265   : >> { %13160 = vst [vmem:[#allocation171_spill] sm:$0xff] %v8822_v13  ;;  %13161 = vst [vmem:[#allocation172_spill] sm:$0xff] %v8824_v45  ;;  %v13225_v45 = vld [vmem:[#allocation110_spill] sm:$0xff]  ;;  %v13226_v13 = vld [vmem:[#allocation99_spill] sm:$0xff] }
 0x266   : >> { %2170 = vrot.lane.b32.xlu1 %v2149_v4, %s6769_s1  ;;  %2168 = vrot.lane.b32.xlu0 %v2148_v25, %s6769_s1  ;;  %v2202_v4 = vstv %s2201_s25 }
 0x267   : >> { %v2203_v50 = vmul.f32 %v2202_v4, %v8616_v39  ;;  %v2205_v59 = vmul.f32 %v2202_v4, %v8634_v7  ;;  %v2204_v3 = vmul.f32 %v2202_v4, %v8613_v2 }
 0x268   : >> { %v8830_v51 = vpop.permute.xlu1 %1723  ;;  %v8832_v40 = vpop.permute.xlu0 %1721 }
 0x269   : >> { %13162 = vst [vmem:[#allocation173_spill] sm:$0xff] %v8830_v51  ;;  %13163 = vst [vmem:[#allocation174_spill] sm:$0xff] %v8832_v40  ;;  %v9004_v40 = vld [vmem:[%s8143_s30 + $0x3a] sm:$0xff]  ;;  %v9007_v51 = vld [vmem:[%s8143_s30 + $0x32] sm:$0xff] }
 0x26a   : >> { %2174 = vrot.lane.b32.xlu1 %v2151_v33, %s6769_s1  ;;  %2172 = vrot.lane.b32.xlu0 %v2150_v28, %s6769_s1  ;;  %v2154_v33 = vmul.f32 %v2145_v42, %v8678_v11  ;;  %v2206_v42 = vmul.f32 %v2202_v4, %v8631_v63 }
 0x26c   : >> { %v8838_v43 = vpop.permute.xlu1 %1727  ;;  %v8840_v25 = vpop.permute.xlu0 %1725 }
 0x26d   : >> { %13164 = vst [vmem:[#allocation175_spill] sm:$0xff] %v8838_v43  ;;  %13165 = vst [vmem:[#allocation176_spill] sm:$0xff] %v8840_v25 }
 0x26e   : >> { %2178 = vrot.lane.b32.xlu1 %v2153_v10, %s6769_s1  ;;  %2176 = vrot.lane.b32.xlu0 %v2152_v14, %s6769_s1  ;;  %v2207_v14 = vmul.f32 %v2202_v4, %v8649_v52 }
 0x270   : >> { %v8846_v62 = vpop.permute.xlu1 %1731  ;;  %v8848_v28 = vpop.permute.xlu0 %1729 }
 0x271   : >> { %13166 = vst [vmem:[#allocation177_spill] sm:$0xff] %v8846_v62  ;;  %13167 = vst [vmem:[#allocation178_spill] sm:$0xff] %v8848_v28 }
 0x272   : >> { %2221 = vrot.lane.b32.xlu1 %v2203_v50, %s6769_s1  ;;  %2180 = vrot.lane.b32.xlu0 %v2154_v33, %s6769_s1 }
 0x274   : >> { %v8854_v26 = vpop.permute.xlu1 %1735  ;;  %v8856_v10 = vpop.permute.xlu0 %1733 }
 0x275   : >> { %13168 = vst [vmem:[#allocation179_spill] sm:$0xff] %v8854_v26  ;;  %13169 = vst [vmem:[#allocation180_spill] sm:$0xff] %v8856_v10  ;;  %v2209_v10 = vmul.f32 %v2202_v4, %v8663_v21  ;;  %v2208_v26 = vmul.f32 %v2202_v4, %v8646_v60 }
 0x276   : >> { %2225 = vrot.lane.b32.xlu1 %v2205_v59, %s6769_s1  ;;  %2223 = vrot.lane.b32.xlu0 %v2204_v3, %s6769_s1 }
 0x278   : >> { %v8863_v50 = vpop.permute.xlu1 %1778  ;;  %v8865_v33 = vpop.permute.xlu0 %1737 }
 0x279   : >> { %13170 = vst [vmem:[#allocation181_spill] sm:$0xff] %v8863_v50  ;;  %13171 = vst [vmem:[#allocation182_spill] sm:$0xff] %v8865_v33  ;;  %v2211_v50 = vmul.f32 %v2202_v4, %v8678_v11  ;;  %v2210_v33 = vmul.f32 %v2202_v4, %v8660_v15 }
 0x27a   : >> { %2229 = vrot.lane.b32.xlu1 %v2207_v14, %s6769_s1  ;;  %2227 = vrot.lane.b32.xlu0 %v2206_v42, %s6769_s1  ;;  %v2259_v14 = vstv %s2258_s22  ;;  %s9647_s22 = sld [smem:[#allocation8 + %s2810_s26]] }
 0x27b   : >> { %v2263_v4 = vmul.f32 %v2259_v14, %v8631_v63 }
 0x27c   : >> { %v8871_v59 = vpop.permute.xlu1 %1782  ;;  %v8873_v3 = vpop.permute.xlu0 %1780 }
 0x27d   : >> { %13172 = vst [vmem:[#allocation183_spill] sm:$0xff] %v8871_v59  ;;  %13173 = vst [vmem:[#allocation184_spill] sm:$0xff] %v8873_v3  ;;  %v2261_v59 = vmul.f32 %v2259_v14, %v8613_v2  ;;  %v2260_v3 = vmul.f32 %v2259_v14, %v8616_v39 }
 0x27e   : >> { %2233 = vrot.lane.b32.xlu1 %v2209_v10, %s6769_s1  ;;  %2231 = vrot.lane.b32.xlu0 %v2208_v26, %s6769_s1 }
 0x280   : >> { %v8879_v28 = vpop.permute.xlu1 %1786  ;;  %v8881_v42 = vpop.permute.xlu0 %1784 }
 0x281   : >> { %13174 = vst [vmem:[#allocation185_spill] sm:$0xff] %v8879_v28  ;;  %13175 = vst [vmem:[#allocation186_spill] sm:$0xff] %v8881_v42  ;;  %v2262_v42 = vmul.f32 %v2259_v14, %v8634_v7  ;;  %v2316_v28 = vstv %s2315_s4  ;;  %s2867_s4 = sadd.s32 2, %s9125_s16 }
 0x282   : >> { %2237 = vrot.lane.b32.xlu1 %v2211_v50, %s6769_s1  ;;  %2235 = vrot.lane.b32.xlu0 %v2210_v33, %s6769_s1  ;;  %s9748_s18 = sld [smem:[#allocation8 + %s2867_s4]] }
 0x284   : >> { %v8887_v10 = vpop.permute.xlu1 %1790  ;;  %v8889_v26 = vpop.permute.xlu0 %1788 }
 0x285   : >> { %13176 = vst [vmem:[#allocation187_spill] sm:$0xff] %v8887_v10  ;;  %13177 = vst [vmem:[#allocation188_spill] sm:$0xff] %v8889_v26  ;;  %v2265_v26 = vmul.f32 %v2259_v14, %v8646_v60 }
 0x286   : >> { %2280 = vrot.lane.b32.xlu1 %v2261_v59, %s6769_s1  ;;  %2278 = vrot.lane.b32.xlu0 %v2260_v3, %s6769_s1  ;;  %v2264_v59 = vmul.f32 %v2259_v14, %v8649_v52 }
 0x288   : >> { %v8896_v50 = vpop.permute.xlu1 %1794  ;;  %v8898_v33 = vpop.permute.xlu0 %1792 }
 0x289   : >> { %13178 = vst [vmem:[#allocation189_spill] sm:$0xff] %v8896_v50  ;;  %13179 = vst [vmem:[#allocation190_spill] sm:$0xff] %v8898_v33  ;;  %v2267_v50 = vmul.f32 %v2259_v14, %v8660_v15  ;;  %v2266_v33 = vmul.f32 %v2259_v14, %v8663_v21 }
 0x28a   : >> { %2284 = vrot.lane.b32.xlu1 %v2263_v4, %s6769_s1  ;;  %2282 = vrot.lane.b32.xlu0 %v2262_v42, %s6769_s1 }
 0x28c   : >> { %v8904_v10 = vpop.permute.xlu1 %1938  ;;  %v8906_v3 = vpop.permute.xlu0 %1936 }
 0x28d   : >> { %13180 = vst [vmem:[#allocation191_spill] sm:$0xff] %v8904_v10  ;;  %13181 = vst [vmem:[#allocation192_spill] sm:$0xff] %v8906_v3  ;;  %v2317_v3 = vmul.f32 %v2316_v28, %v8616_v39 }
 0x28e   : >> { %2288 = vrot.lane.b32.xlu1 %v2265_v26, %s6769_s1  ;;  %2286 = vrot.lane.b32.xlu0 %v2264_v59, %s6769_s1  ;;  %v2268_v26 = vmul.f32 %v2259_v14, %v8678_v11  ;;  %v2321_v14 = vmul.f32 %v2316_v28, %v8649_v52 }
 0x290   : >> { %v8912_v4 = vpop.permute.xlu1 %1942  ;;  %v8914_v42 = vpop.permute.xlu0 %1940 }
 0x291   : >> { %13182 = vst [vmem:[#allocation193_spill] sm:$0xff] %v8912_v4  ;;  %13183 = vst [vmem:[#allocation194_spill] sm:$0xff] %v8914_v42  ;;  %v2319_v42 = vmul.f32 %v2316_v28, %v8634_v7 }
 0x292   : >> { %2292 = vrot.lane.b32.xlu1 %v2267_v50, %s6769_s1  ;;  %2290 = vrot.lane.b32.xlu0 %v2266_v33, %s6769_s1  ;;  %v2318_v50 = vmul.f32 %v2316_v28, %v8613_v2 }
 0x294   : >> { %v8922_v59 = vpop.permute.xlu1 %1946  ;;  %v8924_v10 = vpop.permute.xlu0 %1944 }
 0x295   : >> { %13184 = vst [vmem:[#allocation195_spill] sm:$0xff] %v8922_v59  ;;  %13185 = vst [vmem:[#allocation196_spill] sm:$0xff] %v8924_v10  ;;  %v8962_v59 = vld [vmem:[%s8143_s30 + $0x2] sm:$0xff] }
 0x296   : >> { %2335 = vrot.lane.b32.xlu1 %v2317_v3, %s6769_s1  ;;  %2294 = vrot.lane.b32.xlu0 %v2268_v26, %s6769_s1  ;;  %v2320_v3 = vmul.f32 %v2316_v28, %v8631_v63 }
 0x298   : >> { %v8932_v33 = vpop.permute.xlu1 %1950  ;;  %v8934_v4 = vpop.permute.xlu0 %1948 }
 0x299   : >> { %13186 = vst [vmem:[#allocation197_spill] sm:$0xff] %v8932_v33  ;;  %13187 = vst [vmem:[#allocation198_spill] sm:$0xff] %v8934_v4  ;;  %v2323_v4 = vmul.f32 %v2316_v28, %v8663_v21 }
 0x29a   : >> { %2339 = vrot.lane.b32.xlu1 %v2319_v42, %s6769_s1  ;;  %2337 = vrot.lane.b32.xlu0 %v2318_v50, %s6769_s1  ;;  %v2322_v42 = vmul.f32 %v2316_v28, %v8646_v60 }
 0x29c   : >> { %v8941_v26 = vpop.permute.xlu1 %1993  ;;  %v8943_v10 = vpop.permute.xlu0 %1952 }
 0x29d   : >> { %13188 = vst [vmem:[#allocation199_spill] sm:$0xff] %v8941_v26  ;;  %13189 = vst [vmem:[#allocation200_spill] sm:$0xff] %v8943_v10  ;;  %v2325_v10 = vmul.f32 %v2316_v28, %v8678_v11  ;;  %v2470_v26 = vstv %s2469_s6 }
 0x29e   : >> { %2343 = vrot.lane.b32.xlu1 %v2321_v14, %s6769_s1  ;;  %2341 = vrot.lane.b32.xlu0 %v2320_v3, %s6769_s1  ;;  %v2324_v14 = vmul.f32 %v2316_v28, %v8660_v15  ;;  %v8959_v3 = vld [vmem:[%s8143_s30 + $0xa] sm:$0xff] }
 0x29f   : >> { %v2472_v28 = vmul.f32 %v2470_v26, %v8959_v3 }
 0x2a0   : >> { %v8949_v50 = vpop.permute.xlu1 %1997  ;;  %v8951_v33 = vpop.permute.xlu0 %1995 }
 0x2a2   : >> { %2347 = vrot.lane.b32.xlu1 %v2323_v4, %s6769_s1  ;;  %2345 = vrot.lane.b32.xlu0 %v2322_v42, %s6769_s1  ;;  %v2471_v4 = vmul.f32 %v2470_v26, %v8962_v59  ;;  %v8975_v42 = vld [vmem:[%s8143_s30 + $0x1a] sm:$0xff] }
 0x2a4   : >> { %v8964_v62 = vpop.permute.xlu1 %2001  ;;  %v8966_v20 = vpop.permute.xlu0 %1999 }
 0x2a5   : >> { %13190 = vst [vmem:[#allocation201_spill] sm:$0xff] %v8964_v62  ;;  %13191 = vst [vmem:[#allocation202_spill] sm:$0xff] %v8966_v20  ;;  %v13262_v62 = vld [vmem:[#allocation88_spill] sm:$0xff] }
 0x2a6   : >> { %2351 = vrot.lane.b32.xlu1 %v2325_v10, %s6769_s1  ;;  %2349 = vrot.lane.b32.xlu0 %v2324_v14, %s6769_s1  ;;  %v2474_v10 = vmul.f32 %v2470_v26, %v8975_v42  ;;  %v2473_v14 = vmul.f32 %v2470_v26, %v8978_v19 }
 0x2a8   : >> { %v8980_v25 = vpop.permute.xlu1 %2005  ;;  %v8982_v43 = vpop.permute.xlu0 %2003 }
 0x2a9   : >> { %13192 = vst [vmem:[#allocation203_spill] sm:$0xff] %v8980_v25  ;;  %13193 = vst [vmem:[#allocation204_spill] sm:$0xff] %v8982_v43 }
 0x2aa   : >> { %2491 = vrot.lane.b32.xlu1 %v2472_v28, %s6768_s12  ;;  %2489 = vrot.lane.b32.xlu0 %v2471_v4, %s6768_s12  ;;  %v2476_v28 = vmul.f32 %v2470_v26, %v8990_v9  ;;  %v2475_v4 = vmul.f32 %v2470_v26, %v8993_v37 }
 0x2ac   : >> { %v8995_v18 = vpop.permute.xlu1 %2009  ;;  %v8997_v34 = vpop.permute.xlu0 %2007 }
 0x2ad   : >> { %13194 = vst [vmem:[#allocation205_spill] sm:$0xff] %v8995_v18  ;;  %13195 = vst [vmem:[#allocation206_spill] sm:$0xff] %v8997_v34  ;;  %v2527_v34 = vstv %s2526_s11  ;;  %v9018_v18 = vld [vmem:[%s8143_s30 + $0x42] sm:$0x1]  ;;  %s10256_s11 = sld [smem:[#allocation9 + $0x3]] (%p10126_p2) }
 0x2ae   : >> { %2495 = vrot.lane.b32.xlu1 %v2474_v10, %s6768_s12  ;;  %2493 = vrot.lane.b32.xlu0 %v2473_v14, %s6768_s12  ;;  %v2478_v10 = vmul.f32 %v2470_v26, %v9004_v40  ;;  %v2477_v14 = vmul.f32 %v2470_v26, %v9007_v51 }
 0x2b0   : >> { %v9009_v35 = vpop.permute.xlu1 %2052  ;;  %v9011_v43 = vpop.permute.xlu0 %2050 }
 0x2b1   : >> { %13196 = vst [vmem:[#allocation207_spill] sm:$0xff] %v9009_v35  ;;  %13197 = vst [vmem:[#allocation208_spill] sm:$0xff] %v9011_v43 }
 0x2b2   : >> { %2499 = vrot.lane.b32.xlu1 %v2476_v28, %s6768_s12  ;;  %2497 = vrot.lane.b32.xlu0 %v2475_v4, %s6768_s12  ;;  %v2528_v28 = vmul.f32 %v2527_v34, %v8962_v59  ;;  %v2479_v4 = vmul.f32 %v2470_v26, %v9018_v18  ;;  %v2532_v26 = vmul.f32 %v2527_v34, %v8993_v37 }
 0x2b4   : >> { %v9020_v25 = vpop.permute.xlu1 %2056  ;;  %v9022_v6 = vpop.permute.xlu0 %2054 }
 0x2b5   : >> { %13198 = vst [vmem:[#allocation209_spill] sm:$0xff] %v9020_v25  ;;  %13199 = vst [vmem:[#allocation210_spill] sm:$0xff] %v9022_v6  ;;  %v2530_v6 = vmul.f32 %v2527_v34, %v8978_v19 }
 0x2b6   : >> { %2503 = vrot.lane.b32.xlu1 %v2478_v10, %s6768_s12  ;;  %2501 = vrot.lane.b32.xlu0 %v2477_v14, %s6768_s12  ;;  %v2529_v10 = vmul.f32 %v2527_v34, %v8959_v3 }
 0x2b8   : >> { %v9029_v43 = vpop.permute.xlu1 %2060  ;;  %v9031_v35 = vpop.permute.xlu0 %2058 }
 0x2b9   : >> { %13200 = vst [vmem:[#allocation211_spill] sm:$0xff] %v9029_v43  ;;  %13201 = vst [vmem:[#allocation212_spill] sm:$0xff] %v9031_v35  ;;  %v2531_v35 = vmul.f32 %v2527_v34, %v8975_v42 }
 0x2ba   : >> { %2546 = vrot.lane.b32.xlu1 %v2528_v28, %s6768_s12  ;;  %2505 = vrot.lane.b32.xlu0 %v2479_v4, %s6768_s12  ;;  %v9050_v28 = vadd.f32 %v6600_v12, %v8162_v1  ;;  %v9054_v4 = vadd.f32 %v6608_v47, %v8166_v38  ;;  %v2534_v12 = vmul.f32 %v2527_v34, %v9007_v51  ;;  %v13211_v1 = vld [vmem:[#allocation106_spill] sm:$0xff]  ;;  %v13212_v38 = vld [vmem:[#allocation103_spill] sm:$0xff] }
 0x2bb   : >> { %v2533_v47 = vmul.f32 %v2527_v34, %v8990_v9 }
 0x2bc   : >> { %v9039_v14 = vpop.permute.xlu1 %2064  ;;  %v9041_v25 = vpop.permute.xlu0 %2062  ;;  %13204 = vst [vmem:[#allocation215_spill] sm:$0xff] %v9050_v28  ;;  %13205 = vst [vmem:[#allocation216_spill] sm:$0xff] %v9054_v4  ;;  %v13218_v4 = vld [vmem:[#allocation101_spill] sm:$0xff]  ;;  %v13258_v28 = vld [vmem:[#allocation122_spill] sm:$0xff] }
 0x2bd   : >> { %13202 = vst [vmem:[#allocation213_spill] sm:$0xff] %v9039_v14  ;;  %13203 = vst [vmem:[#allocation214_spill] sm:$0xff] %v9041_v25  ;;  %v9058_v25 = vadd.f32 %v6596_v53, %v8170_v29  ;;  %v13209_v14 = vld [vmem:[#allocation105_spill] sm:$0xff]  ;;  %v9074_v53 = vadd.f32 %v13212_v38, %v13211_v1  ;;  %v13214_v29 = vld [vmem:[#allocation107_spill] sm:$0xff]  ;;  %v9094_v1 = vadd.f32 %v13226_v13, %v13225_v45 }
 0x2be   : >> { %2550 = vrot.lane.b32.xlu1 %v2530_v6, %s6768_s12  ;;  %2548 = vrot.lane.b32.xlu0 %v2529_v10, %s6768_s12  ;;  %v9066_v43 = vadd.f32 %v13209_v14, %v8306_v31  ;;  %v13220_v14 = vld [vmem:[#allocation109_spill] sm:$0xff]  ;;  %v13228_v38 = vld [vmem:[#allocation111_spill] sm:$0xff]  ;;  %v13234_v13 = vld [vmem:[#allocation98_spill] sm:$0xff] }
 0x2bf   : >> { %13206 = vst [vmem:[#allocation217_spill] sm:$0xff] %v9058_v25  ;;  %13213 = vst [vmem:[#allocation106_spill] sm:$0xff] %v9074_v53 }
 0x2c0   : >> { %v9060_v6 = vpop.permute.xlu1 %2107  ;;  %v9062_v10 = vpop.permute.xlu0 %2066  ;;  %13210 = vst [vmem:[#allocation105_spill] sm:$0xff] %v9066_v43  ;;  %13227 = vst [vmem:[#allocation109_spill] sm:$0xff] %v9094_v1  ;;  %v13235_v1 = vld [vmem:[#allocation114_spill] sm:$0xff] }
 0x2c1   : >> { %13207 = vst [vmem:[#allocation218_spill] sm:$0xff] %v9060_v6  ;;  %13208 = vst [vmem:[#allocation219_spill] sm:$0xff] %v9062_v10  ;;  %v13215_v6 = vld [vmem:[#allocation104_spill] sm:$0xff] }
 0x2c2   : >> { %2554 = vrot.lane.b32.xlu1 %v2532_v26, %s6768_s12  ;;  %2552 = vrot.lane.b32.xlu0 %v2531_v35, %s6768_s12  ;;  %v9078_v25 = vadd.f32 %v13215_v6, %v13214_v29  ;;  %v13217_v10 = vld [vmem:[#allocation108_spill] sm:$0xff]  ;;  %v13221_v26 = vld [vmem:[#allocation102_spill] sm:$0xff] }
 0x2c3   : >> { %v9082_v31 = vadd.f32 %v13218_v4, %v13217_v10  ;;  %v9086_v43 = vadd.f32 %v13221_v26, %v13220_v14  ;;  %v13229_v6 = vld [vmem:[#allocation100_spill] sm:$0xff]  ;;  %v2536_v4 = vmul.f32 %v2527_v34, %v9018_v18  ;;  %v2535_v10 = vmul.f32 %v2527_v34, %v9004_v40  ;;  %v13232_v26 = vld [vmem:[#allocation97_spill] sm:$0xff] }
 0x2c4   : >> { %13216 = vst [vmem:[#allocation103_spill] sm:$0xff] %v9078_v25  ;;  %v9088_v35 = vpop.permute.xlu1 %2111  ;;  %v9090_v49 = vpop.permute.xlu0 %2109  ;;  %v9099_v29 = vadd.f32 %v13229_v6, %v13228_v38  ;;  %v13231_v14 = vld [vmem:[#allocation112_spill] sm:$0xff]  ;;  %v2584_v6 = vstv %s2583_s17 }
 0x2c5   : >> { %13219 = vst [vmem:[#allocation107_spill] sm:$0xff] %v9082_v31  ;;  %13222 = vst [vmem:[#allocation104_spill] sm:$0xff] %v9086_v43  ;;  %v13236_v43 = vld [vmem:[#allocation95_spill] sm:$0xff] }
 0x2c6   : >> { %13223 = vst [vmem:[#allocation108_spill] sm:$0xff] %v9088_v35  ;;  %13224 = vst [vmem:[#allocation101_spill] sm:$0xff] %v9090_v49  ;;  %2558 = vrot.lane.b32.xlu1 %v2534_v12, %s6768_s12  ;;  %2556 = vrot.lane.b32.xlu0 %v2533_v47, %s6768_s12  ;;  %v9107_v49 = vadd.f32 %v13232_v26, %v13231_v14  ;;  %v13233_v35 = vld [vmem:[#allocation113_spill] sm:$0xff]  ;;  %v9115_v38 = vadd.f32 %v13236_v43, %v13235_v1  ;;  %v13237_v12 = vld [vmem:[#allocation115_spill] sm:$0xff] }
 0x2c7   : >> { %13230 = vst [vmem:[#allocation102_spill] sm:$0xff] %v9099_v29  ;;  %v9111_v45 = vadd.f32 %v13234_v13, %v13233_v35  ;;  %v13238_v29 = vld [vmem:[#allocation96_spill] sm:$0xff]  ;;  %v2586_v35 = vmul.f32 %v2584_v6, %v8959_v3  ;;  %v2585_v43 = vmul.f32 %v2584_v6, %v8962_v59  ;;  %v13242_v14 = vld [vmem:[#allocation93_spill] sm:$0xff]  ;;  %v13244_v13 = vld [vmem:[#allocation94_spill] sm:$0xff] }
 0x2c8   : >> { %v9119_v47 = vadd.f32 %v13238_v29, %v13237_v12  ;;  %v9121_v31 = vpop.permute.xlu1 %2115  ;;  %v9123_v34 = vpop.permute.xlu0 %2113  ;;  %v13241_v1 = vld [vmem:[#allocation116_spill] sm:$0xff]  ;;  %v13243_v29 = vld [vmem:[#allocation117_spill] sm:$0xff] }
 0x2c9   : >> { %13239 = vst [vmem:[#allocation110_spill] sm:$0xff] %v9121_v31  ;;  %13240 = vst [vmem:[#allocation99_spill] sm:$0xff] %v9123_v34  ;;  %v9133_v26 = vadd.f32 %v13242_v14, %v13241_v1  ;;  %v9137_v12 = vadd.f32 %v13244_v13, %v13243_v29  ;;  %v2588_v1 = vmul.f32 %v2584_v6, %v8975_v42  ;;  %v13249_v29 = vld [vmem:[#allocation119_spill] sm:$0xff]  ;;  %v13250_v13 = vld [vmem:[#allocation92_spill] sm:$0xff] }
 0x2ca   : >> { %2562 = vrot.lane.b32.xlu1 %v2536_v4, %s6768_s12  ;;  %2560 = vrot.lane.b32.xlu0 %v2535_v10, %s6768_s12  ;;  %v13247_v4 = vld [vmem:[#allocation118_spill] sm:$0xff]  ;;  %v13248_v10 = vld [vmem:[#allocation91_spill] sm:$0xff]  ;;  %v2587_v14 = vmul.f32 %v2584_v6, %v8978_v19  ;;  %v9154_v53 = vadd.f32 %v13250_v13, %v13249_v29  ;;  %v13264_v29 = vld [vmem:[#allocation124_spill] sm:$0xff] }
 0x2cb   : >> { %v9146_v25 = vadd.f32 %v13248_v10, %v13247_v4  ;;  %v13256_v4 = vld [vmem:[#allocation90_spill] sm:$0xff]  ;;  %v13265_v13 = vld [vmem:[#allocation85_spill] sm:$0xff] }
 0x2cc   : >> { %v9139_v34 = vpop.permute.xlu1 %2119  ;;  %v9141_v31 = vpop.permute.xlu0 %2117  ;;  %13251 = vst [vmem:[#allocation112_spill] sm:$0xff] %v9154_v53  ;;  %v9162_v10 = vadd.f32 %v13256_v4, %v13255_v58  ;;  %v9174_v53 = vadd.f32 %v13265_v13, %v13264_v29  ;;  %v13269_v58 = vld [vmem:[#allocation125_spill] sm:$0xff]  ;;  %v13270_v4 = vld [vmem:[#allocation86_spill] sm:$0xff]  ;;  %v13275_v13 = vld [vmem:[#allocation127_spill] sm:$0xff] }
 0x2cd   : >> { %13245 = vst [vmem:[#allocation111_spill] sm:$0xff] %v9139_v34  ;;  %13246 = vst [vmem:[#allocation100_spill] sm:$0xff] %v9141_v31  ;;  %v13252_v34 = vld [vmem:[#allocation120_spill] sm:$0xff]  ;;  %v13253_v31 = vld [vmem:[#allocation89_spill] sm:$0xff] }
 0x2ce   : >> { %2605 = vrot.lane.b32.xlu1 %v2586_v35, %s6768_s12  ;;  %2603 = vrot.lane.b32.xlu0 %v2585_v43, %s6768_s12  ;;  %v9158_v23 = vadd.f32 %v13253_v31, %v13252_v34  ;;  %13257 = vst [vmem:[#allocation113_spill] sm:$0xff] %v9162_v10  ;;  %v13259_v35 = vld [vmem:[#allocation87_spill] sm:$0xff]  ;;  %13266 = vst [vmem:[#allocation95_spill] sm:$0xff] %v9174_v53  ;;  %v9183_v10 = vadd.f32 %v13270_v4, %v13269_v58  ;;  %v13280_v4 = vld [vmem:[#allocation128_spill] sm:$0xff] }
 0x2cf   : >> { %v9166_v20 = vadd.f32 %v13259_v35, %v13258_v28  ;;  %v13261_v43 = vld [vmem:[#allocation123_spill] sm:$0xff]  ;;  %v2589_v28 = vmul.f32 %v2584_v6, %v8993_v37  ;;  %v13272_v35 = vld [vmem:[#allocation126_spill] sm:$0xff] }
 0x2d0   : >> { %13254 = vst [vmem:[#allocation97_spill] sm:$0xff] %v9158_v23  ;;  %v9170_v17 = vadd.f32 %v13262_v62, %v13261_v43  ;;  %v9177_v31 = vpop.permute.xlu1 %2123  ;;  %v9179_v34 = vpop.permute.xlu0 %2121  ;;  %13271 = vst [vmem:[#allocation116_spill] sm:$0xff] %v9183_v10  ;;  %v2590_v62 = vmul.f32 %v2584_v6, %v8990_v9  ;;  %v13273_v43 = vld [vmem:[#allocation83_spill] sm:$0xff] }
 0x2d1   : >> { %13260 = vst [vmem:[#allocation98_spill] sm:$0xff] %v9166_v20  ;;  %13267 = vst [vmem:[#allocation115_spill] sm:$0xff] %v9177_v31  ;;  %v9192_v29 = vadd.f32 %v13273_v43, %v13272_v35  ;;  %v13276_v31 = vld [vmem:[#allocation84_spill] sm:$0xff]  ;;  %v13281_v35 = vld [vmem:[#allocation81_spill] sm:$0xff] }
 0x2d2   : >> { %13263 = vst [vmem:[#allocation114_spill] sm:$0xff] %v9170_v17  ;;  %13268 = vst [vmem:[#allocation96_spill] sm:$0xff] %v9179_v34  ;;  %2609 = vrot.lane.b32.xlu1 %v2588_v1, %s6768_s12  ;;  %2607 = vrot.lane.b32.xlu0 %v2587_v14, %s6768_s12  ;;  %v9196_v34 = vadd.f32 %v13276_v31, %v13275_v13  ;;  %v2592_v1 = vmul.f32 %v2584_v6, %v9004_v40  ;;  %v13282_v31 = vld [vmem:[#allocation129_spill] sm:$0xff]  ;;  %v13283_v13 = vld [vmem:[#allocation82_spill] sm:$0xff] }
 0x2d3   : >> { %13274 = vst [vmem:[#allocation93_spill] sm:$0xff] %v9192_v29  ;;  %v2591_v14 = vmul.f32 %v2584_v6, %v9007_v51  ;;  %v9211_v43 = vadd.f32 %v13281_v35, %v13280_v4  ;;  %v13286_v29 = vld [vmem:[#allocation79_spill] sm:$0xff]  ;;  %v13290_v20 = vld [vmem:[#allocation80_spill] sm:$0xff]  ;;  %v13291_v4 = vld [vmem:[#allocation77_spill] sm:$0xff] }
 0x2d4   : >> { %13277 = vst [vmem:[#allocation117_spill] sm:$0xff] %v9196_v34  ;;  %v9198_v53 = vpop.permute.xlu1 %2166  ;;  %v9200_v58 = vpop.permute.xlu0 %2164  ;;  %v9215_v34 = vadd.f32 %v13283_v13, %v13282_v31  ;;  %v9229_v23 = vadd.f32 %v13290_v20, %v8467_v55  ;;  %v9233_v35 = vadd.f32 %v13291_v4, %v8474_v5  ;;  %v13292_v31 = vld [vmem:[#allocation78_spill] sm:$0xff]  ;;  %v2593_v5 = vmul.f32 %v2584_v6, %v9018_v18 }
 0x2d5   : >> { %13278 = vst [vmem:[#allocation94_spill] sm:$0xff] %v9198_v53  ;;  %13279 = vst [vmem:[#allocation118_spill] sm:$0xff] %v9200_v58  ;;  %v9217_v53 = vstv %s2640_s21  ;;  %v13285_v58 = vld [vmem:[#allocation130_spill] sm:$0xff]  ;;  %v9237_v13 = vadd.f32 %v13292_v31, %v8477_v44  ;;  %v13296_v44 = vld [vmem:[#allocation73_spill] sm:$0xff] }
 0x2d6   : >> { %2613 = vrot.lane.b32.xlu1 %v2590_v62, %s6768_s12  ;;  %2611 = vrot.lane.b32.xlu0 %v2589_v28, %s6768_s12  ;;  %13284 = vst [vmem:[#allocation91_spill] sm:$0xff] %v9215_v34  ;;  %v9221_v10 = vadd.f32 %v13286_v29, %v13285_v58  ;;  %v1827_v62 = vstv %s1826_s23  ;;  %v13293_v29 = vld [vmem:[#allocation75_spill] sm:$0xff]  ;;  %v1850_v34 = vstv %s1849_s24  ;;  %v2642_v55 = vmul.f32 %v9217_v53, %v8962_v59 }
 0x2d7   : >> { %v9241_v58 = vadd.f32 %v13293_v29, %v8480_v54  ;;  %v9254_v20 = vadd.f32 %v13296_v44, %v8490_v24  ;;  %v13297_v54 = vld [vmem:[#allocation74_spill] sm:$0xff]  ;;  %v9270_v6 = vmul.f32 %v1827_v62, %v8634_v7  ;;  %v9273_v24 = vmul.f32 %v1827_v62, %v8646_v60 }
 0x2d8   : >> { %13287 = vst [vmem:[#allocation119_spill] sm:$0xff] %v9221_v10  ;;  %v9223_v28 = vpop.permute.xlu1 %2170  ;;  %v9225_v17 = vpop.permute.xlu0 %2168  ;;  %v13295_v10 = vld [vmem:[#allocation76_spill] sm:$0xff]  ;;  %v9258_v4 = vadd.f32 %v13297_v54, %v8493_v46  ;;  %v9286_v29 = vmul.f32 %v1827_v62, %v8660_v15  ;;  %v9289_v44 = vmul.f32 %v1827_v62, %v8663_v21  ;;  %v9292_v54 = vmul.f32 %v1850_v34, %v8616_v39 }
 0x2d9   : >> { %13288 = vst [vmem:[#allocation92_spill] sm:$0xff] %v9223_v28  ;;  %13289 = vst [vmem:[#allocation120_spill] sm:$0xff] %v9225_v17  ;;  %v13294_v28 = vld [vmem:[#allocation131_spill] sm:$0xff] }
 0x2da   : >> { %v9245_v17 = vadd.f32 %v13295_v10, %v13294_v28  ;;  %2617 = vrot.lane.b32.xlu1 %v2592_v1, %s6768_s12  ;;  %2615 = vrot.lane.b32.xlu0 %v2591_v14, %s6768_s12  ;;  %v9261_v10 = vmul.f32 %v1827_v62, %v8613_v2  ;;  %v9264_v1 = vmul.f32 %v1827_v62, %v8616_v39 }
 0x2db   : >> { %v9267_v14 = vmul.f32 %v1827_v62, %v8631_v63  ;;  %13301 = vst [vmem:[#allocation122_spill] sm:$0xff] %v9270_v6  ;;  %13302 = vst [vmem:[#allocation87_spill] sm:$0xff] %v9273_v24  ;;  %v9276_v28 = vmul.f32 %v1827_v62, %v8649_v52  ;;  %v9295_v24 = vmul.f32 %v1827_v62, %v8678_v11  ;;  %v1873_v6 = vstv %s9203_s5 }
 0x2dc   : >> { %13298 = vst [vmem:[#allocation89_spill] sm:$0xff] %v9261_v10  ;;  %13299 = vst [vmem:[#allocation121_spill] sm:$0xff] %v9264_v1  ;;  %v9281_v46 = vpop.permute.xlu1 %2174  ;;  %v9283_v31 = vpop.permute.xlu0 %2172  ;;  %v1465_v39 = vadd.f32 %v8603_v16, %v9107_v49  ;;  %v1464_v62 = vadd.f32 %v8605_v61, %v9111_v45  ;;  %v9329_v45 = vmul.f32 %v1850_v34, %v8660_v15  ;;  %v6055_v1 = vld [vmem:[%s8143_s30 + $0x1] sm:$0xff] }
 0x2dd   : >> { %13300 = vst [vmem:[#allocation90_spill] sm:$0xff] %v9267_v14  ;;  %13303 = vst [vmem:[#allocation123_spill] sm:$0xff] %v9276_v28  ;;  %v1853_v28 = vmul.f32 %v1850_v34, %v8634_v7  ;;  %v9338_v10 = vmul.f32 %v6055_v1, %v1873_v6  ;;  %v2645_v15 = vmul.f32 %v9217_v53, %v8975_v42 }
 0x2de   : >> { %13304 = vst [vmem:[#allocation88_spill] sm:$0xff] %v9281_v46  ;;  %13305 = vst [vmem:[#allocation124_spill] sm:$0xff] %v9283_v31  ;;  %2660 = vrot.lane.b32.xlu1 %v2642_v55, %s6768_s12  ;;  %2619 = vrot.lane.b32.xlu0 %v2593_v5, %s6768_s12  ;;  %v2644_v31 = vmul.f32 %v9217_v53, %v8978_v19  ;;  %v2643_v46 = vmul.f32 %v9217_v53, %v8959_v3 }
 0x2df   : >> { %13306 = vst [vmem:[#allocation85_spill] sm:$0xff] %v9286_v29  ;;  %13307 = vst [vmem:[#allocation125_spill] sm:$0xff] %v9289_v44  ;;  %v1855_v55 = vmul.f32 %v1850_v34, %v8649_v52  ;;  %v1854_v5 = vmul.f32 %v1850_v34, %v8631_v63  ;;  %v9316_v44 = vmul.f32 %v1850_v34, %v8646_v60 }
 0x2e0   : >> { %13308 = vst [vmem:[#allocation86_spill] sm:$0xff] %v9292_v54  ;;  %13309 = vst [vmem:[#allocation126_spill] sm:$0xff] %v9295_v24  ;;  %v1852_v24 = vmul.f32 %v1850_v34, %v8613_v2  ;;  %v9313_v54 = vmul.f32 %v1850_v34, %v8663_v21  ;;  %v9319_v29 = vmul.f32 %v1850_v34, %v8678_v11  ;;  %v9321_v16 = vpop.permute.xlu1 %2178  ;;  %v9323_v49 = vpop.permute.xlu0 %2176  ;;  %v9332_v21 = vld [vmem:[%s8143_s30 + $0x9] sm:$0xff] }
 0x2e1   : >> { %13310 = vst [vmem:[#allocation83_spill] sm:$0xff] %v9323_v49  ;;  %v1693_v61 = vadd.f32 %v8797_v8, %v1465_v39  ;;  %v1692_v2 = vadd.f32 %v8799_v32, %v1464_v62  ;;  %v9335_v14 = vmul.f32 %v9332_v21, %v1873_v6  ;;  %v2646_v8 = vmul.f32 %v9217_v53, %v8993_v37 }
 0x2e2   : >> { %2664 = vrot.lane.b32.xlu1 %v2644_v31, %s6768_s12  ;;  %2662 = vrot.lane.b32.xlu0 %v2643_v46, %s6768_s12  ;;  %v1467_v32 = vadd.f32 %v8618_v48, %v9115_v38  ;;  %v1466_v34 = vadd.f32 %v8620_v22, %v9119_v47  ;;  %v9351_v39 = vmul.f32 %v1873_v6, %v8631_v63  ;;  %v9367_v38 = vstv %s9279_s2 }
 0x2e3   : >> { %v9354_v62 = vmul.f32 %v1873_v6, %v8634_v7  ;;  %v1469_v46 = vadd.f32 %v8636_v57, %v9133_v26  ;;  %v9361_v31 = vmul.f32 %v1873_v6, %v8646_v60  ;;  %v9364_v48 = vmul.f32 %v1873_v6, %v8649_v52 }
 0x2e4   : >> { %v9369_v22 = vpop.permute.xlu1 %2221  ;;  %v9371_v63 = vpop.permute.xlu0 %2180  ;;  %v1695_v7 = vadd.f32 %v8805_v36, %v1467_v32  ;;  %v1694_v47 = vadd.f32 %v8807_v41, %v1466_v34  ;;  %v1862_v49 = vadd.f32 %v1853_v28, %v1693_v61  ;;  %v1861_v57 = vadd.f32 %v1852_v24, %v1692_v2  ;;  %v9386_v41 = vld [vmem:[%s8143_s30 + $0x39] sm:$0xff] }
 0x2e5   : >> { %13311 = vst [vmem:[#allocation127_spill] sm:$0xff] %v9371_v63  ;;  %v1468_v60 = vadd.f32 %v8638_v27, %v9137_v12  ;;  %v2648_v52 = vmul.f32 %v9217_v53, %v9007_v51  ;;  %v2647_v26 = vmul.f32 %v9217_v53, %v8990_v9  ;;  %v9389_v24 = vmul.f32 %v9386_v41, %v1873_v6  ;;  %v9392_v27 = vld [vmem:[%s8143_s30 + $0x31] sm:$0xff] }
 0x2e6   : >> { %2668 = vrot.lane.b32.xlu1 %v2646_v8, %s6768_s12  ;;  %2666 = vrot.lane.b32.xlu0 %v2645_v15, %s6768_s12  ;;  %v2022_v63 = vadd.f32 %v8949_v50, %v1862_v49  ;;  %v2021_v36 = vadd.f32 %v8951_v33, %v1861_v57  ;;  %v9395_v12 = vmul.f32 %v9392_v27, %v1873_v6 }
 0x2e7   : >> { %v1697_v28 = vadd.f32 %v8813_v30, %v1469_v46  ;;  %v1696_v61 = vadd.f32 %v8815_v0, %v1468_v60  ;;  %v9400_v2 = vmul.f32 %v6055_v1, %v9367_v38  ;;  %v9403_v33 = vmul.f32 %v1873_v6, %v8678_v11  ;;  %v13313_v1 = vld [vmem:[#allocation112_spill] sm:$0xff]  ;;  %v13314_v6 = vld [vmem:[#allocation142_spill] sm:$0xff]  ;;  %v13319_v60 = vld [vmem:[#allocation97_spill] sm:$0xff] }
 0x2e8   : >> { %v2226_v50 = vpop.permute.xlu1 %2225  ;;  %v2224_v49 = vpop.permute.xlu0 %2223  ;;  %v1864_v8 = vadd.f32 %v1855_v55, %v1695_v7  ;;  %v1863_v15 = vadd.f32 %v1854_v5, %v1694_v47  ;;  %v1471_v30 = vadd.f32 %v8651_v56, %v9146_v25  ;;  %v2650_v0 = vmul.f32 %v9217_v53, %v9018_v18  ;;  %v13315_v5 = vld [vmem:[#allocation201_spill] sm:$0xff]  ;;  %v13317_v56 = vld [vmem:[#allocation215_spill] sm:$0xff]  ;;  %v13318_v25 = vld [vmem:[#allocation132_spill] sm:$0xff] }
 0x2e9   : >> { %v9405_v32 = vadd.f32 %v2226_v50, %v2022_v63  ;;  %v9407_v34 = vadd.f32 %v2224_v49, %v2021_v36  ;;  %v2649_v11 = vmul.f32 %v9217_v53, %v9004_v40  ;;  %v1470_v55 = vadd.f32 %v13314_v6, %v13313_v1  ;;  %v13316_v63 = vld [vmem:[#allocation202_spill] sm:$0xff]  ;;  %v13321_v1 = vld [vmem:[#allocation171_spill] sm:$0xff]  ;;  %v13322_v6 = vld [vmem:[#allocation172_spill] sm:$0xff] }
 0x2ea   : >> { %2672 = vrot.lane.b32.xlu1 %v2648_v52, %s6768_s12  ;;  %2670 = vrot.lane.b32.xlu0 %v2647_v26, %s6768_s12  ;;  %v2024_v46 = vadd.f32 %v13315_v5, %v1864_v8  ;;  %v2023_v7 = vadd.f32 %v13316_v63, %v1863_v15  ;;  %v9422_v47 = vstv %s9356_s13  ;;  %v9426_v57 = vadd.f32 %v13318_v25, %v13317_v56  ;;  %v13320_v52 = vld [vmem:[#allocation143_spill] sm:$0xff]  ;;  %v13324_v56 = vld [vmem:[#allocation113_spill] sm:$0xff]  ;;  %v13325_v25 = vld [vmem:[#allocation144_spill] sm:$0xff] }
 0x2eb   : >> { %13312 = vst [vmem:[#allocation84_spill] sm:$0xff] %v9407_v34  ;;  %v1521_v26 = vadd.f32 %v13320_v52, %v13319_v60  ;;  %v1866_v36 = vadd.f32 %v9313_v54, %v1697_v28  ;;  %v1865_v53 = vadd.f32 %v9316_v44, %v1696_v61  ;;  %v1699_v8 = vadd.f32 %v13321_v1, %v1471_v30  ;;  %v13326_v28 = vld [vmem:[#allocation216_spill] sm:$0xff]  ;;  %v13327_v61 = vld [vmem:[#allocation133_spill] sm:$0xff] }
 0x2ec   : >> { %v2230_v50 = vpop.permute.xlu1 %2229  ;;  %v2228_v49 = vpop.permute.xlu0 %2227  ;;  %v1698_v15 = vadd.f32 %v13322_v6, %v1470_v55  ;;  %v1520_v34 = vadd.f32 %v13325_v25, %v13324_v56  ;;  %v2700_v44 = vmul.f32 %v9422_v47, %v8959_v3  ;;  %v2699_v54 = vmul.f32 %v9422_v47, %v8962_v59  ;;  %v13328_v55 = vld [vmem:[#allocation203_spill] sm:$0xff]  ;;  %v6058_v52 = vld [vmem:[%s8143_s30 + $0x11] sm:$0xff]  ;;  %v13333_v56 = vld [vmem:[#allocation174_spill] sm:$0xff] }
 0x2ed   : >> { %v9434_v5 = vadd.f32 %v2230_v50, %v2024_v46  ;;  %v9436_v63 = vadd.f32 %v2228_v49, %v2023_v7  ;;  %v9448_v30 = vadd.f32 %v13327_v61, %v13326_v28  ;;  %v2026_v46 = vadd.f32 %v13328_v55, %v1866_v36  ;;  %v13329_v7 = vld [vmem:[#allocation204_spill] sm:$0xff]  ;;  %v13332_v1 = vld [vmem:[#allocation173_spill] sm:$0xff] }
 0x2ee   : >> { %2676 = vrot.lane.b32.xlu1 %v2650_v0, %s6768_s12  ;;  %2674 = vrot.lane.b32.xlu0 %v2649_v11, %s6768_s12  ;;  %v2025_v60 = vadd.f32 %v13329_v7, %v1865_v53  ;;  %v9454_v50 = vmul.f32 %v6058_v52, %v9367_v38  ;;  %v13330_v0 = vld [vmem:[#allocation217_spill] sm:$0xff]  ;;  %v13331_v11 = vld [vmem:[#allocation134_spill] sm:$0xff]  ;;  %v1749_v6 = vadd.f32 %v13332_v1, %v1521_v26  ;;  %s2753_s12 = sadd.s32 2, %s8968_s29  ;;  %v13337_v26 = vld [vmem:[#allocation135_spill] sm:$0xff]  ;;  %s5333_s29 = sld [smem:[#allocation9 + $0x1]] (%p10126_p2) }
 0x2ef   : >> { %13323 = vst [vmem:[#allocation128_spill] sm:$0xff] %v9436_v63  ;;  %v9458_v49 = vadd.f32 %v13331_v11, %v13330_v0  ;;  %v1748_v25 = vadd.f32 %v13333_v56, %v1520_v34  ;;  %v9464_v28 = vmul.f32 %v9332_v21, %v9367_v38  ;;  %v1868_v53 = vadd.f32 %v9319_v29, %v1699_v8  ;;  %v13336_v0 = vld [vmem:[#allocation105_spill] sm:$0xff]  ;;  %s9489_s25 = sld [smem:[#allocation8 + %s2753_s12]] }
 0x2f0   : >> { %v2234_v61 = vpop.permute.xlu1 %2233  ;;  %v2232_v36 = vpop.permute.xlu0 %2231  ;;  %v1867_v55 = vadd.f32 %v9329_v45, %v1698_v15  ;;  %v9475_v11 = vadd.f32 %v13337_v26, %v13336_v0  ;;  %v2702_v21 = vmul.f32 %v9422_v47, %v8975_v42  ;;  %v2701_v29 = vmul.f32 %v9422_v47, %v8978_v19  ;;  %v13338_v45 = vld [vmem:[#allocation98_spill] sm:$0xff]  ;;  %v13339_v34 = vld [vmem:[#allocation145_spill] sm:$0xff] }
 0x2f1   : >> { %v9469_v7 = vadd.f32 %v2234_v61, %v2026_v46  ;;  %v9471_v52 = vadd.f32 %v2232_v36, %v2025_v60  ;;  %v1523_v8 = vadd.f32 %v13339_v34, %v13338_v45  ;;  %v13340_v15 = vld [vmem:[#allocation114_spill] sm:$0xff]  ;;  %v13342_v1 = vld [vmem:[#allocation205_spill] sm:$0xff]  ;;  %v1884_v26 = vadd.f32 %v9335_v14, %v1749_v6 }
 0x2f2   : >> { %2719 = vrot.lane.b32.xlu1 %v2700_v44, %s6769_s1  ;;  %2717 = vrot.lane.b32.xlu0 %v2699_v54, %s6769_s1  ;;  %v13341_v46 = vld [vmem:[#allocation146_spill] sm:$0xff]  ;;  %v2028_v56 = vadd.f32 %v13342_v1, %v1868_v53  ;;  %v13344_v44 = vld [vmem:[#allocation95_spill] sm:$0xff]  ;;  %v13347_v1 = vld [vmem:[#allocation176_spill] sm:$0xff]  ;;  %v2703_v6 = vmul.f32 %v9422_v47, %v8993_v37 }
 0x2f3   : >> { %13334 = vst [vmem:[#allocation81_spill] sm:$0xff] %v9469_v7  ;;  %13335 = vst [vmem:[#allocation129_spill] sm:$0xff] %v9471_v52  ;;  %v1522_v60 = vadd.f32 %v13341_v46, %v13340_v15  ;;  %v13343_v61 = vld [vmem:[#allocation206_spill] sm:$0xff]  ;;  %v13345_v54 = vld [vmem:[#allocation147_spill] sm:$0xff]  ;;  %v1883_v52 = vadd.f32 %v9338_v10, %v1748_v25  ;;  %v2704_v10 = vmul.f32 %v9422_v47, %v8990_v9 }
 0x2f4   : >> { %v2027_v36 = vadd.f32 %v13343_v61, %v1867_v55  ;;  %v1525_v0 = vadd.f32 %v13345_v54, %v13344_v44  ;;  %v6059_v7 = vld [vmem:[%s8143_s30 + $0x21] sm:$0xff]  ;;  %v2238_v34 = vpop.permute.xlu1 %2237  ;;  %v2236_v15 = vpop.permute.xlu0 %2235  ;;  %v13350_v44 = vld [vmem:[#allocation116_spill] sm:$0xff] }
 0x2f5   : >> { %v9497_v45 = vmul.f32 %v6059_v7, %v9367_v38  ;;  %v13346_v46 = vld [vmem:[#allocation175_spill] sm:$0xff]  ;;  %v1750_v55 = vadd.f32 %v13347_v1, %v1522_v60  ;;  %v9501_v61 = vadd.f32 %v2238_v34, %v2028_v56  ;;  %v13351_v54 = vld [vmem:[#allocation148_spill] sm:$0xff]  ;;  %v13352_v25 = vld [vmem:[#allocation106_spill] sm:$0xff] }
 0x2f6   : >> { %v1751_v53 = vadd.f32 %v13346_v46, %v1523_v8  ;;  %v9503_v63 = vadd.f32 %v2236_v15, %v2027_v36  ;;  %v1524_v14 = vadd.f32 %v13351_v54, %v13350_v44  ;;  %2723 = vrot.lane.b32.xlu1 %v2702_v21, %s6769_s1  ;;  %2721 = vrot.lane.b32.xlu0 %v2701_v29, %s6769_s1  ;;  %v13353_v7 = vld [vmem:[#allocation136_spill] sm:$0xff]  ;;  %v13354_v60 = vld [vmem:[#allocation207_spill] sm:$0xff]  ;;  %v6060_v15 = vld [vmem:[%s8143_s30 + $0x19] sm:$0xff] }
 0x2f7   : >> { %13348 = vst [vmem:[#allocation82_spill] sm:$0xff] %v9501_v61  ;;  %v9515_v8 = vadd.f32 %v13353_v7, %v13352_v25  ;;  %v2078_v56 = vadd.f32 %v13354_v60, %v1884_v26  ;;  %v13355_v36 = vld [vmem:[#allocation208_spill] sm:$0xff]  ;;  %v9521_v46 = vmul.f32 %v6060_v15, %v9367_v38  ;;  %v13356_v21 = vld [vmem:[#allocation103_spill] sm:$0xff]  ;;  %v13357_v29 = vld [vmem:[#allocation137_spill] sm:$0xff]  ;;  %v9531_v25 = vmul.f32 %v9392_v27, %v9367_v38 }
 0x2f8   : >> { %13349 = vst [vmem:[#allocation130_spill] sm:$0xff] %v9503_v63  ;;  %v2077_v34 = vadd.f32 %v13355_v36, %v1883_v52  ;;  %v9525_v1 = vadd.f32 %v13357_v29, %v13356_v21  ;;  %v13358_v44 = vld [vmem:[#allocation177_spill] sm:$0xff]  ;;  %v13359_v63 = vld [vmem:[#allocation178_spill] sm:$0xff]  ;;  %v2281_v26 = vpop.permute.xlu1 %2280  ;;  %v2279_v7 = vpop.permute.xlu0 %2278  ;;  %v1886_v52 = vadd.f32 %v9351_v39, %v1751_v53  ;;  %v1885_v60 = vadd.f32 %v9354_v62, %v1750_v55 }
 0x2f9   : >> { %v1753_v54 = vadd.f32 %v13358_v44, %v1525_v0  ;;  %v1752_v61 = vadd.f32 %v13359_v63, %v1524_v14  ;;  %v9535_v36 = vadd.f32 %v2281_v26, %v2078_v56  ;;  %v13362_v21 = vld [vmem:[#allocation93_spill] sm:$0xff]  ;;  %v2706_v27 = vmul.f32 %v9422_v47, %v9004_v40  ;;  %v13365_v53 = vld [vmem:[#allocation150_spill] sm:$0xff]  ;;  %v13368_v26 = vld [vmem:[#allocation151_spill] sm:$0xff] }
 0x2fa   : >> { %v9537_v15 = vadd.f32 %v2279_v7, %v2077_v34  ;;  %v13363_v0 = vld [vmem:[#allocation149_spill] sm:$0xff]  ;;  %2727 = vrot.lane.b32.xlu1 %v2704_v10, %s6769_s1  ;;  %2725 = vrot.lane.b32.xlu0 %v2703_v6, %s6769_s1  ;;  %v2705_v39 = vmul.f32 %v9422_v47, %v9007_v51  ;;  %v13367_v56 = vld [vmem:[#allocation210_spill] sm:$0xff]  ;;  %v9552_v44 = vstv %s9489_s25  ;;  %v1577_v10 = vadd.f32 %v13368_v26, %v9211_v43  ;;  %v13373_v43 = vld [vmem:[#allocation91_spill] sm:$0xff] }
 0x2fb   : >> { %13360 = vst [vmem:[#allocation79_spill] sm:$0xff] %v9535_v36  ;;  %v1527_v29 = vadd.f32 %v13363_v0, %v13362_v21  ;;  %v13364_v63 = vld [vmem:[#allocation117_spill] sm:$0xff]  ;;  %v2079_v34 = vadd.f32 %v13367_v56, %v1885_v60  ;;  %v1888_v6 = vadd.f32 %v9361_v31, %v1753_v54  ;;  %v1887_v7 = vadd.f32 %v9364_v48, %v1752_v61  ;;  %v6061_v21 = vld [vmem:[%s8143_s30 + $0x29] sm:$0xff] }
 0x2fc   : >> { %13361 = vst [vmem:[#allocation80_spill] sm:$0xff] %v9537_v15  ;;  %v1526_v62 = vadd.f32 %v13365_v53, %v13364_v63  ;;  %v13366_v55 = vld [vmem:[#allocation209_spill] sm:$0xff]  ;;  %v9560_v0 = vmul.f32 %v6061_v21, %v9367_v38  ;;  %v2285_v15 = vpop.permute.xlu1 %2284  ;;  %v2283_v36 = vpop.permute.xlu0 %2282  ;;  %v13369_v63 = vld [vmem:[#allocation179_spill] sm:$0xff]  ;;  %v13370_v53 = vld [vmem:[#allocation180_spill] sm:$0xff]  ;;  %v2756_v48 = vmul.f32 %v9552_v44, %v8962_v59  ;;  %v2707_v61 = vmul.f32 %v9422_v47, %v9018_v18 }
 0x2fd   : >> { %v2080_v14 = vadd.f32 %v13366_v55, %v1886_v52  ;;  %v1755_v52 = vadd.f32 %v13369_v63, %v1527_v29  ;;  %v9566_v56 = vadd.f32 %v2283_v36, %v2079_v34  ;;  %v13374_v26 = vld [vmem:[#allocation152_spill] sm:$0xff]  ;;  %v13375_v54 = vld [vmem:[#allocation107_spill] sm:$0xff]  ;;  %v13376_v29 = vld [vmem:[#allocation138_spill] sm:$0xff]  ;;  %v9594_v47 = vmul.f32 %v9386_v41, %v9367_v38 }
 0x2fe   : >> { %v1754_v60 = vadd.f32 %v13370_v53, %v1526_v62  ;;  %v1528_v31 = vadd.f32 %v13374_v26, %v13373_v43  ;;  %2731 = vrot.lane.b32.xlu1 %v2706_v27, %s6769_s1  ;;  %2729 = vrot.lane.b32.xlu0 %v2705_v39, %s6769_s1  ;;  %v9578_v62 = vadd.f32 %v13376_v29, %v13375_v54  ;;  %v13378_v36 = vld [vmem:[#allocation139_spill] sm:$0xff]  ;;  %v13380_v63 = vld [vmem:[#allocation212_spill] sm:$0xff]  ;;  %v13381_v53 = vld [vmem:[#allocation181_spill] sm:$0xff] }
 0x2ff   : >> { %v9564_v55 = vadd.f32 %v2285_v15, %v2080_v14  ;;  %13372 = vst [vmem:[#allocation78_spill] sm:$0xff] %v9566_v56  ;;  %v13377_v15 = vld [vmem:[#allocation104_spill] sm:$0xff]  ;;  %v13379_v34 = vld [vmem:[#allocation211_spill] sm:$0xff]  ;;  %v2081_v27 = vadd.f32 %v13380_v63, %v1887_v7  ;;  %v1805_v39 = vadd.f32 %v13381_v53, %v1577_v10  ;;  %v13382_v43 = vld [vmem:[#allocation182_spill] sm:$0xff]  ;;  %v2757_v41 = vmul.f32 %v9552_v44, %v8959_v3 }
 0x300   : >> { %v9582_v14 = vadd.f32 %v13378_v36, %v13377_v15  ;;  %v2082_v21 = vadd.f32 %v13379_v34, %v1888_v6  ;;  %v1756_v26 = vadd.f32 %v13382_v43, %v1528_v31  ;;  %v6062_v56 = vld [vmem:[%s8143_s30 + $0x41] sm:$0x1]  ;;  %v2289_v54 = vpop.permute.xlu1 %2288  ;;  %v2287_v29 = vpop.permute.xlu0 %2286  ;;  %v1890_v15 = vadd.f32 %v9389_v24, %v1755_v52  ;;  %v13384_v10 = vld [vmem:[#allocation109_spill] sm:$0xff]  ;;  %v13385_v31 = vld [vmem:[#allocation140_spill] sm:$0xff] }
 0x301   : >> { %13371 = vst [vmem:[#allocation77_spill] sm:$0xff] %v9564_v55  ;;  %v9590_v55 = vmul.f32 %v6062_v56, %v9367_v38  ;;  %v1889_v6 = vadd.f32 %v9395_v12, %v1754_v60  ;;  %v9600_v7 = vadd.f32 %v2287_v29, %v2081_v27  ;;  %v9604_v34 = vadd.f32 %v13385_v31, %v13384_v10  ;;  %v13386_v24 = vld [vmem:[#allocation119_spill] sm:$0xff]  ;;  %v13387_v12 = vld [vmem:[#allocation153_spill] sm:$0xff]  ;;  %v13388_v60 = vld [vmem:[#allocation154_spill] sm:$0xff] }
 0x302   : >> { %v9598_v36 = vadd.f32 %v2289_v54, %v2082_v21  ;;  %2774 = vrot.lane.b32.xlu1 %v2756_v48, %s6769_s1  ;;  %2733 = vrot.lane.b32.xlu0 %v2707_v61, %s6769_s1  ;;  %v2758_v38 = vmul.f32 %v9552_v44, %v8978_v19  ;;  %v1579_v52 = vadd.f32 %v13387_v12, %v13386_v24  ;;  %v13389_v21 = vld [vmem:[#allocation213_spill] sm:$0xff]  ;;  %v13390_v27 = vld [vmem:[#allocation214_spill] sm:$0xff]  ;;  %v13393_v61 = vld [vmem:[#allocation155_spill] sm:$0xff] }
 0x303   : >> { %13383 = vst [vmem:[#allocation75_spill] sm:$0xff] %v9600_v7  ;;  %v1578_v56 = vadd.f32 %v13388_v60, %v9229_v23  ;;  %v2084_v63 = vadd.f32 %v13389_v21, %v1890_v15  ;;  %v2083_v53 = vadd.f32 %v13390_v27, %v1889_v6  ;;  %v13391_v43 = vld [vmem:[#allocation102_spill] sm:$0xff]  ;;  %v13392_v48 = vld [vmem:[#allocation141_spill] sm:$0xff]  ;;  %v1581_v29 = vadd.f32 %v13393_v61, %v9233_v35  ;;  %v13394_v12 = vld [vmem:[#allocation183_spill] sm:$0xff] }
 0x304   : >> { %v9620_v54 = vadd.f32 %v13392_v48, %v13391_v43  ;;  %v1906_v10 = vadd.f32 %v9400_v2, %v1805_v39  ;;  %v1891_v31 = vadd.f32 %v9403_v33, %v1756_v26  ;;  %v2293_v7 = vpop.permute.xlu1 %2292  ;;  %v2291_v24 = vpop.permute.xlu0 %2290  ;;  %v1807_v23 = vadd.f32 %v13394_v12, %v1579_v52  ;;  %v13395_v60 = vld [vmem:[#allocation184_spill] sm:$0xff]  ;;  %v13397_v33 = vld [vmem:[#allocation157_spill] sm:$0xff]  ;;  %v13399_v52 = vld [vmem:[#allocation218_spill] sm:$0xff] }
 0x305   : >> { %v1806_v15 = vadd.f32 %v13395_v60, %v1578_v56  ;;  %v9629_v21 = vadd.f32 %v2293_v7, %v2084_v63  ;;  %v9631_v6 = vadd.f32 %v2291_v24, %v2083_v53  ;;  %v13396_v27 = vld [vmem:[#allocation156_spill] sm:$0xff]  ;;  %v2760_v35 = vmul.f32 %v9552_v44, %v8993_v37  ;;  %v13398_v26 = vld [vmem:[#allocation161_spill] sm:$0xff]  ;;  %v13402_v37 = vld [vmem:[#allocation162_spill] sm:$0xff] }
 0x306   : >> { %v1580_v43 = vadd.f32 %v13396_v27, %v9237_v13  ;;  %2778 = vrot.lane.b32.xlu1 %v2758_v38, %s6769_s1  ;;  %2776 = vrot.lane.b32.xlu0 %v2757_v41, %s6769_s1  ;;  %v2759_v2 = vmul.f32 %v9552_v44, %v8975_v42  ;;  %v1583_v39 = vadd.f32 %v13397_v33, %v9241_v58  ;;  %v13400_v13 = vld [vmem:[#allocation219_spill] sm:$0xff]  ;;  %v13401_v38 = vld [vmem:[#allocation158_spill] sm:$0xff]  ;;  %v13403_v48 = vld [vmem:[#allocation185_spill] sm:$0xff] }
 0x307   : >> { %v1635_v7 = vadd.f32 %v13398_v26, %v9475_v11  ;;  %v2134_v56 = vadd.f32 %v13399_v52, %v1906_v10  ;;  %v2085_v63 = vadd.f32 %v13400_v13, %v1891_v31  ;;  %v1582_v41 = vadd.f32 %v13401_v38, %v9245_v17  ;;  %v13404_v24 = vld [vmem:[#allocation186_spill] sm:$0xff]  ;;  %v13405_v17 = vld [vmem:[#allocation159_spill] sm:$0xff]  ;;  %v13409_v52 = vld [vmem:[#allocation101_spill] sm:$0xff] }
 0x308   : >> { %v1634_v53 = vadd.f32 %v13402_v37, %v9448_v30  ;;  %v1809_v61 = vadd.f32 %v13403_v48, %v1581_v29  ;;  %v1808_v12 = vadd.f32 %v13404_v24, %v1580_v43  ;;  %v2336_v58 = vpop.permute.xlu1 %2335  ;;  %v2295_v60 = vpop.permute.xlu0 %2294  ;;  %v1908_v11 = vadd.f32 %v9454_v50, %v1807_v23  ;;  %v13406_v50 = vld [vmem:[#allocation160_spill] sm:$0xff]  ;;  %v13407_v23 = vld [vmem:[#allocation89_spill] sm:$0xff]  ;;  %v13412_v37 = vld [vmem:[#allocation187_spill] sm:$0xff] }
 0x309   : >> { %v1907_v10 = vadd.f32 %v9464_v28, %v1806_v15  ;;  %v9660_v31 = vadd.f32 %v2336_v58, %v2134_v56  ;;  %v9662_v27 = vadd.f32 %v2295_v60, %v2085_v63  ;;  %v1585_v33 = vadd.f32 %v13405_v17, %v9254_v20  ;;  %v13408_v43 = vld [vmem:[#allocation108_spill] sm:$0xff]  ;;  %v13410_v20 = vld [vmem:[#allocation163_spill] sm:$0xff]  ;;  %v13411_v13 = vld [vmem:[#allocation121_spill] sm:$0xff] }
 0x30a   : >> { %2782 = vrot.lane.b32.xlu1 %v2760_v35, %s6769_s1  ;;  %2780 = vrot.lane.b32.xlu0 %v2759_v2, %s6769_s1  ;;  %v2762_v30 = vmul.f32 %v9552_v44, %v9007_v51  ;;  %v2761_v29 = vmul.f32 %v9552_v44, %v8990_v9  ;;  %v1584_v28 = vadd.f32 %v13406_v50, %v9258_v4  ;;  %v13413_v48 = vld [vmem:[#allocation188_spill] sm:$0xff] }
 0x30b   : >> { %v1838_v15 = vadd.f32 %v13407_v23, %v1635_v7  ;;  %v2136_v26 = vadd.f32 %v13408_v43, %v1908_v11  ;;  %v2135_v56 = vadd.f32 %v13409_v52, %v1907_v10  ;;  %v1637_v35 = vadd.f32 %v13410_v20, %v9458_v49  ;;  %v13414_v49 = vld [vmem:[#allocation164_spill] sm:$0xff] }
 0x30c   : >> { %v1837_v2 = vadd.f32 %v13411_v13, %v1634_v53  ;;  %v1910_v63 = vadd.f32 %v9497_v45, %v1809_v61  ;;  %v1909_v51 = vadd.f32 %v9521_v46, %v1808_v12  ;;  %v2340_v9 = vpop.permute.xlu1 %2339  ;;  %v2338_v38 = vpop.permute.xlu0 %2337  ;;  %v1811_v4 = vadd.f32 %v13412_v37, %v1583_v39  ;;  %v13415_v39 = vld [vmem:[#allocation165_spill] sm:$0xff]  ;;  %v13416_v53 = vld [vmem:[#allocation110_spill] sm:$0xff]  ;;  %v13417_v12 = vld [vmem:[#allocation99_spill] sm:$0xff] }
 0x30d   : >> { %v1810_v7 = vadd.f32 %v13413_v48, %v1582_v41  ;;  %v9684_v24 = vadd.f32 %v2340_v9, %v2136_v26  ;;  %v9686_v58 = vadd.f32 %v2338_v38, %v2135_v56  ;;  %v1636_v60 = vadd.f32 %v13414_v49, %v9426_v57  ;;  %v13418_v57 = vld [vmem:[#allocation189_spill] sm:$0xff]  ;;  %v13421_v56 = vld [vmem:[#allocation122_spill] sm:$0xff]  ;;  %v13425_v9 = vld [vmem:[#allocation100_spill] sm:$0xff] }
 0x30e   : >> { %2786 = vrot.lane.b32.xlu1 %v2762_v30, %s6769_s1  ;;  %2784 = vrot.lane.b32.xlu0 %v2761_v29, %s6769_s1  ;;  %v2764_v45 = vmul.f32 %v9552_v44, %v9018_v18  ;;  %v2763_v46 = vmul.f32 %v9552_v44, %v9004_v40  ;;  %v1639_v41 = vadd.f32 %v13415_v39, %v9515_v8  ;;  %v9701_v10 = vstv %s9647_s22  ;;  %v13419_v30 = vld [vmem:[#allocation190_spill] sm:$0xff]  ;;  %v13426_v37 = vld [vmem:[#allocation167_spill] sm:$0xff]  ;;  %v13428_v39 = vld [vmem:[#allocation192_spill] sm:$0xff] }
 0x30f   : >> { %v2138_v61 = vadd.f32 %v13416_v53, %v1910_v63  ;;  %v2137_v11 = vadd.f32 %v13417_v12, %v1909_v51  ;;  %v1813_v17 = vadd.f32 %v13418_v57, %v1585_v33  ;;  %v1812_v50 = vadd.f32 %v13419_v30, %v1584_v28  ;;  %v13420_v29 = vld [vmem:[#allocation90_spill] sm:$0xff]  ;;  %v13424_v63 = vld [vmem:[#allocation111_spill] sm:$0xff] }
 0x310   : >> { %v1840_v23 = vadd.f32 %v13420_v29, %v1637_v35  ;;  %v2344_v43 = vpop.permute.xlu1 %2343  ;;  %v2342_v18 = vpop.permute.xlu0 %2341  ;;  %v9707_v26 = vstv %s9656_s28  ;;  %v1912_v40 = vadd.f32 %v9531_v25, %v1811_v4  ;;  %v1911_v8 = vadd.f32 %v9560_v0, %v1810_v7  ;;  %v13422_v25 = vld [vmem:[#allocation166_spill] sm:$0xff]  ;;  %v13423_v0 = vld [vmem:[#allocation87_spill] sm:$0xff] }
 0x311   : >> { %v9711_v44 = vadd.f32 %v2344_v43, %v2138_v61  ;;  %v9713_v52 = vadd.f32 %v2342_v18, %v2137_v11  ;;  %v1839_v20 = vadd.f32 %v13421_v56, %v1636_v60  ;;  %v2814_v33 = vmul.f32 %v9701_v10, %v8959_v3  ;;  %v13431_v11 = vld [vmem:[#allocation94_spill] sm:$0xff]  ;;  %v13434_v29 = vld [vmem:[#allocation123_spill] sm:$0xff]  ;;  %v13435_v43 = vld [vmem:[#allocation85_spill] sm:$0xff] }
 0x312   : >> { %2790 = vrot.lane.b32.xlu1 %v2764_v45, %s6769_s1  ;;  %2788 = vrot.lane.b32.xlu0 %v2763_v46, %s6769_s1  ;;  %v2813_v28 = vmul.f32 %v9701_v10, %v8962_v59  ;;  %v1638_v35 = vadd.f32 %v13422_v25, %v9525_v1  ;;  %v1842_v13 = vadd.f32 %v13423_v0, %v1639_v41  ;;  %v13427_v1 = vld [vmem:[#allocation191_spill] sm:$0xff]  ;;  %v13437_v25 = vld [vmem:[#allocation194_spill] sm:$0xff] }
 0x313   : >> { %v2140_v51 = vadd.f32 %v13424_v63, %v1912_v40  ;;  %v2139_v38 = vadd.f32 %v13425_v9, %v1911_v8  ;;  %v1641_v4 = vadd.f32 %v13426_v37, %v9578_v62  ;;  %v1914_v48 = vadd.f32 %v9590_v55, %v1813_v17  ;;  %v13432_v17 = vld [vmem:[#allocation118_spill] sm:$0xff]  ;;  %v13438_v37 = vld [vmem:[#allocation92_spill] sm:$0xff] }
 0x314   : >> { %v1913_v7 = vadd.f32 %v9594_v47, %v1812_v50  ;;  %v2348_v49 = vpop.permute.xlu1 %2347  ;;  %v2346_v60 = vpop.permute.xlu0 %2345  ;;  %v2385_v45 = vmul.f32 %v9707_v26, %v8959_v3  ;;  %v1964_v46 = vadd.f32 %v13427_v1, %v1838_v15  ;;  %v1963_v41 = vadd.f32 %v13428_v39, %v1837_v2  ;;  %v13429_v47 = vld [vmem:[#allocation115_spill] sm:$0xff]  ;;  %v13430_v2 = vld [vmem:[#allocation96_spill] sm:$0xff]  ;;  %v9759_v8 = vld [vmem:[%s8143_s30 + $0x1a] sm:$0xff] }
 0x315   : >> { %v9736_v53 = vadd.f32 %v2348_v49, %v2140_v51  ;;  %v9738_v61 = vadd.f32 %v2346_v60, %v2139_v38  ;;  %v2816_v55 = vmul.f32 %v9701_v10, %v8975_v42  ;;  %v2815_v3 = vmul.f32 %v9701_v10, %v8978_v19  ;;  %v13433_v50 = vld [vmem:[#allocation168_spill] sm:$0xff]  ;;  %v9780_v9 = vld [vmem:[%s8143_s30 + $0x22] sm:$0xff]  ;;  %v13440_v1 = vld [vmem:[#allocation169_spill] sm:$0xff] }
 0x316   : >> { %2833 = vrot.lane.b32.xlu1 %v2814_v33, %s6769_s1  ;;  %2831 = vrot.lane.b32.xlu0 %v2813_v28, %s6769_s1  ;;  %v2384_v62 = vmul.f32 %v9707_v26, %v8962_v59  ;;  %v2142_v15 = vadd.f32 %v13429_v47, %v1914_v48  ;;  %v2141_v12 = vadd.f32 %v13430_v2, %v1913_v7  ;;  %v13436_v33 = vld [vmem:[#allocation193_spill] sm:$0xff]  ;;  %v13439_v48 = vld [vmem:[#allocation120_spill] sm:$0xff]  ;;  %v13441_v39 = vld [vmem:[#allocation170_spill] sm:$0xff] }
 0x317   : >> { %v2192_v57 = vadd.f32 %v13431_v11, %v1964_v46  ;;  %v2191_v30 = vadd.f32 %v13432_v17, %v1963_v41  ;;  %v1640_v42 = vadd.f32 %v13433_v50, %v9582_v14  ;;  %v1841_v19 = vadd.f32 %v13434_v29, %v1638_v35  ;;  %v9775_v35 = vld [vmem:[%s8143_s30 + $0x2a] sm:$0xff]  ;;  %v9785_v38 = vld [vmem:[%s8143_s30 + $0x12] sm:$0xff] }
 0x318   : >> { %v1844_v18 = vadd.f32 %v13435_v43, %v1641_v4  ;;  %v2352_v59 = vpop.permute.xlu1 %2351  ;;  %v2350_v40 = vpop.permute.xlu0 %2349  ;;  %v2387_v56 = vmul.f32 %v9759_v8, %v9707_v26  ;;  %v1966_v28 = vadd.f32 %v13436_v33, %v1840_v23  ;;  %v1965_v0 = vadd.f32 %v13437_v25, %v1839_v20  ;;  %v13444_v17 = vld [vmem:[#allocation196_spill] sm:$0xff] }
 0x319   : >> { %v9768_v14 = vadd.f32 %v2352_v59, %v2142_v15  ;;  %v9770_v63 = vadd.f32 %v2350_v40, %v2141_v12  ;;  %v2818_v51 = vmul.f32 %v9775_v35, %v9701_v10  ;;  %v2817_v23 = vmul.f32 %v9780_v9, %v9701_v10  ;;  %v13443_v12 = vld [vmem:[#allocation195_spill] sm:$0xff]  ;;  %v13445_v29 = vld [vmem:[#allocation88_spill] sm:$0xff] }
 0x31a   : >> { %2837 = vrot.lane.b32.xlu1 %v2816_v55, %s6769_s1  ;;  %2835 = vrot.lane.b32.xlu0 %v2815_v3, %s6769_s1  ;;  %v2386_v20 = vmul.f32 %v9785_v38, %v9707_v26  ;;  %v2194_v4 = vadd.f32 %v13438_v37, %v1966_v28  ;;  %v2193_v7 = vadd.f32 %v13439_v48, %v1965_v0  ;;  %v13442_v55 = vld [vmem:[#allocation125_spill] sm:$0xff]  ;;  %v13446_v43 = vld [vmem:[#allocation124_spill] sm:$0xff]  ;;  %v13447_v28 = vld [vmem:[#allocation86_spill] sm:$0xff] }
 0x31b   : >> { %v2394_v49 = vadd.f32 %v2385_v45, %v2192_v57  ;;  %v2393_v60 = vadd.f32 %v2384_v62, %v2191_v30  ;;  %v1691_v46 = vadd.f32 %v13440_v1, %v9604_v34  ;;  %v1642_v41 = vadd.f32 %v13441_v39, %v9620_v54  ;;  %v9807_v34 = vld [vmem:[%s8143_s30 + $0x3a] sm:$0xff]  ;;  %v9812_v30 = vld [vmem:[%s8143_s30 + $0x32] sm:$0xff] }
 0x31c   : >> { %v1843_v3 = vadd.f32 %v13442_v55, %v1640_v42  ;;  %v2492_v47 = vpop.permute.xlu1 %2491  ;;  %v2490_v15 = vpop.permute.xlu0 %2489  ;;  %v2389_v2 = vmul.f32 %v9775_v35, %v9707_v26  ;;  %v1968_v11 = vadd.f32 %v13443_v12, %v1842_v13  ;;  %v1967_v45 = vadd.f32 %v13444_v17, %v1841_v19  ;;  %v13448_v0 = vld [vmem:[#allocation126_spill] sm:$0xff] }
 0x31d   : >> { %v9800_v57 = vadd.f32 %v2492_v47, %v2394_v49  ;;  %v9802_v62 = vadd.f32 %v2490_v15, %v2393_v60  ;;  %v2820_v54 = vmul.f32 %v9807_v34, %v9701_v10  ;;  %v2819_v13 = vmul.f32 %v9812_v30, %v9701_v10  ;;  %v13449_v60 = vld [vmem:[#allocation197_spill] sm:$0xff]  ;;  %v13450_v39 = vld [vmem:[#allocation198_spill] sm:$0xff] }
 0x31e   : >> { %2841 = vrot.lane.b32.xlu1 %v2818_v51, %s6769_s1  ;;  %2839 = vrot.lane.b32.xlu0 %v2817_v23, %s6769_s1  ;;  %v2388_v50 = vmul.f32 %v9780_v9, %v9707_v26  ;;  %v9819_v42 = vstv %s9748_s18  ;;  %v2196_v19 = vadd.f32 %v13445_v29, %v1968_v11  ;;  %v2195_v59 = vadd.f32 %v13446_v43, %v1967_v45  ;;  %v13453_v43 = vld [vmem:[#allocation200_spill] sm:$0xff] }
 0x31f   : >> { %v2396_v40 = vadd.f32 %v2387_v56, %v2194_v4  ;;  %v2395_v33 = vadd.f32 %v2386_v20, %v2193_v7  ;;  %v1860_v25 = vadd.f32 %v13447_v28, %v1691_v46  ;;  %v1845_v51 = vadd.f32 %v13448_v0, %v1642_v41  ;;  %v9839_v20 = vld [vmem:[%s8143_s30 + $0x2] sm:$0xff] }
 0x320   : >> { %v2496_v23 = vpop.permute.xlu1 %2495  ;;  %v2494_v37 = vpop.permute.xlu0 %2493  ;;  %v2391_v48 = vmul.f32 %v9807_v34, %v9707_v26  ;;  %v9828_v49 = vstv %s9764_s27  ;;  %v1970_v1 = vadd.f32 %v13449_v60, %v1844_v18  ;;  %v1969_v55 = vadd.f32 %v13450_v39, %v1843_v3  ;;  %v9844_v7 = vld [vmem:[%s8143_s30 + $0x42] sm:$0x1]  ;;  %v13451_v3 = vld [vmem:[#allocation83_spill] sm:$0xff] }
 0x321   : >> { %v9832_v47 = vadd.f32 %v2496_v23, %v2396_v40  ;;  %v9834_v56 = vadd.f32 %v2494_v37, %v2395_v33  ;;  %v2870_v4 = vmul.f32 %v9839_v20, %v9819_v42  ;;  %v2821_v18 = vmul.f32 %v9844_v7, %v9701_v10  ;;  %v13454_v28 = vld [vmem:[#allocation127_spill] sm:$0xff] }
 0x322   : >> { %2845 = vrot.lane.b32.xlu1 %v2820_v54, %s6769_s1  ;;  %2843 = vrot.lane.b32.xlu0 %v2819_v13, %s6769_s1  ;;  %v2390_v46 = vmul.f32 %v9812_v30, %v9707_v26  ;;  %v2198_v41 = vadd.f32 %v9321_v16, %v1970_v1  ;;  %v2197_v15 = vadd.f32 %v13451_v3, %v1969_v55  ;;  %v13452_v13 = vld [vmem:[#allocation199_spill] sm:$0xff] }
 0x323   : >> { %v2398_v12 = vadd.f32 %v2389_v2, %v2196_v19  ;;  %v2397_v11 = vadd.f32 %v2388_v50, %v2195_v59  ;;  %v2406_v54 = vmul.f32 %v9839_v20, %v9828_v49  ;;  %v2020_v29 = vadd.f32 %v13452_v13, %v1860_v25  ;;  %v9865_v2 = vld [vmem:[%s8143_s30 + $0xa] sm:$0xff]  ;;  %s2426_s30 = sld [smem:[#allocation8 + %s9033_s15]] }
 0x324   : >> { %v2500_v17 = vpop.permute.xlu1 %2499  ;;  %v2498_v45 = vpop.permute.xlu0 %2497  ;;  %v1971_v40 = vadd.f32 %v13453_v43, %v1845_v51  ;;  %v2872_v16 = vmul.f32 %v9785_v38, %v9819_v42  ;;  %v2871_v50 = vmul.f32 %v9865_v2, %v9819_v42  ;;  %v2392_v19 = vmul.f32 %v9844_v7, %v9707_v26 }
 0x325   : >> { %v9856_v10 = vadd.f32 %v2500_v17, %v2398_v12  ;;  %v9858_v33 = vadd.f32 %v2498_v45, %v2397_v11  ;;  %v2248_v59 = vadd.f32 %v9369_v22, %v2020_v29  ;;  %v2400_v0 = vadd.f32 %v2391_v48, %v2198_v41  ;;  %v13455_v17 = vld [vmem:[#allocation84_spill] sm:$0xff] }
 0x326   : >> { %2888 = vrot.lane.b32.xlu1 %v2870_v4, %s6769_s1  ;;  %2847 = vrot.lane.b32.xlu0 %v2821_v18, %s6769_s1  ;;  %v2199_v25 = vadd.f32 %v13454_v28, %v1971_v40  ;;  %v2399_v51 = vadd.f32 %v2390_v46, %v2197_v15  ;;  %v2874_v39 = vmul.f32 %v9780_v9, %v9819_v42 }
 0x327   : >> { %v2873_v22 = vmul.f32 %v9759_v8, %v9819_v42  ;;  %v2415_v26 = vadd.f32 %v2406_v54, %v2248_v59  ;;  %v2408_v48 = vmul.f32 %v9785_v38, %v9828_v49  ;;  %v2407_v4 = vmul.f32 %v9865_v2, %v9828_v49  ;;  %v13456_v59 = vld [vmem:[#allocation128_spill] sm:$0xff] }
 0x328   : >> { %v2504_v23 = vpop.permute.xlu1 %2503  ;;  %v2502_v37 = vpop.permute.xlu0 %2501  ;;  %v2401_v55 = vadd.f32 %v2392_v19, %v2199_v25  ;;  %v2876_v15 = vmul.f32 %v9812_v30, %v9819_v42  ;;  %v2875_v12 = vmul.f32 %v9775_v35, %v9819_v42  ;;  %v2410_v54 = vmul.f32 %v9780_v9, %v9828_v49 }
 0x329   : >> { %v9873_v60 = vadd.f32 %v2504_v23, %v2400_v0  ;;  %v9875_v1 = vadd.f32 %v2502_v37, %v2399_v51  ;;  %v2417_v11 = vadd.f32 %v2408_v48, %v9405_v32  ;;  %v2416_v45 = vadd.f32 %v2407_v4, %v13455_v17 }
 0x32a   : >> { %2892 = vrot.lane.b32.xlu1 %v2872_v16, %s6769_s1  ;;  %2890 = vrot.lane.b32.xlu0 %v2871_v50, %s6769_s1  ;;  %v2409_v13 = vmul.f32 %v9759_v8, %v9828_v49  ;;  %v2878_v32 = vmul.f32 %v9844_v7, %v9819_v42  ;;  %v2877_v50 = vmul.f32 %v9807_v34, %v9819_v42  ;;  %v13457_v42 = vld [vmem:[#allocation81_spill] sm:$0xff] }
 0x32b   : >> { %v2419_v19 = vadd.f32 %v2410_v54, %v9434_v5  ;;  %v2412_v25 = vmul.f32 %v9812_v30, %v9828_v49  ;;  %v2411_v0 = vmul.f32 %v9775_v35, %v9828_v49  ;;  %v2413_v48 = vmul.f32 %v9807_v34, %v9828_v49 }
 0x32c   : >> { %v2547_v18 = vpop.permute.xlu1 %2546  ;;  %v2506_v46 = vpop.permute.xlu0 %2505  ;;  %v2418_v28 = vadd.f32 %v2409_v13, %v13456_v59 }
 0x32d   : >> { %v9887_v41 = vadd.f32 %v2547_v18, %v2415_v26  ;;  %v9889_v3 = vadd.f32 %v2506_v46, %v2401_v55  ;;  %v2421_v5 = vadd.f32 %v2412_v25, %v13457_v42  ;;  %v2414_v55 = vmul.f32 %v9844_v7, %v9828_v49 }
 0x32e   : >> { %2896 = vrot.lane.b32.xlu1 %v2874_v39, %s6769_s1  ;;  %2894 = vrot.lane.b32.xlu0 %v2873_v22, %s6769_s1  ;;  %v13458_v22 = vld [vmem:[#allocation129_spill] sm:$0xff]  ;;  %v2427_v46 = vstv %s2426_s30 }
 0x32f   : >> { %v2420_v26 = vadd.f32 %v2411_v0, %v13458_v22  ;;  %v2429_v13 = vmul.f32 %v9865_v2, %v2427_v46  ;;  %v2431_v0 = vmul.f32 %v9759_v8, %v2427_v46 }
 0x330   : >> { %v2551_v29 = vpop.permute.xlu1 %2550  ;;  %v2549_v43 = vpop.permute.xlu0 %2548 }
 0x331   : >> { %v9904_v40 = vadd.f32 %v2551_v29, %v2417_v11  ;;  %v9906_v16 = vadd.f32 %v2549_v43, %v2416_v45  ;;  %v13459_v11 = vld [vmem:[#allocation82_spill] sm:$0xff]  ;;  %v2428_v29 = vmul.f32 %v9839_v20, %v2427_v46 }
 0x332   : >> { %2900 = vrot.lane.b32.xlu1 %v2876_v15, %s6769_s1  ;;  %2898 = vrot.lane.b32.xlu0 %v2875_v12, %s6769_s1  ;;  %v2423_v17 = vadd.f32 %v2414_v55, %v13459_v11  ;;  %v13460_v45 = vld [vmem:[#allocation130_spill] sm:$0xff]  ;;  %v2432_v11 = vmul.f32 %v9780_v9, %v2427_v46 }
 0x333   : >> { %v2422_v54 = vadd.f32 %v2413_v48, %v13460_v45  ;;  %v13464_v48 = vld [vmem:[#allocation78_spill] sm:$0xff] }
 0x334   : >> { %v2555_v51 = vpop.permute.xlu1 %2554  ;;  %v2553_v23 = vpop.permute.xlu0 %2552 }
 0x335   : >> { %v9920_v37 = vadd.f32 %v2555_v51, %v2419_v19  ;;  %v9922_v39 = vadd.f32 %v2553_v23, %v2418_v28  ;;  %v13461_v19 = vld [vmem:[#allocation79_spill] sm:$0xff]  ;;  %v13462_v28 = vld [vmem:[#allocation80_spill] sm:$0xff]  ;;  %v2430_v51 = vmul.f32 %v9785_v38, %v2427_v46 }
 0x336   : >> { %2904 = vrot.lane.b32.xlu1 %v2878_v32, %s6769_s1  ;;  %2902 = vrot.lane.b32.xlu0 %v2877_v50, %s6769_s1  ;;  %v2438_v59 = vadd.f32 %v2429_v13, %v13461_v19  ;;  %v2437_v25 = vadd.f32 %v2428_v29, %v13462_v28  ;;  %s2448_s1 = sld [smem:[#allocation8 + %s9125_s16]]  ;;  %v2435_v19 = vmul.f32 %v9807_v34, %v2427_v46 }
 0x338   : >> { %v2559_v4 = vpop.permute.xlu1 %2558  ;;  %v2557_v18 = vpop.permute.xlu0 %2556 }
 0x339   : >> { %v9932_v15 = vadd.f32 %v2559_v4, %v2421_v5  ;;  %v9934_v12 = vadd.f32 %v2557_v18, %v2420_v26  ;;  %v13463_v26 = vld [vmem:[#allocation77_spill] sm:$0xff]  ;;  %v2439_v4 = vadd.f32 %v2430_v51, %v13464_v48  ;;  %v2433_v18 = vmul.f32 %v9775_v35, %v2427_v46 }
 0x33a   : >> { %v2440_v55 = vadd.f32 %v2431_v0, %v13463_v26 }
 0x33b   : >> { %v2442_v29 = vadd.f32 %v2433_v18, %v9598_v36  ;;  %v2436_v36 = vmul.f32 %v9844_v7, %v2427_v46 }
 0x33c   : >> { %v2563_v43 = vpop.permute.xlu1 %2562  ;;  %v2561_v32 = vpop.permute.xlu0 %2560  ;;  %v2449_v0 = vstv %s2448_s1 }
 0x33d   : >> { %v9940_v50 = vadd.f32 %v2563_v43, %v2423_v17  ;;  %v9942_v49 = vadd.f32 %v2561_v32, %v2422_v54  ;;  %v13465_v43 = vld [vmem:[#allocation75_spill] sm:$0xff] }
 0x33e   : >> { %v2441_v32 = vadd.f32 %v2432_v11, %v13465_v43 }
 0x340   : >> { %v2606_v23 = vpop.permute.xlu1 %2605  ;;  %v2604_v42 = vpop.permute.xlu0 %2603 }
 0x341   : >> { %v9949_v5 = vadd.f32 %v2606_v23, %v2438_v59  ;;  %v9951_v22 = vadd.f32 %v2604_v42, %v2437_v25  ;;  %v2434_v59 = vmul.f32 %v9812_v30, %v2427_v46  ;;  %v2444_v42 = vadd.f32 %v2435_v19, %v9629_v21 }
 0x342   : >> { %v2451_v21 = vmul.f32 %v9865_v2, %v2449_v0 }
 0x343   : >> { %v2443_v26 = vadd.f32 %v2434_v59, %v9631_v6  ;;  %v2454_v59 = vmul.f32 %v9780_v9, %v2449_v0 }
 0x344   : >> { %v2610_v17 = vpop.permute.xlu1 %2609  ;;  %v2608_v45 = vpop.permute.xlu0 %2607  ;;  %v2460_v19 = vadd.f32 %v2451_v21, %v9686_v58 }
 0x345   : >> { %v9957_v54 = vadd.f32 %v2610_v17, %v2440_v55  ;;  %v9959_v13 = vadd.f32 %v2608_v45, %v2439_v4  ;;  %v2450_v55 = vmul.f32 %v9839_v20, %v2449_v0  ;;  %v2445_v45 = vadd.f32 %v2436_v36, %v9662_v27 }
 0x346   : >> { %v2463_v2 = vadd.f32 %v2454_v59, %v9711_v44  ;;  %v2457_v44 = vmul.f32 %v9807_v34, %v2449_v0 }
 0x347   : >> { %v2459_v17 = vadd.f32 %v2450_v55, %v9660_v31  ;;  %v2453_v31 = vmul.f32 %v9759_v8, %v2449_v0 }
 0x348   : >> { %v2614_v28 = vpop.permute.xlu1 %2613  ;;  %v2612_v25 = vpop.permute.xlu0 %2611 }
 0x349   : >> { %v9965_v51 = vadd.f32 %v2614_v28, %v2442_v29  ;;  %v9967_v23 = vadd.f32 %v2612_v25, %v2441_v32  ;;  %v2452_v29 = vmul.f32 %v9785_v38, %v2449_v0 }
 0x34b   : >> { %v2461_v46 = vadd.f32 %v2452_v29, %v9684_v24  ;;  %v2455_v24 = vmul.f32 %v9775_v35, %v2449_v0  ;;  %v2466_v29 = vadd.f32 %v2457_v44, %v9770_v63 }
 0x34c   : >> { %v2618_v48 = vpop.permute.xlu1 %2617  ;;  %v2616_v4 = vpop.permute.xlu0 %2615 }
 0x34d   : >> { %v9973_v18 = vadd.f32 %v2618_v48, %v2444_v42  ;;  %v9975_v11 = vadd.f32 %v2616_v4, %v2443_v26  ;;  %v2462_v42 = vadd.f32 %v2453_v31, %v9713_v52  ;;  %v2456_v26 = vmul.f32 %v9812_v30, %v2449_v0 }
 0x34e   : >> { %v2464_v48 = vadd.f32 %v2455_v24, %v9738_v61  ;;  %v2458_v4 = vmul.f32 %v9844_v7, %v2449_v0 }
 0x34f   : >> { %v2465_v8 = vadd.f32 %v2456_v26, %v9736_v53 }
 0x350   : >> { %v2661_v43 = vpop.permute.xlu1 %2660  ;;  %v2620_v6 = vpop.permute.xlu0 %2619  ;;  %v2467_v35 = vadd.f32 %v2458_v4, %v9768_v14 }
 0x351   : >> { %v9981_v32 = vadd.f32 %v2661_v43, %v2459_v17  ;;  %v9983_v20 = vadd.f32 %v2620_v6, %v2445_v45 }
 0x354   : >> { %v2665_v28 = vpop.permute.xlu1 %2664  ;;  %v2663_v27 = vpop.permute.xlu0 %2662 }
 0x355   : >> { %v9989_v25 = vadd.f32 %v2665_v28, %v2461_v46  ;;  %v9991_v38 = vadd.f32 %v2663_v27, %v2460_v19 }
 0x358   : >> { %v2669_v55 = vpop.permute.xlu1 %2668  ;;  %v2667_v58 = vpop.permute.xlu0 %2666 }
 0x359   : >> { %v9997_v36 = vadd.f32 %v2669_v55, %v2463_v2  ;;  %v9999_v9 = vadd.f32 %v2667_v58, %v2462_v42 }
 0x35c   : >> { %v2673_v17 = vpop.permute.xlu1 %2672  ;;  %v2671_v52 = vpop.permute.xlu0 %2670 }
 0x35d   : >> { %v10005_v45 = vadd.f32 %v2673_v17, %v2465_v8  ;;  %v10007_v30 = vadd.f32 %v2671_v52, %v2464_v48 }
 0x360   : >> { %v2677_v21 = vpop.permute.xlu1 %2676  ;;  %v2675_v43 = vpop.permute.xlu0 %2674 }
 0x361   : >> { %v10011_v6 = vadd.f32 %v2677_v21, %v2467_v35  ;;  %v10013_v53 = vadd.f32 %v2675_v43, %v2466_v29 }
 0x364   : >> { %v2720_v61 = vpop.permute.xlu1 %2719  ;;  %v2718_v7 = vpop.permute.xlu0 %2717 }
 0x365   : >> { %v10016_v28 = vadd.f32 %v2720_v61, %v9800_v57   ;;  %v10019_v34 = vadd.f32 %v2718_v7, %v9802_v62  }
 0x367   : >> { %13466 = vst [vmem:[#allocation59_spill] sm:$0xff] %v10016_v28  ;;  %13467 = vst [vmem:[#allocation61_spill] sm:$0xff] %v10019_v34 }
 0x368   : >> { %v2724_v0 = vpop.permute.xlu1 %2723  ;;  %v2722_v59 = vpop.permute.xlu0 %2721 }
 0x369   : >> { %v10022_v14 = vadd.f32 %v2724_v0, %v9832_v47   ;;  %v10025_v63 = vadd.f32 %v2722_v59, %v9834_v56  }
 0x36b   : >> { %13468 = vst [vmem:[#allocation63_spill] sm:$0xff] %v10022_v14  ;;  %13469 = vst [vmem:[#allocation65_spill] sm:$0xff] %v10025_v63 }
 0x36c   : >> { %v2728_v27 = vpop.permute.xlu1 %2727  ;;  %v2726_v2 = vpop.permute.xlu0 %2725 }
 0x36d   : >> { %v10028_v26 = vadd.f32 %v2728_v27, %v9856_v10   ;;  %v10031_v55 = vadd.f32 %v2726_v2, %v9858_v33  }
 0x36f   : >> { %13470 = vst [vmem:[#allocation17_spill] sm:$0xff] %v10028_v26  ;;  %13471 = vst [vmem:[#allocation18_spill] sm:$0xff] %v10031_v55 }
 0x370   : >> { %v2732_v57 = vpop.permute.xlu1 %2731  ;;  %v2730_v28 = vpop.permute.xlu0 %2729 }
 0x371   : >> { %v10034_v27 = vadd.f32 %v2732_v57, %v9873_v60   ;;  %v10037_v62 = vadd.f32 %v2730_v28, %v9875_v1  }
 0x373   : >> { %13472 = vst [vmem:[#allocation19_spill] sm:$0xff] %v10034_v27  ;;  %13473 = vst [vmem:[#allocation20_spill] sm:$0xff] %v10037_v62 }
 0x374   : >> { %v2775_v47 = vpop.permute.xlu1 %2774  ;;  %v2734_v58 = vpop.permute.xlu0 %2733 }
 0x375   : >> { %v10040_v57 = vadd.f32 %v2775_v47, %v9887_v41   ;;  %v10043_v8 = vadd.f32 %v2734_v58, %v9889_v3   ;;  %v13556_v47 = vld [vmem:[#allocation61_spill] sm:$0xff] }
 0x376   : > { %v13562_v47 = vld [vmem:[#allocation18_spill] sm:$0xff] (%p10126_p2) }
 0x377   : >> { %v13474_v56 = vmov %v10040_v57  ;;  %13475 = vst [vmem:[#allocation25_spill] sm:$0xff] %v10043_v8 }
 0x378   : >> { %v2779_v10 = vpop.permute.xlu1 %2778  ;;  %v2777_v48 = vpop.permute.xlu0 %2776 }
 0x379   : >> { %v10046_v33 = vadd.f32 %v2779_v10, %v9904_v40   ;;  %v10049_v7 = vadd.f32 %v2777_v48, %v9906_v16  }
 0x37b   : >> { %v13476_v60 = vmov %v10049_v7 }
 0x37c   : >> { %v2783_v35 = vpop.permute.xlu1 %2782  ;;  %v2781_v29 = vpop.permute.xlu0 %2780 }
 0x37d   : >> { %v10052_v1 = vadd.f32 %v2783_v35, %v9920_v37   ;;  %v10055_v63 = vadd.f32 %v2781_v29, %v9922_v39  }
 0x37f   : >> { %v13477_v41 = vmov %v10055_v63 }
 0x380   : >> { %v2787_v21 = vpop.permute.xlu1 %2786  ;;  %v2785_v43 = vpop.permute.xlu0 %2784 }
 0x381   : >> { %v10058_v3 = vadd.f32 %v2787_v21, %v9932_v15   ;;  %v10061_v55 = vadd.f32 %v2785_v43, %v9934_v12  }
 0x383   : >> { %v13478_v40 = vmov %v10061_v55 }
 0x384   : >> { %v2791_v8 = vpop.permute.xlu1 %2790  ;;  %v2789_v61 = vpop.permute.xlu0 %2788 }
 0x385   : >> { %v10064_v16 = vadd.f32 %v2791_v8, %v9940_v50   ;;  %v10067_v7 = vadd.f32 %v2789_v61, %v9942_v49   ;;  %v13548_v8 = vld [vmem:[#allocation25_spill] sm:$0xff] }
 0x387   : >> { %v13479_v59 = vmov %v10064_v16  ;;  %v13480_v37 = vmov %v10067_v7  ;;  %v13546_v7 = vmov %v13476_v60 }
 0x388   : >> { %v2834_v34 = vpop.permute.xlu1 %2833  ;;  %v2832_v0 = vpop.permute.xlu0 %2831 }
 0x389   : >> { %v10070_v48 = vadd.f32 %v2834_v34, %v9949_v5   ;;  %v10073_v22 = vadd.f32 %v2832_v0, %v9951_v22  }
 0x38b   : >> { %v13481_v29 = vmov %v10070_v48  ;;  %v13482_v15 = vmov %v10073_v22 }
 0x38c   : >> { %v2838_v39 = vpop.permute.xlu1 %2837  ;;  %v2836_v14 = vpop.permute.xlu0 %2835  ;;  %v13537_v48 = vmov %v13481_v29 }
 0x38d   : >> { %v10076_v62 = vadd.f32 %v2838_v39, %v9957_v54   ;;  %v10079_v39 = vadd.f32 %v2836_v14, %v9959_v13  }
 0x38f   : >> { %v13483_v21 = vmov %v10076_v62  ;;  %v13484_v19 = vmov %v10079_v39 }
 0x390   : >> { %v2842_v12 = vpop.permute.xlu1 %2841  ;;  %v2840_v50 = vpop.permute.xlu0 %2839  ;;  %v13535_v62 = vmov %v13483_v21  ;;  %v13536_v39 = vmov %v13484_v19 }
 0x391   : >> { %v10082_v61 = vadd.f32 %v2842_v12, %v9965_v51   ;;  %v10085_v2 = vadd.f32 %v2840_v50, %v9967_v23   ;;  %v13541_v50 = vmov %v10058_v3  ;;  %v13554_v12 = vld [vmem:[#allocation65_spill] sm:$0xff] }
 0x393   : >> { %13485 = vst [vmem:[#allocation26_spill] sm:$0xff] %v10082_v61  ;;  %v13486_v49 = vmov %v10082_v61  ;;  %13487 = vst [vmem:[#allocation27_spill] sm:$0xff] %v10085_v2  ;;  %v13488_v46 = vmov %v10085_v2 }
 0x394   : >> { %v2846_v5 = vpop.permute.xlu1 %2845  ;;  %v2844_v63 = vpop.permute.xlu0 %2843  ;;  %v13533_v61 = vmov %v13486_v49  ;;  %v13564_v49 = vld [vmem:[#allocation20_spill] sm:$0xff] (%p10126_p2) }
 0x395   : >> { %v10088_v22 = vadd.f32 %v2846_v5, %v9973_v18   ;;  %v10091_v16 = vadd.f32 %v2844_v63, %v9975_v11   ;;  %v13544_v63 = vmov %v13477_v41  ;;  %v13545_v5 = vmov %v10046_v33 }
 0x397   : >> { %13489 = vst [vmem:[#allocation28_spill] sm:$0xff] %v10088_v22  ;;  %13491 = vst [vmem:[#allocation21_spill] sm:$0xff] %v10091_v16  ;;  %v13529_v42 = vmov %v10088_v22  ;;  %v13531_v54 = vmov %v10091_v16  ;;  %v13538_v22 = vmov %v13482_v15 }
 0x398   : >> { %v2889_v27 = vpop.permute.xlu1 %2888  ;;  %v2848_v26 = vpop.permute.xlu0 %2847  ;;  %v13532_v16 = vmov %v13531_v54 }
 0x399   : >> { %v10094_v10 = vadd.f32 %v2889_v27, %v9981_v32   ;;  %v10097_v0 = vadd.f32 %v2848_v26, %v9983_v20   ;;  %v13549_v27 = vld [vmem:[#allocation19_spill] sm:$0xff] }
 0x39b   : >> { %13493 = vst [vmem:[#allocation22_spill] sm:$0xff] %v10094_v10  ;;  %13495 = vst [vmem:[#allocation23_spill] sm:$0xff] %v10097_v0  ;;  %v13525_v31 = vmov %v10094_v10  ;;  %v13527_v4 = vmov %v10097_v0 }
 0x39c   : >> { %v2893_v13 = vpop.permute.xlu1 %2892  ;;  %v2891_v51 = vpop.permute.xlu0 %2890  ;;  %v13526_v10 = vmov %v13525_v31  ;;  %v13528_v0 = vmov %v13527_v4 }
 0x39d   : >> { %v10100_v43 = vadd.f32 %v2893_v13, %v9989_v25   ;;  %v10103_v14 = vadd.f32 %v2891_v51, %v9991_v38   ;;  %v13540_v13 = vmov %v13480_v37  ;;  %v13551_v51 = vld [vmem:[#allocation17_spill] sm:$0xff] }
 0x39e   : > { %v3004_v51 = vstv (%p10126_p2), %s10254_s9 }
 0x39f   : >> { %13497 = vst [vmem:[#allocation24_spill] sm:$0xff] %v10100_v43  ;;  %v13498_v23 = vmov %v10100_v43  ;;  %13499 = vst [vmem:[#allocation29_spill] sm:$0xff] %v10103_v14  ;;  %v13523_v18 = vmov %v10103_v14 }
 0x3a0   : >> { %v2897_v2 = vpop.permute.xlu1 %2896  ;;  %v2895_v55 = vpop.permute.xlu0 %2894  ;;  %v13522_v43 = vmov %v13498_v23  ;;  %v13524_v14 = vmov %v13523_v18  ;;  %v13561_v18 = vld [vmem:[#allocation63_spill] sm:$0xff] (%p10126_p2) }
 0x3a1   : >> { %v10106_v20 = vadd.f32 %v2897_v2, %v9997_v36   ;;  %v10109_v26 = vadd.f32 %v2895_v55, %v9999_v9   ;;  %v13534_v2 = vmov %v13488_v46  ;;  %v13539_v36 = vmov %v13479_v59  ;;  %v13550_v9 = vld [vmem:[#allocation20_spill] sm:$0xff] }
 0x3a2   : >> { %v13542_v55 = vmov %v13478_v40  ;;  %v3006_v2 = vadd.f32 (%p10126_p2), %v3004_v51, %v13481_v29 }
 0x3a3   : >> { %13501 = vst [vmem:[#allocation30_spill] sm:$0xff] %v10106_v20  ;;  %v13502_v11 = vmov %v10106_v20  ;;  %13503 = vst [vmem:[#allocation31_spill] sm:$0xff] %v10109_v26  ;;  %v13504_v24 = vmov %v10109_v26  ;;  %v3008_v55 = vadd.f32 (%p10126_p2), %v3004_v51, %v13483_v21 }
 0x3a4   : >> { %v2901_v32 = vpop.permute.xlu1 %2900  ;;  %v2899_v57 = vpop.permute.xlu0 %2898  ;;  %v13520_v20 = vmov %v13502_v11  ;;  %v13521_v26 = vmov %v13504_v24  ;;  %v13560_v24 = vld [vmem:[#allocation65_spill] sm:$0xff] (%p10126_p2) }
 0x3a5   : >> { %v10112_v35 = vadd.f32 %v2901_v32, %v10005_v45   ;;  %v10115_v34 = vadd.f32 %v2899_v57, %v10007_v30   ;;  %v13543_v32 = vmov %v10052_v1  ;;  %v13547_v57 = vmov %v13474_v56  ;;  %v13552_v30 = vld [vmem:[#allocation18_spill] sm:$0xff]  ;;  %v13565_v20 = vld [vmem:[#allocation19_spill] sm:$0xff] (%p10126_p2) }
 0x3a6   : > { %1222 = sbr.rel (!%p10126_p2) target bundleno = 381 (0x17d), region = 121  ;;  %v2925_v45 = vstv (%p10126_p2), %s2924_s8  ;;  %v13568_v32 = vld [vmem:[#allocation27_spill] sm:$0xff] (%p10126_p2) }
 0x3a7   : >> { %13505 = vst [vmem:[#allocation32_spill] sm:$0xff] %v10112_v35  ;;  %v13506_v17 = vmov %v10112_v35  ;;  %13507 = vst [vmem:[#allocation66_spill] sm:$0xff] %v10115_v34  ;;  %v13518_v44 = vmov %v10115_v34  ;;  %v2928_v23 = vadd.f32 (%p10126_p2), %v2925_v45, %v13560_v24  ;;  %v2929_v31 = vadd.f32 (%p10126_p2), %v2925_v45, %v13561_v18 }
 0x3a8   : >> { %v2905_v25 = vpop.permute.xlu1 %2904  ;;  %v2903_v28 = vpop.permute.xlu0 %2902  ;;  %v13517_v35 = vmov %v13506_v17  ;;  %v13519_v34 = vmov %v13518_v44  ;;  %v13559_v44 = vld [vmem:[#allocation59_spill] sm:$0xff] (%p10126_p2)  ;;  %v2930_v4 = vadd.f32 (%p10126_p2), %v2925_v45, %v13562_v47  ;;  %v2932_v46 = vadd.f32 (%p10126_p2), %v2925_v45, %v13564_v49 }
 0x3a9   : >> { %v10118_v58 = vadd.f32 %v2905_v25, %v10011_v6   ;;  %v10121_v6 = vadd.f32 %v2903_v28, %v10013_v53   ;;  %v13530_v25 = vmov %v13529_v42  ;;  %v13553_v53 = vld [vmem:[#allocation63_spill] sm:$0xff]  ;;  %v2927_v11 = vadd.f32 (%p10126_p2), %v2925_v45, %v13559_v44  ;;  %v13563_v42 = vld [vmem:[#allocation17_spill] sm:$0xff] (%p10126_p2) }
 0x3aa   : >> { %v13555_v28 = vld [vmem:[#allocation59_spill] sm:$0xff]  ;;  %v2931_v54 = vadd.f32 (%p10126_p2), %v2925_v45, %v13563_v42  ;;  %v2933_v36 = vadd.f32 (%p10126_p2), %v2925_v45, %v13565_v20  ;;  %v2938_v53 = vmax.f32 (%p10126_p2), %v2929_v31, 0.0  ;;  %v2939_v44 = vmax.f32 (%p10126_p2), %v2930_v4, 0.0  ;;  %v13569_v25 = vld [vmem:[#allocation26_spill] sm:$0xff] (%p10126_p2) }
 0x3ab   : >> { %13509 = vst [vmem:[#allocation33_spill] sm:$0xff] %v10118_v58  ;;  %v13510_v38 = vmov %v10118_v58  ;;  %13511 = vst [vmem:[#allocation67_spill] sm:$0xff] %v10121_v6  ;;  %v13515_v52 = vmov %v10121_v6  ;;  %v2936_v30 = vmax.f32 (%p10126_p2), %v2927_v11, 0.0  ;;  %v2941_v62 = vmax.f32 (%p10126_p2), %v2932_v46, 0.0  ;;  %v13567_v46 = vld [vmem:[#allocation25_spill] sm:$0xff] (%p10126_p2) }
 0x3ac   : >> { %v13514_v58 = vmov %v13510_v38  ;;  %v13516_v6 = vmov %v13515_v52  ;;  %v10244_v38 = vstv (%p10126_p2), %s5333_s29  ;;  %v13558_v52 = vld [vmem:[#allocation61_spill] sm:$0xff] (%p10126_p2)  ;;  %v2940_v24 = vmax.f32 (%p10126_p2), %v2931_v54, 0.0 }
 0x3ad   : > { %v2926_v17 = vadd.f32 %v2925_v45, %v13558_v52  ;;  %v2937_v6 = vmax.f32 %v2928_v23, 0.0  ;;  %v2942_v58 = vmax.f32 %v2933_v36, 0.0  ;;  %v2945_v52 = vmin.f32 %v2936_v30, 1.0 }
 0x3ae   : > { %v2947_v48 = vmin.f32 %v2938_v53, 1.0  ;;  %v2948_v31 = vmin.f32 %v2939_v44, 1.0  ;;  %v2950_v4 = vmin.f32 %v2941_v62, 1.0  ;;  %v2934_v43 = vadd.f32 %v2925_v45, %v13567_v46 }
 0x3af   : > { %v2935_v9 = vmax.f32 %v2926_v17, 0.0  ;;  %v2946_v10 = vmin.f32 %v2937_v6, 1.0  ;;  %v2949_v17 = vmin.f32 %v2940_v24, 1.0  ;;  %v2951_v35 = vmin.f32 %v2942_v58, 1.0  ;;  %2955 = vst.msk [vmem:[%s13566_s0 + $0x8] sm:$0xff] %vm2953_vm2, %v2945_v52  ;;  %v13570_v24 = vld [vmem:[#allocation21_spill] sm:$0xff] }
 0x3b0   : > { %2957 = vst.msk [vmem:[%s13566_s0 + $0x18] sm:$0xff] %vm2953_vm2, %v2947_v48  ;;  %v2966_v8 = vadd.f32 %v10244_v38, %v13474_v56  ;;  %v2967_v61 = vadd.f32 %v10244_v38, %v13476_v60  ;;  %v2968_v16 = vadd.f32 %v10244_v38, %v10046_v33  ;;  %2958 = vst.msk [vmem:[%s13566_s0 + $0x20] sm:$0xff] %vm2953_vm2, %v2948_v31  ;;  %v2943_v34 = vmax.f32 %v2934_v43, 0.0  ;;  %v13571_v58 = vld [vmem:[#allocation28_spill] sm:$0xff]  ;;  %v13572_v52 = vld [vmem:[#allocation23_spill] sm:$0xff] }
 0x3b1   : > { %v2944_v42 = vmin.f32 %v2935_v9, 1.0  ;;  %2956 = vst.msk [vmem:[%s13566_s0 + $0x10] sm:$0xff] %vm2953_vm2, %v2946_v10  ;;  %2959 = vst.msk [vmem:[%s13566_s0 + $0x28] sm:$0xff] %vm2953_vm2, %v2949_v17  ;;  %v2969_v7 = vadd.f32 %v10244_v38, %v13477_v41  ;;  %v2970_v56 = vadd.f32 %v10244_v38, %v10052_v1  ;;  %v2971_v60 = vadd.f32 %v10244_v38, %v13478_v40  ;;  %v13573_v48 = vld [vmem:[#allocation22_spill] sm:$0xff]  ;;  %v13574_v17 = vld [vmem:[#allocation29_spill] sm:$0xff] }
 0x3b2   : > { %2960 = vst.msk [vmem:[%s13566_s0 + $0x30] sm:$0xff] %vm2953_vm2, %v2950_v4  ;;  %2961 = vst.msk [vmem:[%s13566_s0 + $0x38] sm:$0xff] %vm2953_vm2, %v2951_v35  ;;  %v2972_v33 = vadd.f32 %v10244_v38, %v10058_v3  ;;  %v2975_v0 = vmax.f32 %v2966_v8, 0.0  ;;  %v2976_v39 = vmax.f32 %v2967_v61, 0.0  ;;  %v2977_v14 = vmax.f32 %v2968_v16, 0.0  ;;  %v13575_v35 = vld [vmem:[#allocation24_spill] sm:$0xff] }
 0x3b3   : > { %2954 = vst.msk [vmem:[%s13566_s0] sm:$0xff] %vm2953_vm2, %v2944_v42  ;;  %v2978_v12 = vmax.f32 %v2969_v7, 0.0  ;;  %v2979_v50 = vmax.f32 %v2970_v56, 0.0  ;;  %v2980_v41 = vmax.f32 %v2971_v60, 0.0  ;;  %v2952_v1 = vmin.f32 %v2943_v34, 1.0  ;;  %v13576_v61 = vld [vmem:[#allocation31_spill] sm:$0xff] }
 0x3b4   : > { %v2981_v49 = vmax.f32 %v2972_v33, 0.0  ;;  %v2984_v40 = vmin.f32 %v2975_v0, 1.0  ;;  %v2985_v5 = vmin.f32 %v2976_v39, 1.0  ;;  %v2986_v3 = vmin.f32 %v2977_v14, 1.0  ;;  %v13577_v7 = vld [vmem:[#allocation30_spill] sm:$0xff] }
 0x3b5   : > { %v2987_v63 = vmin.f32 %v2978_v12, 1.0  ;;  %v2988_v22 = vmin.f32 %v2979_v50, 1.0  ;;  %v2989_v54 = vmin.f32 %v2980_v41, 1.0  ;;  %2963 = vst.msk [vmem:[%s13566_s0 + $0x40] sm:$0x1] %vm2962_vm3, %v2952_v1  ;;  %v2973_v26 = vadd.f32 %v10244_v38, %v13480_v37 }
 0x3b6   : > { %v2990_v27 = vmin.f32 %v2981_v49, 1.0  ;;  %5334 = vst.msk [vmem:[%s13566_s0 + $0x48] sm:$0xff] %vm2953_vm2, %v2984_v40  ;;  %5335 = vst.msk [vmem:[%s13566_s0 + $0x50] sm:$0xff] %vm2953_vm2, %v2985_v5  ;;  %v2974_v13 = vadd.f32 %v10244_v38, %v13479_v59  ;;  %v10303_v23 = vstv %s10256_s11  ;;  %v3005_v18 = vadd.f32 %v3004_v51, %v13482_v15 }
 0x3b7   : > { %5336 = vst.msk [vmem:[%s13566_s0 + $0x58] sm:$0xff] %vm2953_vm2, %v2986_v3  ;;  %5337 = vst.msk [vmem:[%s13566_s0 + $0x60] sm:$0xff] %vm2953_vm2, %v2987_v63  ;;  %v3007_v37 = vadd.f32 %v3004_v51, %v13484_v19  ;;  %v2982_v59 = vmax.f32 %v2973_v26, 0.0  ;;  %v3009_v57 = vadd.f32 %v3004_v51, %v13568_v32  ;;  %v3010_v28 = vadd.f32 %v3004_v51, %v13569_v25  ;;  %v13578_v63 = vld [vmem:[#allocation66_spill] sm:$0xff]  ;;  %v13580_v26 = vld [vmem:[#allocation67_spill] sm:$0xff] }
 0x3b8   : > { %5338 = vst.msk [vmem:[%s13566_s0 + $0x68] sm:$0xff] %vm2953_vm2, %v2988_v22  ;;  %5339 = vst.msk [vmem:[%s13566_s0 + $0x70] sm:$0xff] %vm2953_vm2, %v2989_v54  ;;  %v2983_v11 = vmax.f32 %v2974_v13, 0.0  ;;  %v3014_v38 = vmax.f32 %v3005_v18, 0.0  ;;  %v3015_v45 = vmax.f32 %v3006_v2, 0.0  ;;  %v3017_v20 = vmax.f32 %v3008_v55, 0.0 }
 0x3b9   : > { %5340 = vst.msk [vmem:[%s13566_s0 + $0x78] sm:$0xff] %vm2953_vm2, %v2990_v27  ;;  %v3016_v47 = vmax.f32 %v3007_v37, 0.0  ;;  %v2991_v15 = vmin.f32 %v2982_v59, 1.0  ;;  %v3018_v19 = vmax.f32 %v3009_v57, 0.0  ;;  %v3019_v21 = vmax.f32 %v3010_v28, 0.0  ;;  %v13579_v54 = vld [vmem:[#allocation32_spill] sm:$0xff] }
 0x3ba   : > { %v2992_v29 = vmin.f32 %v2983_v11, 1.0  ;;  %v3023_v36 = vmin.f32 %v3014_v38, 1.0  ;;  %v3024_v9 = vmin.f32 %v3015_v45, 1.0  ;;  %v3026_v6 = vmin.f32 %v3017_v20, 1.0 }
 0x3bb   : > { %v3025_v30 = vmin.f32 %v3016_v47, 1.0  ;;  %5341 = vst.msk [vmem:[%s13566_s0 + $0x80] sm:$0xff] %vm2953_vm2, %v2991_v15  ;;  %v3027_v53 = vmin.f32 %v3018_v19, 1.0  ;;  %v3028_v44 = vmin.f32 %v3019_v21, 1.0  ;;  %v3011_v62 = vadd.f32 %v3004_v51, %v13570_v24 }
 0x3bc   : > { %5342 = vst.msk [vmem:[%s13566_s0 + $0x88] sm:$0x1] %vm2962_vm3, %v2992_v29  ;;  %v3012_v42 = vadd.f32 %v3004_v51, %v13571_v58  ;;  %v3013_v10 = vadd.f32 %v3004_v51, %v13572_v52  ;;  %v3044_v31 = vadd.f32 %v10303_v23, %v13573_v48  ;;  %v3045_v4 = vadd.f32 %v10303_v23, %v13574_v17  ;;  %v13581_v51 = vld [vmem:[#allocation33_spill] sm:$0xff] }
 0x3bd   : > { %5344 = vst.msk [vmem:[%s13566_s0 + $0x90] sm:$0xff] %vm2953_vm2, %v3023_v36  ;;  %5345 = vst.msk [vmem:[%s13566_s0 + $0x98] sm:$0xff] %vm2953_vm2, %v3024_v9  ;;  %v3046_v46 = vadd.f32 %v10303_v23, %v13575_v35  ;;  %v3020_v43 = vmax.f32 %v3011_v62, 0.0  ;;  %v3047_v16 = vadd.f32 %v10303_v23, %v13576_v61  ;;  %v3048_v56 = vadd.f32 %v10303_v23, %v13577_v7 }
 0x3be   : > { %5346 = vst.msk [vmem:[%s13566_s0 + $0xa0] sm:$0xff] %vm2953_vm2, %v3025_v30  ;;  %5347 = vst.msk [vmem:[%s13566_s0 + $0xa8] sm:$0xff] %vm2953_vm2, %v3026_v6  ;;  %v3021_v8 = vmax.f32 %v3012_v42, 0.0  ;;  %v3022_v60 = vmax.f32 %v3013_v10, 0.0  ;;  %v3053_v33 = vmax.f32 %v3044_v31, 0.0  ;;  %v3054_v34 = vmax.f32 %v3045_v4, 0.0 }
 0x3bf   : > { %5348 = vst.msk [vmem:[%s13566_s0 + $0xb0] sm:$0xff] %vm2953_vm2, %v3027_v53  ;;  %5349 = vst.msk [vmem:[%s13566_s0 + $0xb8] sm:$0xff] %vm2953_vm2, %v3028_v44  ;;  %v3055_v0 = vmax.f32 %v3046_v46, 0.0  ;;  %v3029_v39 = vmin.f32 %v3020_v43, 1.0  ;;  %v3056_v12 = vmax.f32 %v3047_v16, 0.0  ;;  %v3057_v50 = vmax.f32 %v3048_v56, 0.0 }
 0x3c0   : > { %v3030_v14 = vmin.f32 %v3021_v8, 1.0  ;;  %v3031_v41 = vmin.f32 %v3022_v60, 1.0  ;;  %v3062_v49 = vmin.f32 %v3053_v33, 1.0  ;;  %v3063_v1 = vmin.f32 %v3054_v34, 1.0 }
 0x3c1   : > { %v3064_v40 = vmin.f32 %v3055_v0, 1.0  ;;  %5350 = vst.msk [vmem:[%s13566_s0 + $0xc0] sm:$0xff] %vm2953_vm2, %v3029_v39  ;;  %v3065_v5 = vmin.f32 %v3056_v12, 1.0  ;;  %v3066_v3 = vmin.f32 %v3057_v50, 1.0  ;;  %v3049_v22 = vadd.f32 %v10303_v23, %v13578_v63 }
 0x3c2   : > { %5351 = vst.msk [vmem:[%s13566_s0 + $0xc8] sm:$0xff] %vm2953_vm2, %v3030_v14  ;;  %v3050_v27 = vadd.f32 %v10303_v23, %v13579_v54  ;;  %5354 = vst.msk [vmem:[%s13566_s0 + $0xd8] sm:$0xff] %vm2953_vm2, %v3062_v49  ;;  %v3051_v13 = vadd.f32 %v10303_v23, %v13580_v26  ;;  %v3052_v18 = vadd.f32 %v10303_v23, %v13581_v51  ;;  %v10380_v23 = vmov 0.0  }
 0x3c3   : > { %5352 = vst.msk [vmem:[%s13566_s0 + $0xd0] sm:$0x1] %vm2962_vm3, %v3031_v41  ;;  %v3058_v2 = vmax.f32 %v3049_v22, 0.0  ;;  %v10382_v28 = vmov 0.0   ;;  %v10384_v38 = vmov 0.0   ;;  %v10386_v45 = vmov 0.0  }
 0x3c4   : > { %5355 = vst.msk [vmem:[%s13566_s0 + $0xe0] sm:$0xff] %vm2953_vm2, %v3063_v1  ;;  %5356 = vst.msk [vmem:[%s13566_s0 + $0xe8] sm:$0xff] %vm2953_vm2, %v3064_v40  ;;  %v3059_v37 = vmax.f32 %v3050_v27, 0.0  ;;  %v3060_v55 = vmax.f32 %v3051_v13, 0.0  ;;  %v3061_v59 = vmax.f32 %v3052_v18, 0.0  ;;  %v10388_v47 = vmov 0.0  }
 0x3c5   : > { %5357 = vst.msk [vmem:[%s13566_s0 + $0xf0] sm:$0xff] %vm2953_vm2, %v3065_v5  ;;  %5358 = vst.msk [vmem:[%s13566_s0 + $0xf8] sm:$0xff] %vm2953_vm2, %v3066_v3  ;;  %v3067_v11 = vmin.f32 %v3058_v2, 1.0  ;;  %v10390_v20 = vmov 0.0   ;;  %v10392_v15 = vmov 0.0   ;;  %v10394_v29 = vmov 0.0  }
 0x3c6   : > { %v3068_v32 = vmin.f32 %v3059_v37, 1.0  ;;  %v3069_v57 = vmin.f32 %v3060_v55, 1.0  ;;  %v3070_v25 = vmin.f32 %v3061_v59, 1.0  ;;  %v10396_v19 = vmov 0.0  }
 0x3c7   : > { %5359 = vst.msk [vmem:[%s13566_s0 + $0x100] sm:$0xff] %vm2953_vm2, %v3067_v11  ;;  %v10398_v21 = vmov 0.0   ;;  %v10400_v36 = vmov 0.0   ;;  %v10402_v9 = vmov 0.0   ;;  %v10404_v30 = vmov 0.0  }
 0x3c8   : > { %5360 = vst.msk [vmem:[%s13566_s0 + $0x108] sm:$0xff] %vm2953_vm2, %v3068_v32  ;;  %5361 = vst.msk [vmem:[%s13566_s0 + $0x110] sm:$0xff] %vm2953_vm2, %v3069_v57  ;;  %v10406_v6 = vmov 0.0   ;;  %v10408_v53 = vmov 0.0   ;;  %v10410_v44 = vmov 0.0   ;;  %v10412_v24 = vmov 0.0  }
 0x3c9   : > { %5362 = vst.msk [vmem:[%s13566_s0 + $0x118] sm:$0x1] %vm2962_vm3, %v3070_v25  ;;  %v10414_v62 = vmov 0.0   ;;  %v10416_v58 = vmov 0.0   ;;  %v10418_v42 = vmov 0.0   ;;  %v10420_v52 = vmov 0.0  }
 0x3ca   : > { %v10422_v10 = vmov 0.0   ;;  %v10424_v48 = vmov 0.0   ;;  %v10426_v31 = vmov 0.0   ;;  %v10428_v17 = vmov 0.0  }
 0x3cb   : > { %v10430_v4 = vmov 0.0   ;;  %v10432_v35 = vmov 0.0   ;;  %v10434_v46 = vmov 0.0   ;;  %v10436_v43 = vmov 0.0  }
 0x3cc   : > { %v10438_v8 = vmov 0.0   ;;  %v10440_v61 = vmov 0.0   ;;  %v10442_v16 = vmov 0.0   ;;  %v10444_v7 = vmov 0.0  }
 0x3cd   : > { %v10446_v56 = vmov 0.0   ;;  %v10448_v60 = vmov 0.0   ;;  %v10450_v33 = vmov 0.0  }
 0x3ce LB: >> { %13582 = vst [vmem:[#allocation220_spill] sm:$0xff] %v6616_v23  ;;  %13583 = vst [vmem:[#allocation221_spill] sm:$0xff] %v6620_v28  ;;  %s3123_s15 = smul.u32 72, %s6760_s14  ;;  %s3134_s10 = sadd.s32 32, %s6760_s14  ;;  %s6760_s14 = sphi %s10452_s14, %s14074_s14   ;;  %v6756_v33 = vphi %v10450_v33, %v14073_v33   ;;  %v6752_v60 = vphi %v10448_v60, %v14072_v60   ;;  %v6748_v56 = vphi %v10446_v56, %v14071_v56   ;;  %v6744_v7 = vphi %v10444_v7, %v14070_v7   ;;  %v6740_v16 = vphi %v10442_v16, %v14069_v16   ;;  %v6736_v61 = vphi %v10440_v61, %v14068_v61   ;;  %v6732_v8 = vphi %v10438_v8, %v14067_v8   ;;  %v6728_v43 = vphi %v10436_v43, %v14066_v43   ;;  %v6724_v46 = vphi %v10434_v46, %v14065_v46   ;;  %v6720_v35 = vphi %v10432_v35, %v14064_v35   ;;  %v6716_v4 = vphi %v10430_v4, %v14063_v4   ;;  %v6712_v17 = vphi %v10428_v17, %v14062_v17   ;;  %v6708_v31 = vphi %v10426_v31, %v14061_v31   ;;  %v6704_v48 = vphi %v10424_v48, %v14060_v48   ;;  %v6700_v10 = vphi %v10422_v10, %v14059_v10   ;;  %v6696_v52 = vphi %v10420_v52, %v14058_v52   ;;  %v6692_v42 = vphi %v10418_v42, %v14057_v42   ;;  %v6688_v58 = vphi %v10416_v58, %v14056_v58   ;;  %v6684_v62 = vphi %v10414_v62, %v14055_v62   ;;  %v6680_v24 = vphi %v10412_v24, %v14054_v24   ;;  %v6676_v44 = vphi %v10410_v44, %v14053_v44   ;;  %v6672_v53 = vphi %v10408_v53, %v14052_v53   ;;  %v6668_v6 = vphi %v10406_v6, %v14051_v6   ;;  %v6664_v30 = vphi %v10404_v30, %v14050_v30   ;;  %v6660_v9 = vphi %v10402_v9, %v14049_v9   ;;  %v6656_v36 = vphi %v10400_v36, %v14047_v36   ;;  %v6652_v21 = vphi %v10398_v21, %v14046_v21   ;;  %v6648_v19 = vphi %v10396_v19, %v14045_v19   ;;  %v6644_v29 = vphi %v10394_v29, %v14044_v29   ;;  %v6640_v15 = vphi %v10392_v15, %v14043_v15   ;;  %v6636_v20 = vphi %v10390_v20, %v14041_v20   ;;  %v6632_v47 = vphi %v10388_v47, %v14039_v47   ;;  %v6628_v45 = vphi %v10386_v45, %v14038_v45   ;;  %v6624_v38 = vphi %v10384_v38, %v14037_v38   ;;  %v6620_v28 = vphi %v10382_v28, %v14036_v28   ;;  %v6616_v23 = vphi %v10380_v23, %v14034_v23  }
 0x3cf   : >> { %13584 = vst [vmem:[#allocation222_spill] sm:$0xff] %v6624_v38  ;;  %13585 = vst [vmem:[#allocation223_spill] sm:$0xff] %v6628_v45  ;;  %s10569_s17 = smul.u32 9, %s3134_s10  ;;  %s3156_s19 = sadd.s32 40, %s6760_s14 }
 0x3d0   : >> { %13586 = vst [vmem:[#allocation224_spill] sm:$0xff] %v6632_v47  ;;  %13587 = vst [vmem:[#allocation225_spill] sm:$0xff] %v6636_v20  ;;  %s10576_s23 = smul.u32 9, %s3156_s19  ;;  %s10578_s24 = scalar_lea.vmem [#allocation3], %s3123_s15 }
 0x3d1   : >> { %13588 = vst [vmem:[#allocation226_spill] sm:$0xff] %v6640_v15  ;;  %13589 = vst [vmem:[#allocation227_spill] sm:$0xff] %v6644_v29  ;;  %s3136_s16 = sld [smem:[#allocation8 + %s10569_s17]]  ;;  %s3222_s20 = sadd.s32 1, %s10569_s17  ;;  %v10581_v34 = vld [vmem:[%s10578_s24 + $0x10] sm:$0xff]  ;;  %v10584_v0 = vld [vmem:[%s10578_s24] sm:$0xff] }
 0x3d2   : >> { %13590 = vst [vmem:[#allocation228_spill] sm:$0xff] %v6648_v19  ;;  %13591 = vst [vmem:[#allocation229_spill] sm:$0xff] %v6652_v21  ;;  %s3223_s21 = sld [smem:[#allocation8 + %s3222_s20]]  ;;  %v10587_v39 = vld [vmem:[%s10578_s24 + $0x18] sm:$0xff]  ;;  %s3279_s5 = sadd.s32 1, %s10576_s23  ;;  %v10593_v50 = vld [vmem:[%s10578_s24 + $0x8] sm:$0xff] }
 0x3d3   : >> { %13592 = vst [vmem:[#allocation230_spill] sm:$0xff] %v6656_v36  ;;  %13593 = vst [vmem:[#allocation231_spill] sm:$0xff] %v6660_v9  ;;  %s3450_s2 = sadd.s32 2, %s10569_s17  ;;  %s3280_s7 = sld [smem:[#allocation8 + %s3279_s5]]  ;;  %v10616_v22 = vld [vmem:[%s10578_s24 + $0x28] sm:$0xff]  ;;  %v10619_v54 = vld [vmem:[%s10578_s24 + $0x20] sm:$0xff] }
 0x3d4   : >> { %13594 = vst [vmem:[#allocation232_spill] sm:$0xff] %v6664_v30  ;;  %13595 = vst [vmem:[#allocation233_spill] sm:$0xff] %v6668_v6  ;;  %s3178_s13 = sadd.s32 48, %s6760_s14  ;;  %s6770_s12 = smov 127   ;;  %v10623_v27 = vld [vmem:[%s10578_s24 + $0x38] sm:$0xff]  ;;  %v10626_v26 = vld [vmem:[%s10578_s24 + $0x30] sm:$0xff] }
 0x3d5   : >> { %13596 = vst [vmem:[#allocation234_spill] sm:$0xff] %v6672_v53  ;;  %13597 = vst [vmem:[#allocation235_spill] sm:$0xff] %v6676_v44  ;;  %s3200_s25 = sadd.s32 56, %s6760_s14  ;;  %s3451_s26 = sld [smem:[#allocation8 + %s3450_s2]]  ;;  %v10666_v32 = vld [vmem:[%s10578_s24 + $0x40] sm:$0x1] }
 0x3d6   : >> { %13598 = vst [vmem:[#allocation236_spill] sm:$0xff] %v6680_v24  ;;  %13599 = vst [vmem:[#allocation237_spill] sm:$0xff] %v6684_v62  ;;  %s3507_s22 = sadd.s32 2, %s10576_s23  ;;  %s10643_s28 = smul.u32 9, %s3178_s13 }
 0x3d7   : >> { %13600 = vst [vmem:[#allocation238_spill] sm:$0xff] %v6688_v58  ;;  %13601 = vst [vmem:[#allocation239_spill] sm:$0xff] %v6692_v42  ;;  %v10590_v14 = vstv %s3136_s16  ;;  %s10655_s4 = smul.u32 9, %s3200_s25  ;;  %s3508_s18 = sld [smem:[#allocation8 + %s3507_s22]] }
 0x3d8   : >> { %13602 = vst [vmem:[#allocation240_spill] sm:$0xff] %v6696_v52  ;;  %13603 = vst [vmem:[#allocation241_spill] sm:$0xff] %v6700_v10  ;;  %v3224_v12 = vstv %s3223_s21  ;;  %v10598_v41 = vmul.f32 %v10590_v14, %v10581_v34  ;;  %v10602_v49 = vmul.f32 %v10590_v14, %v10584_v0  ;;  %v10606_v1 = vmul.f32 %v10590_v14, %v10587_v39  ;;  %s3564_s27 = sadd.s32 2, %s10643_s28  ;;  %s10709_s6 = sld [smem:[#allocation8 + %s10576_s23]] }
 0x3d9   : >> { %13604 = vst [vmem:[#allocation242_spill] sm:$0xff] %v6704_v48  ;;  %13605 = vst [vmem:[#allocation243_spill] sm:$0xff] %v6708_v31  ;;  %v3227_v40 = vmul.f32 %v3224_v12, %v10581_v34  ;;  %v3225_v5 = vmul.f32 %v3224_v12, %v10584_v0  ;;  %v3228_v3 = vmul.f32 %v3224_v12, %v10587_v39  ;;  %s3621_s30 = sadd.s32 2, %s10655_s4  ;;  %v10663_v11 = vstv %s3280_s7  ;;  %s10668_s1 = sld [smem:[#allocation8 + %s3564_s27]] }
 0x3da   : >> { %13606 = vst [vmem:[#allocation244_spill] sm:$0xff] %v6712_v17  ;;  %13607 = vst [vmem:[#allocation245_spill] sm:$0xff] %v6716_v4  ;;  %v3226_v63 = vmul.f32 %v3224_v12, %v10593_v50  ;;  %v10631_v13 = vmul.f32 %v10590_v14, %v10593_v50  ;;  %v10635_v51 = vmul.f32 %v10590_v14, %v10616_v22  ;;  %s10674_s3 = sld [smem:[#allocation8 + %s3621_s30]]  ;;  %s3336_s8 = sadd.s32 1, %s10643_s28 }
 0x3db   : >> { %13608 = vst [vmem:[#allocation246_spill] sm:$0xff] %v6720_v35  ;;  %13609 = vst [vmem:[#allocation247_spill] sm:$0xff] %v6724_v46  ;;  %3247 = vrot.lane.b32.xlu1 %v3227_v40, %s6770_s12  ;;  %3243 = vrot.lane.b32.xlu0 %v3225_v5, %s6770_s12  ;;  %v10639_v18 = vmul.f32 %v10590_v14, %v10619_v54  ;;  %v10647_v2 = vmul.f32 %v10590_v14, %v10623_v27  ;;  %v3452_v40 = vstv %s3451_s26  ;;  %s3337_s29 = sld [smem:[#allocation8 + %s3336_s8]]  ;;  %s3393_s9 = sadd.s32 1, %s10655_s4 }
 0x3dc   : >> { %13610 = vst [vmem:[#allocation248_spill] sm:$0xff] %v6728_v43  ;;  %13611 = vst [vmem:[#allocation249_spill] sm:$0xff] %v6732_v8  ;;  %v10651_v37 = vmul.f32 %v10590_v14, %v10626_v26  ;;  %v3230_v55 = vmul.f32 %v3224_v12, %v10616_v22  ;;  %v3229_v59 = vmul.f32 %v3224_v12, %v10619_v54  ;;  %s3180_s0 = sld [smem:[#allocation8 + %s10643_s28]]  ;;  %s6771_s17 = smov 126  }
 0x3dd   : >> { %13612 = vst [vmem:[#allocation250_spill] sm:$0xff] %v6736_v61  ;;  %13613 = vst [vmem:[#allocation251_spill] sm:$0xff] %v6740_v16  ;;  %v3232_v57 = vmul.f32 %v3224_v12, %v10623_v27  ;;  %v3231_v25 = vmul.f32 %v3224_v12, %v10626_v26  ;;  %v3282_v5 = vmul.f32 %v10663_v11, %v10584_v0  ;;  %v3509_v20 = vstv %s3508_s18  ;;  %s3202_s11 = sld [smem:[#allocation8 + %s10655_s4]]  ;;  %s10996_s16 = smul.u32 3, %s3134_s10 }
 0x3de   : >> { %13614 = vst [vmem:[#allocation252_spill] sm:$0xff] %v6752_v60  ;;  %13615 = vst [vmem:[#allocation253_spill] sm:$0xff] %v10635_v51  ;;  %v10689_v28 = vmul.f32 %v3452_v40, %v10581_v34  ;;  %v10692_v23 = vmul.f32 %v3452_v40, %v10616_v22  ;;  %v10695_v45 = vmul.f32 %v3452_v40, %v10619_v54  ;;  %v3159_v46 = vstv %s10709_s6  ;;  %s3394_s15 = sld [smem:[#allocation8 + %s3393_s9]]  ;;  %s11036_s5 = smul.u32 3, %s3156_s19 }
 0x3df   : >> { %13616 = vst [vmem:[#allocation254_spill] sm:$0xff] %v10639_v18  ;;  %13617 = vst [vmem:[#allocation255_spill] sm:$0xff] %v10647_v2  ;;  %3249 = vrot.lane.b32.xlu1 %v3228_v3, %s6770_s12  ;;  %3245 = vrot.lane.b32.xlu0 %v3226_v63, %s6770_s12  ;;  %v3233_v3 = vmul.f32 %v3224_v12, %v10666_v32  ;;  %v10680_v63 = vmul.f32 %v3452_v40, %v10593_v50  ;;  %v3566_v44 = vstv %s10668_s1  ;;  %s3688_s20 = sadd.s32 1, %s10996_s16  ;;  %s11110_s22 = smul.u32 3, %s3178_s13 }
 0x3e0   : >> { %13618 = vst [vmem:[#allocation256_spill] sm:$0xff] %v10651_v37  ;;  %v10700_v12 = vmul.f32 %v3452_v40, %v10623_v27  ;;  %v10703_v38 = vmul.f32 %v3452_v40, %v10626_v26  ;;  %v10706_v47 = vmul.f32 %v3452_v40, %v10666_v32  ;;  %v10712_v29 = vmul.f32 %v3509_v20, %v10584_v0  ;;  %s11015_s10 = smul.u32 3, %s3688_s20  ;;  %s3711_s2 = sadd.s32 1, %s11036_s5 }
 0x3e1   : >> { %v10721_v15 = vmul.f32 %v3509_v20, %v10619_v54  ;;  %v10724_v21 = vmul.f32 %v3509_v20, %v10587_v39  ;;  %v10730_v19 = vmul.f32 %v3509_v20, %v10616_v22  ;;  %v10733_v9 = vmul.f32 %v3509_v20, %v10666_v32  ;;  %s11061_s19 = smul.u32 3, %s3711_s2  ;;  %s3734_s28 = sadd.s32 1, %s11110_s22 }
 0x3e2   : >> { %v3284_v36 = vmul.f32 %v10663_v11, %v10581_v34  ;;  %v3283_v6 = vmul.f32 %v10663_v11, %v10593_v50  ;;  %v10740_v30 = vmul.f32 %v3509_v20, %v10623_v27  ;;  %v10746_v53 = vmul.f32 %v3566_v44, %v10593_v50  ;;  %s3779_s21 = sadd.s32 1, %s11015_s10  ;;  %s11132_s13 = smul.u32 3, %s3734_s28 }
 0x3e3   : >> { %3253 = vrot.lane.b32.xlu1 %v3230_v55, %s6770_s12  ;;  %3251 = vrot.lane.b32.xlu0 %v3229_v59, %s6770_s12  ;;  %v10683_v55 = vmul.f32 %v3452_v40, %v10584_v0  ;;  %v10686_v59 = vmul.f32 %v3452_v40, %v10587_v39  ;;  %v10727_v40 = vmul.f32 %v3509_v20, %v10626_v26  ;;  %v3623_v42 = vstv %s10674_s3  ;;  %s3780_s23 = sld [smem:[#allocation8 + %s3779_s21]]  ;;  %s3836_s7 = sadd.s32 1, %s11061_s19 }
 0x3e4   : >> { %v10749_v62 = vmul.f32 %v3566_v44, %v10584_v0  ;;  %v10752_v24 = vmul.f32 %v3566_v44, %v10587_v39  ;;  %v10756_v58 = vmul.f32 %v3566_v44, %v10581_v34  ;;  %v10769_v10 = vmul.f32 %v3566_v44, %v10626_v26  ;;  %s3837_s26 = sld [smem:[#allocation8 + %s3836_s7]]  ;;  %s3893_s4 = sadd.s32 1, %s11132_s13 }
 0x3e5   : >> { %v10772_v52 = vmul.f32 %v3623_v42, %v10584_v0  ;;  %v10775_v31 = vmul.f32 %v3566_v44, %v10666_v32  ;;  %v3286_v48 = vmul.f32 %v10663_v11, %v10619_v54  ;;  %v10780_v4 = vmul.f32 %v3623_v42, %v10581_v34  ;;  %s3894_s18 = sld [smem:[#allocation8 + %s3893_s4]]  ;;  %s11153_s27 = smul.u32 3, %s3200_s25 }
 0x3e6   : >> { %v10783_v17 = vmul.f32 %v3623_v42, %v10593_v50  ;;  %v3285_v35 = vmul.f32 %v10663_v11, %v10587_v39  ;;  %v10795_v8 = vmul.f32 %v3623_v42, %v10619_v54  ;;  %v10798_v37 = vmul.f32 %v3159_v46, %v10584_v0  ;;  %s4007_s6 = sadd.s32 2, %s11015_s10  ;;  %s4121_s9 = sadd.s32 2, %s11132_s13 }
 0x3e7   : >> { %3257 = vrot.lane.b32.xlu1 %v3232_v57, %s6770_s12  ;;  %3255 = vrot.lane.b32.xlu0 %v3231_v25, %s6770_s12  ;;  %v10715_v57 = vmul.f32 %v3509_v20, %v10581_v34  ;;  %v10718_v25 = vmul.f32 %v3509_v20, %v10593_v50  ;;  %v10759_v20 = vmul.f32 %v3566_v44, %v10616_v22  ;;  %v3338_v61 = vstv %s3337_s29  ;;  %s3757_s30 = sadd.s32 1, %s11153_s27  ;;  %s4008_s8 = sld [smem:[#allocation8 + %s4007_s6]] }
 0x3e8   : >> { %13620 = vst [vmem:[#allocation258_spill] sm:$0xff] %v10798_v37  ;;  %v10807_v43 = vmul.f32 %v3159_v46, %v10593_v50  ;;  %v10810_v2 = vmul.f32 %v3623_v42, %v10626_v26  ;;  %v3287_v37 = vmul.f32 %v10663_v11, %v10616_v22  ;;  %v10835_v16 = vmul.f32 %v3159_v46, %v10626_v26  ;;  %s11172_s25 = smul.u32 3, %s3757_s30  ;;  %s4064_s29 = sadd.s32 2, %s11061_s19 }
 0x3e9   : >> { %v10838_v18 = vmul.f32 %v3159_v46, %v10616_v22  ;;  %v3395_v60 = vstv %s3394_s15  ;;  %s4244_s21 = sadd.s32 2, %s10996_s16  ;;  %s4266_s7 = sadd.s32 2, %s11036_s5 }
 0x3ea   : >> { %13622 = vst [vmem:[#allocation260_spill] sm:$0xff] %v10807_v43  ;;  %v10826_v43 = vmul.f32 %v3159_v46, %v10587_v39  ;;  %13625 = vst [vmem:[#allocation263_spill] sm:$0xff] %v10835_v16  ;;  %v10850_v16 = vmul.f32 %v3159_v46, %v10623_v27  ;;  %s3950_s1 = sadd.s32 1, %s11172_s25  ;;  %s4178_s15 = sadd.s32 2, %s11172_s25 }
 0x3eb   : >> { %3300 = vrot.lane.b32.xlu1 %v3282_v5, %s6770_s12  ;;  %3259 = vrot.lane.b32.xlu0 %v3233_v3, %s6770_s12  ;;  %v10762_v5 = vmul.f32 %v3566_v44, %v10619_v54  ;;  %v10765_v3 = vmul.f32 %v3566_v44, %v10623_v27  ;;  %v10792_v44 = vmul.f32 %v10590_v14, %v10666_v32  ;;  %s3951_s3 = sld [smem:[#allocation8 + %s3950_s1]]  ;;  %s11406_s5 = smul.u32 3, %s4266_s7 }
 0x3ec   : >> { %v3288_v14 = vmul.f32 %v10663_v11, %v10626_v26  ;;  %13624 = vst [vmem:[#allocation262_spill] sm:$0xff] %v10826_v43  ;;  %13626 = vst [vmem:[#allocation264_spill] sm:$0xff] %v10838_v18  ;;  %v3290_v43 = vmul.f32 %v10663_v11, %v10666_v32  ;;  %v3181_v18 = vstv %s3180_s0  ;;  %s4065_s0 = sld [smem:[#allocation8 + %s4064_s29]]  ;;  %s4288_s4 = sadd.s32 2, %s11110_s22 }
 0x3ed   : >> { %13619 = vst [vmem:[#allocation257_spill] sm:$0xff] %v10792_v44  ;;  %v10819_v44 = vmul.f32 %v3623_v42, %v10616_v22  ;;  %13628 = vst [vmem:[#allocation266_spill] sm:$0xff] %v10850_v16  ;;  %v10857_v51 = vmul.f32 %v3181_v18, %v10593_v50  ;;  %v3203_v16 = vstv %s3202_s11  ;;  %s4122_s11 = sld [smem:[#allocation8 + %s4121_s9]]  ;;  %s4310_s1 = sadd.s32 2, %s11153_s27 }
 0x3ee   : >> { %s4179_s20 = sld [smem:[#allocation8 + %s4178_s15]]  ;;  %s11563_s27 = smul.u32 3, %s4310_s1 }
 0x3ef   : >> { %3304 = vrot.lane.b32.xlu1 %v3284_v36, %s6770_s12  ;;  %3302 = vrot.lane.b32.xlu0 %v3283_v6, %s6770_s12  ;;  %v10801_v36 = vmul.f32 %v3623_v42, %v10587_v39  ;;  %v10804_v6 = vmul.f32 %v3159_v46, %v10581_v34  ;;  %13629 = vst [vmem:[#allocation267_spill] sm:$0xff] %v10857_v51  ;;  %s3713_s29 = sld [smem:[#allocation8 + %s11061_s19]] }
 0x3f0   : >> { %v10875_v51 = vmul.f32 %v3181_v18, %v10616_v22  ;;  %s11717_s19 = sld [smem:[#allocation8 + %s11172_s25]] }
 0x3f1   : >> { %13621 = vst [vmem:[#allocation259_spill] sm:$0xff] %v10804_v6  ;;  %v10823_v6 = vmul.f32 %v3159_v46, %v10619_v54 }
 0x3f2   : >> { %13633 = vst [vmem:[#allocation271_spill] sm:$0xff] %v10875_v51  ;;  %v10891_v51 = vmul.f32 %v3203_v16, %v10584_v0 }
 0x3f3   : >> { %3308 = vrot.lane.b32.xlu1 %v3286_v48, %s6770_s12  ;;  %3306 = vrot.lane.b32.xlu0 %v3285_v35, %s6770_s12  ;;  %13623 = vst [vmem:[#allocation261_spill] sm:$0xff] %v10823_v6  ;;  %v10829_v48 = vmul.f32 %v3623_v42, %v10666_v32  ;;  %v10832_v35 = vmul.f32 %v3623_v42, %v10623_v27 }
 0x3f4   : >> { %v3289_v6 = vmul.f32 %v10663_v11, %v10623_v27  ;;  %v10847_v42 = vmul.f32 %v3159_v46, %v10666_v32  ;;  %v10860_v11 = vmul.f32 %v3181_v18, %v10584_v0  ;;  %v10868_v46 = vmul.f32 %v3181_v18, %v10581_v34  ;;  %13637 = vst [vmem:[#allocation275_spill] sm:$0xff] %v10891_v51 }
 0x3f5   : >> { %v3347_v51 = vmul.f32 %v3338_v61, %v10666_v32 }
 0x3f6   : >> { %13627 = vst [vmem:[#allocation265_spill] sm:$0xff] %v10847_v42  ;;  %13630 = vst [vmem:[#allocation268_spill] sm:$0xff] %v10860_v11  ;;  %v10864_v42 = vmul.f32 %v3181_v18, %v10587_v39  ;;  %v10878_v11 = vmul.f32 %v3181_v18, %v10619_v54 }
 0x3f7   : >> { %3312 = vrot.lane.b32.xlu1 %v3288_v14, %s6770_s12  ;;  %3310 = vrot.lane.b32.xlu0 %v3287_v37, %s6770_s12  ;;  %v3340_v14 = vmul.f32 %v3338_v61, %v10593_v50  ;;  %v3339_v37 = vmul.f32 %v3338_v61, %v10584_v0  ;;  %13632 = vst [vmem:[#allocation270_spill] sm:$0xff] %v10868_v46 }
 0x3f8   : >> { %13631 = vst [vmem:[#allocation269_spill] sm:$0xff] %v10864_v42  ;;  %13634 = vst [vmem:[#allocation272_spill] sm:$0xff] %v10878_v11  ;;  %v3344_v46 = vmul.f32 %v3338_v61, %v10616_v22  ;;  %v10888_v42 = vmul.f32 %v3181_v18, %v10626_v26  ;;  %v10894_v11 = vmul.f32 %v3181_v18, %v10666_v32 }
 0x3fa   : >> { %13636 = vst [vmem:[#allocation274_spill] sm:$0xff] %v10888_v42  ;;  %13638 = vst [vmem:[#allocation276_spill] sm:$0xff] %v10894_v11  ;;  %v10904_v42 = vmul.f32 %v3203_v16, %v10593_v50  ;;  %v10917_v11 = vmul.f32 %v3203_v16, %v10626_v26 }
 0x3fb   : >> { %3316 = vrot.lane.b32.xlu1 %v3290_v43, %s6770_s12  ;;  %3314 = vrot.lane.b32.xlu0 %v3289_v6, %s6770_s12  ;;  %v3342_v43 = vmul.f32 %v3338_v61, %v10587_v39  ;;  %v3341_v6 = vmul.f32 %v3338_v61, %v10581_v34 }
 0x3ff   : >> { %3359 = vrot.lane.b32.xlu1 %v3340_v14, %s6770_s12  ;;  %3357 = vrot.lane.b32.xlu0 %v3339_v37, %s6770_s12  ;;  %v3343_v14 = vmul.f32 %v3338_v61, %v10619_v54  ;;  %v10885_v37 = vmul.f32 %v3181_v18, %v10623_v27  ;;  %v3396_v18 = vmul.f32 %v3395_v60, %v10584_v0 }
 0x400   : >> { %v3397_v0 = vmul.f32 %v3395_v60, %v10593_v50  ;;  %v3401_v50 = vmul.f32 %v3395_v60, %v10616_v22 }
 0x401   : >> { %13635 = vst [vmem:[#allocation273_spill] sm:$0xff] %v10885_v37  ;;  %v10901_v37 = vmul.f32 %v3203_v16, %v10581_v34 }
 0x403   : >> { %3363 = vrot.lane.b32.xlu1 %v3342_v43, %s6770_s12  ;;  %3361 = vrot.lane.b32.xlu0 %v3341_v6, %s6770_s12  ;;  %v3346_v43 = vmul.f32 %v3338_v61, %v10623_v27  ;;  %v3345_v6 = vmul.f32 %v3338_v61, %v10626_v26  ;;  %13639 = vst [vmem:[#allocation277_spill] sm:$0xff] %v10901_v37 }
 0x404   : >> { %v10920_v37 = vmul.f32 %v3203_v16, %v10616_v22  ;;  %v3398_v61 = vmul.f32 %v3395_v60, %v10581_v34  ;;  %v3402_v34 = vmul.f32 %v3395_v60, %v10626_v26  ;;  %v11088_v26 = vld [vmem:[%s10578_s24 + $0x21] sm:$0xff] }
 0x406   : >> { %13640 = vst [vmem:[#allocation278_spill] sm:$0xff] %v10920_v37  ;;  %v3400_v37 = vmul.f32 %v3395_v60, %v10619_v54 }
 0x407   : >> { %3367 = vrot.lane.b32.xlu1 %v3344_v46, %s6770_s12  ;;  %3365 = vrot.lane.b32.xlu0 %v3343_v14, %s6770_s12  ;;  %v10911_v46 = vmul.f32 %v3203_v16, %v10619_v54  ;;  %v10914_v14 = vmul.f32 %v3203_v16, %v10587_v39 }
 0x40b   : >> { %3371 = vrot.lane.b32.xlu1 %v3346_v43, %s6770_s12  ;;  %3369 = vrot.lane.b32.xlu0 %v3345_v6, %s6770_s12  ;;  %v10927_v43 = vmul.f32 %v3203_v16, %v10666_v32  ;;  %v10930_v6 = vmul.f32 %v3203_v16, %v10623_v27  ;;  %v3404_v16 = vmul.f32 %v3395_v60, %v10666_v32 }
 0x40f   : >> { %3414 = vrot.lane.b32.xlu1 %v3396_v18, %s6770_s12  ;;  %3373 = vrot.lane.b32.xlu0 %v3347_v51, %s6770_s12  ;;  %v3399_v18 = vmul.f32 %v3395_v60, %v10587_v39  ;;  %v3403_v51 = vmul.f32 %v3395_v60, %v10623_v27  ;;  %v11085_v27 = vld [vmem:[%s10578_s24 + $0x29] sm:$0xff] }
 0x413   : >> { %3418 = vrot.lane.b32.xlu1 %v3398_v61, %s6770_s12  ;;  %3416 = vrot.lane.b32.xlu0 %v3397_v0, %s6770_s12 }
 0x417   : >> { %3422 = vrot.lane.b32.xlu1 %v3400_v37, %s6770_s12  ;;  %3420 = vrot.lane.b32.xlu0 %v3399_v18, %s6770_s12 }
 0x41b   : >> { %3426 = vrot.lane.b32.xlu1 %v3402_v34, %s6770_s12  ;;  %3424 = vrot.lane.b32.xlu0 %v3401_v50, %s6770_s12 }
 0x41f   : >> { %3430 = vrot.lane.b32.xlu1 %v3404_v16, %s6770_s12  ;;  %3428 = vrot.lane.b32.xlu0 %v3403_v51, %s6770_s12 }
 0x423   : >> { %3473 = vrot.lane.b32.xlu1 %v10680_v63, %s6771_s17  ;;  %3471 = vrot.lane.b32.xlu0 %v10683_v55, %s6771_s17 }
 0x427   : >> { %3477 = vrot.lane.b32.xlu1 %v10686_v59, %s6771_s17  ;;  %3475 = vrot.lane.b32.xlu0 %v10689_v28, %s6771_s17  ;;  %v11099_v59 = vld [vmem:[%s10578_s24 + $0x39] sm:$0xff] }
 0x42b   : >> { %3481 = vrot.lane.b32.xlu1 %v10692_v23, %s6771_s17  ;;  %3479 = vrot.lane.b32.xlu0 %v10695_v45, %s6771_s17 }
 0x42f   : >> { %3485 = vrot.lane.b32.xlu1 %v10700_v12, %s6771_s17  ;;  %3483 = vrot.lane.b32.xlu0 %v10703_v38, %s6771_s17  ;;  %v11102_v12 = vld [vmem:[%s10578_s24 + $0x31] sm:$0xff] }
 0x433   : >> { %3528 = vrot.lane.b32.xlu1 %v10712_v29, %s6771_s17  ;;  %3487 = vrot.lane.b32.xlu0 %v10706_v47, %s6771_s17 }
 0x437   : >> { %3532 = vrot.lane.b32.xlu1 %v10715_v57, %s6771_s17  ;;  %3530 = vrot.lane.b32.xlu0 %v10718_v25, %s6771_s17 }
 0x43b   : >> { %3536 = vrot.lane.b32.xlu1 %v10721_v15, %s6771_s17  ;;  %3534 = vrot.lane.b32.xlu0 %v10724_v21, %s6771_s17 }
 0x43f   : >> { %3540 = vrot.lane.b32.xlu1 %v10727_v40, %s6771_s17  ;;  %3538 = vrot.lane.b32.xlu0 %v10730_v19, %s6771_s17 }
 0x443   : >> { %3544 = vrot.lane.b32.xlu1 %v10733_v9, %s6771_s17  ;;  %3542 = vrot.lane.b32.xlu0 %v10740_v30, %s6771_s17 }
 0x447   : >> { %3587 = vrot.lane.b32.xlu1 %v10746_v53, %s6771_s17  ;;  %3585 = vrot.lane.b32.xlu0 %v10749_v62, %s6771_s17  ;;  %v3781_v62 = vstv %s3780_s23  ;;  %s11360_s23 = smul.u32 3, %s4244_s21 }
 0x448   : >> { %v3787_v63 = vmul.f32 %v3781_v62, %v11085_v27  ;;  %v3786_v55 = vmul.f32 %v3781_v62, %v11088_v26  ;;  %v3789_v40 = vmul.f32 %v3781_v62, %v11099_v59 }
 0x449   : >> { %s4332_s16 = sadd.s32 1, %s11360_s23  ;;  %s12094_s15 = sld [smem:[#allocation8 + %s11360_s23]] }
 0x44a   : >> { %s4333_s2 = sld [smem:[#allocation8 + %s4332_s16]]  ;;  %s3086_s16 = sadd.s32 1, %s6760_s14  }
 0x44b   : >> { %3591 = vrot.lane.b32.xlu1 %v10752_v24, %s6771_s17  ;;  %3589 = vrot.lane.b32.xlu0 %v10756_v58, %s6771_s17  ;;  %v11052_v24 = vld [vmem:[%s10578_s24 + $0x9] sm:$0xff]  ;;  %v11055_v58 = vld [vmem:[%s10578_s24 + $0x1] sm:$0xff]  ;;  %p12564_p5 = scmp.ge.s32.totalorder %s3086_s16, 8   ;;  %s14074_s14 = smov %s3086_s16 }
 0x44c   : > { %s5363_s7 = sld [smem:[#allocation9 + $0x4]] (%p12564_p5)  ;;  %s14083_s14 = sld [smem:[#allocation15_spill]] (%p12564_p5) }
 0x44d   : >> { %v10990_v23 = vpop.permute.xlu1 %3247  ;;  %v10992_v28 = vpop.permute.xlu0 %3243 }
 0x44e   : >> { %13641 = vst [vmem:[#allocation279_spill] sm:$0xff] %v10990_v23  ;;  %13642 = vst [vmem:[#allocation280_spill] sm:$0xff] %v10992_v28  ;;  %v13775_v23 = vld [vmem:[#allocation268_spill] sm:$0xff] }
 0x44f   : >> { %3595 = vrot.lane.b32.xlu1 %v10759_v20, %s6771_s17  ;;  %3593 = vrot.lane.b32.xlu0 %v10762_v5, %s6771_s17  ;;  %v3788_v20 = vmul.f32 %v3781_v62, %v11102_v12  ;;  %v3838_v5 = vstv %s3837_s26  ;;  %s4389_s26 = sadd.s32 1, %s11406_s5 }
 0x450   : >> { %v3840_v18 = vmul.f32 %v3838_v5, %v11052_v24  ;;  %v3843_v16 = vmul.f32 %v3838_v5, %v11088_v26  ;;  %s4390_s28 = sld [smem:[#allocation8 + %s4389_s26]] }
 0x451   : >> { %v11002_v38 = vpop.permute.xlu1 %3249  ;;  %v11004_v45 = vpop.permute.xlu0 %3245  ;;  %s12692_s26 = sld [smem:[#allocation9 + $0x6]] (%p12564_p5) }
 0x452   : >> { %13643 = vst [vmem:[#allocation281_spill] sm:$0xff] %v11002_v38  ;;  %13644 = vst [vmem:[#allocation282_spill] sm:$0xff] %v11004_v45 }
 0x453   : >> { %3599 = vrot.lane.b32.xlu1 %v10765_v3, %s6771_s17  ;;  %3597 = vrot.lane.b32.xlu0 %v10769_v10, %s6771_s17  ;;  %v11117_v3 = vld [vmem:[%s10578_s24 + $0x41] sm:$0x1] }
 0x455   : >> { %v11011_v47 = vpop.permute.xlu1 %3253  ;;  %v11013_v15 = vpop.permute.xlu0 %3251 }
 0x456   : >> { %13645 = vst [vmem:[#allocation283_spill] sm:$0xff] %v11011_v47  ;;  %13646 = vst [vmem:[#allocation284_spill] sm:$0xff] %v11013_v15 }
 0x457   : >> { %3642 = vrot.lane.b32.xlu1 %v10772_v52, %s6771_s17  ;;  %3601 = vrot.lane.b32.xlu0 %v10775_v31, %s6771_s17  ;;  %v3783_v31 = vmul.f32 %v3781_v62, %v11052_v24 }
 0x459   : >> { %v11021_v29 = vpop.permute.xlu1 %3257  ;;  %v11023_v19 = vpop.permute.xlu0 %3255 }
 0x45a   : >> { %13647 = vst [vmem:[#allocation285_spill] sm:$0xff] %v11021_v29  ;;  %13648 = vst [vmem:[#allocation286_spill] sm:$0xff] %v11023_v19 }
 0x45b   : >> { %3646 = vrot.lane.b32.xlu1 %v10780_v4, %s6771_s17  ;;  %3644 = vrot.lane.b32.xlu0 %v10783_v17, %s6771_s17  ;;  %v3782_v17 = vmul.f32 %v3781_v62, %v11055_v58  ;;  %v11070_v4 = vld [vmem:[%s10578_s24 + $0x19] sm:$0xff] }
 0x45c   : >> { %v3785_v22 = vmul.f32 %v3781_v62, %v11070_v4  ;;  %v3842_v51 = vmul.f32 %v3838_v5, %v11070_v4 }
 0x45d   : >> { %v11030_v21 = vpop.permute.xlu1 %3300  ;;  %v11032_v9 = vpop.permute.xlu0 %3259 }
 0x45e   : >> { %13649 = vst [vmem:[#allocation287_spill] sm:$0xff] %v11030_v21  ;;  %13650 = vst [vmem:[#allocation288_spill] sm:$0xff] %v11032_v9 }
 0x45f   : >> { %3650 = vrot.lane.b32.xlu1 %v10795_v8, %s6771_s17  ;;  %3648 = vrot.lane.b32.xlu0 %v10801_v36, %s6771_s17  ;;  %v11073_v8 = vld [vmem:[%s10578_s24 + $0x11] sm:$0xff] }
 0x460   : >> { %v3784_v54 = vmul.f32 %v3781_v62, %v11073_v8  ;;  %v3841_v0 = vmul.f32 %v3838_v5, %v11073_v8 }
 0x461   : >> { %v11042_v30 = vpop.permute.xlu1 %3304  ;;  %v11044_v53 = vpop.permute.xlu0 %3302 }
 0x463   : >> { %3654 = vrot.lane.b32.xlu1 %v10810_v2, %s6771_s17  ;;  %3652 = vrot.lane.b32.xlu0 %v10819_v44, %s6771_s17 }
 0x465   : >> { %v11057_v52 = vpop.permute.xlu1 %3308  ;;  %v11059_v10 = vpop.permute.xlu0 %3306 }
 0x467   : >> { %3658 = vrot.lane.b32.xlu1 %v10829_v48, %s6771_s17  ;;  %3656 = vrot.lane.b32.xlu0 %v10832_v35, %s6771_s17  ;;  %v3839_v48 = vmul.f32 %v3838_v5, %v11055_v58  ;;  %v3790_v35 = vmul.f32 %v3781_v62, %v11117_v3 }
 0x469   : >> { %v11075_v60 = vpop.permute.xlu1 %3312  ;;  %v11077_v39 = vpop.permute.xlu0 %3310 }
 0x46b   : >> { %3802 = vrot.lane.b32.xlu1 %v3783_v31, %s6770_s12  ;;  %3800 = vrot.lane.b32.xlu0 %v3782_v17, %s6770_s12  ;;  %v3845_v17 = vmul.f32 %v3838_v5, %v11102_v12 }
 0x46d   : >> { %v11090_v2 = vpop.permute.xlu1 %3316  ;;  %v11092_v32 = vpop.permute.xlu0 %3314 }
 0x46e   : >> { %13651 = vst [vmem:[#allocation289_spill] sm:$0xff] %v11092_v32 }
 0x46f   : >> { %3806 = vrot.lane.b32.xlu1 %v3785_v22, %s6770_s12  ;;  %3804 = vrot.lane.b32.xlu0 %v3784_v54, %s6770_s12  ;;  %v3844_v22 = vmul.f32 %v3838_v5, %v11085_v27 }
 0x471   : >> { %v11104_v57 = vpop.permute.xlu1 %3359  ;;  %v11106_v25 = vpop.permute.xlu0 %3357 }
 0x472   : >> { %13652 = vst [vmem:[#allocation290_spill] sm:$0xff] %v11104_v57  ;;  %13653 = vst [vmem:[#allocation291_spill] sm:$0xff] %v11106_v25  ;;  %v13741_v25 = vld [vmem:[#allocation249_spill] sm:$0xff] }
 0x473   : >> { %3810 = vrot.lane.b32.xlu1 %v3787_v63, %s6770_s12  ;;  %3808 = vrot.lane.b32.xlu0 %v3786_v55, %s6770_s12  ;;  %v3847_v55 = vmul.f32 %v3838_v5, %v11117_v3 }
 0x475   : >> { %v11119_v44 = vpop.permute.xlu1 %3363  ;;  %v11121_v36 = vpop.permute.xlu0 %3361 }
 0x476   : >> { %13654 = vst [vmem:[#allocation292_spill] sm:$0xff] %v11119_v44  ;;  %13655 = vst [vmem:[#allocation293_spill] sm:$0xff] %v11121_v36  ;;  %v11431_v36 = vld [vmem:[%s10578_s24 + $0x22] sm:$0xff] }
 0x477   : >> { %3814 = vrot.lane.b32.xlu1 %v3789_v40, %s6770_s12  ;;  %3812 = vrot.lane.b32.xlu0 %v3788_v20, %s6770_s12  ;;  %v3846_v40 = vmul.f32 %v3838_v5, %v11099_v59  ;;  %v3895_v20 = vstv %s3894_s18  ;;  %s11471_s18 = smul.u32 3, %s4288_s4 }
 0x478   : >> { %v3899_v5 = vmul.f32 %v3895_v20, %v11070_v4 }
 0x479   : >> { %v11128_v37 = vpop.permute.xlu1 %3367  ;;  %v11130_v61 = vpop.permute.xlu0 %3365  ;;  %s4446_s22 = sadd.s32 1, %s11471_s18  ;;  %s4674_s9 = sadd.s32 2, %s11471_s18 }
 0x47a   : >> { %13656 = vst [vmem:[#allocation294_spill] sm:$0xff] %v11128_v37  ;;  %13657 = vst [vmem:[#allocation295_spill] sm:$0xff] %v11130_v61  ;;  %v11416_v61 = vld [vmem:[%s10578_s24 + $0x12] sm:$0xff]  ;;  %v11428_v37 = vld [vmem:[%s10578_s24 + $0x2a] sm:$0xff]  ;;  %s4447_s30 = sld [smem:[#allocation8 + %s4446_s22]] }
 0x47b   : >> { %3857 = vrot.lane.b32.xlu1 %v3839_v48, %s6770_s12  ;;  %3816 = vrot.lane.b32.xlu0 %v3790_v35, %s6770_s12 }
 0x47d   : >> { %v11138_v34 = vpop.permute.xlu1 %3371  ;;  %v11140_v50 = vpop.permute.xlu0 %3369 }
 0x47e   : >> { %13658 = vst [vmem:[#allocation296_spill] sm:$0xff] %v11138_v34  ;;  %13659 = vst [vmem:[#allocation297_spill] sm:$0xff] %v11140_v50 }
 0x47f   : >> { %3861 = vrot.lane.b32.xlu1 %v3841_v0, %s6770_s12  ;;  %3859 = vrot.lane.b32.xlu0 %v3840_v18, %s6770_s12  ;;  %v3897_v0 = vmul.f32 %v3895_v20, %v11052_v24  ;;  %v3896_v18 = vmul.f32 %v3895_v20, %v11055_v58 }
 0x481   : >> { %v11147_v62 = vpop.permute.xlu1 %3414  ;;  %v11149_v31 = vpop.permute.xlu0 %3373 }
 0x482   : >> { %13660 = vst [vmem:[#allocation298_spill] sm:$0xff] %v11147_v62  ;;  %13661 = vst [vmem:[#allocation299_spill] sm:$0xff] %v11149_v31 }
 0x483   : >> { %3865 = vrot.lane.b32.xlu1 %v3843_v16, %s6770_s12  ;;  %3863 = vrot.lane.b32.xlu0 %v3842_v51, %s6770_s12 }
 0x485   : >> { %v11159_v54 = vpop.permute.xlu1 %3418  ;;  %v11161_v63 = vpop.permute.xlu0 %3416 }
 0x486   : >> { %13662 = vst [vmem:[#allocation300_spill] sm:$0xff] %v11159_v54  ;;  %13663 = vst [vmem:[#allocation301_spill] sm:$0xff] %v11161_v63 }
 0x487   : >> { %3869 = vrot.lane.b32.xlu1 %v3845_v17, %s6770_s12  ;;  %3867 = vrot.lane.b32.xlu0 %v3844_v22, %s6770_s12  ;;  %v3898_v17 = vmul.f32 %v3895_v20, %v11073_v8 }
 0x489   : >> { %v11168_v48 = vpop.permute.xlu1 %3422  ;;  %v11170_v35 = vpop.permute.xlu0 %3420 }
 0x48a   : >> { %13664 = vst [vmem:[#allocation302_spill] sm:$0xff] %v11168_v48  ;;  %13665 = vst [vmem:[#allocation303_spill] sm:$0xff] %v11170_v35 }
 0x48b   : >> { %3873 = vrot.lane.b32.xlu1 %v3847_v55, %s6770_s12  ;;  %3871 = vrot.lane.b32.xlu0 %v3846_v40, %s6770_s12  ;;  %v3901_v40 = vmul.f32 %v3895_v20, %v11085_v27 }
 0x48d   : >> { %v11178_v16 = vpop.permute.xlu1 %3426  ;;  %v11180_v51 = vpop.permute.xlu0 %3424 }
 0x48e   : >> { %13666 = vst [vmem:[#allocation304_spill] sm:$0xff] %v11178_v16  ;;  %13667 = vst [vmem:[#allocation305_spill] sm:$0xff] %v11180_v51  ;;  %v3900_v51 = vmul.f32 %v3895_v20, %v11088_v26 }
 0x48f   : >> { %3916 = vrot.lane.b32.xlu1 %v3897_v0, %s6770_s12  ;;  %3914 = vrot.lane.b32.xlu0 %v3896_v18, %s6770_s12 }
 0x491   : >> { %v11187_v22 = vpop.permute.xlu1 %3430  ;;  %v11189_v55 = vpop.permute.xlu0 %3428 }
 0x492   : >> { %13668 = vst [vmem:[#allocation306_spill] sm:$0xff] %v11187_v22  ;;  %13669 = vst [vmem:[#allocation307_spill] sm:$0xff] %v11189_v55  ;;  %v3903_v22 = vmul.f32 %v3895_v20, %v11099_v59  ;;  %v3902_v55 = vmul.f32 %v3895_v20, %v11102_v12 }
 0x493   : >> { %3920 = vrot.lane.b32.xlu1 %v3899_v5, %s6770_s12  ;;  %3918 = vrot.lane.b32.xlu0 %v3898_v17, %s6770_s12  ;;  %v3952_v5 = vstv %s3951_s3  ;;  %s4503_s3 = sadd.s32 1, %s11563_s27 }
 0x494   : >> { %s4504_s6 = sld [smem:[#allocation8 + %s4503_s3]] }
 0x495   : >> { %v11195_v0 = vpop.permute.xlu1 %3473  ;;  %v11197_v18 = vpop.permute.xlu0 %3471 }
 0x496   : >> { %13670 = vst [vmem:[#allocation308_spill] sm:$0xff] %v11195_v0  ;;  %13671 = vst [vmem:[#allocation309_spill] sm:$0xff] %v11197_v18  ;;  %v3953_v18 = vmul.f32 %v3952_v5, %v11055_v58 }
 0x497   : >> { %3924 = vrot.lane.b32.xlu1 %v3901_v40, %s6770_s12  ;;  %3922 = vrot.lane.b32.xlu0 %v3900_v51, %s6770_s12  ;;  %v3904_v40 = vmul.f32 %v3895_v20, %v11117_v3  ;;  %v3957_v20 = vmul.f32 %v3952_v5, %v11088_v26 }
 0x499   : >> { %v11203_v16 = vpop.permute.xlu1 %3477  ;;  %v11205_v17 = vpop.permute.xlu0 %3475 }
 0x49a   : >> { %13672 = vst [vmem:[#allocation310_spill] sm:$0xff] %v11203_v16  ;;  %13673 = vst [vmem:[#allocation311_spill] sm:$0xff] %v11205_v17  ;;  %v3955_v16 = vmul.f32 %v3952_v5, %v11073_v8  ;;  %v3954_v17 = vmul.f32 %v3952_v5, %v11052_v24 }
 0x49b   : >> { %3928 = vrot.lane.b32.xlu1 %v3903_v22, %s6770_s12  ;;  %3926 = vrot.lane.b32.xlu0 %v3902_v55, %s6770_s12  ;;  %v3956_v55 = vmul.f32 %v3952_v5, %v11070_v4 }
 0x49d   : >> { %v11211_v0 = vpop.permute.xlu1 %3481  ;;  %v11213_v51 = vpop.permute.xlu0 %3479 }
 0x49e   : >> { %13674 = vst [vmem:[#allocation312_spill] sm:$0xff] %v11211_v0  ;;  %13675 = vst [vmem:[#allocation313_spill] sm:$0xff] %v11213_v51 }
 0x49f   : >> { %3971 = vrot.lane.b32.xlu1 %v3953_v18, %s6770_s12  ;;  %3930 = vrot.lane.b32.xlu0 %v3904_v40, %s6770_s12 }
 0x4a1   : >> { %v11219_v35 = vpop.permute.xlu1 %3485  ;;  %v11221_v22 = vpop.permute.xlu0 %3483 }
 0x4a2   : >> { %13676 = vst [vmem:[#allocation314_spill] sm:$0xff] %v11219_v35  ;;  %13677 = vst [vmem:[#allocation315_spill] sm:$0xff] %v11221_v22  ;;  %v3959_v22 = vmul.f32 %v3952_v5, %v11102_v12  ;;  %v3958_v35 = vmul.f32 %v3952_v5, %v11085_v27 }
 0x4a3   : >> { %3975 = vrot.lane.b32.xlu1 %v3955_v16, %s6770_s12  ;;  %3973 = vrot.lane.b32.xlu0 %v3954_v17, %s6770_s12 }
 0x4a5   : >> { %v11228_v18 = vpop.permute.xlu1 %3528  ;;  %v11230_v40 = vpop.permute.xlu0 %3487 }
 0x4a6   : >> { %13678 = vst [vmem:[#allocation316_spill] sm:$0xff] %v11228_v18  ;;  %13679 = vst [vmem:[#allocation317_spill] sm:$0xff] %v11230_v40  ;;  %v3961_v18 = vmul.f32 %v3952_v5, %v11117_v3  ;;  %v3960_v40 = vmul.f32 %v3952_v5, %v11099_v59 }
 0x4a7   : >> { %3979 = vrot.lane.b32.xlu1 %v3957_v20, %s6770_s12  ;;  %3977 = vrot.lane.b32.xlu0 %v3956_v55, %s6770_s12  ;;  %v4009_v20 = vstv %s4008_s8  ;;  %s3690_s8 = sld [smem:[#allocation8 + %s11015_s10]] }
 0x4a8   : >> { %v4011_v0 = vmul.f32 %v4009_v20, %v11052_v24  ;;  %v4010_v48 = vmul.f32 %v4009_v20, %v11055_v58  ;;  %v4013_v5 = vmul.f32 %v4009_v20, %v11070_v4  ;;  %v4012_v9 = vmul.f32 %v4009_v20, %v11073_v8  ;;  %s11641_s10 = sld [smem:[#allocation8 + %s11132_s13]]  ;;  %s4560_s13 = sadd.s32 2, %s11360_s23 }
 0x4a9   : >> { %v11236_v16 = vpop.permute.xlu1 %3532  ;;  %v11238_v17 = vpop.permute.xlu0 %3530  ;;  %v4015_v63 = vmul.f32 %v4009_v20, %v11085_v27  ;;  %v4014_v54 = vmul.f32 %v4009_v20, %v11088_v26  ;;  %v4017_v21 = vmul.f32 %v4009_v20, %v11099_v59  ;;  %v4016_v19 = vmul.f32 %v4009_v20, %v11102_v12  ;;  %s11794_s25 = sld [smem:[#allocation8 + %s4560_s13]] }
 0x4aa   : >> { %s12202_s23 = sld [smem:[#allocation8 + %s11406_s5]] }
 0x4ab   : >> { %3983 = vrot.lane.b32.xlu1 %v3959_v22, %s6770_s12  ;;  %3981 = vrot.lane.b32.xlu0 %v3958_v35, %s6770_s12 }
 0x4ad   : >> { %v11244_v51 = vpop.permute.xlu1 %3536  ;;  %v11246_v55 = vpop.permute.xlu0 %3534 }
 0x4af   : >> { %3987 = vrot.lane.b32.xlu1 %v3961_v18, %s6770_s12  ;;  %3985 = vrot.lane.b32.xlu0 %v3960_v40, %s6770_s12 }
 0x4b1   : >> { %v11252_v22 = vpop.permute.xlu1 %3540  ;;  %v11254_v35 = vpop.permute.xlu0 %3538 }
 0x4b3   : >> { %4030 = vrot.lane.b32.xlu1 %v4011_v0, %s6771_s17  ;;  %4028 = vrot.lane.b32.xlu0 %v4010_v48, %s6771_s17 }
 0x4b5   : >> { %v11261_v18 = vpop.permute.xlu1 %3544  ;;  %v11263_v40 = vpop.permute.xlu0 %3542 }
 0x4b6   : >> { %13680 = vst [vmem:[#allocation318_spill] sm:$0xff] %v11261_v18  ;;  %13681 = vst [vmem:[#allocation319_spill] sm:$0xff] %v11263_v40 }
 0x4b7   : >> { %4034 = vrot.lane.b32.xlu1 %v4013_v5, %s6771_s17  ;;  %4032 = vrot.lane.b32.xlu0 %v4012_v9, %s6771_s17  ;;  %v4066_v5 = vstv %s4065_s0 }
 0x4b8   : >> { %v4067_v31 = vmul.f32 %v4066_v5, %v11055_v58  ;;  %v4069_v50 = vmul.f32 %v4066_v5, %v11073_v8  ;;  %v4068_v34 = vmul.f32 %v4066_v5, %v11052_v24 }
 0x4b9   : >> { %v11269_v0 = vpop.permute.xlu1 %3587  ;;  %v11271_v48 = vpop.permute.xlu0 %3585 }
 0x4ba   : >> { %13682 = vst [vmem:[#allocation320_spill] sm:$0xff] %v11269_v0  ;;  %13683 = vst [vmem:[#allocation321_spill] sm:$0xff] %v11271_v48  ;;  %v11442_v48 = vld [vmem:[%s10578_s24 + $0x3a] sm:$0xff]  ;;  %v11445_v0 = vld [vmem:[%s10578_s24 + $0x32] sm:$0xff] }
 0x4bb   : >> { %4038 = vrot.lane.b32.xlu1 %v4015_v63, %s6771_s17  ;;  %4036 = vrot.lane.b32.xlu0 %v4014_v54, %s6771_s17  ;;  %v4018_v63 = vmul.f32 %v4009_v20, %v11117_v3  ;;  %v4070_v20 = vmul.f32 %v4066_v5, %v11070_v4 }
 0x4bd   : >> { %v11277_v29 = vpop.permute.xlu1 %3591  ;;  %v11279_v9 = vpop.permute.xlu0 %3589 }
 0x4be   : >> { %13684 = vst [vmem:[#allocation322_spill] sm:$0xff] %v11277_v29  ;;  %13685 = vst [vmem:[#allocation323_spill] sm:$0xff] %v11279_v9 }
 0x4bf   : >> { %4042 = vrot.lane.b32.xlu1 %v4017_v21, %s6771_s17  ;;  %4040 = vrot.lane.b32.xlu0 %v4016_v19, %s6771_s17  ;;  %v4071_v19 = vmul.f32 %v4066_v5, %v11088_v26 }
 0x4c1   : >> { %v11285_v62 = vpop.permute.xlu1 %3595  ;;  %v11287_v54 = vpop.permute.xlu0 %3593 }
 0x4c2   : >> { %13686 = vst [vmem:[#allocation324_spill] sm:$0xff] %v11285_v62  ;;  %13687 = vst [vmem:[#allocation325_spill] sm:$0xff] %v11287_v54 }
 0x4c3   : >> { %4085 = vrot.lane.b32.xlu1 %v4067_v31, %s6771_s17  ;;  %4044 = vrot.lane.b32.xlu0 %v4018_v63, %s6771_s17 }
 0x4c5   : >> { %v11293_v15 = vpop.permute.xlu1 %3599  ;;  %v11295_v21 = vpop.permute.xlu0 %3597 }
 0x4c6   : >> { %13688 = vst [vmem:[#allocation326_spill] sm:$0xff] %v11293_v15  ;;  %13689 = vst [vmem:[#allocation327_spill] sm:$0xff] %v11295_v21  ;;  %v4073_v21 = vmul.f32 %v4066_v5, %v11102_v12  ;;  %v4072_v15 = vmul.f32 %v4066_v5, %v11085_v27 }
 0x4c7   : >> { %4089 = vrot.lane.b32.xlu1 %v4069_v50, %s6771_s17  ;;  %4087 = vrot.lane.b32.xlu0 %v4068_v34, %s6771_s17 }
 0x4c9   : >> { %v11302_v31 = vpop.permute.xlu1 %3642  ;;  %v11304_v63 = vpop.permute.xlu0 %3601 }
 0x4ca   : >> { %13690 = vst [vmem:[#allocation328_spill] sm:$0xff] %v11302_v31  ;;  %13691 = vst [vmem:[#allocation329_spill] sm:$0xff] %v11304_v63  ;;  %v4075_v31 = vmul.f32 %v4066_v5, %v11117_v3  ;;  %v4074_v63 = vmul.f32 %v4066_v5, %v11099_v59 }
 0x4cb   : >> { %4093 = vrot.lane.b32.xlu1 %v4071_v19, %s6771_s17  ;;  %4091 = vrot.lane.b32.xlu0 %v4070_v20, %s6771_s17  ;;  %v4123_v19 = vstv %s4122_s11  ;;  %s12085_s11 = sld [smem:[#allocation8 + %s4674_s9]] }
 0x4cc   : >> { %v4127_v5 = vmul.f32 %v4123_v19, %v11070_v4 }
 0x4cd   : >> { %v11310_v50 = vpop.permute.xlu1 %3646  ;;  %v11312_v34 = vpop.permute.xlu0 %3644 }
 0x4ce   : >> { %13692 = vst [vmem:[#allocation330_spill] sm:$0xff] %v11310_v50  ;;  %13693 = vst [vmem:[#allocation331_spill] sm:$0xff] %v11312_v34  ;;  %v4125_v50 = vmul.f32 %v4123_v19, %v11052_v24  ;;  %v4124_v34 = vmul.f32 %v4123_v19, %v11055_v58 }
 0x4cf   : >> { %4097 = vrot.lane.b32.xlu1 %v4073_v21, %s6771_s17  ;;  %4095 = vrot.lane.b32.xlu0 %v4072_v15, %s6771_s17 }
 0x4d1   : >> { %v11318_v54 = vpop.permute.xlu1 %3650  ;;  %v11320_v20 = vpop.permute.xlu0 %3648 }
 0x4d2   : >> { %13694 = vst [vmem:[#allocation332_spill] sm:$0xff] %v11318_v54  ;;  %13695 = vst [vmem:[#allocation333_spill] sm:$0xff] %v11320_v20  ;;  %v4126_v20 = vmul.f32 %v4123_v19, %v11073_v8  ;;  %v4180_v54 = vstv %s4179_s20  ;;  %s4731_s20 = sadd.s32 2, %s11563_s27 }
 0x4d3   : >> { %4101 = vrot.lane.b32.xlu1 %v4075_v31, %s6771_s17  ;;  %4099 = vrot.lane.b32.xlu0 %v4074_v63, %s6771_s17  ;;  %s12186_s21 = sld [smem:[#allocation8 + %s4731_s20]] }
 0x4d5   : >> { %v11326_v21 = vpop.permute.xlu1 %3654  ;;  %v11328_v15 = vpop.permute.xlu0 %3652 }
 0x4d6   : >> { %13696 = vst [vmem:[#allocation334_spill] sm:$0xff] %v11326_v21  ;;  %13697 = vst [vmem:[#allocation335_spill] sm:$0xff] %v11328_v15  ;;  %v4129_v15 = vmul.f32 %v4123_v19, %v11085_v27 }
 0x4d7   : >> { %4144 = vrot.lane.b32.xlu1 %v4125_v50, %s6771_s17  ;;  %4142 = vrot.lane.b32.xlu0 %v4124_v34, %s6771_s17  ;;  %v4128_v50 = vmul.f32 %v4123_v19, %v11088_v26 }
 0x4d9   : >> { %v11335_v31 = vpop.permute.xlu1 %3658  ;;  %v11337_v63 = vpop.permute.xlu0 %3656 }
 0x4da   : >> { %13698 = vst [vmem:[#allocation336_spill] sm:$0xff] %v11335_v31  ;;  %13699 = vst [vmem:[#allocation337_spill] sm:$0xff] %v11337_v63  ;;  %v4131_v31 = vmul.f32 %v4123_v19, %v11099_v59  ;;  %v4130_v63 = vmul.f32 %v4123_v19, %v11102_v12 }
 0x4db   : >> { %4148 = vrot.lane.b32.xlu1 %v4127_v5, %s6771_s17  ;;  %4146 = vrot.lane.b32.xlu0 %v4126_v20, %s6771_s17 }
 0x4dd   : >> { %v11343_v21 = vpop.permute.xlu1 %3802  ;;  %v11345_v34 = vpop.permute.xlu0 %3800 }
 0x4de   : >> { %13700 = vst [vmem:[#allocation338_spill] sm:$0xff] %v11343_v21  ;;  %13701 = vst [vmem:[#allocation339_spill] sm:$0xff] %v11345_v34  ;;  %v4181_v34 = vmul.f32 %v4180_v54, %v11055_v58 }
 0x4df   : >> { %4152 = vrot.lane.b32.xlu1 %v4129_v15, %s6771_s17  ;;  %4150 = vrot.lane.b32.xlu0 %v4128_v50, %s6771_s17  ;;  %v4132_v15 = vmul.f32 %v4123_v19, %v11117_v3  ;;  %v4185_v19 = vmul.f32 %v4180_v54, %v11088_v26 }
 0x4e1   : >> { %v11351_v5 = vpop.permute.xlu1 %3806  ;;  %v11353_v20 = vpop.permute.xlu0 %3804 }
 0x4e2   : >> { %13702 = vst [vmem:[#allocation340_spill] sm:$0xff] %v11351_v5  ;;  %13703 = vst [vmem:[#allocation341_spill] sm:$0xff] %v11353_v20  ;;  %v4183_v20 = vmul.f32 %v4180_v54, %v11073_v8 }
 0x4e3   : >> { %4156 = vrot.lane.b32.xlu1 %v4131_v31, %s6771_s17  ;;  %4154 = vrot.lane.b32.xlu0 %v4130_v63, %s6771_s17  ;;  %v4182_v31 = vmul.f32 %v4180_v54, %v11052_v24 }
 0x4e5   : >> { %v11362_v50 = vpop.permute.xlu1 %3810  ;;  %v11364_v21 = vpop.permute.xlu0 %3808 }
 0x4e6   : >> { %13704 = vst [vmem:[#allocation342_spill] sm:$0xff] %v11362_v50  ;;  %13705 = vst [vmem:[#allocation343_spill] sm:$0xff] %v11364_v21  ;;  %v11400_v50 = vld [vmem:[%s10578_s24 + $0x2] sm:$0xff] }
 0x4e7   : >> { %4199 = vrot.lane.b32.xlu1 %v4181_v34, %s6771_s17  ;;  %4158 = vrot.lane.b32.xlu0 %v4132_v15, %s6771_s17  ;;  %v4184_v34 = vmul.f32 %v4180_v54, %v11070_v4 }
 0x4e9   : >> { %v11370_v63 = vpop.permute.xlu1 %3814  ;;  %v11372_v5 = vpop.permute.xlu0 %3812 }
 0x4ea   : >> { %13706 = vst [vmem:[#allocation344_spill] sm:$0xff] %v11370_v63  ;;  %13707 = vst [vmem:[#allocation345_spill] sm:$0xff] %v11372_v5  ;;  %v4187_v5 = vmul.f32 %v4180_v54, %v11102_v12 }
 0x4eb   : >> { %4203 = vrot.lane.b32.xlu1 %v4183_v20, %s6771_s17  ;;  %4201 = vrot.lane.b32.xlu0 %v4182_v31, %s6771_s17  ;;  %v4186_v20 = vmul.f32 %v4180_v54, %v11085_v27 }
 0x4ed   : >> { %v11379_v15 = vpop.permute.xlu1 %3857  ;;  %v11381_v21 = vpop.permute.xlu0 %3816 }
 0x4ee   : >> { %13708 = vst [vmem:[#allocation346_spill] sm:$0xff] %v11379_v15  ;;  %13709 = vst [vmem:[#allocation347_spill] sm:$0xff] %v11381_v21  ;;  %v4189_v21 = vmul.f32 %v4180_v54, %v11117_v3  ;;  %v4334_v15 = vstv %s4333_s2 }
 0x4ef   : >> { %4207 = vrot.lane.b32.xlu1 %v4185_v19, %s6771_s17  ;;  %4205 = vrot.lane.b32.xlu0 %v4184_v34, %s6771_s17  ;;  %v4188_v19 = vmul.f32 %v4180_v54, %v11099_v59  ;;  %v11397_v34 = vld [vmem:[%s10578_s24 + $0xa] sm:$0xff] }
 0x4f0   : >> { %v4336_v54 = vmul.f32 %v4334_v15, %v11397_v34 }
 0x4f1   : >> { %v11387_v31 = vpop.permute.xlu1 %3861  ;;  %v11389_v63 = vpop.permute.xlu0 %3859 }
 0x4f3   : >> { %4211 = vrot.lane.b32.xlu1 %v4187_v5, %s6771_s17  ;;  %4209 = vrot.lane.b32.xlu0 %v4186_v20, %s6771_s17  ;;  %v4335_v5 = vmul.f32 %v4334_v15, %v11400_v50  ;;  %v11413_v20 = vld [vmem:[%s10578_s24 + $0x1a] sm:$0xff] }
 0x4f5   : >> { %v11402_v62 = vpop.permute.xlu1 %3865  ;;  %v11404_v47 = vpop.permute.xlu0 %3863 }
 0x4f6   : >> { %13710 = vst [vmem:[#allocation348_spill] sm:$0xff] %v11402_v62  ;;  %13711 = vst [vmem:[#allocation349_spill] sm:$0xff] %v11404_v47  ;;  %v13782_v62 = vld [vmem:[#allocation235_spill] sm:$0xff] }
 0x4f7   : >> { %4215 = vrot.lane.b32.xlu1 %v4189_v21, %s6771_s17  ;;  %4213 = vrot.lane.b32.xlu0 %v4188_v19, %s6771_s17  ;;  %v4338_v21 = vmul.f32 %v4334_v15, %v11413_v20  ;;  %v4337_v19 = vmul.f32 %v4334_v15, %v11416_v61 }
 0x4f9   : >> { %v11418_v9 = vpop.permute.xlu1 %3869  ;;  %v11420_v29 = vpop.permute.xlu0 %3867 }
 0x4fa   : >> { %13712 = vst [vmem:[#allocation350_spill] sm:$0xff] %v11418_v9  ;;  %13713 = vst [vmem:[#allocation351_spill] sm:$0xff] %v11420_v29 }
 0x4fb   : >> { %4355 = vrot.lane.b32.xlu1 %v4336_v54, %s6770_s12  ;;  %4353 = vrot.lane.b32.xlu0 %v4335_v5, %s6770_s12  ;;  %v4340_v54 = vmul.f32 %v4334_v15, %v11428_v37  ;;  %v4339_v5 = vmul.f32 %v4334_v15, %v11431_v36 }
 0x4fd   : >> { %v11433_v44 = vpop.permute.xlu1 %3873  ;;  %v11435_v45 = vpop.permute.xlu0 %3871 }
 0x4fe   : >> { %13714 = vst [vmem:[#allocation352_spill] sm:$0xff] %v11433_v44  ;;  %13715 = vst [vmem:[#allocation353_spill] sm:$0xff] %v11435_v45  ;;  %v4391_v45 = vstv %s4390_s28  ;;  %v11456_v44 = vld [vmem:[%s10578_s24 + $0x42] sm:$0x1]  ;;  %s12694_s28 = sld [smem:[#allocation9 + $0x7]] (%p12564_p5) }
 0x4ff   : >> { %4359 = vrot.lane.b32.xlu1 %v4338_v21, %s6770_s12  ;;  %4357 = vrot.lane.b32.xlu0 %v4337_v19, %s6770_s12  ;;  %v4342_v21 = vmul.f32 %v4334_v15, %v11442_v48  ;;  %v4341_v19 = vmul.f32 %v4334_v15, %v11445_v0 }
 0x501   : >> { %v11447_v38 = vpop.permute.xlu1 %3916  ;;  %v11449_v29 = vpop.permute.xlu0 %3914 }
 0x502   : >> { %13716 = vst [vmem:[#allocation354_spill] sm:$0xff] %v11447_v38  ;;  %13717 = vst [vmem:[#allocation355_spill] sm:$0xff] %v11449_v29 }
 0x503   : >> { %4363 = vrot.lane.b32.xlu1 %v4340_v54, %s6770_s12  ;;  %4361 = vrot.lane.b32.xlu0 %v4339_v5, %s6770_s12  ;;  %v4392_v54 = vmul.f32 %v4391_v45, %v11400_v50  ;;  %v4343_v5 = vmul.f32 %v4334_v15, %v11456_v44  ;;  %v4396_v15 = vmul.f32 %v4391_v45, %v11431_v36 }
 0x505   : >> { %v11458_v9 = vpop.permute.xlu1 %3920  ;;  %v11460_v28 = vpop.permute.xlu0 %3918 }
 0x506   : >> { %13718 = vst [vmem:[#allocation356_spill] sm:$0xff] %v11458_v9  ;;  %13719 = vst [vmem:[#allocation357_spill] sm:$0xff] %v11460_v28  ;;  %v4394_v28 = vmul.f32 %v4391_v45, %v11416_v61 }
 0x507   : >> { %4367 = vrot.lane.b32.xlu1 %v4342_v21, %s6770_s12  ;;  %4365 = vrot.lane.b32.xlu0 %v4341_v19, %s6770_s12  ;;  %v4393_v21 = vmul.f32 %v4391_v45, %v11397_v34 }
 0x509   : >> { %v11467_v29 = vpop.permute.xlu1 %3924  ;;  %v11469_v38 = vpop.permute.xlu0 %3922 }
 0x50a   : >> { %13720 = vst [vmem:[#allocation358_spill] sm:$0xff] %v11467_v29  ;;  %13721 = vst [vmem:[#allocation359_spill] sm:$0xff] %v11469_v38  ;;  %v4395_v38 = vmul.f32 %v4391_v45, %v11413_v20  ;;  %v13732_v29 = vld [vmem:[#allocation250_spill] sm:$0xff] }
 0x50b   : >> { %4410 = vrot.lane.b32.xlu1 %v4392_v54, %s6770_s12  ;;  %4369 = vrot.lane.b32.xlu0 %v4343_v5, %s6770_s12  ;;  %v11488_v54 = vadd.f32 %v6748_v56, %v10598_v41  ;;  %v11492_v5 = vadd.f32 %v6756_v33, %v10602_v49  ;;  %v4398_v56 = vmul.f32 %v4391_v45, %v11445_v0  ;;  %v13729_v33 = vld [vmem:[#allocation252_spill] sm:$0xff] }
 0x50c   : >> { %v4397_v41 = vmul.f32 %v4391_v45, %v11428_v37  ;;  %v11508_v49 = vadd.f32 %v13729_v33, %v10631_v13  ;;  %v13745_v33 = vld [vmem:[#allocation257_spill] sm:$0xff] }
 0x50d   : >> { %v11477_v19 = vpop.permute.xlu1 %3928  ;;  %v11479_v9 = vpop.permute.xlu0 %3926  ;;  %13724 = vst [vmem:[#allocation362_spill] sm:$0xff] %v11488_v54  ;;  %13725 = vst [vmem:[#allocation363_spill] sm:$0xff] %v11492_v5  ;;  %v13778_v54 = vld [vmem:[#allocation269_spill] sm:$0xff] }
 0x50e   : >> { %13722 = vst [vmem:[#allocation360_spill] sm:$0xff] %v11477_v19  ;;  %13723 = vst [vmem:[#allocation361_spill] sm:$0xff] %v11479_v9  ;;  %v11496_v9 = vadd.f32 %v6744_v7, %v10606_v1  ;;  %v13731_v19 = vld [vmem:[#allocation253_spill] sm:$0xff]  ;;  %v13734_v1 = vld [vmem:[#allocation254_spill] sm:$0xff] }
 0x50f   : >> { %4414 = vrot.lane.b32.xlu1 %v4394_v28, %s6770_s12  ;;  %4412 = vrot.lane.b32.xlu0 %v4393_v21, %s6770_s12  ;;  %13730 = vst [vmem:[#allocation252_spill] sm:$0xff] %v11508_v49  ;;  %v11512_v7 = vadd.f32 %v13732_v29, %v13731_v19  ;;  %v13746_v49 = vld [vmem:[#allocation247_spill] sm:$0xff]  ;;  %v13748_v19 = vld [vmem:[#allocation258_spill] sm:$0xff] }
 0x510   : >> { %13726 = vst [vmem:[#allocation364_spill] sm:$0xff] %v11496_v9  ;;  %v11532_v29 = vadd.f32 %v13746_v49, %v13745_v33  ;;  %v13754_v49 = vld [vmem:[#allocation245_spill] sm:$0xff] }
 0x511   : >> { %v11498_v28 = vpop.permute.xlu1 %3971  ;;  %v11500_v21 = vpop.permute.xlu0 %3930  ;;  %13733 = vst [vmem:[#allocation253_spill] sm:$0xff] %v11512_v7 }
 0x512   : >> { %13727 = vst [vmem:[#allocation365_spill] sm:$0xff] %v11498_v28  ;;  %13728 = vst [vmem:[#allocation366_spill] sm:$0xff] %v11500_v21  ;;  %v13735_v28 = vld [vmem:[#allocation251_spill] sm:$0xff] }
 0x513   : >> { %4418 = vrot.lane.b32.xlu1 %v4396_v15, %s6770_s12  ;;  %4416 = vrot.lane.b32.xlu0 %v4395_v38, %s6770_s12  ;;  %v11516_v9 = vadd.f32 %v13735_v28, %v13734_v1  ;;  %v13737_v21 = vld [vmem:[#allocation255_spill] sm:$0xff]  ;;  %v13738_v15 = vld [vmem:[#allocation248_spill] sm:$0xff]  ;;  %v13749_v28 = vld [vmem:[#allocation246_spill] sm:$0xff] }
 0x514   : >> { %v11520_v5 = vadd.f32 %v13738_v15, %v13737_v21  ;;  %v13740_v38 = vld [vmem:[#allocation256_spill] sm:$0xff]  ;;  %v11537_v1 = vadd.f32 %v13749_v28, %v13748_v19  ;;  %v4399_v21 = vmul.f32 %v4391_v45, %v11442_v48  ;;  %v13751_v15 = vld [vmem:[#allocation259_spill] sm:$0xff]  ;;  %v4448_v28 = vstv %s4447_s30 }
 0x515   : >> { %13736 = vst [vmem:[#allocation250_spill] sm:$0xff] %v11516_v9  ;;  %v11524_v40 = vadd.f32 %v13741_v25, %v13740_v38  ;;  %v11526_v18 = vpop.permute.xlu1 %3975  ;;  %v11528_v13 = vpop.permute.xlu0 %3973  ;;  %13747 = vst [vmem:[#allocation256_spill] sm:$0xff] %v11532_v29  ;;  %v4400_v25 = vmul.f32 %v4391_v45, %v11456_v44  ;;  %v13752_v38 = vld [vmem:[#allocation244_spill] sm:$0xff]  ;;  %v13755_v29 = vld [vmem:[#allocation261_spill] sm:$0xff] }
 0x516   : >> { %13739 = vst [vmem:[#allocation254_spill] sm:$0xff] %v11520_v5  ;;  %13743 = vst [vmem:[#allocation255_spill] sm:$0xff] %v11526_v18  ;;  %v13753_v18 = vld [vmem:[#allocation260_spill] sm:$0xff] }
 0x517   : >> { %13742 = vst [vmem:[#allocation251_spill] sm:$0xff] %v11524_v40  ;;  %13744 = vst [vmem:[#allocation248_spill] sm:$0xff] %v11528_v13  ;;  %4422 = vrot.lane.b32.xlu1 %v4398_v56, %s6770_s12  ;;  %4420 = vrot.lane.b32.xlu0 %v4397_v41, %s6770_s12  ;;  %v11545_v13 = vadd.f32 %v13752_v38, %v13751_v15  ;;  %v11549_v33 = vadd.f32 %v13754_v49, %v13753_v18  ;;  %v13756_v40 = vld [vmem:[#allocation242_spill] sm:$0xff]  ;;  %v13762_v15 = vld [vmem:[#allocation240_spill] sm:$0xff] }
 0x518   : >> { %13750 = vst [vmem:[#allocation249_spill] sm:$0xff] %v11537_v1  ;;  %v11553_v19 = vadd.f32 %v13756_v40, %v13755_v29  ;;  %v13757_v56 = vld [vmem:[#allocation262_spill] sm:$0xff]  ;;  %v13758_v1 = vld [vmem:[#allocation243_spill] sm:$0xff]  ;;  %v4450_v18 = vmul.f32 %v4448_v28, %v11397_v34  ;;  %v4449_v40 = vmul.f32 %v4448_v28, %v11400_v50  ;;  %v13764_v49 = vld [vmem:[#allocation241_spill] sm:$0xff] }
 0x519   : >> { %v11557_v41 = vadd.f32 %v13758_v1, %v13757_v56  ;;  %v11559_v5 = vpop.permute.xlu1 %3979  ;;  %v11561_v45 = vpop.permute.xlu0 %3977  ;;  %v13761_v29 = vld [vmem:[#allocation263_spill] sm:$0xff]  ;;  %v13763_v1 = vld [vmem:[#allocation264_spill] sm:$0xff] }
 0x51a   : >> { %13759 = vst [vmem:[#allocation257_spill] sm:$0xff] %v11559_v5  ;;  %13760 = vst [vmem:[#allocation247_spill] sm:$0xff] %v11561_v45  ;;  %v11571_v38 = vadd.f32 %v13762_v15, %v13761_v29  ;;  %v11575_v56 = vadd.f32 %v13764_v49, %v13763_v1  ;;  %v4452_v29 = vmul.f32 %v4448_v28, %v11413_v20  ;;  %v13769_v1 = vld [vmem:[#allocation266_spill] sm:$0xff]  ;;  %v13770_v49 = vld [vmem:[#allocation239_spill] sm:$0xff] }
 0x51b   : >> { %4426 = vrot.lane.b32.xlu1 %v4400_v25, %s6770_s12  ;;  %4424 = vrot.lane.b32.xlu0 %v4399_v21, %s6770_s12  ;;  %v13767_v25 = vld [vmem:[#allocation265_spill] sm:$0xff]  ;;  %v13768_v21 = vld [vmem:[#allocation238_spill] sm:$0xff]  ;;  %v4451_v15 = vmul.f32 %v4448_v28, %v11416_v61  ;;  %v11592_v7 = vadd.f32 %v13770_v49, %v13769_v1  ;;  %v13784_v1 = vld [vmem:[#allocation271_spill] sm:$0xff] }
 0x51c   : >> { %v11584_v9 = vadd.f32 %v13768_v21, %v13767_v25  ;;  %v13776_v25 = vld [vmem:[#allocation237_spill] sm:$0xff]  ;;  %v13785_v49 = vld [vmem:[#allocation232_spill] sm:$0xff] }
 0x51d   : >> { %v11577_v45 = vpop.permute.xlu1 %3983  ;;  %v11579_v5 = vpop.permute.xlu0 %3981  ;;  %13771 = vst [vmem:[#allocation259_spill] sm:$0xff] %v11592_v7  ;;  %v11600_v21 = vadd.f32 %v13776_v25, %v13775_v23  ;;  %v11612_v7 = vadd.f32 %v13785_v49, %v13784_v1  ;;  %v13789_v23 = vld [vmem:[#allocation272_spill] sm:$0xff]  ;;  %v13790_v25 = vld [vmem:[#allocation233_spill] sm:$0xff]  ;;  %v13795_v49 = vld [vmem:[#allocation274_spill] sm:$0xff] }
 0x51e   : >> { %13765 = vst [vmem:[#allocation258_spill] sm:$0xff] %v11577_v45  ;;  %13766 = vst [vmem:[#allocation246_spill] sm:$0xff] %v11579_v5  ;;  %v13772_v45 = vld [vmem:[#allocation267_spill] sm:$0xff]  ;;  %v13773_v5 = vld [vmem:[#allocation236_spill] sm:$0xff] }
 0x51f   : >> { %4469 = vrot.lane.b32.xlu1 %v4450_v18, %s6770_s12  ;;  %4467 = vrot.lane.b32.xlu0 %v4449_v40, %s6770_s12  ;;  %v11596_v57 = vadd.f32 %v13773_v5, %v13772_v45  ;;  %13777 = vst [vmem:[#allocation260_spill] sm:$0xff] %v11600_v21  ;;  %v13779_v18 = vld [vmem:[#allocation234_spill] sm:$0xff]  ;;  %13786 = vst [vmem:[#allocation242_spill] sm:$0xff] %v11612_v7  ;;  %v11621_v21 = vadd.f32 %v13790_v25, %v13789_v23  ;;  %v13800_v25 = vld [vmem:[#allocation275_spill] sm:$0xff] }
 0x520   : >> { %v11604_v47 = vadd.f32 %v13779_v18, %v13778_v54  ;;  %v13781_v40 = vld [vmem:[#allocation270_spill] sm:$0xff]  ;;  %v4453_v54 = vmul.f32 %v4448_v28, %v11431_v36  ;;  %v13792_v18 = vld [vmem:[#allocation273_spill] sm:$0xff] }
 0x521   : >> { %13774 = vst [vmem:[#allocation244_spill] sm:$0xff] %v11596_v57  ;;  %v11608_v32 = vadd.f32 %v13782_v62, %v13781_v40  ;;  %v11615_v5 = vpop.permute.xlu1 %3987  ;;  %v11617_v45 = vpop.permute.xlu0 %3985  ;;  %13791 = vst [vmem:[#allocation263_spill] sm:$0xff] %v11621_v21  ;;  %v4454_v62 = vmul.f32 %v4448_v28, %v11428_v37  ;;  %v13793_v40 = vld [vmem:[#allocation230_spill] sm:$0xff] }
 0x522   : >> { %13780 = vst [vmem:[#allocation245_spill] sm:$0xff] %v11604_v47  ;;  %13787 = vst [vmem:[#allocation262_spill] sm:$0xff] %v11615_v5  ;;  %v11630_v1 = vadd.f32 %v13793_v40, %v13792_v18  ;;  %v13796_v5 = vld [vmem:[#allocation231_spill] sm:$0xff]  ;;  %v13801_v18 = vld [vmem:[#allocation228_spill] sm:$0xff] }
 0x523   : >> { %13783 = vst [vmem:[#allocation261_spill] sm:$0xff] %v11608_v32  ;;  %13788 = vst [vmem:[#allocation243_spill] sm:$0xff] %v11617_v45  ;;  %4473 = vrot.lane.b32.xlu1 %v4452_v29, %s6770_s12  ;;  %4471 = vrot.lane.b32.xlu0 %v4451_v15, %s6770_s12  ;;  %v11634_v45 = vadd.f32 %v13796_v5, %v13795_v49  ;;  %v4456_v29 = vmul.f32 %v4448_v28, %v11442_v48  ;;  %v13802_v5 = vld [vmem:[#allocation276_spill] sm:$0xff]  ;;  %v13803_v49 = vld [vmem:[#allocation229_spill] sm:$0xff] }
 0x524   : >> { %13794 = vst [vmem:[#allocation240_spill] sm:$0xff] %v11630_v1  ;;  %v4455_v15 = vmul.f32 %v4448_v28, %v11445_v0  ;;  %v11649_v40 = vadd.f32 %v13801_v18, %v13800_v25  ;;  %v13806_v1 = vld [vmem:[#allocation226_spill] sm:$0xff]  ;;  %v13810_v47 = vld [vmem:[#allocation227_spill] sm:$0xff]  ;;  %v13811_v25 = vld [vmem:[#allocation224_spill] sm:$0xff] }
 0x525   : >> { %13797 = vst [vmem:[#allocation264_spill] sm:$0xff] %v11634_v45  ;;  %v11636_v7 = vpop.permute.xlu1 %4030  ;;  %v11638_v23 = vpop.permute.xlu0 %4028  ;;  %v11653_v45 = vadd.f32 %v13803_v49, %v13802_v5  ;;  %v11667_v57 = vadd.f32 %v13810_v47, %v10904_v42  ;;  %v11671_v18 = vadd.f32 %v13811_v25, %v10911_v46  ;;  %v13812_v5 = vld [vmem:[#allocation225_spill] sm:$0xff]  ;;  %v4457_v46 = vmul.f32 %v4448_v28, %v11456_v44 }
 0x526   : >> { %13798 = vst [vmem:[#allocation241_spill] sm:$0xff] %v11636_v7  ;;  %13799 = vst [vmem:[#allocation265_spill] sm:$0xff] %v11638_v23  ;;  %v11655_v7 = vstv %s4504_s6  ;;  %v13805_v23 = vld [vmem:[#allocation277_spill] sm:$0xff]  ;;  %v11675_v49 = vadd.f32 %v13812_v5, %v10914_v14  ;;  %v13816_v14 = vld [vmem:[#allocation220_spill] sm:$0xff] }
 0x527   : >> { %4477 = vrot.lane.b32.xlu1 %v4454_v62, %s6770_s12  ;;  %4475 = vrot.lane.b32.xlu0 %v4453_v54, %s6770_s12  ;;  %13804 = vst [vmem:[#allocation238_spill] sm:$0xff] %v11653_v45  ;;  %v11659_v21 = vadd.f32 %v13806_v1, %v13805_v23  ;;  %v3691_v62 = vstv %s3690_s8  ;;  %v13813_v1 = vld [vmem:[#allocation222_spill] sm:$0xff]  ;;  %v3714_v45 = vstv %s3713_s29  ;;  %v4506_v42 = vmul.f32 %v11655_v7, %v11400_v50 }
 0x528   : >> { %v11679_v23 = vadd.f32 %v13813_v1, %v10917_v11  ;;  %v11692_v47 = vadd.f32 %v13816_v14, %v10927_v43  ;;  %v13817_v11 = vld [vmem:[#allocation221_spill] sm:$0xff]  ;;  %v11708_v28 = vmul.f32 %v3691_v62, %v11073_v8  ;;  %v11711_v43 = vmul.f32 %v3691_v62, %v11085_v27 }
 0x529   : >> { %13807 = vst [vmem:[#allocation266_spill] sm:$0xff] %v11659_v21  ;;  %v11661_v54 = vpop.permute.xlu1 %4034  ;;  %v11663_v32 = vpop.permute.xlu0 %4032  ;;  %v13815_v21 = vld [vmem:[#allocation223_spill] sm:$0xff]  ;;  %v11696_v25 = vadd.f32 %v13817_v11, %v10930_v6  ;;  %v11724_v1 = vmul.f32 %v3691_v62, %v11099_v59  ;;  %v11727_v14 = vmul.f32 %v3691_v62, %v11102_v12  ;;  %v11730_v11 = vmul.f32 %v3714_v45, %v11055_v58 }
 0x52a   : >> { %13808 = vst [vmem:[#allocation239_spill] sm:$0xff] %v11661_v54  ;;  %13809 = vst [vmem:[#allocation267_spill] sm:$0xff] %v11663_v32  ;;  %v13814_v54 = vld [vmem:[#allocation278_spill] sm:$0xff] }
 0x52b   : >> { %v11683_v32 = vadd.f32 %v13815_v21, %v13814_v54  ;;  %4481 = vrot.lane.b32.xlu1 %v4456_v29, %s6770_s12  ;;  %4479 = vrot.lane.b32.xlu0 %v4455_v15, %s6770_s12  ;;  %v11699_v21 = vmul.f32 %v3691_v62, %v11052_v24  ;;  %v11702_v29 = vmul.f32 %v3691_v62, %v11055_v58 }
 0x52c   : >> { %v11705_v15 = vmul.f32 %v3691_v62, %v11070_v4  ;;  %13821 = vst [vmem:[#allocation269_spill] sm:$0xff] %v11708_v28  ;;  %13822 = vst [vmem:[#allocation234_spill] sm:$0xff] %v11711_v43  ;;  %v11714_v54 = vmul.f32 %v3691_v62, %v11088_v26  ;;  %v11733_v43 = vmul.f32 %v3691_v62, %v11117_v3  ;;  %v3737_v28 = vstv %s11641_s10 }
 0x52d   : >> { %13818 = vst [vmem:[#allocation236_spill] sm:$0xff] %v11699_v21  ;;  %13819 = vst [vmem:[#allocation268_spill] sm:$0xff] %v11702_v29  ;;  %v11719_v6 = vpop.permute.xlu1 %4038  ;;  %v11721_v5 = vpop.permute.xlu0 %4036  ;;  %v3329_v58 = vadd.f32 %v11042_v30, %v11545_v13  ;;  %v3328_v62 = vadd.f32 %v11044_v53, %v11549_v33  ;;  %v11767_v33 = vmul.f32 %v3714_v45, %v11099_v59  ;;  %v6073_v29 = vld [vmem:[%s10578_s24 + $0x1] sm:$0xff] }
 0x52e   : >> { %13820 = vst [vmem:[#allocation237_spill] sm:$0xff] %v11705_v15  ;;  %13823 = vst [vmem:[#allocation270_spill] sm:$0xff] %v11714_v54  ;;  %v3717_v54 = vmul.f32 %v3714_v45, %v11073_v8  ;;  %v11776_v21 = vmul.f32 %v6073_v29, %v3737_v28  ;;  %v4509_v59 = vmul.f32 %v11655_v7, %v11413_v20 }
 0x52f   : >> { %13824 = vst [vmem:[#allocation235_spill] sm:$0xff] %v11719_v6  ;;  %13825 = vst [vmem:[#allocation271_spill] sm:$0xff] %v11721_v5  ;;  %4524 = vrot.lane.b32.xlu1 %v4506_v42, %s6770_s12  ;;  %4483 = vrot.lane.b32.xlu0 %v4457_v46, %s6770_s12  ;;  %v4508_v5 = vmul.f32 %v11655_v7, %v11416_v61  ;;  %v4507_v6 = vmul.f32 %v11655_v7, %v11397_v34 }
 0x530   : >> { %13826 = vst [vmem:[#allocation232_spill] sm:$0xff] %v11724_v1  ;;  %13827 = vst [vmem:[#allocation272_spill] sm:$0xff] %v11727_v14  ;;  %v3719_v42 = vmul.f32 %v3714_v45, %v11088_v26  ;;  %v3718_v46 = vmul.f32 %v3714_v45, %v11070_v4  ;;  %v11754_v14 = vmul.f32 %v3714_v45, %v11085_v27 }
 0x531   : >> { %13828 = vst [vmem:[#allocation233_spill] sm:$0xff] %v11730_v11  ;;  %13829 = vst [vmem:[#allocation273_spill] sm:$0xff] %v11733_v43  ;;  %v3716_v43 = vmul.f32 %v3714_v45, %v11052_v24  ;;  %v11751_v11 = vmul.f32 %v3714_v45, %v11102_v12  ;;  %v11757_v1 = vmul.f32 %v3714_v45, %v11117_v3  ;;  %v11759_v30 = vpop.permute.xlu1 %4042  ;;  %v11761_v13 = vpop.permute.xlu0 %4040  ;;  %v11770_v12 = vld [vmem:[%s10578_s24 + $0x9] sm:$0xff] }
 0x532   : >> { %13830 = vst [vmem:[#allocation230_spill] sm:$0xff] %v11761_v13  ;;  %v3557_v53 = vadd.f32 %v11236_v16, %v3329_v58  ;;  %v3556_v24 = vadd.f32 %v11238_v17, %v3328_v62  ;;  %v11773_v15 = vmul.f32 %v11770_v12, %v3737_v28  ;;  %v4510_v16 = vmul.f32 %v11655_v7, %v11431_v36 }
 0x533   : >> { %4528 = vrot.lane.b32.xlu1 %v4508_v5, %s6770_s12  ;;  %4526 = vrot.lane.b32.xlu0 %v4507_v6, %s6770_s12  ;;  %v3331_v17 = vadd.f32 %v11057_v52, %v11553_v19  ;;  %v3330_v45 = vadd.f32 %v11059_v10, %v11557_v41  ;;  %v11789_v58 = vmul.f32 %v3737_v28, %v11070_v4  ;;  %v11805_v19 = vstv %s11717_s19 }
 0x534   : >> { %v11792_v62 = vmul.f32 %v3737_v28, %v11073_v8  ;;  %v3333_v6 = vadd.f32 %v11075_v60, %v11571_v38  ;;  %v11799_v5 = vmul.f32 %v3737_v28, %v11085_v27  ;;  %v11802_v52 = vmul.f32 %v3737_v28, %v11088_v26 }
 0x535   : >> { %v11807_v10 = vpop.permute.xlu1 %4085  ;;  %v11809_v4 = vpop.permute.xlu0 %4044  ;;  %v3559_v8 = vadd.f32 %v11244_v51, %v3331_v17  ;;  %v3558_v41 = vadd.f32 %v11246_v55, %v3330_v45  ;;  %v3726_v13 = vadd.f32 %v3717_v54, %v3557_v53  ;;  %v3725_v60 = vadd.f32 %v3716_v43, %v3556_v24  ;;  %v11824_v55 = vld [vmem:[%s10578_s24 + $0x39] sm:$0xff] }
 0x536   : >> { %13831 = vst [vmem:[#allocation274_spill] sm:$0xff] %v11809_v4  ;;  %v3332_v27 = vadd.f32 %v11077_v39, %v11575_v56  ;;  %v4512_v26 = vmul.f32 %v11655_v7, %v11445_v0  ;;  %v4511_v38 = vmul.f32 %v11655_v7, %v11428_v37  ;;  %v11827_v43 = vmul.f32 %v11824_v55, %v3737_v28  ;;  %v11830_v39 = vld [vmem:[%s10578_s24 + $0x31] sm:$0xff] }
 0x537   : >> { %4532 = vrot.lane.b32.xlu1 %v4510_v16, %s6770_s12  ;;  %4530 = vrot.lane.b32.xlu0 %v4509_v59, %s6770_s12  ;;  %v3886_v4 = vadd.f32 %v11387_v31, %v3726_v13  ;;  %v3885_v51 = vadd.f32 %v11389_v63, %v3725_v60  ;;  %v11833_v56 = vmul.f32 %v11830_v39, %v3737_v28 }
 0x538   : >> { %v3561_v54 = vadd.f32 %v11252_v22, %v3333_v6  ;;  %v3560_v53 = vadd.f32 %v11254_v35, %v3332_v27  ;;  %v11838_v24 = vmul.f32 %v6073_v29, %v11805_v19  ;;  %v11841_v63 = vmul.f32 %v3737_v28, %v11117_v3  ;;  %v13833_v29 = vld [vmem:[#allocation259_spill] sm:$0xff]  ;;  %v13834_v28 = vld [vmem:[#allocation289_spill] sm:$0xff]  ;;  %v13839_v27 = vld [vmem:[#allocation244_spill] sm:$0xff] }
 0x539   : >> { %v4090_v31 = vpop.permute.xlu1 %4089  ;;  %v4088_v13 = vpop.permute.xlu0 %4087  ;;  %v3728_v16 = vadd.f32 %v3719_v42, %v3559_v8  ;;  %v3727_v59 = vadd.f32 %v3718_v46, %v3558_v41  ;;  %v3335_v22 = vadd.f32 %v11090_v2, %v11584_v9  ;;  %v4514_v35 = vmul.f32 %v11655_v7, %v11456_v44  ;;  %v13835_v46 = vld [vmem:[#allocation348_spill] sm:$0xff]  ;;  %v13837_v2 = vld [vmem:[#allocation362_spill] sm:$0xff]  ;;  %v13838_v9 = vld [vmem:[#allocation279_spill] sm:$0xff] }
 0x53a   : >> { %v11843_v17 = vadd.f32 %v4090_v31, %v3886_v4  ;;  %v11845_v45 = vadd.f32 %v4088_v13, %v3885_v51  ;;  %v4513_v3 = vmul.f32 %v11655_v7, %v11442_v48  ;;  %v3334_v42 = vadd.f32 %v13834_v28, %v13833_v29  ;;  %v13836_v4 = vld [vmem:[#allocation349_spill] sm:$0xff]  ;;  %v13841_v29 = vld [vmem:[#allocation318_spill] sm:$0xff]  ;;  %v13842_v28 = vld [vmem:[#allocation319_spill] sm:$0xff] }
 0x53b   : >> { %4536 = vrot.lane.b32.xlu1 %v4512_v26, %s6770_s12  ;;  %4534 = vrot.lane.b32.xlu0 %v4511_v38, %s6770_s12  ;;  %v3888_v6 = vadd.f32 %v13835_v46, %v3728_v16  ;;  %v3887_v8 = vadd.f32 %v13836_v4, %v3727_v59  ;;  %v11860_v41 = vstv %s11794_s25  ;;  %v11864_v60 = vadd.f32 %v13838_v9, %v13837_v2  ;;  %v13840_v26 = vld [vmem:[#allocation290_spill] sm:$0xff]  ;;  %v13844_v2 = vld [vmem:[#allocation260_spill] sm:$0xff]  ;;  %v13845_v9 = vld [vmem:[#allocation291_spill] sm:$0xff] }
 0x53c   : >> { %13832 = vst [vmem:[#allocation231_spill] sm:$0xff] %v11845_v45  ;;  %v3385_v38 = vadd.f32 %v13840_v26, %v13839_v27  ;;  %v3730_v51 = vadd.f32 %v11751_v11, %v3561_v54  ;;  %v3729_v7 = vadd.f32 %v11754_v14, %v3560_v53  ;;  %v3563_v16 = vadd.f32 %v13841_v29, %v3335_v22  ;;  %v13846_v54 = vld [vmem:[#allocation363_spill] sm:$0xff]  ;;  %v13847_v53 = vld [vmem:[#allocation280_spill] sm:$0xff] }
 0x53d   : >> { %v4094_v31 = vpop.permute.xlu1 %4093  ;;  %v4092_v13 = vpop.permute.xlu0 %4091  ;;  %v3562_v59 = vadd.f32 %v13842_v28, %v3334_v42  ;;  %v3384_v45 = vadd.f32 %v13845_v9, %v13844_v2  ;;  %v4564_v14 = vmul.f32 %v11860_v41, %v11397_v34  ;;  %v4563_v11 = vmul.f32 %v11860_v41, %v11400_v50  ;;  %v13848_v42 = vld [vmem:[#allocation350_spill] sm:$0xff]  ;;  %v6076_v26 = vld [vmem:[%s10578_s24 + $0x11] sm:$0xff]  ;;  %v13853_v2 = vld [vmem:[#allocation321_spill] sm:$0xff] }
 0x53e   : >> { %v11872_v46 = vadd.f32 %v4094_v31, %v3888_v6  ;;  %v11874_v4 = vadd.f32 %v4092_v13, %v3887_v8  ;;  %v11886_v22 = vadd.f32 %v13847_v53, %v13846_v54  ;;  %v3890_v6 = vadd.f32 %v13848_v42, %v3730_v51  ;;  %v13849_v8 = vld [vmem:[#allocation351_spill] sm:$0xff]  ;;  %v13852_v29 = vld [vmem:[#allocation320_spill] sm:$0xff] }
 0x53f   : >> { %4540 = vrot.lane.b32.xlu1 %v4514_v35, %s6770_s12  ;;  %4538 = vrot.lane.b32.xlu0 %v4513_v3, %s6770_s12  ;;  %v3889_v27 = vadd.f32 %v13849_v8, %v3729_v7  ;;  %v11892_v31 = vmul.f32 %v6076_v26, %v11805_v19  ;;  %v13850_v35 = vld [vmem:[#allocation364_spill] sm:$0xff]  ;;  %v13851_v3 = vld [vmem:[#allocation281_spill] sm:$0xff]  ;;  %v3613_v28 = vadd.f32 %v13852_v29, %v3385_v38  ;;  %s4617_s12 = sadd.s32 2, %s11406_s5  ;;  %v13857_v38 = vld [vmem:[#allocation282_spill] sm:$0xff]  ;;  %s5373_s5 = sld [smem:[#allocation9 + $0x5]] (%p12564_p5) }
 0x540   : >> { %13843 = vst [vmem:[#allocation275_spill] sm:$0xff] %v11874_v4  ;;  %v11896_v13 = vadd.f32 %v13851_v3, %v13850_v35  ;;  %v3612_v9 = vadd.f32 %v13853_v2, %v3384_v45  ;;  %v11902_v54 = vmul.f32 %v11770_v12, %v11805_v19  ;;  %v3732_v7 = vadd.f32 %v11757_v1, %v3563_v16  ;;  %v13856_v35 = vld [vmem:[#allocation252_spill] sm:$0xff]  ;;  %s11927_s0 = sld [smem:[#allocation8 + %s4617_s12]] }
 0x541   : >> { %v4098_v53 = vpop.permute.xlu1 %4097  ;;  %v4096_v51 = vpop.permute.xlu0 %4095  ;;  %v3731_v42 = vadd.f32 %v11767_v33, %v3562_v59  ;;  %v11913_v3 = vadd.f32 %v13857_v38, %v13856_v35  ;;  %v4566_v12 = vmul.f32 %v11860_v41, %v11413_v20  ;;  %v4565_v1 = vmul.f32 %v11860_v41, %v11416_v61  ;;  %v13858_v33 = vld [vmem:[#allocation245_spill] sm:$0xff]  ;;  %v13859_v45 = vld [vmem:[#allocation292_spill] sm:$0xff] }
 0x542   : >> { %v11907_v8 = vadd.f32 %v4098_v53, %v3890_v6  ;;  %v11909_v26 = vadd.f32 %v4096_v51, %v3889_v27  ;;  %v3387_v16 = vadd.f32 %v13859_v45, %v13858_v33  ;;  %v13860_v59 = vld [vmem:[#allocation261_spill] sm:$0xff]  ;;  %v13862_v29 = vld [vmem:[#allocation352_spill] sm:$0xff]  ;;  %v3748_v38 = vadd.f32 %v11773_v15, %v3613_v28 }
 0x543   : >> { %4583 = vrot.lane.b32.xlu1 %v4564_v14, %s6771_s17  ;;  %4581 = vrot.lane.b32.xlu0 %v4563_v11, %s6771_s17  ;;  %v13861_v6 = vld [vmem:[#allocation293_spill] sm:$0xff]  ;;  %v3892_v2 = vadd.f32 %v13862_v29, %v3732_v7  ;;  %v13864_v14 = vld [vmem:[#allocation242_spill] sm:$0xff]  ;;  %v13867_v29 = vld [vmem:[#allocation323_spill] sm:$0xff]  ;;  %v4567_v28 = vmul.f32 %v11860_v41, %v11431_v36 }
 0x544   : >> { %13854 = vst [vmem:[#allocation228_spill] sm:$0xff] %v11907_v8  ;;  %13855 = vst [vmem:[#allocation276_spill] sm:$0xff] %v11909_v26  ;;  %v3386_v27 = vadd.f32 %v13861_v6, %v13860_v59  ;;  %v13863_v53 = vld [vmem:[#allocation353_spill] sm:$0xff]  ;;  %v13865_v11 = vld [vmem:[#allocation294_spill] sm:$0xff]  ;;  %v3747_v26 = vadd.f32 %v11776_v21, %v3612_v9  ;;  %v4568_v21 = vmul.f32 %v11860_v41, %v11428_v37 }
 0x545   : >> { %v3891_v51 = vadd.f32 %v13863_v53, %v3731_v42  ;;  %v3389_v35 = vadd.f32 %v13865_v11, %v13864_v14  ;;  %v6077_v8 = vld [vmem:[%s10578_s24 + $0x21] sm:$0xff]  ;;  %v4102_v45 = vpop.permute.xlu1 %4101  ;;  %v4100_v59 = vpop.permute.xlu0 %4099  ;;  %v13870_v14 = vld [vmem:[#allocation263_spill] sm:$0xff] }
 0x546   : >> { %v11935_v33 = vmul.f32 %v6077_v8, %v11805_v19  ;;  %v13866_v6 = vld [vmem:[#allocation322_spill] sm:$0xff]  ;;  %v3614_v42 = vadd.f32 %v13867_v29, %v3386_v27  ;;  %v11939_v53 = vadd.f32 %v4102_v45, %v3892_v2  ;;  %v13871_v11 = vld [vmem:[#allocation295_spill] sm:$0xff]  ;;  %v13872_v9 = vld [vmem:[#allocation253_spill] sm:$0xff] }
 0x547   : >> { %v3615_v7 = vadd.f32 %v13866_v6, %v3387_v16  ;;  %v11941_v4 = vadd.f32 %v4100_v59, %v3891_v51  ;;  %v3388_v15 = vadd.f32 %v13871_v11, %v13870_v14  ;;  %4587 = vrot.lane.b32.xlu1 %v4566_v12, %s6771_s17  ;;  %4585 = vrot.lane.b32.xlu0 %v4565_v1, %s6771_s17  ;;  %v13873_v8 = vld [vmem:[#allocation283_spill] sm:$0xff]  ;;  %v13874_v27 = vld [vmem:[#allocation354_spill] sm:$0xff]  ;;  %v6078_v59 = vld [vmem:[%s10578_s24 + $0x19] sm:$0xff] }
 0x548   : >> { %13868 = vst [vmem:[#allocation229_spill] sm:$0xff] %v11939_v53  ;;  %v11953_v16 = vadd.f32 %v13873_v8, %v13872_v9  ;;  %v3942_v2 = vadd.f32 %v13874_v27, %v3748_v38  ;;  %v13875_v51 = vld [vmem:[#allocation355_spill] sm:$0xff]  ;;  %v11959_v6 = vmul.f32 %v6078_v59, %v11805_v19  ;;  %v13876_v12 = vld [vmem:[#allocation250_spill] sm:$0xff]  ;;  %v13877_v1 = vld [vmem:[#allocation284_spill] sm:$0xff]  ;;  %v11969_v9 = vmul.f32 %v11830_v39, %v11805_v19 }
 0x549   : >> { %13869 = vst [vmem:[#allocation277_spill] sm:$0xff] %v11941_v4  ;;  %v3941_v45 = vadd.f32 %v13875_v51, %v3747_v26  ;;  %v11963_v29 = vadd.f32 %v13877_v1, %v13876_v12  ;;  %v13878_v14 = vld [vmem:[#allocation324_spill] sm:$0xff]  ;;  %v13879_v4 = vld [vmem:[#allocation325_spill] sm:$0xff]  ;;  %v4145_v38 = vpop.permute.xlu1 %4144  ;;  %v4143_v8 = vpop.permute.xlu0 %4142  ;;  %v3750_v26 = vadd.f32 %v11789_v58, %v3615_v7  ;;  %v3749_v27 = vadd.f32 %v11792_v62, %v3614_v42 }
 0x54a   : >> { %v3617_v11 = vadd.f32 %v13878_v14, %v3389_v35  ;;  %v3616_v53 = vadd.f32 %v13879_v4, %v3388_v15  ;;  %v11973_v51 = vadd.f32 %v4145_v38, %v3942_v2  ;;  %v13882_v12 = vld [vmem:[#allocation240_spill] sm:$0xff]  ;;  %v4570_v39 = vmul.f32 %v11860_v41, %v11442_v48  ;;  %v13885_v7 = vld [vmem:[#allocation297_spill] sm:$0xff]  ;;  %v13888_v38 = vld [vmem:[#allocation298_spill] sm:$0xff] }
 0x54b   : >> { %v11975_v59 = vadd.f32 %v4143_v8, %v3941_v45  ;;  %v13883_v35 = vld [vmem:[#allocation296_spill] sm:$0xff]  ;;  %4591 = vrot.lane.b32.xlu1 %v4568_v21, %s6771_s17  ;;  %4589 = vrot.lane.b32.xlu0 %v4567_v28, %s6771_s17  ;;  %v4569_v58 = vmul.f32 %v11860_v41, %v11445_v0  ;;  %v13887_v2 = vld [vmem:[#allocation357_spill] sm:$0xff]  ;;  %v11990_v14 = vstv %s11927_s0  ;;  %v3441_v21 = vadd.f32 %v13888_v38, %v11649_v40  ;;  %v13893_v40 = vld [vmem:[#allocation238_spill] sm:$0xff] }
 0x54c   : >> { %13880 = vst [vmem:[#allocation226_spill] sm:$0xff] %v11973_v51  ;;  %v3391_v1 = vadd.f32 %v13883_v35, %v13882_v12  ;;  %v13884_v4 = vld [vmem:[#allocation264_spill] sm:$0xff]  ;;  %v3943_v45 = vadd.f32 %v13887_v2, %v3749_v27  ;;  %v3752_v28 = vadd.f32 %v11799_v5, %v3617_v11  ;;  %v3751_v8 = vadd.f32 %v11802_v52, %v3616_v53  ;;  %v6079_v12 = vld [vmem:[%s10578_s24 + $0x29] sm:$0xff] }
 0x54d   : >> { %13881 = vst [vmem:[#allocation227_spill] sm:$0xff] %v11975_v59  ;;  %v3390_v62 = vadd.f32 %v13885_v7, %v13884_v4  ;;  %v13886_v42 = vld [vmem:[#allocation356_spill] sm:$0xff]  ;;  %v11998_v35 = vmul.f32 %v6079_v12, %v11805_v19  ;;  %v4149_v59 = vpop.permute.xlu1 %4148  ;;  %v4147_v51 = vpop.permute.xlu0 %4146  ;;  %v13889_v4 = vld [vmem:[#allocation326_spill] sm:$0xff]  ;;  %v13890_v7 = vld [vmem:[#allocation327_spill] sm:$0xff]  ;;  %v4620_v52 = vmul.f32 %v11990_v14, %v11400_v50  ;;  %v4571_v53 = vmul.f32 %v11860_v41, %v11456_v44 }
 0x54e   : >> { %v3944_v15 = vadd.f32 %v13886_v42, %v3750_v26  ;;  %v3619_v26 = vadd.f32 %v13889_v4, %v3391_v1  ;;  %v12004_v2 = vadd.f32 %v4147_v51, %v3943_v45  ;;  %v13894_v38 = vld [vmem:[#allocation299_spill] sm:$0xff]  ;;  %v13895_v11 = vld [vmem:[#allocation254_spill] sm:$0xff]  ;;  %v13896_v1 = vld [vmem:[#allocation285_spill] sm:$0xff]  ;;  %v12032_v41 = vmul.f32 %v11824_v55, %v11805_v19 }
 0x54f   : >> { %v3618_v27 = vadd.f32 %v13890_v7, %v3390_v62  ;;  %v3392_v5 = vadd.f32 %v13894_v38, %v13893_v40  ;;  %4595 = vrot.lane.b32.xlu1 %v4570_v39, %s6771_s17  ;;  %4593 = vrot.lane.b32.xlu0 %v4569_v58, %s6771_s17  ;;  %v12016_v62 = vadd.f32 %v13896_v1, %v13895_v11  ;;  %v13898_v51 = vld [vmem:[#allocation286_spill] sm:$0xff]  ;;  %v13900_v4 = vld [vmem:[#allocation359_spill] sm:$0xff]  ;;  %v13901_v7 = vld [vmem:[#allocation328_spill] sm:$0xff] }
 0x550   : >> { %v12002_v42 = vadd.f32 %v4149_v59, %v3944_v15  ;;  %13892 = vst [vmem:[#allocation225_spill] sm:$0xff] %v12004_v2  ;;  %v13897_v59 = vld [vmem:[#allocation251_spill] sm:$0xff]  ;;  %v13899_v45 = vld [vmem:[#allocation358_spill] sm:$0xff]  ;;  %v3945_v39 = vadd.f32 %v13900_v4, %v3751_v8  ;;  %v3669_v58 = vadd.f32 %v13901_v7, %v3441_v21  ;;  %v13902_v40 = vld [vmem:[#allocation329_spill] sm:$0xff]  ;;  %v4621_v55 = vmul.f32 %v11990_v14, %v11397_v34 }
 0x551   : >> { %v12020_v15 = vadd.f32 %v13898_v51, %v13897_v59  ;;  %v3946_v12 = vadd.f32 %v13899_v45, %v3752_v28  ;;  %v3620_v38 = vadd.f32 %v13902_v40, %v3392_v5  ;;  %v6080_v2 = vld [vmem:[%s10578_s24 + $0x41] sm:$0x1]  ;;  %v4153_v11 = vpop.permute.xlu1 %4152  ;;  %v4151_v1 = vpop.permute.xlu0 %4150  ;;  %v3754_v59 = vadd.f32 %v11827_v43, %v3619_v26  ;;  %v13905_v5 = vld [vmem:[#allocation287_spill] sm:$0xff]  ;;  %v13906_v43 = vld [vmem:[#allocation266_spill] sm:$0xff] }
 0x552   : >> { %13891 = vst [vmem:[#allocation224_spill] sm:$0xff] %v12002_v42  ;;  %v12028_v42 = vmul.f32 %v6080_v2, %v11805_v19  ;;  %v3753_v28 = vadd.f32 %v11833_v56, %v3618_v27  ;;  %v12038_v8 = vadd.f32 %v4151_v1, %v3945_v39  ;;  %v13904_v21 = vld [vmem:[#allocation249_spill] sm:$0xff]  ;;  %v4622_v19 = vmul.f32 %v11990_v14, %v11416_v61  ;;  %v13907_v56 = vld [vmem:[#allocation300_spill] sm:$0xff] }
 0x553   : >> { %v12036_v51 = vadd.f32 %v4153_v11, %v3946_v12  ;;  %v12042_v45 = vadd.f32 %v13905_v5, %v13904_v21  ;;  %4638 = vrot.lane.b32.xlu1 %v4620_v52, %s6771_s17  ;;  %4597 = vrot.lane.b32.xlu0 %v4571_v53, %s6771_s17  ;;  %v3443_v26 = vadd.f32 %v13907_v56, %v13906_v43  ;;  %v13908_v27 = vld [vmem:[#allocation301_spill] sm:$0xff]  ;;  %v13909_v12 = vld [vmem:[#allocation360_spill] sm:$0xff]  ;;  %v13913_v53 = vld [vmem:[#allocation302_spill] sm:$0xff] }
 0x554   : >> { %13903 = vst [vmem:[#allocation222_spill] sm:$0xff] %v12038_v8  ;;  %v3442_v2 = vadd.f32 %v13908_v27, %v11667_v57  ;;  %v3948_v4 = vadd.f32 %v13909_v12, %v3754_v59  ;;  %v13910_v39 = vld [vmem:[#allocation361_spill] sm:$0xff]  ;;  %v13911_v40 = vld [vmem:[#allocation256_spill] sm:$0xff]  ;;  %v3445_v1 = vadd.f32 %v13913_v53, %v11671_v18  ;;  %v3770_v21 = vadd.f32 %v11838_v24, %v3669_v58  ;;  %v13914_v56 = vld [vmem:[#allocation330_spill] sm:$0xff] }
 0x555   : >> { %v3947_v7 = vadd.f32 %v13910_v39, %v3753_v28  ;;  %v13912_v52 = vld [vmem:[#allocation288_spill] sm:$0xff]  ;;  %v3755_v5 = vadd.f32 %v11841_v63, %v3620_v38  ;;  %v4157_v8 = vpop.permute.xlu1 %4156  ;;  %v4155_v43 = vpop.permute.xlu0 %4154  ;;  %v3671_v57 = vadd.f32 %v13914_v56, %v3443_v26  ;;  %v13915_v27 = vld [vmem:[#allocation331_spill] sm:$0xff]  ;;  %v4624_v18 = vmul.f32 %v11990_v14, %v11431_v36  ;;  %v13919_v26 = vld [vmem:[#allocation365_spill] sm:$0xff] }
 0x556   : >> { %v12058_v11 = vadd.f32 %v13912_v52, %v13911_v40  ;;  %v3670_v59 = vadd.f32 %v13915_v27, %v3442_v2  ;;  %v12067_v12 = vadd.f32 %v4157_v8, %v3948_v4  ;;  %v13916_v39 = vld [vmem:[#allocation303_spill] sm:$0xff]  ;;  %v4623_v24 = vmul.f32 %v11990_v14, %v11413_v20  ;;  %v13917_v63 = vld [vmem:[#allocation304_spill] sm:$0xff]  ;;  %v13922_v36 = vld [vmem:[#allocation309_spill] sm:$0xff] }
 0x557   : >> { %v12069_v28 = vadd.f32 %v4155_v43, %v3947_v7  ;;  %v3444_v40 = vadd.f32 %v13916_v39, %v11675_v49  ;;  %4642 = vrot.lane.b32.xlu1 %v4622_v19, %s6771_s17  ;;  %4640 = vrot.lane.b32.xlu0 %v4621_v55, %s6771_s17  ;;  %v3447_v58 = vadd.f32 %v13917_v63, %v11679_v23  ;;  %v13918_v38 = vld [vmem:[#allocation308_spill] sm:$0xff]  ;;  %v13920_v49 = vld [vmem:[#allocation366_spill] sm:$0xff]  ;;  %v13921_v19 = vld [vmem:[#allocation305_spill] sm:$0xff] }
 0x558   : >> { %v3499_v8 = vadd.f32 %v13918_v38, %v11913_v3  ;;  %v3998_v2 = vadd.f32 %v13919_v26, %v3770_v21  ;;  %v3949_v4 = vadd.f32 %v13920_v49, %v3755_v5  ;;  %v3446_v55 = vadd.f32 %v13921_v19, %v11683_v32  ;;  %v13923_v52 = vld [vmem:[#allocation332_spill] sm:$0xff]  ;;  %v13924_v43 = vld [vmem:[#allocation333_spill] sm:$0xff]  ;;  %v13925_v32 = vld [vmem:[#allocation306_spill] sm:$0xff] }
 0x559   : >> { %v3498_v7 = vadd.f32 %v13922_v36, %v11886_v22  ;;  %v3673_v53 = vadd.f32 %v13923_v52, %v3445_v1  ;;  %v3672_v56 = vadd.f32 %v13924_v43, %v3444_v40  ;;  %v4200_v23 = vpop.permute.xlu1 %4199  ;;  %v4159_v27 = vpop.permute.xlu0 %4158  ;;  %v3772_v3 = vadd.f32 %v11892_v31, %v3671_v57  ;;  %v13926_v31 = vld [vmem:[#allocation307_spill] sm:$0xff]  ;;  %v13927_v57 = vld [vmem:[#allocation236_spill] sm:$0xff]  ;;  %v13932_v36 = vld [vmem:[#allocation334_spill] sm:$0xff] }
 0x55a   : >> { %v3771_v21 = vadd.f32 %v11902_v54, %v3670_v59  ;;  %v12098_v5 = vadd.f32 %v4200_v23, %v3998_v2  ;;  %v12100_v39 = vadd.f32 %v4159_v27, %v3949_v4  ;;  %v3449_v63 = vadd.f32 %v13925_v32, %v11692_v47  ;;  %v13928_v40 = vld [vmem:[#allocation255_spill] sm:$0xff]  ;;  %v13929_v26 = vld [vmem:[#allocation248_spill] sm:$0xff]  ;;  %v13930_v47 = vld [vmem:[#allocation310_spill] sm:$0xff] }
 0x55b   : >> { %4646 = vrot.lane.b32.xlu1 %v4624_v18, %s6771_s17  ;;  %4644 = vrot.lane.b32.xlu0 %v4623_v24, %s6771_s17  ;;  %v4626_v22 = vmul.f32 %v11990_v14, %v11445_v0  ;;  %v4625_v1 = vmul.f32 %v11990_v14, %v11428_v37  ;;  %v3448_v54 = vadd.f32 %v13926_v31, %v11696_v25  ;;  %v13931_v49 = vld [vmem:[#allocation268_spill] sm:$0xff]  ;;  %v13933_v52 = vld [vmem:[#allocation335_spill] sm:$0xff] }
 0x55c   : >> { %v3702_v59 = vadd.f32 %v13927_v57, %v3499_v8  ;;  %v4000_v38 = vadd.f32 %v13928_v40, %v3772_v3  ;;  %v3999_v2 = vadd.f32 %v13929_v26, %v3771_v21  ;;  %v3501_v18 = vadd.f32 %v13930_v47, %v11896_v13  ;;  %v13934_v13 = vld [vmem:[#allocation311_spill] sm:$0xff] }
 0x55d   : >> { %v3701_v24 = vadd.f32 %v13931_v49, %v3498_v7  ;;  %v3774_v4 = vadd.f32 %v11935_v33, %v3673_v53  ;;  %v3773_v0 = vadd.f32 %v11959_v6, %v3672_v56  ;;  %v4204_v37 = vpop.permute.xlu1 %4203  ;;  %v4202_v19 = vpop.permute.xlu0 %4201  ;;  %v3675_v25 = vadd.f32 %v13932_v36, %v3447_v58  ;;  %v13935_v58 = vld [vmem:[#allocation312_spill] sm:$0xff]  ;;  %v13936_v7 = vld [vmem:[#allocation257_spill] sm:$0xff]  ;;  %v13937_v56 = vld [vmem:[#allocation247_spill] sm:$0xff] }
 0x55e   : >> { %v3674_v8 = vadd.f32 %v13933_v52, %v3446_v55  ;;  %v12122_v43 = vadd.f32 %v4204_v37, %v4000_v38  ;;  %v12124_v23 = vadd.f32 %v4202_v19, %v3999_v2  ;;  %v3500_v27 = vadd.f32 %v13934_v13, %v11864_v60  ;;  %v13938_v60 = vld [vmem:[#allocation336_spill] sm:$0xff]  ;;  %v13941_v2 = vld [vmem:[#allocation269_spill] sm:$0xff]  ;;  %v13945_v37 = vld [vmem:[#allocation246_spill] sm:$0xff] }
 0x55f   : >> { %4650 = vrot.lane.b32.xlu1 %v4626_v22, %s6771_s17  ;;  %4648 = vrot.lane.b32.xlu0 %v4625_v1, %s6771_s17  ;;  %v4628_v33 = vmul.f32 %v11990_v14, %v11456_v44  ;;  %v4627_v6 = vmul.f32 %v11990_v14, %v11442_v48  ;;  %v3503_v55 = vadd.f32 %v13935_v58, %v11953_v16  ;;  %v12139_v21 = vstv %s12085_s11  ;;  %v13939_v22 = vld [vmem:[#allocation337_spill] sm:$0xff]  ;;  %v13946_v36 = vld [vmem:[#allocation314_spill] sm:$0xff]  ;;  %v13948_v58 = vld [vmem:[#allocation339_spill] sm:$0xff] }
 0x560   : >> { %v4002_v53 = vadd.f32 %v13936_v7, %v3774_v4  ;;  %v4001_v3 = vadd.f32 %v13937_v56, %v3773_v0  ;;  %v3677_v32 = vadd.f32 %v13938_v60, %v3449_v63  ;;  %v3676_v31 = vadd.f32 %v13939_v22, %v3448_v54  ;;  %v13940_v1 = vld [vmem:[#allocation237_spill] sm:$0xff]  ;;  %v13944_v4 = vld [vmem:[#allocation258_spill] sm:$0xff] }
 0x561   : >> { %v3704_v57 = vadd.f32 %v13940_v1, %v3501_v18  ;;  %v4208_v40 = vpop.permute.xlu1 %4207  ;;  %v4206_v44 = vpop.permute.xlu0 %4205  ;;  %v12145_v38 = vstv %s12094_s15  ;;  %v3776_v48 = vadd.f32 %v11969_v9, %v3675_v25  ;;  %v3775_v16 = vadd.f32 %v11998_v35, %v3674_v8  ;;  %v13942_v9 = vld [vmem:[#allocation313_spill] sm:$0xff]  ;;  %v13943_v35 = vld [vmem:[#allocation234_spill] sm:$0xff] }
 0x562   : >> { %v12149_v14 = vadd.f32 %v4208_v40, %v4002_v53  ;;  %v12151_v26 = vadd.f32 %v4206_v44, %v4001_v3  ;;  %v3703_v47 = vadd.f32 %v13941_v2, %v3500_v27  ;;  %v4678_v63 = vmul.f32 %v12139_v21, %v11397_v34  ;;  %v13951_v3 = vld [vmem:[#allocation241_spill] sm:$0xff]  ;;  %v13954_v1 = vld [vmem:[#allocation270_spill] sm:$0xff]  ;;  %v13955_v40 = vld [vmem:[#allocation232_spill] sm:$0xff] }
 0x563   : >> { %4654 = vrot.lane.b32.xlu1 %v4628_v33, %s6771_s17  ;;  %4652 = vrot.lane.b32.xlu0 %v4627_v6, %s6771_s17  ;;  %v4677_v54 = vmul.f32 %v12139_v21, %v11400_v50  ;;  %v3502_v18 = vadd.f32 %v13942_v9, %v11963_v29  ;;  %v3706_v49 = vadd.f32 %v13943_v35, %v3503_v55  ;;  %v13947_v29 = vld [vmem:[#allocation338_spill] sm:$0xff]  ;;  %v13957_v9 = vld [vmem:[#allocation341_spill] sm:$0xff] }
 0x564   : >> { %v4004_v0 = vadd.f32 %v13944_v4, %v3776_v48  ;;  %v4003_v19 = vadd.f32 %v13945_v37, %v3775_v16  ;;  %v3505_v25 = vadd.f32 %v13946_v36, %v12016_v62  ;;  %v3778_v52 = vadd.f32 %v12028_v42, %v3677_v32  ;;  %v13952_v32 = vld [vmem:[#allocation265_spill] sm:$0xff]  ;;  %v13958_v36 = vld [vmem:[#allocation239_spill] sm:$0xff] }
 0x565   : >> { %v3777_v8 = vadd.f32 %v12032_v41, %v3676_v31  ;;  %v4212_v13 = vpop.permute.xlu1 %4211  ;;  %v4210_v27 = vpop.permute.xlu0 %4209  ;;  %v4249_v33 = vmul.f32 %v12145_v38, %v11397_v34  ;;  %v3828_v6 = vadd.f32 %v13947_v29, %v3702_v59  ;;  %v3827_v55 = vadd.f32 %v13948_v58, %v3701_v24  ;;  %v13949_v41 = vld [vmem:[#allocation262_spill] sm:$0xff]  ;;  %v13950_v24 = vld [vmem:[#allocation243_spill] sm:$0xff]  ;;  %v12197_v16 = vld [vmem:[%s10578_s24 + $0x1a] sm:$0xff] }
 0x566   : >> { %v12174_v7 = vadd.f32 %v4212_v13, %v4004_v0  ;;  %v12176_v53 = vadd.f32 %v4210_v27, %v4003_v19  ;;  %v4680_v42 = vmul.f32 %v12139_v21, %v11413_v20  ;;  %v4679_v34 = vmul.f32 %v12139_v21, %v11416_v61  ;;  %v13953_v31 = vld [vmem:[#allocation315_spill] sm:$0xff]  ;;  %v12218_v37 = vld [vmem:[%s10578_s24 + $0x22] sm:$0xff]  ;;  %v13960_v29 = vld [vmem:[#allocation316_spill] sm:$0xff] }
 0x567   : >> { %4697 = vrot.lane.b32.xlu1 %v4678_v63, %s6771_s17  ;;  %4695 = vrot.lane.b32.xlu0 %v4677_v54, %s6771_s17  ;;  %v4248_v62 = vmul.f32 %v12145_v38, %v11400_v50  ;;  %v4006_v59 = vadd.f32 %v13949_v41, %v3778_v52  ;;  %v4005_v56 = vadd.f32 %v13950_v24, %v3777_v8  ;;  %v13956_v63 = vld [vmem:[#allocation340_spill] sm:$0xff]  ;;  %v13959_v52 = vld [vmem:[#allocation267_spill] sm:$0xff]  ;;  %v13961_v58 = vld [vmem:[#allocation317_spill] sm:$0xff] }
 0x568   : >> { %v4056_v60 = vadd.f32 %v13951_v3, %v3828_v6  ;;  %v4055_v22 = vadd.f32 %v13952_v32, %v3827_v55  ;;  %v3504_v20 = vadd.f32 %v13953_v31, %v12020_v15  ;;  %v3705_v61 = vadd.f32 %v13954_v1, %v3502_v18  ;;  %v12213_v18 = vld [vmem:[%s10578_s24 + $0x2a] sm:$0xff]  ;;  %v12223_v19 = vld [vmem:[%s10578_s24 + $0x12] sm:$0xff] }
 0x569   : >> { %v3708_v44 = vadd.f32 %v13955_v40, %v3505_v25  ;;  %v4216_v50 = vpop.permute.xlu1 %4215  ;;  %v4214_v48 = vpop.permute.xlu0 %4213  ;;  %v4251_v2 = vmul.f32 %v12197_v16, %v12145_v38  ;;  %v3830_v54 = vadd.f32 %v13956_v63, %v3704_v57  ;;  %v3829_v35 = vadd.f32 %v13957_v9, %v3703_v47  ;;  %v13964_v32 = vld [vmem:[#allocation343_spill] sm:$0xff] }
 0x56a   : >> { %v12206_v15 = vadd.f32 %v4216_v50, %v4006_v59  ;;  %v12208_v4 = vadd.f32 %v4214_v48, %v4005_v56  ;;  %v4682_v0 = vmul.f32 %v12213_v18, %v12139_v21  ;;  %v4681_v57 = vmul.f32 %v12218_v37, %v12139_v21  ;;  %v13963_v56 = vld [vmem:[#allocation342_spill] sm:$0xff]  ;;  %v13965_v1 = vld [vmem:[#allocation235_spill] sm:$0xff] }
 0x56b   : >> { %4701 = vrot.lane.b32.xlu1 %v4680_v42, %s6771_s17  ;;  %4699 = vrot.lane.b32.xlu0 %v4679_v34, %s6771_s17  ;;  %v4250_v47 = vmul.f32 %v12223_v19, %v12145_v38  ;;  %v4058_v25 = vadd.f32 %v13958_v36, %v3830_v54  ;;  %v4057_v8 = vadd.f32 %v13959_v52, %v3829_v35  ;;  %v13962_v42 = vld [vmem:[#allocation272_spill] sm:$0xff]  ;;  %v13966_v40 = vld [vmem:[#allocation271_spill] sm:$0xff]  ;;  %v13967_v54 = vld [vmem:[#allocation233_spill] sm:$0xff] }
 0x56c   : >> { %v4258_v13 = vadd.f32 %v4249_v33, %v4056_v60  ;;  %v4257_v27 = vadd.f32 %v4248_v62, %v4055_v22  ;;  %v3555_v6 = vadd.f32 %v13960_v29, %v12042_v45  ;;  %v3506_v55 = vadd.f32 %v13961_v58, %v12058_v11  ;;  %v12245_v45 = vld [vmem:[%s10578_s24 + $0x3a] sm:$0xff]  ;;  %v12250_v22 = vld [vmem:[%s10578_s24 + $0x32] sm:$0xff] }
 0x56d   : >> { %v3707_v34 = vadd.f32 %v13962_v42, %v3504_v20  ;;  %v4356_v41 = vpop.permute.xlu1 %4355  ;;  %v4354_v59 = vpop.permute.xlu0 %4353  ;;  %v4253_v24 = vmul.f32 %v12213_v18, %v12145_v38  ;;  %v3832_v3 = vadd.f32 %v13963_v56, %v3706_v49  ;;  %v3831_v33 = vadd.f32 %v13964_v32, %v3705_v61  ;;  %v13968_v35 = vld [vmem:[#allocation273_spill] sm:$0xff] }
 0x56e   : >> { %v12238_v60 = vadd.f32 %v4356_v41, %v4258_v13  ;;  %v12240_v62 = vadd.f32 %v4354_v59, %v4257_v27  ;;  %v4684_v11 = vmul.f32 %v12245_v45, %v12139_v21  ;;  %v4683_v49 = vmul.f32 %v12250_v22, %v12139_v21  ;;  %v13969_v27 = vld [vmem:[#allocation344_spill] sm:$0xff]  ;;  %v13970_v58 = vld [vmem:[#allocation345_spill] sm:$0xff] }
 0x56f   : >> { %4705 = vrot.lane.b32.xlu1 %v4682_v0, %s6771_s17  ;;  %4703 = vrot.lane.b32.xlu0 %v4681_v57, %s6771_s17  ;;  %v4252_v31 = vmul.f32 %v12218_v37, %v12145_v38  ;;  %v12257_v20 = vstv %s12186_s21  ;;  %v4060_v61 = vadd.f32 %v13965_v1, %v3832_v3  ;;  %v4059_v50 = vadd.f32 %v13966_v40, %v3831_v33  ;;  %v13973_v40 = vld [vmem:[#allocation347_spill] sm:$0xff] }
 0x570   : >> { %v4260_v48 = vadd.f32 %v4251_v2, %v4058_v25  ;;  %v4259_v63 = vadd.f32 %v4250_v47, %v4057_v8  ;;  %v3724_v9 = vadd.f32 %v13967_v54, %v3555_v6  ;;  %v3709_v0 = vadd.f32 %v13968_v35, %v3506_v55  ;;  %v12277_v47 = vld [vmem:[%s10578_s24 + $0x2] sm:$0xff] }
 0x571   : >> { %v4360_v57 = vpop.permute.xlu1 %4359  ;;  %v4358_v36 = vpop.permute.xlu0 %4357  ;;  %v4255_v52 = vmul.f32 %v12245_v45, %v12145_v38  ;;  %v12266_v13 = vstv %s12202_s23  ;;  %v3834_v29 = vadd.f32 %v13969_v27, %v3708_v44  ;;  %v3833_v42 = vadd.f32 %v13970_v58, %v3707_v34  ;;  %v12282_v8 = vld [vmem:[%s10578_s24 + $0x42] sm:$0x1]  ;;  %v13971_v34 = vld [vmem:[#allocation230_spill] sm:$0xff] }
 0x572   : >> { %v12270_v41 = vadd.f32 %v4360_v57, %v4260_v48  ;;  %v12272_v2 = vadd.f32 %v4358_v36, %v4259_v63  ;;  %v4734_v25 = vmul.f32 %v12277_v47, %v12257_v20  ;;  %v4685_v44 = vmul.f32 %v12282_v8, %v12139_v21  ;;  %v13974_v54 = vld [vmem:[#allocation274_spill] sm:$0xff] }
 0x573   : >> { %4709 = vrot.lane.b32.xlu1 %v4684_v11, %s6771_s17  ;;  %4707 = vrot.lane.b32.xlu0 %v4683_v49, %s6771_s17  ;;  %v4254_v6 = vmul.f32 %v12250_v22, %v12145_v38  ;;  %v4062_v55 = vadd.f32 %v11759_v30, %v3834_v29  ;;  %v4061_v59 = vadd.f32 %v13971_v34, %v3833_v42  ;;  %v13972_v49 = vld [vmem:[#allocation346_spill] sm:$0xff] }
 0x574   : >> { %v4262_v56 = vadd.f32 %v4253_v24, %v4060_v61  ;;  %v4261_v3 = vadd.f32 %v4252_v31, %v4059_v50  ;;  %v4270_v11 = vmul.f32 %v12277_v47, %v12266_v13  ;;  %v3884_v1 = vadd.f32 %v13972_v49, %v3724_v9  ;;  %v12303_v24 = vld [vmem:[%s10578_s24 + $0xa] sm:$0xff]  ;;  %s4290_s24 = sld [smem:[#allocation8 + %s11471_s18]] }
 0x575   : >> { %v4364_v32 = vpop.permute.xlu1 %4363  ;;  %v4362_v33 = vpop.permute.xlu0 %4361  ;;  %v3835_v48 = vadd.f32 %v13973_v40, %v3709_v0  ;;  %v4736_v30 = vmul.f32 %v12223_v19, %v12257_v20  ;;  %v4735_v31 = vmul.f32 %v12303_v24, %v12257_v20  ;;  %v4256_v61 = vmul.f32 %v12282_v8, %v12145_v38 }
 0x576   : >> { %v12294_v21 = vadd.f32 %v4364_v32, %v4262_v56  ;;  %v12296_v63 = vadd.f32 %v4362_v33, %v4261_v3  ;;  %v4112_v50 = vadd.f32 %v11807_v10, %v3884_v1  ;;  %v4264_v35 = vadd.f32 %v4255_v52, %v4062_v55  ;;  %v13975_v32 = vld [vmem:[#allocation231_spill] sm:$0xff] }
 0x577   : >> { %4752 = vrot.lane.b32.xlu1 %v4734_v25, %s6771_s17  ;;  %4711 = vrot.lane.b32.xlu0 %v4685_v44, %s6771_s17  ;;  %v4063_v9 = vadd.f32 %v13974_v54, %v3835_v48  ;;  %v4263_v0 = vadd.f32 %v4254_v6, %v4061_v59  ;;  %v4738_v58 = vmul.f32 %v12218_v37, %v12257_v20 }
 0x578   : >> { %v4737_v10 = vmul.f32 %v12197_v16, %v12257_v20  ;;  %v4279_v38 = vadd.f32 %v4270_v11, %v4112_v50  ;;  %v4272_v52 = vmul.f32 %v12223_v19, %v12266_v13  ;;  %v4271_v25 = vmul.f32 %v12303_v24, %v12266_v13  ;;  %v13976_v50 = vld [vmem:[#allocation275_spill] sm:$0xff] }
 0x579   : >> { %v4368_v57 = vpop.permute.xlu1 %4367  ;;  %v4366_v36 = vpop.permute.xlu0 %4365  ;;  %v4265_v42 = vadd.f32 %v4256_v61, %v4063_v9  ;;  %v4740_v59 = vmul.f32 %v12250_v22, %v12257_v20  ;;  %v4739_v56 = vmul.f32 %v12213_v18, %v12257_v20  ;;  %v4274_v11 = vmul.f32 %v12218_v37, %v12266_v13 }
 0x57a   : >> { %v12311_v27 = vadd.f32 %v4368_v57, %v4264_v35  ;;  %v12313_v29 = vadd.f32 %v4366_v36, %v4263_v0  ;;  %v4281_v3 = vadd.f32 %v4272_v52, %v11843_v17  ;;  %v4280_v33 = vadd.f32 %v4271_v25, %v13975_v32 }
 0x57b   : >> { %4756 = vrot.lane.b32.xlu1 %v4736_v30, %s6771_s17  ;;  %4754 = vrot.lane.b32.xlu0 %v4735_v31, %s6771_s17  ;;  %v4273_v49 = vmul.f32 %v12197_v16, %v12266_v13  ;;  %v4742_v17 = vmul.f32 %v12282_v8, %v12257_v20  ;;  %v4741_v31 = vmul.f32 %v12245_v45, %v12257_v20  ;;  %v13977_v20 = vld [vmem:[#allocation228_spill] sm:$0xff] }
 0x57c   : >> { %v4283_v61 = vadd.f32 %v4274_v11, %v11872_v46  ;;  %v4276_v9 = vmul.f32 %v12250_v22, %v12266_v13  ;;  %v4275_v35 = vmul.f32 %v12213_v18, %v12266_v13  ;;  %v4277_v52 = vmul.f32 %v12245_v45, %v12266_v13 }
 0x57d   : >> { %v4411_v44 = vpop.permute.xlu1 %4410  ;;  %v4370_v6 = vpop.permute.xlu0 %4369  ;;  %v4282_v54 = vadd.f32 %v4273_v49, %v13976_v50 }
 0x57e   : >> { %v12325_v55 = vadd.f32 %v4411_v44, %v4279_v38  ;;  %v12327_v34 = vadd.f32 %v4370_v6, %v4265_v42  ;;  %v4285_v46 = vadd.f32 %v4276_v9, %v13977_v20  ;;  %v4278_v42 = vmul.f32 %v12282_v8, %v12266_v13 }
 0x57f   : >> { %4760 = vrot.lane.b32.xlu1 %v4738_v58, %s6771_s17  ;;  %4758 = vrot.lane.b32.xlu0 %v4737_v10, %s6771_s17  ;;  %v13978_v10 = vld [vmem:[#allocation276_spill] sm:$0xff]  ;;  %v4291_v6 = vstv %s4290_s24 }
 0x580   : >> { %v4284_v38 = vadd.f32 %v4275_v35, %v13978_v10  ;;  %v4293_v49 = vmul.f32 %v12303_v24, %v4291_v6  ;;  %v4295_v35 = vmul.f32 %v12197_v16, %v4291_v6 }
 0x581   : >> { %v4415_v1 = vpop.permute.xlu1 %4414  ;;  %v4413_v40 = vpop.permute.xlu0 %4412 }
 0x582   : >> { %v12342_v48 = vadd.f32 %v4415_v1, %v4281_v3  ;;  %v12344_v30 = vadd.f32 %v4413_v40, %v4280_v33  ;;  %v13979_v3 = vld [vmem:[#allocation229_spill] sm:$0xff]  ;;  %v4292_v1 = vmul.f32 %v12277_v47, %v4291_v6 }
 0x583   : >> { %4764 = vrot.lane.b32.xlu1 %v4740_v59, %s6771_s17  ;;  %4762 = vrot.lane.b32.xlu0 %v4739_v56, %s6771_s17  ;;  %v4287_v32 = vadd.f32 %v4278_v42, %v13979_v3  ;;  %v13980_v33 = vld [vmem:[#allocation277_spill] sm:$0xff]  ;;  %v4296_v3 = vmul.f32 %v12218_v37, %v4291_v6 }
 0x584   : >> { %v4286_v11 = vadd.f32 %v4277_v52, %v13980_v33  ;;  %v13984_v52 = vld [vmem:[#allocation225_spill] sm:$0xff] }
 0x585   : >> { %v4419_v0 = vpop.permute.xlu1 %4418  ;;  %v4417_v57 = vpop.permute.xlu0 %4416 }
 0x586   : >> { %v12358_v36 = vadd.f32 %v4419_v0, %v4283_v61  ;;  %v12360_v58 = vadd.f32 %v4417_v57, %v4282_v54  ;;  %v13981_v61 = vld [vmem:[#allocation226_spill] sm:$0xff]  ;;  %v13982_v54 = vld [vmem:[#allocation227_spill] sm:$0xff]  ;;  %v4294_v0 = vmul.f32 %v12223_v19, %v4291_v6 }
 0x587   : >> { %4768 = vrot.lane.b32.xlu1 %v4742_v17, %s6771_s17  ;;  %4766 = vrot.lane.b32.xlu0 %v4741_v31, %s6771_s17  ;;  %v4302_v50 = vadd.f32 %v4293_v49, %v13981_v61  ;;  %v4301_v9 = vadd.f32 %v4292_v1, %v13982_v54  ;;  %s4312_s17 = sld [smem:[#allocation8 + %s11563_s27]]  ;;  %v4299_v61 = vmul.f32 %v12245_v45, %v4291_v6 }
 0x589   : >> { %v4423_v25 = vpop.permute.xlu1 %4422  ;;  %v4421_v44 = vpop.permute.xlu0 %4420 }
 0x58a   : >> { %v12370_v59 = vadd.f32 %v4423_v25, %v4285_v46  ;;  %v12372_v56 = vadd.f32 %v4421_v44, %v4284_v38  ;;  %v13983_v38 = vld [vmem:[#allocation224_spill] sm:$0xff]  ;;  %v4303_v25 = vadd.f32 %v4294_v0, %v13984_v52  ;;  %v4297_v44 = vmul.f32 %v12213_v18, %v4291_v6 }
 0x58b   : >> { %v4304_v42 = vadd.f32 %v4295_v35, %v13983_v38 }
 0x58c   : >> { %v4306_v1 = vadd.f32 %v4297_v44, %v12036_v51  ;;  %v4300_v51 = vmul.f32 %v12282_v8, %v4291_v6 }
 0x58d   : >> { %v4427_v40 = vpop.permute.xlu1 %4426  ;;  %v4425_v17 = vpop.permute.xlu0 %4424  ;;  %v4313_v35 = vstv %s4312_s17 }
 0x58e   : >> { %v12378_v31 = vadd.f32 %v4427_v40, %v4287_v32  ;;  %v12380_v13 = vadd.f32 %v4425_v17, %v4286_v11  ;;  %v13985_v40 = vld [vmem:[#allocation222_spill] sm:$0xff] }
 0x58f   : >> { %v4305_v17 = vadd.f32 %v4296_v3, %v13985_v40 }
 0x591   : >> { %v4470_v57 = vpop.permute.xlu1 %4469  ;;  %v4468_v20 = vpop.permute.xlu0 %4467 }
 0x592   : >> { %v12387_v46 = vadd.f32 %v4470_v57, %v4302_v50  ;;  %v12389_v10 = vadd.f32 %v4468_v20, %v4301_v9  ;;  %v4298_v50 = vmul.f32 %v12250_v22, %v4291_v6  ;;  %v4308_v20 = vadd.f32 %v4299_v61, %v12067_v12 }
 0x593   : >> { %v4315_v12 = vmul.f32 %v12303_v24, %v4313_v35 }
 0x594   : >> { %v4307_v38 = vadd.f32 %v4298_v50, %v12069_v28  ;;  %v4318_v50 = vmul.f32 %v12218_v37, %v4313_v35 }
 0x595   : >> { %v4474_v32 = vpop.permute.xlu1 %4473  ;;  %v4472_v33 = vpop.permute.xlu0 %4471  ;;  %v4324_v61 = vadd.f32 %v4315_v12, %v12124_v23 }
 0x596   : >> { %v12395_v11 = vadd.f32 %v4474_v32, %v4304_v42  ;;  %v12397_v49 = vadd.f32 %v4472_v33, %v4303_v25  ;;  %v4314_v42 = vmul.f32 %v12277_v47, %v4313_v35  ;;  %v4309_v33 = vadd.f32 %v4300_v51, %v12100_v39 }
 0x597   : >> { %v4327_v24 = vadd.f32 %v4318_v50, %v12149_v14  ;;  %v4321_v14 = vmul.f32 %v12245_v45, %v4313_v35 }
 0x598   : >> { %v4323_v32 = vadd.f32 %v4314_v42, %v12098_v5  ;;  %v4317_v5 = vmul.f32 %v12197_v16, %v4313_v35 }
 0x599   : >> { %v4478_v54 = vpop.permute.xlu1 %4477  ;;  %v4476_v9 = vpop.permute.xlu0 %4475 }
 0x59a   : >> { %v12403_v0 = vadd.f32 %v4478_v54, %v4306_v1  ;;  %v12405_v57 = vadd.f32 %v4476_v9, %v4305_v17  ;;  %v4316_v1 = vmul.f32 %v12223_v19, %v4313_v35 }
 0x59c   : >> { %v4325_v6 = vadd.f32 %v4316_v1, %v12122_v43  ;;  %v4319_v43 = vmul.f32 %v12213_v18, %v4313_v35  ;;  %v4330_v1 = vadd.f32 %v4321_v14, %v12208_v4 }
 0x59d   : >> { %v4482_v52 = vpop.permute.xlu1 %4481  ;;  %v4480_v25 = vpop.permute.xlu0 %4479 }
 0x59e   : >> { %v12411_v44 = vadd.f32 %v4482_v52, %v4308_v20  ;;  %v12413_v3 = vadd.f32 %v4480_v25, %v4307_v38  ;;  %v4326_v20 = vadd.f32 %v4317_v5, %v12151_v26  ;;  %v4320_v38 = vmul.f32 %v12250_v22, %v4313_v35 }
 0x59f   : >> { %v4328_v52 = vadd.f32 %v4319_v43, %v12176_v53  ;;  %v4322_v25 = vmul.f32 %v12282_v8, %v4313_v35 }
 0x5a0   : >> { %v4329_v16 = vadd.f32 %v4320_v38, %v12174_v7 }
 0x5a1   : >> { %v4525_v40 = vpop.permute.xlu1 %4524  ;;  %v4484_v28 = vpop.permute.xlu0 %4483  ;;  %v4331_v18 = vadd.f32 %v4322_v25, %v12206_v15 }
 0x5a2   : >> { %v12419_v17 = vadd.f32 %v4525_v40, %v4323_v32  ;;  %v12421_v47 = vadd.f32 %v4484_v28, %v4309_v33 }
 0x5a5   : >> { %v4529_v54 = vpop.permute.xlu1 %4528  ;;  %v4527_v39 = vpop.permute.xlu0 %4526 }
 0x5a6   : >> { %v12427_v9 = vadd.f32 %v4529_v54, %v4325_v6  ;;  %v12429_v19 = vadd.f32 %v4527_v39, %v4324_v61 }
 0x5a9   : >> { %v4533_v42 = vpop.permute.xlu1 %4532  ;;  %v4531_v23 = vpop.permute.xlu0 %4530 }
 0x5aa   : >> { %v12435_v51 = vadd.f32 %v4533_v42, %v4327_v24  ;;  %v12437_v37 = vadd.f32 %v4531_v23, %v4326_v20 }
 0x5ad   : >> { %v4537_v32 = vpop.permute.xlu1 %4536  ;;  %v4535_v26 = vpop.permute.xlu0 %4534 }
 0x5ae   : >> { %v12443_v33 = vadd.f32 %v4537_v32, %v4329_v16  ;;  %v12445_v22 = vadd.f32 %v4535_v26, %v4328_v52 }
 0x5b1   : >> { %v4541_v12 = vpop.permute.xlu1 %4540  ;;  %v4539_v40 = vpop.permute.xlu0 %4538 }
 0x5b2   : >> { %v12449_v28 = vadd.f32 %v4541_v12, %v4331_v18  ;;  %v12451_v7 = vadd.f32 %v4539_v40, %v4330_v1 }
 0x5b5   : >> { %v4584_v53 = vpop.permute.xlu1 %4583  ;;  %v4582_v8 = vpop.permute.xlu0 %4581 }
 0x5b6   : >> { %v12454_v60 = vadd.f32 %v4584_v53, %v12238_v60   ;;  %v12457_v45 = vadd.f32 %v4582_v8, %v12240_v62  }
 0x5b8   : >> { %13986 = vst [vmem:[#allocation34_spill] sm:$0xff] %v12454_v60  ;;  %13987 = vst [vmem:[#allocation68_spill] sm:$0xff] %v12457_v45 }
 0x5b9   : >> { %v4588_v35 = vpop.permute.xlu1 %4587  ;;  %v4586_v6 = vpop.permute.xlu0 %4585 }
 0x5ba   : >> { %v12460_v15 = vadd.f32 %v4588_v35, %v12270_v41   ;;  %v12463_v4 = vadd.f32 %v4586_v6, %v12272_v2  }
 0x5bc   : >> { %13988 = vst [vmem:[#allocation35_spill] sm:$0xff] %v12460_v15  ;;  %13989 = vst [vmem:[#allocation69_spill] sm:$0xff] %v12463_v4 }
 0x5bd   : >> { %v4592_v61 = vpop.permute.xlu1 %4591  ;;  %v4590_v24 = vpop.permute.xlu0 %4589 }
 0x5be   : >> { %v12466_v61 = vadd.f32 %v4592_v61, %v12294_v21   ;;  %v12469_v16 = vadd.f32 %v4590_v24, %v12296_v63  }
 0x5c0   : >> { %13990 = vst [vmem:[#allocation36_spill] sm:$0xff] %v12466_v61  ;;  %13991 = vst [vmem:[#allocation70_spill] sm:$0xff] %v12469_v16 }
 0x5c1   : >> { %v4596_v60 = vpop.permute.xlu1 %4595  ;;  %v4594_v20 = vpop.permute.xlu0 %4593 }
 0x5c2   : >> { %v12472_v43 = vadd.f32 %v4596_v60, %v12311_v27   ;;  %v12475_v8 = vadd.f32 %v4594_v20, %v12313_v29  }
 0x5c4   : >> { %13992 = vst [vmem:[#allocation37_spill] sm:$0xff] %v12472_v43  ;;  %13993 = vst [vmem:[#allocation71_spill] sm:$0xff] %v12475_v8 }
 0x5c5   : >> { %v4639_v62 = vpop.permute.xlu1 %4638  ;;  %v4598_v38 = vpop.permute.xlu0 %4597 }
 0x5c6   : >> { %v12478_v35 = vadd.f32 %v4639_v62, %v12325_v55   ;;  %v12481_v42 = vadd.f32 %v4598_v38, %v12327_v34  }
 0x5c8   : >> { %13994 = vst [vmem:[#allocation38_spill] sm:$0xff] %v12478_v35  ;;  %13995 = vst [vmem:[#allocation72_spill] sm:$0xff] %v12481_v42 }
 0x5c9   : >> { %v4643_v21 = vpop.permute.xlu1 %4642  ;;  %v4641_v23 = vpop.permute.xlu0 %4640 }
 0x5ca   : >> { %v12484_v63 = vadd.f32 %v4643_v21, %v12342_v48   ;;  %v12487_v4 = vadd.f32 %v4641_v23, %v12344_v30  }
 0x5cc   : >> { %v13996_v27 = vmov %v12487_v4 }
 0x5cd   : >> { %v4647_v43 = vpop.permute.xlu1 %4646  ;;  %v4645_v16 = vpop.permute.xlu0 %4644 }
 0x5ce   : >> { %v12490_v48 = vadd.f32 %v4647_v43, %v12358_v36   ;;  %v12493_v29 = vadd.f32 %v4645_v16, %v12360_v58   ;;  %v14066_v43 = vld [vmem:[#allocation37_spill] sm:$0xff]  ;;  %v14069_v16 = vld [vmem:[#allocation70_spill] sm:$0xff] }
 0x5d0   : >> { %v13997_v18 = vmov %v12490_v48  ;;  %v13998_v55 = vmov %v12493_v29 }
 0x5d1   : >> { %v4651_v52 = vpop.permute.xlu1 %4650  ;;  %v4649_v1 = vpop.permute.xlu0 %4648 }
 0x5d2   : >> { %v12496_v52 = vadd.f32 %v4651_v52, %v12370_v59   ;;  %v12499_v12 = vadd.f32 %v4649_v1, %v12372_v56  }
 0x5d4   : >> { %v13999_v34 = vmov %v12496_v52 }
 0x5d5   : >> { %v4655_v40 = vpop.permute.xlu1 %4654  ;;  %v4653_v53 = vpop.permute.xlu0 %4652  ;;  %v14058_v52 = vmov %v13999_v34 }
 0x5d6   : >> { %v12502_v58 = vadd.f32 %v4655_v40, %v12378_v31   ;;  %v12505_v42 = vadd.f32 %v4653_v53, %v12380_v13  }
 0x5d8   : >> { %v14000_v5 = vmov %v12502_v58  ;;  %v14001_v50 = vmov %v12505_v42 }
 0x5d9   : >> { %v4698_v48 = vpop.permute.xlu1 %4697  ;;  %v4696_v30 = vpop.permute.xlu0 %4695  ;;  %v14057_v42 = vmov %v14001_v50 }
 0x5da   : >> { %v12508_v24 = vadd.f32 %v4698_v48, %v12387_v46   ;;  %v12511_v62 = vadd.f32 %v4696_v30, %v12389_v10   ;;  %v14060_v48 = vmov %v13997_v18 }
 0x5dc   : >> { %v14002_v39 = vmov %v12508_v24  ;;  %v14003_v59 = vmov %v12511_v62 }
 0x5dd   : >> { %v4702_v36 = vpop.permute.xlu1 %4701  ;;  %v4700_v8 = vpop.permute.xlu0 %4699  ;;  %v14055_v62 = vmov %v14003_v59 }
 0x5de   : >> { %v12514_v53 = vadd.f32 %v4702_v36, %v12395_v11   ;;  %v12517_v56 = vadd.f32 %v4700_v8, %v12397_v49   ;;  %v14067_v8 = vld [vmem:[#allocation71_spill] sm:$0xff] }
 0x5e0   : >> { %v14004_v1 = vmov %v12514_v53  ;;  %v14005_v40 = vmov %v12517_v56  ;;  %v14071_v56 = vld [vmem:[#allocation69_spill] sm:$0xff] }
 0x5e1   : >> { %v4706_v58 = vpop.permute.xlu1 %4705  ;;  %v4704_v31 = vpop.permute.xlu0 %4703  ;;  %v14052_v53 = vmov %v14004_v1 }
 0x5e2   : >> { %v12520_v30 = vadd.f32 %v4706_v58, %v12403_v0   ;;  %v12523_v6 = vadd.f32 %v4704_v31, %v12405_v57   ;;  %v14056_v58 = vmov %v14000_v5  ;;  %v14061_v31 = vmov %v13998_v55 }
 0x5e4   : >> { %14006 = vst [vmem:[#allocation39_spill] sm:$0xff] %v12520_v30  ;;  %v14007_v13 = vmov %v12520_v30  ;;  %14008 = vst [vmem:[#allocation40_spill] sm:$0xff] %v12523_v6  ;;  %v14009_v54 = vmov %v12523_v6 }
 0x5e5   : >> { %v4710_v46 = vpop.permute.xlu1 %4709  ;;  %v4708_v45 = vpop.permute.xlu0 %4707  ;;  %v14050_v30 = vmov %v14007_v13 }
 0x5e6   : >> { %v12526_v36 = vadd.f32 %v4710_v46, %v12411_v44   ;;  %v12529_v10 = vadd.f32 %v4708_v45, %v12413_v3   ;;  %v14065_v46 = vld [vmem:[#allocation72_spill] sm:$0xff] }
 0x5e8   : >> { %14010 = vst [vmem:[#allocation41_spill] sm:$0xff] %v12526_v36  ;;  %v14011_v14 = vmov %v12526_v36  ;;  %14012 = vst [vmem:[#allocation42_spill] sm:$0xff] %v12529_v10  ;;  %v14048_v11 = vmov %v12529_v10  ;;  %v14059_v10 = vmov %v12499_v12 }
 0x5e9   : >> { %v4753_v35 = vpop.permute.xlu1 %4752  ;;  %v4712_v15 = vpop.permute.xlu0 %4711  ;;  %v14047_v36 = vmov %v14011_v14 }
 0x5ea   : >> { %v12532_v49 = vadd.f32 %v4753_v35, %v12419_v17   ;;  %v12535_v21 = vadd.f32 %v4712_v15, %v12421_v47   ;;  %v14064_v35 = vld [vmem:[#allocation38_spill] sm:$0xff] }
 0x5ec   : >> { %14014 = vst [vmem:[#allocation44_spill] sm:$0xff] %v12532_v49  ;;  %14015 = vst [vmem:[#allocation46_spill] sm:$0xff] %v12535_v21  ;;  %v14016_v0 = vmov %v12535_v21 }
 0x5ed   : >> { %v4757_v4 = vpop.permute.xlu1 %4756  ;;  %v4755_v61 = vpop.permute.xlu0 %4754  ;;  %v14046_v21 = vmov %v14016_v0  ;;  %v14080_v0 = vld [vmem:[#allocation36_spill] sm:$0xff] (%p12564_p5) }
 0x5ee   : >> { %v12538_v15 = vadd.f32 %v4757_v4, %v12427_v9   ;;  %v12541_v29 = vadd.f32 %v4755_v61, %v12429_v19   ;;  %v14045_v19 = vmov %v12532_v49  ;;  %v14063_v4 = vmov %v13996_v27  ;;  %v14068_v61 = vld [vmem:[#allocation36_spill] sm:$0xff]  ;;  %v14079_v49 = vld [vmem:[#allocation70_spill] sm:$0xff] (%p12564_p5) }
 0x5ef   : > { %v4867_v61 = vstv (%p12564_p5), %s12692_s26 }
 0x5f0   : >> { %14017 = vst [vmem:[#allocation48_spill] sm:$0xff] %v12538_v15  ;;  %14019 = vst [vmem:[#allocation50_spill] sm:$0xff] %v12541_v29  ;;  %v14020_v25 = vmov %v12541_v29  ;;  %v14042_v57 = vmov %v12538_v15 }
 0x5f1   : >> { %v4761_v44 = vpop.permute.xlu1 %4760  ;;  %v4759_v6 = vpop.permute.xlu0 %4758  ;;  %v14043_v15 = vmov %v14042_v57  ;;  %v14044_v29 = vmov %v14020_v25  ;;  %v14078_v57 = vld [vmem:[#allocation35_spill] sm:$0xff] (%p12564_p5) }
 0x5f2   : >> { %v12544_v47 = vadd.f32 %v4761_v44, %v12435_v51   ;;  %v12547_v20 = vadd.f32 %v4759_v6, %v12437_v37   ;;  %v14051_v6 = vmov %v14009_v54  ;;  %v14053_v44 = vmov %v14005_v40  ;;  %v14082_v54 = vld [vmem:[#allocation37_spill] sm:$0xff] (%p12564_p5)  ;;  %v14085_v29 = vld [vmem:[#allocation38_spill] sm:$0xff] (%p12564_p5) }
 0x5f3   : > { %v4789_v37 = vstv (%p12564_p5), %s5363_s7  ;;  %v4868_v44 = vadd.f32 (%p12564_p5), %v4867_v61, %v14003_v59  ;;  %v4869_v6 = vadd.f32 (%p12564_p5), %v4867_v61, %v14002_v39 }
 0x5f4   : >> { %14021 = vst [vmem:[#allocation52_spill] sm:$0xff] %v12544_v47  ;;  %v14022_v3 = vmov %v12544_v47  ;;  %14023 = vst [vmem:[#allocation54_spill] sm:$0xff] %v12547_v20  ;;  %v14040_v41 = vmov %v12547_v20  ;;  %v4793_v25 = vadd.f32 (%p12564_p5), %v4789_v37, %v14078_v57  ;;  %v4795_v14 = vadd.f32 (%p12564_p5), %v4789_v37, %v14080_v0 }
 0x5f5   : >> { %v4765_v17 = vpop.permute.xlu1 %4764  ;;  %v4763_v24 = vpop.permute.xlu0 %4762  ;;  %v14039_v47 = vmov %v14022_v3  ;;  %v14041_v20 = vmov %v14040_v41  ;;  %v14077_v3 = vld [vmem:[#allocation69_spill] sm:$0xff] (%p12564_p5)  ;;  %v12741_v57 = vstv (%p12564_p5), %s12694_s28 }
 0x5f6   : >> { %v12550_v38 = vadd.f32 %v4765_v17, %v12443_v33   ;;  %v12553_v45 = vadd.f32 %v4763_v24, %v12445_v22   ;;  %v14054_v24 = vmov %v14002_v39  ;;  %v14062_v17 = vmov %v12484_v63  ;;  %v14073_v33 = vld [vmem:[#allocation68_spill] sm:$0xff] }
 0x5f7   : > { %3085 = sbr.rel (!%p12564_p5) target bundleno = 974 (0x3ce), region = 132  ;;  %v12682_v22 = vstv (%p12564_p5), %s5373_s5  ;;  %v4792_v41 = vadd.f32 (%p12564_p5), %v4789_v37, %v14077_v3  ;;  %v4794_v33 = vadd.f32 (%p12564_p5), %v4789_v37, %v14079_v49  ;;  %v4797_v47 = vadd.f32 (%p12564_p5), %v4789_v37, %v14082_v54  ;;  %v14086_v24 = vld [vmem:[#allocation40_spill] sm:$0xff] (%p12564_p5) }
 0x5f8   : >> { %14025 = vst [vmem:[#allocation56_spill] sm:$0xff] %v12550_v38  ;;  %v14026_v32 = vmov %v12550_v38  ;;  %14027 = vst [vmem:[#allocation43_spill] sm:$0xff] %v12553_v45  ;;  %v14028_v26 = vmov %v12553_v45  ;;  %v4802_v20 = vmax.f32 (%p12564_p5), %v4793_v25, 0.0  ;;  %v4829_v52 = vadd.f32 (%p12564_p5), %v12682_v22, %v14085_v29 }
 0x5f9   : >> { %v4769_v9 = vpop.permute.xlu1 %4768  ;;  %v4767_v60 = vpop.permute.xlu0 %4766  ;;  %v14037_v38 = vmov %v14026_v32  ;;  %v14038_v45 = vmov %v14028_v26  ;;  %v14076_v32 = vld [vmem:[#allocation34_spill] sm:$0xff] (%p12564_p5)  ;;  %v4803_v62 = vmax.f32 (%p12564_p5), %v4794_v33, 0.0  ;;  %v4830_v53 = vadd.f32 (%p12564_p5), %v12682_v22, %v13996_v27 }
 0x5fa   : >> { %v12556_v23 = vadd.f32 %v4769_v9, %v12449_v28   ;;  %v12559_v28 = vadd.f32 %v4767_v60, %v12451_v7   ;;  %v14049_v9 = vmov %v14048_v11  ;;  %v14070_v7 = vld [vmem:[#allocation35_spill] sm:$0xff]  ;;  %v14072_v60 = vld [vmem:[#allocation34_spill] sm:$0xff]  ;;  %v4791_v26 = vadd.f32 (%p12564_p5), %v4789_v37, %v14076_v32 }
 0x5fb   : > { %v14081_v11 = vld [vmem:[#allocation71_spill] sm:$0xff] (%p12564_p5)  ;;  %v4801_v7 = vmax.f32 (%p12564_p5), %v4792_v41, 0.0  ;;  %v4804_v32 = vmax.f32 (%p12564_p5), %v4795_v14, 0.0  ;;  %v4811_v54 = vmin.f32 (%p12564_p5), %v4802_v20, 1.0  ;;  %v4812_v25 = vmin.f32 (%p12564_p5), %v4803_v62, 1.0  ;;  %v14084_v14 = vld [vmem:[#allocation72_spill] sm:$0xff] (%p12564_p5) }
 0x5fc   : >> { %14029 = vst [vmem:[#allocation51_spill] sm:$0xff] %v12556_v23  ;;  %v14030_v2 = vmov %v12556_v23  ;;  %14031 = vst [vmem:[#allocation58_spill] sm:$0xff] %v12559_v28  ;;  %v14035_v51 = vmov %v12559_v28  ;;  %v4796_v13 = vadd.f32 (%p12564_p5), %v4789_v37, %v14081_v11  ;;  %v4798_v16 = vadd.f32 (%p12564_p5), %v4789_v37, %v14084_v14  ;;  %v14087_v60 = vld [vmem:[#allocation39_spill] sm:$0xff] (%p12564_p5)  ;;  %v14093_v14 = vld [vmem:[#allocation48_spill] sm:$0xff] (%p12564_p5) }
 0x5fd   : >> { %v14034_v23 = vmov %v14030_v2  ;;  %v14036_v28 = vmov %v14035_v51  ;;  %v14075_v2 = vld [vmem:[#allocation68_spill] sm:$0xff] (%p12564_p5)  ;;  %v4813_v41 = vmin.f32 (%p12564_p5), %v4804_v32, 1.0  ;;  %5367 = vst.msk [vmem:[%s14083_s14 + $0x138] sm:$0xff] (%p12564_p5), %vm2953_vm2, %v4811_v54  ;;  %v4831_v48 = vadd.f32 (%p12564_p5), %v12682_v22, %v12484_v63  ;;  %5368 = vst.msk [vmem:[%s14083_s14 + $0x140] sm:$0xff] (%p12564_p5), %vm2953_vm2, %v4812_v25 }
 0x5fe   : > { %v4790_v51 = vadd.f32 %v4789_v37, %v14075_v2  ;;  %v4800_v28 = vmax.f32 %v4791_v26, 0.0  ;;  %v4805_v38 = vmax.f32 %v4796_v13, 0.0  ;;  %v4806_v2 = vmax.f32 %v4797_v47, 0.0  ;;  %v14091_v25 = vld [vmem:[#allocation44_spill] sm:$0xff] }
 0x5ff   : > { %v4810_v23 = vmin.f32 %v4801_v7, 1.0  ;;  %5369 = vst.msk [vmem:[%s14083_s14 + $0x148] sm:$0xff] %vm2953_vm2, %v4813_v41  ;;  %v4832_v30 = vadd.f32 %v12682_v22, %v13998_v55  ;;  %v4833_v36 = vadd.f32 %v12682_v22, %v13997_v18  ;;  %v4834_v27 = vadd.f32 %v12682_v22, %v12499_v12 }
 0x600   : > { %v4799_v19 = vmax.f32 %v4790_v51, 0.0  ;;  %v4809_v21 = vmin.f32 %v4800_v28, 1.0  ;;  %v4814_v26 = vmin.f32 %v4805_v38, 1.0  ;;  %v4815_v43 = vmin.f32 %v4806_v2, 1.0  ;;  %v14088_v38 = vld [vmem:[#allocation42_spill] sm:$0xff] }
 0x601   : > { %5366 = vst.msk [vmem:[%s14083_s14 + $0x130] sm:$0xff] %vm2953_vm2, %v4810_v23  ;;  %v4835_v63 = vadd.f32 %v12682_v22, %v13999_v34  ;;  %v4807_v8 = vmax.f32 %v4798_v16, 0.0  ;;  %v4838_v56 = vmax.f32 %v4829_v52, 0.0  ;;  %v4839_v58 = vmax.f32 %v4830_v53, 0.0  ;;  %v14090_v23 = vld [vmem:[#allocation46_spill] sm:$0xff] }
 0x602   : > { %v4808_v42 = vmin.f32 %v4799_v19, 1.0  ;;  %5365 = vst.msk [vmem:[%s14083_s14 + $0x128] sm:$0xff] %vm2953_vm2, %v4809_v21  ;;  %5370 = vst.msk [vmem:[%s14083_s14 + $0x150] sm:$0xff] %vm2953_vm2, %v4814_v26  ;;  %v4840_v31 = vmax.f32 %v4831_v48, 0.0  ;;  %v4841_v13 = vmax.f32 %v4832_v30, 0.0  ;;  %v4842_v46 = vmax.f32 %v4833_v36, 0.0 }
 0x603   : > { %5371 = vst.msk [vmem:[%s14083_s14 + $0x158] sm:$0xff] %vm2953_vm2, %v4815_v43  ;;  %v4843_v55 = vmax.f32 %v4834_v27, 0.0  ;;  %v4844_v45 = vmax.f32 %v4835_v63, 0.0  ;;  %v4816_v18 = vmin.f32 %v4807_v8, 1.0  ;;  %v4847_v12 = vmin.f32 %v4838_v56, 1.0  ;;  %v14092_v26 = vld [vmem:[#allocation50_spill] sm:$0xff] }
 0x604   : > { %5364 = vst.msk [vmem:[%s14083_s14 + $0x120] sm:$0xff] %vm2953_vm2, %v4808_v42  ;;  %v4848_v10 = vmin.f32 %v4839_v58, 1.0  ;;  %v4849_v34 = vmin.f32 %v4840_v31, 1.0  ;;  %v4850_v11 = vmin.f32 %v4841_v13, 1.0  ;;  %v4851_v35 = vmin.f32 %v4842_v46, 1.0  ;;  %v14089_v42 = vld [vmem:[#allocation41_spill] sm:$0xff] }
 0x605   : > { %v4852_v15 = vmin.f32 %v4843_v55, 1.0  ;;  %v4853_v49 = vmin.f32 %v4844_v45, 1.0  ;;  %5372 = vst.msk [vmem:[%s14083_s14 + $0x160] sm:$0x1] %vm2962_vm3, %v4816_v18  ;;  %v4836_v0 = vadd.f32 %v12682_v22, %v14001_v50  ;;  %v4837_v4 = vadd.f32 %v12682_v22, %v14000_v5  ;;  %v14094_v53 = vld [vmem:[#allocation54_spill] sm:$0xff]  ;;  %v14095_v30 = vld [vmem:[#allocation52_spill] sm:$0xff] }
 0x606   : > { %5374 = vst.msk [vmem:[%s14083_s14 + $0x168] sm:$0xff] %vm2953_vm2, %v4847_v12  ;;  %5375 = vst.msk [vmem:[%s14083_s14 + $0x170] sm:$0xff] %vm2953_vm2, %v4848_v10  ;;  %v4870_v50 = vadd.f32 %v4867_v61, %v14005_v40  ;;  %v4871_v3 = vadd.f32 %v4867_v61, %v14004_v1  ;;  %v4872_v9 = vadd.f32 %v4867_v61, %v14086_v24  ;;  %v4877_v37 = vmax.f32 %v4868_v44, 0.0 }
 0x607   : > { %5376 = vst.msk [vmem:[%s14083_s14 + $0x178] sm:$0xff] %vm2953_vm2, %v4849_v34  ;;  %5377 = vst.msk [vmem:[%s14083_s14 + $0x180] sm:$0xff] %vm2953_vm2, %v4850_v11  ;;  %v4845_v5 = vmax.f32 %v4836_v0, 0.0  ;;  %v4846_v17 = vmax.f32 %v4837_v4, 0.0  ;;  %v4873_v51 = vadd.f32 %v4867_v61, %v14087_v60  ;;  %v4878_v22 = vmax.f32 %v4869_v6, 0.0  ;;  %v14096_v11 = vld [vmem:[#allocation43_spill] sm:$0xff] }
 0x608   : > { %5378 = vst.msk [vmem:[%s14083_s14 + $0x188] sm:$0xff] %vm2953_vm2, %v4851_v35  ;;  %5379 = vst.msk [vmem:[%s14083_s14 + $0x190] sm:$0xff] %vm2953_vm2, %v4852_v15  ;;  %v4879_v33 = vmax.f32 %v4870_v50, 0.0  ;;  %v4880_v47 = vmax.f32 %v4871_v3, 0.0  ;;  %v4881_v40 = vmax.f32 %v4872_v9, 0.0  ;;  %v4886_v19 = vmin.f32 %v4877_v37, 1.0 }
 0x609   : > { %5380 = vst.msk [vmem:[%s14083_s14 + $0x198] sm:$0xff] %vm2953_vm2, %v4853_v49  ;;  %v4854_v59 = vmin.f32 %v4845_v5, 1.0  ;;  %v4855_v39 = vmin.f32 %v4846_v17, 1.0  ;;  %v4882_v1 = vmax.f32 %v4873_v51, 0.0  ;;  %v4887_v28 = vmin.f32 %v4878_v22, 1.0  ;;  %v14097_v15 = vld [vmem:[#allocation56_spill] sm:$0xff] }
 0x60a   : > { %v4888_v7 = vmin.f32 %v4879_v33, 1.0  ;;  %v4889_v20 = vmin.f32 %v4880_v47, 1.0  ;;  %v4890_v62 = vmin.f32 %v4881_v40, 1.0  ;;  %v4874_v2 = vadd.f32 %v4867_v61, %v14088_v38  ;;  %5384 = vst.msk [vmem:[%s14083_s14 + $0x1b0] sm:$0xff] %vm2953_vm2, %v4886_v19  ;;  %v14098_v0 = vld [vmem:[#allocation58_spill] sm:$0xff] }
 0x60b   : > { %5381 = vst.msk [vmem:[%s14083_s14 + $0x1a0] sm:$0xff] %vm2953_vm2, %v4854_v59  ;;  %v4891_v32 = vmin.f32 %v4882_v1, 1.0  ;;  %v4875_v21 = vadd.f32 %v4867_v61, %v14089_v42  ;;  %5385 = vst.msk [vmem:[%s14083_s14 + $0x1b8] sm:$0xff] %vm2953_vm2, %v4887_v28  ;;  %v4876_v54 = vadd.f32 %v4867_v61, %v14090_v23  ;;  %v4907_v41 = vadd.f32 %v12741_v57, %v14091_v25  ;;  %v14099_v61 = vld [vmem:[#allocation51_spill] sm:$0xff] }
 0x60c   : > { %5382 = vst.msk [vmem:[%s14083_s14 + $0x1a8] sm:$0x1] %vm2962_vm3, %v4855_v39  ;;  %v4908_v43 = vadd.f32 %v12741_v57, %v14092_v26  ;;  %v4909_v16 = vadd.f32 %v12741_v57, %v14093_v14  ;;  %v4883_v29 = vmax.f32 %v4874_v2, 0.0  ;;  %v4910_v48 = vadd.f32 %v12741_v57, %v14094_v53 }
 0x60d   : > { %5386 = vst.msk [vmem:[%s14083_s14 + $0x1c0] sm:$0xff] %vm2953_vm2, %v4888_v7  ;;  %5387 = vst.msk [vmem:[%s14083_s14 + $0x1c8] sm:$0xff] %vm2953_vm2, %v4889_v20  ;;  %v4884_v52 = vmax.f32 %v4875_v21, 0.0  ;;  %v4911_v36 = vadd.f32 %v12741_v57, %v14095_v30  ;;  %v4885_v27 = vmax.f32 %v4876_v54, 0.0  ;;  %v4916_v63 = vmax.f32 %v4907_v41, 0.0 }
 0x60e   : > { %5388 = vst.msk [vmem:[%s14083_s14 + $0x1d0] sm:$0xff] %vm2953_vm2, %v4890_v62  ;;  %5389 = vst.msk [vmem:[%s14083_s14 + $0x1d8] sm:$0xff] %vm2953_vm2, %v4891_v32  ;;  %v4917_v8 = vmax.f32 %v4908_v43, 0.0  ;;  %v4918_v56 = vmax.f32 %v4909_v16, 0.0  ;;  %v4892_v58 = vmin.f32 %v4883_v29, 1.0  ;;  %v4919_v13 = vmax.f32 %v4910_v48, 0.0 }
 0x60f   : > { %v4893_v31 = vmin.f32 %v4884_v52, 1.0  ;;  %v4920_v46 = vmax.f32 %v4911_v36, 0.0  ;;  %v4894_v55 = vmin.f32 %v4885_v27, 1.0  ;;  %v4925_v45 = vmin.f32 %v4916_v63, 1.0 }
 0x610   : > { %v4926_v18 = vmin.f32 %v4917_v8, 1.0  ;;  %v4927_v12 = vmin.f32 %v4918_v56, 1.0  ;;  %5390 = vst.msk [vmem:[%s14083_s14 + $0x1e0] sm:$0xff] %vm2953_vm2, %v4892_v58  ;;  %v4928_v10 = vmin.f32 %v4919_v13, 1.0  ;;  %v4912_v35 = vadd.f32 %v12741_v57, %v14096_v11 }
 0x611   : > { %5391 = vst.msk [vmem:[%s14083_s14 + $0x1e8] sm:$0xff] %vm2953_vm2, %v4893_v31  ;;  %v4929_v34 = vmin.f32 %v4920_v46, 1.0  ;;  %v4913_v49 = vadd.f32 %v12741_v57, %v14097_v15  ;;  %5394 = vst.msk [vmem:[%s14083_s14 + $0x1f8] sm:$0xff] %vm2953_vm2, %v4925_v45  ;;  %v4914_v4 = vadd.f32 %v12741_v57, %v14098_v0  ;;  %v4915_v44 = vadd.f32 %v12741_v57, %v14099_v61 }
 0x612   : > { %5392 = vst.msk [vmem:[%s14083_s14 + $0x1f0] sm:$0x1] %vm2962_vm3, %v4894_v55  ;;  %v4921_v6 = vmax.f32 %v4912_v35, 0.0 }
 0x613   : > { %5395 = vst.msk [vmem:[%s14083_s14 + $0x200] sm:$0xff] %vm2953_vm2, %v4926_v18  ;;  %5396 = vst.msk [vmem:[%s14083_s14 + $0x208] sm:$0xff] %vm2953_vm2, %v4927_v12  ;;  %v4922_v50 = vmax.f32 %v4913_v49, 0.0  ;;  %v4923_v3 = vmax.f32 %v4914_v4, 0.0  ;;  %v4924_v5 = vmax.f32 %v4915_v44, 0.0 }
 0x614   : > { %5397 = vst.msk [vmem:[%s14083_s14 + $0x210] sm:$0xff] %vm2953_vm2, %v4928_v10  ;;  %5398 = vst.msk [vmem:[%s14083_s14 + $0x218] sm:$0xff] %vm2953_vm2, %v4929_v34  ;;  %v4930_v17 = vmin.f32 %v4921_v6, 1.0 }
 0x615   : > { %v4931_v24 = vmin.f32 %v4922_v50, 1.0  ;;  %v4932_v9 = vmin.f32 %v4923_v3, 1.0  ;;  %v4933_v60 = vmin.f32 %v4924_v5, 1.0 }
 0x616   : > { %5399 = vst.msk [vmem:[%s14083_s14 + $0x220] sm:$0xff] %vm2953_vm2, %v4930_v17 }
 0x617   : > { %5400 = vst.msk [vmem:[%s14083_s14 + $0x228] sm:$0xff] %vm2953_vm2, %v4931_v24  ;;  %5401 = vst.msk [vmem:[%s14083_s14 + $0x230] sm:$0xff] %vm2953_vm2, %v4932_v9 }
 0x618   : > { %5402 = vst.msk [vmem:[%s14083_s14 + $0x238] sm:$0x1] %vm2962_vm3, %v4933_v60 }
 0x619 PF: > { %s14100_s4 = sld [smem:[#allocation14_spill]] }
 0x61f   : > { %s18_s18 = sadd.s32 1, %s14100_s4  }
 0x620   : > { %p15_p7 = scmp.ge.s32.totalorder %s18_s18, 4  }
 0x622   :  { %17 = sbr.rel (!%p15_p7) target bundleno = 10 (0xa), region = 143 }
 0x629   :  { %4965 = vsyncpa [#allocation5], 1 }
 0x62a   :  { %4967 = vsyncpa [#allocation5 + $0x1], 1 }
 0x62b   :  { %4968 = vsyncpa [#allocation7], 1 }
 0x62c   :  { %4969 = vsyncpa [#allocation10], 1 }

</bundles_post_ra>
